<compile_context>
chip_gen: v7x
topology: tpu7x:2x2x1
jax: 0.10.0
libtpu: 0.0.40
codegen_flags: <defaults>
</compile_context>

<pallas_src>
import jax
import jax.numpy as jnp
from jax.experimental import pallas as pl
from jax.experimental.pallas import tpu as pltpu

LANE = 128


def _round_up(x, m):
    return ((x + m - 1) // m) * m


def _ae_kernel(x_ref,
               w1_ref, b1_ref, w2_ref, b2_ref, w3_ref, b3_ref,
               w4_ref, b4_ref, w5_ref, b5_ref, w6_ref, b6_ref,
               xr_ref, z_ref):
    """One batch tile of the AE forward pass: encode -> latent -> decode -> sigmoid."""

    def dense(a, w_ref, b_ref):
        # bf16 MXU inputs, f32 accumulation, f32 bias add (implicit (1,out) broadcast).
        return jnp.dot(a.astype(w_ref.dtype), w_ref[...],
                       preferred_element_type=jnp.float32) + b_ref[...]

    x = x_ref[...]                                        # (TB, Dp) bf16

    # ---- encode ----
    h = jnp.maximum(dense(x, w1_ref, b1_ref), 0.0)        # ReLU
    h = jnp.maximum(dense(h, w2_ref, b2_ref), 0.0)        # ReLU
    z = dense(h, w3_ref, b3_ref)                          # latent (no activation)

    # ---- decode ----
    d = jnp.maximum(dense(z, w4_ref, b4_ref), 0.0)        # ReLU
    d = jnp.maximum(dense(d, w5_ref, b5_ref), 0.0)        # ReLU
    logits = dense(d, w6_ref, b6_ref)

    xr_ref[...] = jax.nn.sigmoid(logits).astype(xr_ref.dtype)   # bf16 writeback
    z_ref[...] = z.astype(z_ref.dtype)


def init_params(key, D=784, H=400, M=20):
    """PyTorch-Linear-style uniform init. Weights stored [in, out], biases [1, out], f32."""
    dims = [
        ("1", D, H),  # encode_h1
        ("2", H, H),  # encode_h2
        ("3", H, M),  # encode_h3
        ("4", M, H),  # decode_h1
        ("5", H, H),  # decode_h2
        ("6", H, D),  # decode_h3
    ]
    params = {}
    for name, fan_in, fan_out in dims:
        key, kw, kb = jax.random.split(key, 3)
        bound = 1.0 / jnp.sqrt(jnp.float32(fan_in))
        params["w" + name] = jax.random.uniform(
            kw, (fan_in, fan_out), jnp.float32, -bound, bound)
        params["b" + name] = jax.random.uniform(
            kb, (1, fan_out), jnp.float32, -bound, bound)
    return params


def pack_params(params, *, D=784, H=400, M=20):
    """Zero-pad feature dims to lane multiples (128) and cast weights to bf16.

    Zero padding is exact: padded input columns multiply zero weight rows, padded
    hidden/latent columns get zero bias and zero outgoing weights.  One-time cost.
    """
    Dp, Hp, Mp = _round_up(D, LANE), _round_up(H, LANE), _round_up(M, LANE)
    pad_to = {
        "1": (Dp, Hp), "2": (Hp, Hp), "3": (Hp, Mp),
        "4": (Mp, Hp), "5": (Hp, Hp), "6": (Hp, Dp),
    }
    packed = {}
    for name, (ip, op) in pad_to.items():
        w = params["w" + name]
        b = params["b" + name]
        packed["w" + name] = jnp.pad(
            w, ((0, ip - w.shape[0]), (0, op - w.shape[1]))).astype(jnp.bfloat16)
        packed["b" + name] = jnp.pad(
            b, ((0, 0), (0, op - b.shape[1]))).astype(jnp.float32)
    return packed


def _choose_batch_tile(B, batch_tile):
    """Pick the batch tile: big enough to amortize per-step + MXU fill/drain cost,
    a multiple of 256 for the 256-wide MXU, and >=2 grid steps on larger batches
    so ("parallel",) can shard across v7x's 2 TensorCores."""
    if B < 512:
        return _round_up(max(B, 8), 16)          # single small tile (16 = bf16 sublane pack)
    tb = min(batch_tile, max(256, (B // 2) // 256 * 256))
    return tb


def ae_forward(x, packed, *, d_out, m_out, batch_tile=512, xr_dtype=jnp.bfloat16):
    """AE forward as a single batch-gridded Pallas TPU kernel.

    x:      [B, d_out] float (any float dtype; streamed into the kernel as bf16)
    packed: output of pack_params (padded bf16 weights [in_p,out_p], f32 biases [1,out_p]).
    returns (x_reconst [B, d_out] in xr_dtype, z [B, m_out] f32) — matches the PyTorch module
    up to the documented bf16 weight/writeback precision (~1e-3..1e-2 vs f32 PyTorch).
    """
    B, D = x.shape
    Dp, Hp = packed["w1"].shape
    Mp = packed["w3"].shape[1]

    TB = _choose_batch_tile(B, batch_tile)
    B_pad = _round_up(B, TB)

    # Stream x in bf16 (halves the input HBM bytes); pad AFTER the cast so the pad
    # pass only moves half the data.  Padded rows/columns are exact zeros.
    x_in = jnp.pad(x.astype(jnp.bfloat16), ((0, B_pad - B), (0, Dp - D)))

    operands = (
        x_in,
        packed["w1"], packed["b1"], packed["w2"], packed["b2"],
        packed["w3"], packed["b3"], packed["w4"], packed["b4"],
        packed["w5"], packed["b5"], packed["w6"], packed["b6"],
    )

    weight_bytes = sum(int(v.size) * v.dtype.itemsize for v in packed.values())
    flops = 2 * B_pad * (Dp * Hp + Hp * Hp + Hp * Mp + Mp * Hp + Hp * Hp + Hp * Dp)
    bytes_accessed = (weight_bytes
                      + B_pad * Dp * 2                       # bf16 x stream
                      + B_pad * Dp * 2 + B_pad * Mp * 4)     # bf16 xr, f32 z outputs
    cost = pl.CostEstimate(flops=flops,
                           transcendentals=B_pad * Dp,       # sigmoid
                           bytes_accessed=bytes_accessed)

    def call(weight_pipeline_mode):
        def resident(a):
            # Constant block index every grid step -> block stays in VMEM, no re-DMA.
            if weight_pipeline_mode is None:
                return pl.BlockSpec(a.shape, lambda i: (0, 0))
            return pl.BlockSpec(a.shape, lambda i: (0, 0),
                                pipeline_mode=weight_pipeline_mode)

        in_specs = ([pl.BlockSpec((TB, Dp), lambda i: (i, 0))]
                    + [resident(a) for a in operands[1:]])
        out_specs = (pl.BlockSpec((TB, Dp), lambda i: (i, 0)),
                     pl.BlockSpec((TB, Mp), lambda i: (i, 0)))

        return pl.pallas_call(
            _ae_kernel,
            out_shape=(jax.ShapeDtypeStruct((B_pad, Dp), jnp.bfloat16),   # bf16 writeback
                       jax.ShapeDtypeStruct((B_pad, Mp), jnp.float32)),
            grid_spec=pltpu.PrefetchScalarGridSpec(
                num_scalar_prefetch=0,
                grid=(B_pad // TB,),
                in_specs=in_specs,
                out_specs=out_specs),
            compiler_params=pltpu.CompilerParams(
                dimension_semantics=("parallel",),           # megacore sharding (v7x)
                vmem_limit_bytes=32 * 1024 * 1024),          # headroom on v5e (16 MiB default)
            cost_estimate=cost,
        )(*operands)

    try:
        # Single-buffer the resident weights/biases (they are never re-fetched, so the
        # second pipeline buffer is pure VMEM waste -> ~3 MiB freed for bigger tiles).
        xr_pad, z_pad = call(pl.Buffered(1))
    except Exception:
        # Fallback for JAX versions where pipeline_mode isn't honored on this path.
        xr_pad, z_pad = call(None)

    # Slice padded, lane-dense kernel outputs back to the module's shapes.
    xr = xr_pad[:B, :d_out]
    if xr.dtype != xr_dtype:
        xr = xr.astype(xr_dtype)
    return xr, z_pad[:B, :m_out]


def ae_forward_ref(x, packed, *, d_out, m_out):
    """Plain-JAX reference mirroring the kernel's bf16-weight / f32-accum math."""
    Dp = packed["w1"].shape[0]
    xp = jnp.pad(x.astype(jnp.bfloat16), ((0, 0), (0, Dp - x.shape[1])))

    def dense(a, w, b):
        return jnp.dot(a.astype(w.dtype), w, preferred_element_type=jnp.float32) + b

    h = jnp.maximum(dense(xp, packed["w1"], packed["b1"]), 0.0)
    h = jnp.maximum(dense(h, packed["w2"], packed["b2"]), 0.0)
    z = dense(h, packed["w3"], packed["b3"])
    d = jnp.maximum(dense(z, packed["w4"], packed["b4"]), 0.0)
    d = jnp.maximum(dense(d, packed["w5"], packed["b5"]), 0.0)
    xr = jax.nn.sigmoid(dense(d, packed["w6"], packed["b6"]))
    return xr[:, :d_out], z[:, :m_out]


if __name__ == "__main__":
    D, H, M = 784, 400, 20
    B = 8

    key = jax.random.PRNGKey(0)
    key, kx = jax.random.split(key)
    x = jax.random.normal(kx, (B, D), jnp.float32)
    params = init_params(key, D=D, H=H, M=M)
    packed = pack_params(params, D=D, H=H, M=M)

    x_reconst, z = jax.block_until_ready(ae_forward(x, packed, d_out=D, m_out=M))

    # Correctness check against a pure-JAX reference using the same bf16 weights.
    xr_ref, z_ref = ae_forward_ref(x, packed, d_out=D, m_out=M)
    assert x_reconst.shape == (B, D) and z.shape == (B, M)
    # x_reconst is returned in bf16 (halved HBM writeback) -> bf16-level tolerance.
    assert jnp.allclose(x_reconst.astype(jnp.float32), xr_ref, atol=1e-2, rtol=1e-2)
    assert jnp.allclose(z, z_ref, atol=2e-3, rtol=2e-3)

    print("KERNEL_OK")
</pallas_src>

<mosaic_0001>
module attributes {stable_mosaic.version = 11 : i64} {
  func.func @_ae_kernel(%arg0: i32, %arg1: memref<16x896xbf16, #tpu.memory_space<vmem>>, %arg2: memref<896x512xbf16, #tpu.memory_space<vmem>>, %arg3: memref<1x512xf32, #tpu.memory_space<vmem>>, %arg4: memref<512x512xbf16, #tpu.memory_space<vmem>>, %arg5: memref<1x512xf32, #tpu.memory_space<vmem>>, %arg6: memref<512x128xbf16, #tpu.memory_space<vmem>>, %arg7: memref<1x128xf32, #tpu.memory_space<vmem>>, %arg8: memref<128x512xbf16, #tpu.memory_space<vmem>>, %arg9: memref<1x512xf32, #tpu.memory_space<vmem>>, %arg10: memref<512x512xbf16, #tpu.memory_space<vmem>>, %arg11: memref<1x512xf32, #tpu.memory_space<vmem>>, %arg12: memref<512x896xbf16, #tpu.memory_space<vmem>>, %arg13: memref<1x896xf32, #tpu.memory_space<vmem>>, %arg14: memref<16x896xbf16, #tpu.memory_space<vmem>>, %arg15: memref<16x128xf32, #tpu.memory_space<vmem>>) attributes {dimension_semantics = [#tpu.dimension_semantics<parallel>], iteration_bounds = array<i64: 1>, scalar_prefetch = 0 : i64, scratch_operands = 0 : i64, tpu.core_type = #tpu.core_type<tc>, window_params = [{transform_indices = @transform_0, window_bounds = array<i64: 16, 896>}, {pipeline_mode = #tpu.pipeline_mode<synchronous>, transform_indices = @transform_1, window_bounds = array<i64: 896, 512>}, {pipeline_mode = #tpu.pipeline_mode<synchronous>, transform_indices = @transform_2, window_bounds = array<i64: 1, 512>}, {pipeline_mode = #tpu.pipeline_mode<synchronous>, transform_indices = @transform_3, window_bounds = array<i64: 512, 512>}, {pipeline_mode = #tpu.pipeline_mode<synchronous>, transform_indices = @transform_4, window_bounds = array<i64: 1, 512>}, {pipeline_mode = #tpu.pipeline_mode<synchronous>, transform_indices = @transform_5, window_bounds = array<i64: 512, 128>}, {pipeline_mode = #tpu.pipeline_mode<synchronous>, transform_indices = @transform_6, window_bounds = array<i64: 1, 128>}, {pipeline_mode = #tpu.pipeline_mode<synchronous>, transform_indices = @transform_7, window_bounds = array<i64: 128, 512>}, {pipeline_mode = #tpu.pipeline_mode<synchronous>, transform_indices = @transform_8, window_bounds = array<i64: 1, 512>}, {pipeline_mode = #tpu.pipeline_mode<synchronous>, transform_indices = @transform_9, window_bounds = array<i64: 512, 512>}, {pipeline_mode = #tpu.pipeline_mode<synchronous>, transform_indices = @transform_10, window_bounds = array<i64: 1, 512>}, {pipeline_mode = #tpu.pipeline_mode<synchronous>, transform_indices = @transform_11, window_bounds = array<i64: 512, 896>}, {pipeline_mode = #tpu.pipeline_mode<synchronous>, transform_indices = @transform_12, window_bounds = array<i64: 1, 896>}, {transform_indices = @transform_13, window_bounds = array<i64: 16, 896>}, {transform_indices = @transform_14, window_bounds = array<i64: 16, 128>}]} {
    %c0 = arith.constant 0 : index
    %c0_0 = arith.constant 0 : index
    %0 = vector.load %arg1[%c0, %c0_0] : memref<16x896xbf16, #tpu.memory_space<vmem>>, vector<16x896xbf16>
    %c0_1 = arith.constant 0 : index
    %c0_2 = arith.constant 0 : index
    %1 = vector.load %arg2[%c0_1, %c0_2] : memref<896x512xbf16, #tpu.memory_space<vmem>>, vector<896x512xbf16>
    %cst = arith.constant dense<0.000000e+00> : vector<16x512xf32>
    %2 = tpu.matmul %0, %1, %cst {dimension_numbers = #tpu.dot_dimension_numbers<[1], [0], [0], [1], [0, 0, 1, 1], [], []>} : vector<16x896xbf16>, vector<896x512xbf16>, vector<16x512xf32> -> vector<16x512xf32>
    %c0_3 = arith.constant 0 : index
    %c0_4 = arith.constant 0 : index
    %3 = vector.load %arg3[%c0_3, %c0_4] : memref<1x512xf32, #tpu.memory_space<vmem>>, vector<1x512xf32>
    %4 = vector.broadcast %3 : vector<1x512xf32> to vector<16x512xf32>
    %5 = arith.addf %2, %4 : vector<16x512xf32>
    %cst_5 = arith.constant 0.000000e+00 : f32
    %6 = vector.broadcast %cst_5 : f32 to vector<16x512xf32>
    %7 = arith.maximumf %5, %6 : vector<16x512xf32>
    %8 = arith.truncf %7 : vector<16x512xf32> to vector<16x512xbf16>
    %c0_6 = arith.constant 0 : index
    %c0_7 = arith.constant 0 : index
    %9 = vector.load %arg4[%c0_6, %c0_7] : memref<512x512xbf16, #tpu.memory_space<vmem>>, vector<512x512xbf16>
    %cst_8 = arith.constant dense<0.000000e+00> : vector<16x512xf32>
    %10 = tpu.matmul %8, %9, %cst_8 {dimension_numbers = #tpu.dot_dimension_numbers<[1], [0], [0], [1], [0, 0, 1, 1], [], []>} : vector<16x512xbf16>, vector<512x512xbf16>, vector<16x512xf32> -> vector<16x512xf32>
    %c0_9 = arith.constant 0 : index
    %c0_10 = arith.constant 0 : index
    %11 = vector.load %arg5[%c0_9, %c0_10] : memref<1x512xf32, #tpu.memory_space<vmem>>, vector<1x512xf32>
    %12 = vector.broadcast %11 : vector<1x512xf32> to vector<16x512xf32>
    %13 = arith.addf %10, %12 : vector<16x512xf32>
    %cst_11 = arith.constant 0.000000e+00 : f32
    %14 = vector.broadcast %cst_11 : f32 to vector<16x512xf32>
    %15 = arith.maximumf %13, %14 : vector<16x512xf32>
    %16 = arith.truncf %15 : vector<16x512xf32> to vector<16x512xbf16>
    %c0_12 = arith.constant 0 : index
    %c0_13 = arith.constant 0 : index
    %17 = vector.load %arg6[%c0_12, %c0_13] : memref<512x128xbf16, #tpu.memory_space<vmem>>, vector<512x128xbf16>
    %cst_14 = arith.constant dense<0.000000e+00> : vector<16x128xf32>
    %18 = tpu.matmul %16, %17, %cst_14 {dimension_numbers = #tpu.dot_dimension_numbers<[1], [0], [0], [1], [0, 0, 1, 1], [], []>} : vector<16x512xbf16>, vector<512x128xbf16>, vector<16x128xf32> -> vector<16x128xf32>
    %c0_15 = arith.constant 0 : index
    %c0_16 = arith.constant 0 : index
    %19 = vector.load %arg7[%c0_15, %c0_16] : memref<1x128xf32, #tpu.memory_space<vmem>>, vector<1x128xf32>
    %20 = vector.broadcast %19 : vector<1x128xf32> to vector<16x128xf32>
    %21 = arith.addf %18, %20 : vector<16x128xf32>
    %22 = arith.truncf %21 : vector<16x128xf32> to vector<16x128xbf16>
    %c0_17 = arith.constant 0 : index
    %c0_18 = arith.constant 0 : index
    %23 = vector.load %arg8[%c0_17, %c0_18] : memref<128x512xbf16, #tpu.memory_space<vmem>>, vector<128x512xbf16>
    %cst_19 = arith.constant dense<0.000000e+00> : vector<16x512xf32>
    %24 = tpu.matmul %22, %23, %cst_19 {dimension_numbers = #tpu.dot_dimension_numbers<[1], [0], [0], [1], [0, 0, 1, 1], [], []>} : vector<16x128xbf16>, vector<128x512xbf16>, vector<16x512xf32> -> vector<16x512xf32>
    %c0_20 = arith.constant 0 : index
    %c0_21 = arith.constant 0 : index
    %25 = vector.load %arg9[%c0_20, %c0_21] : memref<1x512xf32, #tpu.memory_space<vmem>>, vector<1x512xf32>
    %26 = vector.broadcast %25 : vector<1x512xf32> to vector<16x512xf32>
    %27 = arith.addf %24, %26 : vector<16x512xf32>
    %cst_22 = arith.constant 0.000000e+00 : f32
    %28 = vector.broadcast %cst_22 : f32 to vector<16x512xf32>
    %29 = arith.maximumf %27, %28 : vector<16x512xf32>
    %30 = arith.truncf %29 : vector<16x512xf32> to vector<16x512xbf16>
    %c0_23 = arith.constant 0 : index
    %c0_24 = arith.constant 0 : index
    %31 = vector.load %arg10[%c0_23, %c0_24] : memref<512x512xbf16, #tpu.memory_space<vmem>>, vector<512x512xbf16>
    %cst_25 = arith.constant dense<0.000000e+00> : vector<16x512xf32>
    %32 = tpu.matmul %30, %31, %cst_25 {dimension_numbers = #tpu.dot_dimension_numbers<[1], [0], [0], [1], [0, 0, 1, 1], [], []>} : vector<16x512xbf16>, vector<512x512xbf16>, vector<16x512xf32> -> vector<16x512xf32>
    %c0_26 = arith.constant 0 : index
    %c0_27 = arith.constant 0 : index
    %33 = vector.load %arg11[%c0_26, %c0_27] : memref<1x512xf32, #tpu.memory_space<vmem>>, vector<1x512xf32>
    %34 = vector.broadcast %33 : vector<1x512xf32> to vector<16x512xf32>
    %35 = arith.addf %32, %34 : vector<16x512xf32>
    %cst_28 = arith.constant 0.000000e+00 : f32
    %36 = vector.broadcast %cst_28 : f32 to vector<16x512xf32>
    %37 = arith.maximumf %35, %36 : vector<16x512xf32>
    %38 = arith.truncf %37 : vector<16x512xf32> to vector<16x512xbf16>
    %c0_29 = arith.constant 0 : index
    %c0_30 = arith.constant 0 : index
    %39 = vector.load %arg12[%c0_29, %c0_30] : memref<512x896xbf16, #tpu.memory_space<vmem>>, vector<512x896xbf16>
    %cst_31 = arith.constant dense<0.000000e+00> : vector<16x896xf32>
    %40 = tpu.matmul %38, %39, %cst_31 {dimension_numbers = #tpu.dot_dimension_numbers<[1], [0], [0], [1], [0, 0, 1, 1], [], []>} : vector<16x512xbf16>, vector<512x896xbf16>, vector<16x896xf32> -> vector<16x896xf32>
    %c0_32 = arith.constant 0 : index
    %c0_33 = arith.constant 0 : index
    %41 = vector.load %arg13[%c0_32, %c0_33] : memref<1x896xf32, #tpu.memory_space<vmem>>, vector<1x896xf32>
    %42 = vector.broadcast %41 : vector<1x896xf32> to vector<16x896xf32>
    %43 = arith.addf %40, %42 : vector<16x896xf32>
    %44 = arith.negf %43 : vector<16x896xf32>
    %45 = math.exp %44 : vector<16x896xf32>
    %cst_34 = arith.constant 1.000000e+00 : f32
    %46 = vector.broadcast %cst_34 : f32 to vector<16x896xf32>
    %47 = arith.addf %46, %45 : vector<16x896xf32>
    %48 = arith.divf %46, %47 : vector<16x896xf32>
    %49 = arith.truncf %48 : vector<16x896xf32> to vector<16x896xbf16>
    %c0_35 = arith.constant 0 : index
    %c0_36 = arith.constant 0 : index
    %50 = vector.load %arg14[%c0_35, %c0_36] : memref<16x896xbf16, #tpu.memory_space<vmem>>, vector<16x896xbf16>
    tpu.vector_store %arg14[%c0_35, %c0_36], %49 {strides = array<i32>} : memref<16x896xbf16, #tpu.memory_space<vmem>>, vector<16x896xbf16>,
    %c0_37 = arith.constant 0 : index
    %c0_38 = arith.constant 0 : index
    %51 = vector.load %arg15[%c0_37, %c0_38] : memref<16x128xf32, #tpu.memory_space<vmem>>, vector<16x128xf32>
    tpu.vector_store %arg15[%c0_37, %c0_38], %21 {strides = array<i32>} : memref<16x128xf32, #tpu.memory_space<vmem>>, vector<16x128xf32>,
    return
  }
  func.func @transform_0(%arg0: i32) -> (i32, i32) {
    %c0_i32 = arith.constant 0 : i32
    %c0_i32_0 = arith.constant 0 : i32
    return %arg0, %c0_i32 : i32, i32
  }
  func.func @transform_1(%arg0: i32) -> (i32, i32) {
    %c0_i32 = arith.constant 0 : i32
    %c0_i32_0 = arith.constant 0 : i32
    %c0_i32_1 = arith.constant 0 : i32
    return %c0_i32, %c0_i32_0 : i32, i32
  }
  func.func @transform_2(%arg0: i32) -> (i32, i32) {
    %c0_i32 = arith.constant 0 : i32
    %c0_i32_0 = arith.constant 0 : i32
    %c0_i32_1 = arith.constant 0 : i32
    return %c0_i32, %c0_i32_0 : i32, i32
  }
  func.func @transform_3(%arg0: i32) -> (i32, i32) {
    %c0_i32 = arith.constant 0 : i32
    %c0_i32_0 = arith.constant 0 : i32
    %c0_i32_1 = arith.constant 0 : i32
    return %c0_i32, %c0_i32_0 : i32, i32
  }
  func.func @transform_4(%arg0: i32) -> (i32, i32) {
    %c0_i32 = arith.constant 0 : i32
    %c0_i32_0 = arith.constant 0 : i32
    %c0_i32_1 = arith.constant 0 : i32
    return %c0_i32, %c0_i32_0 : i32, i32
  }
  func.func @transform_5(%arg0: i32) -> (i32, i32) {
    %c0_i32 = arith.constant 0 : i32
    %c0_i32_0 = arith.constant 0 : i32
    %c0_i32_1 = arith.constant 0 : i32
    return %c0_i32, %c0_i32_0 : i32, i32
  }
  func.func @transform_6(%arg0: i32) -> (i32, i32) {
    %c0_i32 = arith.constant 0 : i32
    %c0_i32_0 = arith.constant 0 : i32
    %c0_i32_1 = arith.constant 0 : i32
    return %c0_i32, %c0_i32_0 : i32, i32
  }
  func.func @transform_7(%arg0: i32) -> (i32, i32) {
    %c0_i32 = arith.constant 0 : i32
    %c0_i32_0 = arith.constant 0 : i32
    %c0_i32_1 = arith.constant 0 : i32
    return %c0_i32, %c0_i32_0 : i32, i32
  }
  func.func @transform_8(%arg0: i32) -> (i32, i32) {
    %c0_i32 = arith.constant 0 : i32
    %c0_i32_0 = arith.constant 0 : i32
    %c0_i32_1 = arith.constant 0 : i32
    return %c0_i32, %c0_i32_0 : i32, i32
  }
  func.func @transform_9(%arg0: i32) -> (i32, i32) {
    %c0_i32 = arith.constant 0 : i32
    %c0_i32_0 = arith.constant 0 : i32
    %c0_i32_1 = arith.constant 0 : i32
    return %c0_i32, %c0_i32_0 : i32, i32
  }
  func.func @transform_10(%arg0: i32) -> (i32, i32) {
    %c0_i32 = arith.constant 0 : i32
    %c0_i32_0 = arith.constant 0 : i32
    %c0_i32_1 = arith.constant 0 : i32
    return %c0_i32, %c0_i32_0 : i32, i32
  }
  func.func @transform_11(%arg0: i32) -> (i32, i32) {
    %c0_i32 = arith.constant 0 : i32
    %c0_i32_0 = arith.constant 0 : i32
    %c0_i32_1 = arith.constant 0 : i32
    return %c0_i32, %c0_i32_0 : i32, i32
  }
  func.func @transform_12(%arg0: i32) -> (i32, i32) {
    %c0_i32 = arith.constant 0 : i32
    %c0_i32_0 = arith.constant 0 : i32
    %c0_i32_1 = arith.constant 0 : i32
    return %c0_i32, %c0_i32_0 : i32, i32
  }
  func.func @transform_13(%arg0: i32) -> (i32, i32) {
    %c0_i32 = arith.constant 0 : i32
    %c0_i32_0 = arith.constant 0 : i32
    return %arg0, %c0_i32 : i32, i32
  }
  func.func @transform_14(%arg0: i32) -> (i32, i32) {
    %c0_i32 = arith.constant 0 : i32
    %c0_i32_0 = arith.constant 0 : i32
    return %arg0, %c0_i32 : i32, i32
  }
}

module attributes {stable_mosaic.version = 11 : i64} {
  func.func @_ae_kernel(%arg0: i32, %arg1: memref<16x896xbf16, #tpu.memory_space<vmem>>, %arg2: memref<896x512xbf16, #tpu.memory_space<vmem>>, %arg3: memref<1x512xf32, #tpu.memory_space<vmem>>, %arg4: memref<512x512xbf16, #tpu.memory_space<vmem>>, %arg5: memref<1x512xf32, #tpu.memory_space<vmem>>, %arg6: memref<512x128xbf16, #tpu.memory_space<vmem>>, %arg7: memref<1x128xf32, #tpu.memory_space<vmem>>, %arg8: memref<128x512xbf16, #tpu.memory_space<vmem>>, %arg9: memref<1x512xf32, #tpu.memory_space<vmem>>, %arg10: memref<512x512xbf16, #tpu.memory_space<vmem>>, %arg11: memref<1x512xf32, #tpu.memory_space<vmem>>, %arg12: memref<512x896xbf16, #tpu.memory_space<vmem>>, %arg13: memref<1x896xf32, #tpu.memory_space<vmem>>, %arg14: memref<16x896xbf16, #tpu.memory_space<vmem>>, %arg15: memref<16x128xf32, #tpu.memory_space<vmem>>) attributes {dimension_semantics = [#tpu.dimension_semantics<parallel>], iteration_bounds = array<i64: 1>, scalar_prefetch = 0 : i64, scratch_operands = 0 : i64, tpu.core_type = #tpu.core_type<tc>, window_params = [{transform_indices = @transform_0, window_bounds = array<i64: 16, 896>}, {pipeline_mode = #tpu.pipeline_mode<synchronous>, transform_indices = @transform_1, window_bounds = array<i64: 896, 512>}, {pipeline_mode = #tpu.pipeline_mode<synchronous>, transform_indices = @transform_2, window_bounds = array<i64: 1, 512>}, {pipeline_mode = #tpu.pipeline_mode<synchronous>, transform_indices = @transform_3, window_bounds = array<i64: 512, 512>}, {pipeline_mode = #tpu.pipeline_mode<synchronous>, transform_indices = @transform_4, window_bounds = array<i64: 1, 512>}, {pipeline_mode = #tpu.pipeline_mode<synchronous>, transform_indices = @transform_5, window_bounds = array<i64: 512, 128>}, {pipeline_mode = #tpu.pipeline_mode<synchronous>, transform_indices = @transform_6, window_bounds = array<i64: 1, 128>}, {pipeline_mode = #tpu.pipeline_mode<synchronous>, transform_indices = @transform_7, window_bounds = array<i64: 128, 512>}, {pipeline_mode = #tpu.pipeline_mode<synchronous>, transform_indices = @transform_8, window_bounds = array<i64: 1, 512>}, {pipeline_mode = #tpu.pipeline_mode<synchronous>, transform_indices = @transform_9, window_bounds = array<i64: 512, 512>}, {pipeline_mode = #tpu.pipeline_mode<synchronous>, transform_indices = @transform_10, window_bounds = array<i64: 1, 512>}, {pipeline_mode = #tpu.pipeline_mode<synchronous>, transform_indices = @transform_11, window_bounds = array<i64: 512, 896>}, {pipeline_mode = #tpu.pipeline_mode<synchronous>, transform_indices = @transform_12, window_bounds = array<i64: 1, 896>}, {transform_indices = @transform_13, window_bounds = array<i64: 16, 896>}, {transform_indices = @transform_14, window_bounds = array<i64: 16, 128>}]} {
    %c0 = arith.constant 0 : index
    %c0_0 = arith.constant 0 : index
    %0 = vector.load %arg1[%c0, %c0_0] : memref<16x896xbf16, #tpu.memory_space<vmem>>, vector<16x896xbf16>
    %c0_1 = arith.constant 0 : index
    %c0_2 = arith.constant 0 : index
    %1 = vector.load %arg2[%c0_1, %c0_2] : memref<896x512xbf16, #tpu.memory_space<vmem>>, vector<896x512xbf16>
    %cst = arith.constant dense<0.000000e+00> : vector<16x512xf32>
    %2 = tpu.matmul %0, %1, %cst {dimension_numbers = #tpu.dot_dimension_numbers<[1], [0], [0], [1], [0, 0, 1, 1], [], []>} : vector<16x896xbf16>, vector<896x512xbf16>, vector<16x512xf32> -> vector<16x512xf32>
    %c0_3 = arith.constant 0 : index
    %c0_4 = arith.constant 0 : index
    %3 = vector.load %arg3[%c0_3, %c0_4] : memref<1x512xf32, #tpu.memory_space<vmem>>, vector<1x512xf32>
    %4 = vector.broadcast %3 : vector<1x512xf32> to vector<16x512xf32>
    %5 = arith.addf %2, %4 : vector<16x512xf32>
    %cst_5 = arith.constant 0.000000e+00 : f32
    %6 = vector.broadcast %cst_5 : f32 to vector<16x512xf32>
    %7 = arith.maximumf %5, %6 : vector<16x512xf32>
    %8 = arith.truncf %7 : vector<16x512xf32> to vector<16x512xbf16>
    %c0_6 = arith.constant 0 : index
    %c0_7 = arith.constant 0 : index
    %9 = vector.load %arg4[%c0_6, %c0_7] : memref<512x512xbf16, #tpu.memory_space<vmem>>, vector<512x512xbf16>
    %cst_8 = arith.constant dense<0.000000e+00> : vector<16x512xf32>
    %10 = tpu.matmul %8, %9, %cst_8 {dimension_numbers = #tpu.dot_dimension_numbers<[1], [0], [0], [1], [0, 0, 1, 1], [], []>} : vector<16x512xbf16>, vector<512x512xbf16>, vector<16x512xf32> -> vector<16x512xf32>
    %c0_9 = arith.constant 0 : index
    %c0_10 = arith.constant 0 : index
    %11 = vector.load %arg5[%c0_9, %c0_10] : memref<1x512xf32, #tpu.memory_space<vmem>>, vector<1x512xf32>
    %12 = vector.broadcast %11 : vector<1x512xf32> to vector<16x512xf32>
    %13 = arith.addf %10, %12 : vector<16x512xf32>
    %cst_11 = arith.constant 0.000000e+00 : f32
    %14 = vector.broadcast %cst_11 : f32 to vector<16x512xf32>
    %15 = arith.maximumf %13, %14 : vector<16x512xf32>
    %16 = arith.truncf %15 : vector<16x512xf32> to vector<16x512xbf16>
    %c0_12 = arith.constant 0 : index
    %c0_13 = arith.constant 0 : index
    %17 = vector.load %arg6[%c0_12, %c0_13] : memref<512x128xbf16, #tpu.memory_space<vmem>>, vector<512x128xbf16>
    %cst_14 = arith.constant dense<0.000000e+00> : vector<16x128xf32>
    %18 = tpu.matmul %16, %17, %cst_14 {dimension_numbers = #tpu.dot_dimension_numbers<[1], [0], [0], [1], [0, 0, 1, 1], [], []>} : vector<16x512xbf16>, vector<512x128xbf16>, vector<16x128xf32> -> vector<16x128xf32>
    %c0_15 = arith.constant 0 : index
    %c0_16 = arith.constant 0 : index
    %19 = vector.load %arg7[%c0_15, %c0_16] : memref<1x128xf32, #tpu.memory_space<vmem>>, vector<1x128xf32>
    %20 = vector.broadcast %19 : vector<1x128xf32> to vector<16x128xf32>
    %21 = arith.addf %18, %20 : vector<16x128xf32>
    %22 = arith.truncf %21 : vector<16x128xf32> to vector<16x128xbf16>
    %c0_17 = arith.constant 0 : index
    %c0_18 = arith.constant 0 : index
    %23 = vector.load %arg8[%c0_17, %c0_18] : memref<128x512xbf16, #tpu.memory_space<vmem>>, vector<128x512xbf16>
    %cst_19 = arith.constant dense<0.000000e+00> : vector<16x512xf32>
    %24 = tpu.matmul %22, %23, %cst_19 {dimension_numbers = #tpu.dot_dimension_numbers<[1], [0], [0], [1], [0, 0, 1, 1], [], []>} : vector<16x128xbf16>, vector<128x512xbf16>, vector<16x512xf32> -> vector<16x512xf32>
    %c0_20 = arith.constant 0 : index
    %c0_21 = arith.constant 0 : index
    %25 = vector.load %arg9[%c0_20, %c0_21] : memref<1x512xf32, #tpu.memory_space<vmem>>, vector<1x512xf32>
    %26 = vector.broadcast %25 : vector<1x512xf32> to vector<16x512xf32>
    %27 = arith.addf %24, %26 : vector<16x512xf32>
    %cst_22 = arith.constant 0.000000e+00 : f32
    %28 = vector.broadcast %cst_22 : f32 to vector<16x512xf32>
    %29 = arith.maximumf %27, %28 : vector<16x512xf32>
    %30 = arith.truncf %29 : vector<16x512xf32> to vector<16x512xbf16>
    %c0_23 = arith.constant 0 : index
    %c0_24 = arith.constant 0 : index
    %31 = vector.load %arg10[%c0_23, %c0_24] : memref<512x512xbf16, #tpu.memory_space<vmem>>, vector<512x512xbf16>
    %cst_25 = arith.constant dense<0.000000e+00> : vector<16x512xf32>
    %32 = tpu.matmul %30, %31, %cst_25 {dimension_numbers = #tpu.dot_dimension_numbers<[1], [0], [0], [1], [0, 0, 1, 1], [], []>} : vector<16x512xbf16>, vector<512x512xbf16>, vector<16x512xf32> -> vector<16x512xf32>
    %c0_26 = arith.constant 0 : index
    %c0_27 = arith.constant 0 : index
    %33 = vector.load %arg11[%c0_26, %c0_27] : memref<1x512xf32, #tpu.memory_space<vmem>>, vector<1x512xf32>
    %34 = vector.broadcast %33 : vector<1x512xf32> to vector<16x512xf32>
    %35 = arith.addf %32, %34 : vector<16x512xf32>
    %cst_28 = arith.constant 0.000000e+00 : f32
    %36 = vector.broadcast %cst_28 : f32 to vector<16x512xf32>
    %37 = arith.maximumf %35, %36 : vector<16x512xf32>
    %38 = arith.truncf %37 : vector<16x512xf32> to vector<16x512xbf16>
    %c0_29 = arith.constant 0 : index
    %c0_30 = arith.constant 0 : index
    %39 = vector.load %arg12[%c0_29, %c0_30] : memref<512x896xbf16, #tpu.memory_space<vmem>>, vector<512x896xbf16>
    %cst_31 = arith.constant dense<0.000000e+00> : vector<16x896xf32>
    %40 = tpu.matmul %38, %39, %cst_31 {dimension_numbers = #tpu.dot_dimension_numbers<[1], [0], [0], [1], [0, 0, 1, 1], [], []>} : vector<16x512xbf16>, vector<512x896xbf16>, vector<16x896xf32> -> vector<16x896xf32>
    %c0_32 = arith.constant 0 : index
    %c0_33 = arith.constant 0 : index
    %41 = vector.load %arg13[%c0_32, %c0_33] : memref<1x896xf32, #tpu.memory_space<vmem>>, vector<1x896xf32>
    %42 = vector.broadcast %41 : vector<1x896xf32> to vector<16x896xf32>
    %43 = arith.addf %40, %42 : vector<16x896xf32>
    %44 = arith.negf %43 : vector<16x896xf32>
    %45 = math.exp %44 : vector<16x896xf32>
    %cst_34 = arith.constant 1.000000e+00 : f32
    %46 = vector.broadcast %cst_34 : f32 to vector<16x896xf32>
    %47 = arith.addf %46, %45 : vector<16x896xf32>
    %48 = arith.divf %46, %47 : vector<16x896xf32>
    %49 = arith.truncf %48 : vector<16x896xf32> to vector<16x896xbf16>
    %c0_35 = arith.constant 0 : index
    %c0_36 = arith.constant 0 : index
    %50 = vector.load %arg14[%c0_35, %c0_36] : memref<16x896xbf16, #tpu.memory_space<vmem>>, vector<16x896xbf16>
    tpu.vector_store %arg14[%c0_35, %c0_36], %49 {strides = array<i32>} : memref<16x896xbf16, #tpu.memory_space<vmem>>, vector<16x896xbf16>,
    %c0_37 = arith.constant 0 : index
    %c0_38 = arith.constant 0 : index
    %51 = vector.load %arg15[%c0_37, %c0_38] : memref<16x128xf32, #tpu.memory_space<vmem>>, vector<16x128xf32>
    tpu.vector_store %arg15[%c0_37, %c0_38], %21 {strides = array<i32>} : memref<16x128xf32, #tpu.memory_space<vmem>>, vector<16x128xf32>,
    return
  }
  func.func @transform_0(%arg0: i32) -> (i32, i32) {
    %c0_i32 = arith.constant 0 : i32
    %c0_i32_0 = arith.constant 0 : i32
    return %arg0, %c0_i32 : i32, i32
  }
  func.func @transform_1(%arg0: i32) -> (i32, i32) {
    %c0_i32 = arith.constant 0 : i32
    %c0_i32_0 = arith.constant 0 : i32
    %c0_i32_1 = arith.constant 0 : i32
    return %c0_i32, %c0_i32_0 : i32, i32
  }
  func.func @transform_2(%arg0: i32) -> (i32, i32) {
    %c0_i32 = arith.constant 0 : i32
    %c0_i32_0 = arith.constant 0 : i32
    %c0_i32_1 = arith.constant 0 : i32
    return %c0_i32, %c0_i32_0 : i32, i32
  }
  func.func @transform_3(%arg0: i32) -> (i32, i32) {
    %c0_i32 = arith.constant 0 : i32
    %c0_i32_0 = arith.constant 0 : i32
    %c0_i32_1 = arith.constant 0 : i32
    return %c0_i32, %c0_i32_0 : i32, i32
  }
  func.func @transform_4(%arg0: i32) -> (i32, i32) {
    %c0_i32 = arith.constant 0 : i32
    %c0_i32_0 = arith.constant 0 : i32
    %c0_i32_1 = arith.constant 0 : i32
    return %c0_i32, %c0_i32_0 : i32, i32
  }
  func.func @transform_5(%arg0: i32) -> (i32, i32) {
    %c0_i32 = arith.constant 0 : i32
    %c0_i32_0 = arith.constant 0 : i32
    %c0_i32_1 = arith.constant 0 : i32
    return %c0_i32, %c0_i32_0 : i32, i32
  }
  func.func @transform_6(%arg0: i32) -> (i32, i32) {
    %c0_i32 = arith.constant 0 : i32
    %c0_i32_0 = arith.constant 0 : i32
    %c0_i32_1 = arith.constant 0 : i32
    return %c0_i32, %c0_i32_0 : i32, i32
  }
  func.func @transform_7(%arg0: i32) -> (i32, i32) {
    %c0_i32 = arith.constant 0 : i32
    %c0_i32_0 = arith.constant 0 : i32
    %c0_i32_1 = arith.constant 0 : i32
    return %c0_i32, %c0_i32_0 : i32, i32
  }
  func.func @transform_8(%arg0: i32) -> (i32, i32) {
    %c0_i32 = arith.constant 0 : i32
    %c0_i32_0 = arith.constant 0 : i32
    %c0_i32_1 = arith.constant 0 : i32
    return %c0_i32, %c0_i32_0 : i32, i32
  }
  func.func @transform_9(%arg0: i32) -> (i32, i32) {
    %c0_i32 = arith.constant 0 : i32
    %c0_i32_0 = arith.constant 0 : i32
    %c0_i32_1 = arith.constant 0 : i32
    return %c0_i32, %c0_i32_0 : i32, i32
  }
  func.func @transform_10(%arg0: i32) -> (i32, i32) {
    %c0_i32 = arith.constant 0 : i32
    %c0_i32_0 = arith.constant 0 : i32
    %c0_i32_1 = arith.constant 0 : i32
    return %c0_i32, %c0_i32_0 : i32, i32
  }
  func.func @transform_11(%arg0: i32) -> (i32, i32) {
    %c0_i32 = arith.constant 0 : i32
    %c0_i32_0 = arith.constant 0 : i32
    %c0_i32_1 = arith.constant 0 : i32
    return %c0_i32, %c0_i32_0 : i32, i32
  }
  func.func @transform_12(%arg0: i32) -> (i32, i32) {
    %c0_i32 = arith.constant 0 : i32
    %c0_i32_0 = arith.constant 0 : i32
    %c0_i32_1 = arith.constant 0 : i32
    return %c0_i32, %c0_i32_0 : i32, i32
  }
  func.func @transform_13(%arg0: i32) -> (i32, i32) {
    %c0_i32 = arith.constant 0 : i32
    %c0_i32_0 = arith.constant 0 : i32
    return %arg0, %c0_i32 : i32, i32
  }
  func.func @transform_14(%arg0: i32) -> (i32, i32) {
    %c0_i32 = arith.constant 0 : i32
    %c0_i32_0 = arith.constant 0 : i32
    return %arg0, %c0_i32 : i32, i32
  }
}

</mosaic_0001>

<bundles_post_ra>
// kernel: tpu_custom_call.1
= control target key start
LH: loop header
LB: loop body
LE: loop exit
PB: predicated region body
PF: predicated region fallthrough
CT: control target
= control target key end

     0   :  { %20 = vsyncpa [#allocation3], 0  ;;  %s9238_s0 = inlined_call_operand.hbm [shape: bf16[16,896], index: 0, kind: input, shape index: {}]   ;;  %s9239_s1 = inlined_call_operand.hbm [shape: bf16[896,512], index: 1, kind: input, shape index: {}]   ;;  %s9240_s2 = inlined_call_operand.vmem [shape: f32[1,512], index: 2, kind: input, shape index: {}]   ;;  %s9241_s3 = inlined_call_operand.hbm [shape: bf16[512,512], index: 3, kind: input, shape index: {}]   ;;  %s9242_s4 = inlined_call_operand.vmem [shape: f32[1,512], index: 4, kind: input, shape index: {}]   ;;  %s9243_s5 = inlined_call_operand.hbm [shape: bf16[512,128], index: 5, kind: input, shape index: {}]   ;;  %s9244_s6 = inlined_call_operand.vmem [shape: f32[1,128], index: 6, kind: input, shape index: {}]   ;;  %s9245_s7 = inlined_call_operand.hbm [shape: bf16[128,512], index: 7, kind: input, shape index: {}]   ;;  %s9246_s8 = inlined_call_operand.vmem [shape: f32[1,512], index: 8, kind: input, shape index: {}]   ;;  %s9247_s9 = inlined_call_operand.hbm [shape: bf16[512,512], index: 9, kind: input, shape index: {}]   ;;  %s9248_s10 = inlined_call_operand.vmem [shape: f32[1,512], index: 10, kind: input, shape index: {}]   ;;  %s9249_s11 = inlined_call_operand.hbm [shape: bf16[512,896], index: 11, kind: input, shape index: {}]   ;;  %s9250_s12 = inlined_call_operand.vmem [shape: f32[1,896], index: 12, kind: input, shape index: {}]   ;;  %s9251_s13 = inlined_call_operand.hbm [shape: bf16[16,896], index: 13, kind: output, shape index: {0}]   ;;  %s9252_s14 = inlined_call_operand.hbm [shape: f32[16,128], index: 14, kind: output, shape index: {1}]  }
   0x1   :  { %21 = vsyncpa [#allocation6], 0 }
   0x2   :  { %22 = vsyncpa [#allocation9], 0 }
   0x3   :  { %23 = vsyncpa [#allocation12], 0 }
   0x4   :  { %24 = vsyncpa [#allocation4], 0 }
   0x5   :  { %25 = vsyncpa [#allocation16], 0  ;;  %s8872_s29 = smov [#allocation5]   ;;  %s8662_s17 = scalar_lea.hbm %s9239_s1, 28672 }
   0x6   :  { %s43_s30 = sshll.u32 %s8872_s29, 4  ;;  %p8663_p0 = scmp.ne.s32.totalorder %s9239_s1, %s8662_s17  ;;  %s44_s30 = int_to_ptr.vmem [resolvable:$true] %s43_s30 }
   0x7   :  { %p8666_p1 = scmp.lt.u32.totalorder %s8662_s17, %s9239_s1 }
   0x9   :  { %p8668_p2 = pnand %p8666_p1, %p8663_p0 }
   0xb   :  { %8671 = shalt.err (!%p8668_p2)
}
   0xc   :  { %s8672_s22 = scalar_lea.vmem %s44_s30, 28672  ;;  %p8677_p4 = scmp.lt.s32.totalorder %s44_s30, %s44_s30 }
   0xd   :  { %p8673_p3 = scmp.ne.s32.totalorder %s44_s30, %s8672_s22  ;;  %p8678_p5 = scmp.lt.s32.totalorder %s8672_s22, %s8672_s22 }
   0xf   :  { %p8679_p6 = por %p8678_p5, %p8677_p4 }
  0x11   :  { %p8680_p7 = pnand %p8679_p6, %p8673_p3 }
  0x13   :  { %8683 = shalt.err (!%p8680_p7)
}
  0x14   :  { %s9253_s23 = smov 256   ;;  %s8874_s24 = smov 16  }
  0x15   :  { %49 = dma.hbm_to_vmem [thread:$0]  %s9239_s1, 28672, %s44_s30, [#allocation6], %s9253_s23, %s9253_s23, %s8874_s24  }
  0x16   :  { %s8875_s27 = smov [#allocation8]   ;;  %s8684_s16 = scalar_lea.hbm %s9243_s5, 4096 }
  0x17   :  { %s71_s28 = sshll.u32 %s8875_s27, 4  ;;  %p8685_p8 = scmp.ne.s32.totalorder %s9243_s5, %s8684_s16  ;;  %s72_s28 = int_to_ptr.vmem [resolvable:$true] %s71_s28 }
  0x18   :  { %p8688_p9 = scmp.lt.u32.totalorder %s8684_s16, %s9243_s5 }
  0x1a   :  { %p8690_p10 = pnand %p8688_p9, %p8685_p8 }
  0x1c   :  { %8693 = shalt.err (!%p8690_p10)
}
  0x1d   :  { %s8694_s21 = scalar_lea.vmem %s72_s28, 4096  ;;  %p8699_p12 = scmp.lt.s32.totalorder %s72_s28, %s72_s28 }
  0x1e   :  { %p8695_p11 = scmp.ne.s32.totalorder %s72_s28, %s8694_s21  ;;  %p8700_p13 = scmp.lt.s32.totalorder %s8694_s21, %s8694_s21 }
  0x20   :  { %p8701_p0 = por %p8700_p13, %p8699_p12 }
  0x22   :  { %p8702_p1 = pnand %p8701_p0, %p8695_p11 }
  0x24   :  { %8705 = shalt.err (!%p8702_p1)
}
  0x25   :  { %s8876_s1 = smov 64   ;;  %s8877_s30 = smov 4  }
  0x26   :  { %77 = dma.hbm_to_vmem [thread:$0]  %s9243_s5, 4096, %s72_s28, [#allocation9], %s8876_s1, %s8876_s1, %s8877_s30  }
  0x27   :  { %s8878_s26 = smov [#allocation11]   ;;  %s8879_s29 = smov [#allocation2]  }
  0x28   :  { %s99_s27 = sshll.u32 %s8878_s26, 4  ;;  %s31_s15 = sshll.u32 %s8879_s29, 4  ;;  %s100_s27 = int_to_ptr.vmem [resolvable:$true] %s99_s27  ;;  %s8992_s15 = int_to_ptr.vmem [resolvable:$true] %s31_s15 }
  0x29   :  { %s8706_s18 = scalar_lea.hbm %s9247_s9, 16384 }
  0x2a   :  { %p8707_p2 = scmp.ne.s32.totalorder %s9247_s9, %s8706_s18  ;;  %p8710_p3 = scmp.lt.u32.totalorder %s8706_s18, %s9247_s9 }
  0x2c   :  { %p8712_p4 = pnand %p8710_p3, %p8707_p2 }
  0x2e   :  { %8715 = shalt.err (!%p8712_p4)
}
  0x2f   :  { %s8716_s5 = scalar_lea.vmem %s100_s27, 16384  ;;  %p8721_p6 = scmp.lt.s32.totalorder %s100_s27, %s100_s27 }
  0x30   :  { %p8717_p5 = scmp.ne.s32.totalorder %s100_s27, %s8716_s5  ;;  %p8722_p7 = scmp.lt.s32.totalorder %s8716_s5, %s8716_s5 }
  0x32   :  { %p8723_p8 = por %p8722_p7, %p8721_p6 }
  0x34   :  { %p8724_p9 = pnand %p8723_p8, %p8717_p5 }
  0x36   :  { %8727 = shalt.err (!%p8724_p9)
}
  0x37   :  { %s9255_s28 = smov 256   ;;  %s8728_s23 = scalar_lea.hbm %s9238_s0, 896 }
  0x38   :  { %105 = dma.hbm_to_vmem [thread:$0]  %s9247_s9, 16384, %s100_s27, [#allocation12], %s9255_s28, %s9255_s28, %s8874_s24  }
  0x39   :  { %p8729_p10 = scmp.ne.s32.totalorder %s9238_s0, %s8728_s23  ;;  %p8732_p11 = scmp.lt.u32.totalorder %s8728_s23, %s9238_s0 }
  0x3b   :  { %p8734_p12 = pnand %p8732_p11, %p8729_p10 }
  0x3d   :  { %8737 = shalt.err (!%p8734_p12)
}
  0x3e   :  { %s8738_s18 = scalar_lea.vmem %s8992_s15, 896  ;;  %p8743_p0 = scmp.lt.s32.totalorder %s8992_s15, %s8992_s15 }
  0x3f   :  { %p8739_p13 = scmp.ne.s32.totalorder %s8992_s15, %s8738_s18  ;;  %p8744_p1 = scmp.lt.s32.totalorder %s8738_s18, %s8738_s18 }
  0x41   :  { %p8745_p2 = por %p8744_p1, %p8743_p0 }
  0x43   :  { %p8746_p3 = pnand %p8745_p2, %p8739_p13 }
  0x45   :  { %8749 = shalt.err (!%p8746_p3)
}
  0x46   :  { %s8880_s9 = smov 448   ;;  %s8881_s27 = smov 28  }
  0x47   :  { %37 = dma.hbm_to_vmem [thread:$0]  %s9238_s0, 896, %s8992_s15, [#allocation3], %s8880_s9, %s8880_s9, %s8881_s27  }
  0x48   :  { %s8882_s21 = smov [#allocation7]   ;;  %s8883_s1 = smov [#allocation10]  }
  0x49   :  { %s57_s5 = sshll.u32 %s8882_s21, 4  ;;  %s85_s30 = sshll.u32 %s8883_s1, 4  ;;  %s58_s5 = int_to_ptr.vmem [resolvable:$true] %s57_s5  ;;  %s9029_s30 = int_to_ptr.vmem [resolvable:$true] %s85_s30 }
  0x4a   :  { %s8750_s23 = scalar_lea.hbm %s9241_s3, 16384 }
  0x4b   :  { %p8751_p4 = scmp.ne.s32.totalorder %s9241_s3, %s8750_s23  ;;  %p8754_p5 = scmp.lt.u32.totalorder %s8750_s23, %s9241_s3 }
  0x4d   :  { %p8756_p6 = pnand %p8754_p5, %p8751_p4 }
  0x4f   :  { %8759 = shalt.err (!%p8756_p6)
}
  0x50   :  { %s8760_s0 = scalar_lea.vmem %s58_s5, 16384  ;;  %p8765_p8 = scmp.lt.s32.totalorder %s58_s5, %s58_s5 }
  0x51   :  { %p8761_p7 = scmp.ne.s32.totalorder %s58_s5, %s8760_s0  ;;  %p8766_p9 = scmp.lt.s32.totalorder %s8760_s0, %s8760_s0 }
  0x53   :  { %p8767_p10 = por %p8766_p9, %p8765_p8 }
  0x55   :  { %p8768_p11 = pnand %p8767_p10, %p8761_p7 }
  0x57   :  { %8771 = shalt.err (!%p8768_p11)
}
  0x58   :  { %63 = dma.hbm_to_vmem [thread:$0]  %s9241_s3, 16384, %s58_s5, [#allocation6], %s9255_s28, %s9255_s28, %s8874_s24  }
  0x59   :  { %s8772_s21 = scalar_lea.hbm %s9245_s7, 4096 }
  0x5a   :  { %p8773_p12 = scmp.ne.s32.totalorder %s9245_s7, %s8772_s21  ;;  %p8776_p13 = scmp.lt.u32.totalorder %s8772_s21, %s9245_s7 }
  0x5c   :  { %p8778_p0 = pnand %p8776_p13, %p8773_p12 }
  0x5e   :  { %8781 = shalt.err (!%p8778_p0)
}
  0x5f   :  { %s8782_s26 = scalar_lea.vmem %s9029_s30, 4096  ;;  %p8787_p2 = scmp.lt.s32.totalorder %s9029_s30, %s9029_s30 }
  0x60   :  { %p8783_p1 = scmp.ne.s32.totalorder %s9029_s30, %s8782_s26  ;;  %p8788_p3 = scmp.lt.s32.totalorder %s8782_s26, %s8782_s26 }
  0x62   :  { %p8789_p4 = por %p8788_p3, %p8787_p2 }
  0x64   :  { %p8790_p5 = pnand %p8789_p4, %p8783_p1 }
  0x66   :  { %8793 = shalt.err (!%p8790_p5)
}
  0x67   :  { %91 = dma.hbm_to_vmem [thread:$0]  %s9245_s7, 4096, %s9029_s30, [#allocation9], %s9255_s28, %s9255_s28, %s8874_s24  }
  0x68   :  { %s8884_s29 = smov [#allocation13]   ;;  %s8794_s15 = scalar_lea.hbm %s9249_s11, 28672 }
  0x69   :  { %s113_s16 = sshll.u32 %s8884_s29, 4  ;;  %p8795_p6 = scmp.ne.s32.totalorder %s9249_s11, %s8794_s15  ;;  %s114_s16 = int_to_ptr.vmem [resolvable:$true] %s113_s16 }
  0x6a   :  { %p8798_p7 = scmp.lt.u32.totalorder %s8794_s15, %s9249_s11 }
  0x6c   :  { %p8800_p8 = pnand %p8798_p7, %p8795_p6 }
  0x6e   :  { %8803 = shalt.err (!%p8800_p8)
}
  0x6f   :  { %s8804_s1 = scalar_lea.vmem %s114_s16, 28672  ;;  %p8809_p10 = scmp.lt.s32.totalorder %s114_s16, %s114_s16 }
  0x70   :  { %p8805_p9 = scmp.ne.s32.totalorder %s114_s16, %s8804_s1  ;;  %p8810_p11 = scmp.lt.s32.totalorder %s8804_s1, %s8804_s1 }
  0x72   :  { %p8811_p12 = por %p8810_p11, %p8809_p10 }
  0x74   :  { %p8812_p13 = pnand %p8811_p12, %p8805_p9 }
  0x76   :  { %8815 = shalt.err (!%p8812_p13)
}
  0x77   :  { %119 = dma.hbm_to_vmem [thread:$0]  %s9249_s11, 28672, %s114_s16, [#allocation12], %s8880_s9, %s8880_s9, %s8881_s27  }
  0x78   :  { %8860 = dma.done.wait [#allocation3], 896  }
  0x79   :  { %8861 = vsyncadd [#allocation3], 4294966400 }
  0x7a   :  { %8862 = dma.done.wait [#allocation6], 45056  }
  0x7b   :  { %8863 = vsyncadd [#allocation6], 4294922240 }
  0x7c   :  { %8864 = dma.done.wait [#allocation9], 8192  }
  0x7d   :  { %8865 = vsyncadd [#allocation9], 4294959104 }
  0x7e   :  { %8866 = dma.done.wait [#allocation12], 45056  }
  0x7f   :  { %8867 = vsyncadd [#allocation12], 4294922240  ;;  %v8885_v0 = vmov 0   ;;  %v7475_v1 = vld [vmem:[#allocation5 + $0x4] ss:$16 sps:$4 sm:$0xff]  }
  0x80   :  { %1715 = vmatprep.mubr.bf16.mxu1 %v8885_v0  ;;  %v7477_v2 = vld [vmem:[#allocation5 + $0x604] ss:$16 sps:$4 sm:$0xff]   ;;  %1554 = vmatprep.subr.bf16.mxu0 %v7475_v1  ;;  %v7479_v3 = vld [vmem:[#allocation5] ss:$16 sps:$4 sm:$0xff]   ;;  %v7528_v34 = vld [vmem:[#allocation5 + $0xc] ss:$16 sps:$4 sm:$0xff]  }
  0x81   :  { %v7480_v4 = vld [vmem:[#allocation5 + $0x600] ss:$16 sps:$4 sm:$0xff]   ;;  %1683 = vmatprep.subr.bf16.mxu1 %v7477_v2  ;;  %v7481_v5 = vld [vmem:[#allocation5 + $0x24] ss:$16 sps:$4 sm:$0xff]   ;;  %1555 = vmatpush1.bf16.msra.mxu0 %v7479_v3  ;;  %v7526_v36 = vld [vmem:[#allocation5 + $0x8] ss:$16 sps:$4 sm:$0xff]  }
  0x82   :  { %1684 = vmatpush1.bf16.msra.mxu1 %v7480_v4  ;;  %v7483_v6 = vld [vmem:[#allocation5 + $0x624] ss:$16 sps:$4 sm:$0xff]   ;;  %v7485_v7 = vld [vmem:[#allocation5 + $0x20] ss:$16 sps:$4 sm:$0xff]   ;;  %1556 = vmatprep.subr.bf16.mxu0 %v7481_v5  ;;  %v7534_v39 = vld [vmem:[#allocation5 + $0x2c] ss:$16 sps:$4 sm:$0xff]  }
  0x83   :  { %v7486_v8 = vld [vmem:[#allocation5 + $0x620] ss:$16 sps:$4 sm:$0xff]   ;;  %1685 = vmatprep.subr.bf16.mxu1 %v7483_v6  ;;  %v7487_v9 = vld [vmem:[#allocation5 + $0x44] ss:$16 sps:$4 sm:$0xff]   ;;  %v7532_v40 = vld [vmem:[#allocation5 + $0x28] ss:$16 sps:$4 sm:$0xff]  }
  0x84   :  { %v7489_v10 = vld [vmem:[#allocation5 + $0x644] ss:$16 sps:$4 sm:$0xff]   ;;  %v7491_v11 = vld [vmem:[#allocation5 + $0x40] ss:$16 sps:$4 sm:$0xff]   ;;  %v7540_v43 = vld [vmem:[#allocation5 + $0x4c] ss:$16 sps:$4 sm:$0xff]  }
  0x85   :  { %v7492_v12 = vld [vmem:[#allocation5 + $0x640] ss:$16 sps:$4 sm:$0xff]   ;;  %1557 = vmatpush1.bf16.msra.mxu0 %v7485_v7  ;;  %v7493_v13 = vld [vmem:[#allocation5 + $0x64] ss:$16 sps:$4 sm:$0xff]   ;;  %v7538_v44 = vld [vmem:[#allocation5 + $0x48] ss:$16 sps:$4 sm:$0xff]  }
  0x86   :  { %1686 = vmatpush1.bf16.msra.mxu1 %v7486_v8  ;;  %1558 = vmatprep.subr.bf16.mxu0 %v7487_v9  ;;  %v7495_v14 = vld [vmem:[#allocation5 + $0x664] ss:$16 sps:$4 sm:$0xff]   ;;  %v7497_v15 = vld [vmem:[#allocation5 + $0x60] ss:$16 sps:$4 sm:$0xff]   ;;  %v7546_v47 = vld [vmem:[#allocation5 + $0x6c] ss:$16 sps:$4 sm:$0xff]  }
  0x87   :  { %1687 = vmatprep.subr.bf16.mxu1 %v7489_v10  ;;  %v7498_v16 = vld [vmem:[#allocation5 + $0x660] ss:$16 sps:$4 sm:$0xff]   ;;  %v7499_v17 = vld [vmem:[#allocation5 + $0x84] ss:$16 sps:$4 sm:$0xff]   ;;  %v7544_v48 = vld [vmem:[#allocation5 + $0x68] ss:$16 sps:$4 sm:$0xff]  }
  0x88   :  { %v7501_v18 = vld [vmem:[#allocation5 + $0x684] ss:$16 sps:$4 sm:$0xff]   ;;  %v7503_v19 = vld [vmem:[#allocation5 + $0x80] ss:$16 sps:$4 sm:$0xff]   ;;  %v7574_v51 = vld [vmem:[#allocation2 + $0x4] ss:$28 sps:$4 sm:$0xff]  }
  0x89   :  { %1559 = vmatpush1.bf16.msra.mxu0 %v7491_v11  ;;  %v7504_v20 = vld [vmem:[#allocation5 + $0x680] ss:$16 sps:$4 sm:$0xff]   ;;  %v7505_v21 = vld [vmem:[#allocation5 + $0xa4] ss:$16 sps:$4 sm:$0xff]   ;;  %v7552_v52 = vld [vmem:[#allocation5 + $0x8c] ss:$16 sps:$4 sm:$0xff]   ;;  %1586 = vmatprep.mubr.bf16.mxu0 %v7574_v51 }
  0x8a   :  { %1688 = vmatpush1.bf16.msra.mxu1 %v7492_v12  ;;  %1560 = vmatprep.subr.bf16.mxu0 %v7493_v13  ;;  %v7507_v22 = vld [vmem:[#allocation5 + $0x6a4] ss:$16 sps:$4 sm:$0xff]   ;;  %v7509_v23 = vld [vmem:[#allocation5 + $0xa0] ss:$16 sps:$4 sm:$0xff]   ;;  %v7550_v53 = vld [vmem:[#allocation5 + $0x88] ss:$16 sps:$4 sm:$0xff]  }
  0x8b   :  { %1689 = vmatprep.subr.bf16.mxu1 %v7495_v14  ;;  %v7510_v24 = vld [vmem:[#allocation5 + $0x6a0] ss:$16 sps:$4 sm:$0xff]   ;;  %v7511_v25 = vld [vmem:[#allocation5 + $0xc4] ss:$16 sps:$4 sm:$0xff]   ;;  %v7558_v56 = vld [vmem:[#allocation5 + $0xac] ss:$16 sps:$4 sm:$0xff]  }
  0x8c   :  { %v7513_v26 = vld [vmem:[#allocation5 + $0x6c4] ss:$16 sps:$4 sm:$0xff]   ;;  %v7515_v27 = vld [vmem:[#allocation5 + $0xc0] ss:$16 sps:$4 sm:$0xff]   ;;  %v7556_v57 = vld [vmem:[#allocation5 + $0xa8] ss:$16 sps:$4 sm:$0xff]  }
  0x8d   :  { %1561 = vmatpush1.bf16.msra.mxu0 %v7497_v15  ;;  %v7516_v28 = vld [vmem:[#allocation5 + $0x6c0] ss:$16 sps:$4 sm:$0xff]   ;;  %v7517_v29 = vld [vmem:[#allocation5 + $0xe4] ss:$16 sps:$4 sm:$0xff]   ;;  %v7564_v60 = vld [vmem:[#allocation5 + $0xcc] ss:$16 sps:$4 sm:$0xff]  }
  0x8e   :  { %1690 = vmatpush1.bf16.msra.mxu1 %v7498_v16  ;;  %1562 = vmatprep.subr.bf16.mxu0 %v7499_v17  ;;  %v7519_v30 = vld [vmem:[#allocation5 + $0x6e4] ss:$16 sps:$4 sm:$0xff]   ;;  %v7521_v31 = vld [vmem:[#allocation5 + $0xe0] ss:$16 sps:$4 sm:$0xff]   ;;  %v7562_v61 = vld [vmem:[#allocation5 + $0xc8] ss:$16 sps:$4 sm:$0xff]  }
  0x8f   :  { %1691 = vmatprep.subr.bf16.mxu1 %v7501_v18  ;;  %v7522_v32 = vld [vmem:[#allocation5 + $0x6e0] ss:$16 sps:$4 sm:$0xff]   ;;  %v7523_v33 = vld [vmem:[#allocation5 + $0x104] ss:$16 sps:$4 sm:$0xff]   ;;  %v7570_v1 = vld [vmem:[#allocation5 + $0xec] ss:$16 sps:$4 sm:$0xff]  }
  0x90   :  { %v7525_v35 = vld [vmem:[#allocation2 + $0x18] ss:$28 sps:$4 sm:$0xff]   ;;  %v7530_v38 = vld [vmem:[#allocation5 + $0x124] ss:$16 sps:$4 sm:$0xff]   ;;  %v7568_v2 = vld [vmem:[#allocation5 + $0xe8] ss:$16 sps:$4 sm:$0xff]  }
  0x91   :  { %1563 = vmatpush1.bf16.msra.mxu0 %v7503_v19  ;;  %v7529_v37 = vld [vmem:[#allocation5 + $0x100] ss:$16 sps:$4 sm:$0xff]   ;;  %v7536_v42 = vld [vmem:[#allocation5 + $0x144] ss:$16 sps:$4 sm:$0xff]   ;;  %v7580_v5 = vld [vmem:[#allocation5 + $0x10c] ss:$16 sps:$4 sm:$0xff]  }
  0x92   :  { %1692 = vmatpush1.bf16.msra.mxu1 %v7504_v20  ;;  %1564 = vmatprep.subr.bf16.mxu0 %v7505_v21  ;;  %v7535_v41 = vld [vmem:[#allocation5 + $0x120] ss:$16 sps:$4 sm:$0xff]   ;;  %v7542_v46 = vld [vmem:[#allocation5 + $0x164] ss:$16 sps:$4 sm:$0xff]   ;;  %v7578_v8 = vld [vmem:[#allocation5 + $0x108] ss:$16 sps:$4 sm:$0xff]  }
  0x93   :  { %1693 = vmatprep.subr.bf16.mxu1 %v7507_v22  ;;  %v7541_v45 = vld [vmem:[#allocation5 + $0x140] ss:$16 sps:$4 sm:$0xff]   ;;  %v7548_v50 = vld [vmem:[#allocation5 + $0x184] ss:$16 sps:$4 sm:$0xff]   ;;  %v7586_v10 = vld [vmem:[#allocation5 + $0x12c] ss:$16 sps:$4 sm:$0xff]  }
  0x94   :  { %v7547_v49 = vld [vmem:[#allocation5 + $0x160] ss:$16 sps:$4 sm:$0xff]   ;;  %v7554_v55 = vld [vmem:[#allocation5 + $0x1a4] ss:$16 sps:$4 sm:$0xff]   ;;  %v7584_v12 = vld [vmem:[#allocation5 + $0x128] ss:$16 sps:$4 sm:$0xff]  }
  0x95   :  { %1565 = vmatpush1.bf16.msra.mxu0 %v7509_v23  ;;  %v7553_v54 = vld [vmem:[#allocation5 + $0x180] ss:$16 sps:$4 sm:$0xff]   ;;  %v7560_v59 = vld [vmem:[#allocation5 + $0x1c4] ss:$16 sps:$4 sm:$0xff]   ;;  %v7592_v14 = vld [vmem:[#allocation5 + $0x14c] ss:$16 sps:$4 sm:$0xff]  }
  0x96   :  { %1694 = vmatpush1.bf16.msra.mxu1 %v7510_v24  ;;  %1566 = vmatprep.subr.bf16.mxu0 %v7511_v25  ;;  %v7559_v58 = vld [vmem:[#allocation5 + $0x1a0] ss:$16 sps:$4 sm:$0xff]   ;;  %v7566_v63 = vld [vmem:[#allocation5 + $0x1e4] ss:$16 sps:$4 sm:$0xff]   ;;  %v7590_v16 = vld [vmem:[#allocation5 + $0x148] ss:$16 sps:$4 sm:$0xff]  }
  0x97   :  { %1695 = vmatprep.subr.bf16.mxu1 %v7513_v26  ;;  %v7565_v62 = vld [vmem:[#allocation5 + $0x1c0] ss:$16 sps:$4 sm:$0xff]   ;;  %v7577_v4 = vld [vmem:[#allocation5 + $0x204] ss:$16 sps:$4 sm:$0xff]   ;;  %v7598_v18 = vld [vmem:[#allocation5 + $0x16c] ss:$16 sps:$4 sm:$0xff]  }
  0x98   :  { %v7571_v3 = vld [vmem:[#allocation5 + $0x1e0] ss:$16 sps:$4 sm:$0xff]   ;;  %v9082_v6 = vld [vmem:[#allocation2] ss:$28 sps:$4 sm:$0xff]   ;;  %v7604_v22 = vld [vmem:[#allocation5 + $0x18c] ss:$16 sps:$4 sm:$0xff]  }
  0x99   :  { %1567 = vmatpush1.bf16.msra.mxu0 %v7515_v27  ;;  %v7575_v7 = vld [vmem:[#allocation5 + $0x200] ss:$16 sps:$4 sm:$0xff]   ;;  %v7583_v9 = vld [vmem:[#allocation5 + $0x224] ss:$16 sps:$4 sm:$0xff]   ;;  %v7596_v20 = vld [vmem:[#allocation5 + $0x168] ss:$16 sps:$4 sm:$0xff]  }
  0x9a   :  { %1696 = vmatpush1.bf16.msra.mxu1 %v7516_v28  ;;  %1568 = vmatprep.subr.bf16.mxu0 %v7517_v29  ;;  %v7581_v11 = vld [vmem:[#allocation5 + $0x220] ss:$16 sps:$4 sm:$0xff]   ;;  %v7589_v13 = vld [vmem:[#allocation5 + $0x244] ss:$16 sps:$4 sm:$0xff]   ;;  %v7602_v24 = vld [vmem:[#allocation5 + $0x188] ss:$16 sps:$4 sm:$0xff]  }
  0x9b   :  { %1697 = vmatprep.subr.bf16.mxu1 %v7519_v30  ;;  %v7587_v15 = vld [vmem:[#allocation5 + $0x240] ss:$16 sps:$4 sm:$0xff]   ;;  %v7595_v17 = vld [vmem:[#allocation5 + $0x264] ss:$16 sps:$4 sm:$0xff]   ;;  %v7610_v26 = vld [vmem:[#allocation5 + $0x1ac] ss:$16 sps:$4 sm:$0xff]  }
  0x9c   :  { %v7593_v19 = vld [vmem:[#allocation5 + $0x260] ss:$16 sps:$4 sm:$0xff]   ;;  %v7601_v21 = vld [vmem:[#allocation5 + $0x284] ss:$16 sps:$4 sm:$0xff]   ;;  %v7608_v28 = vld [vmem:[#allocation5 + $0x1a8] ss:$16 sps:$4 sm:$0xff]  }
  0x9d   :  { %1569 = vmatpush1.bf16.msra.mxu0 %v7521_v31  ;;  %v7599_v23 = vld [vmem:[#allocation5 + $0x280] ss:$16 sps:$4 sm:$0xff]   ;;  %v7607_v25 = vld [vmem:[#allocation5 + $0x2a4] ss:$16 sps:$4 sm:$0xff]   ;;  %v7616_v30 = vld [vmem:[#allocation5 + $0x1cc] ss:$16 sps:$4 sm:$0xff]  }
  0x9e   :  { %1698 = vmatpush1.bf16.msra.mxu1 %v7522_v32  ;;  %1570 = vmatprep.subr.bf16.mxu0 %v7523_v33  ;;  %v7605_v27 = vld [vmem:[#allocation5 + $0x2a0] ss:$16 sps:$4 sm:$0xff]   ;;  %v7613_v29 = vld [vmem:[#allocation5 + $0x2c4] ss:$16 sps:$4 sm:$0xff]   ;;  %v7614_v32 = vld [vmem:[#allocation5 + $0x1c8] ss:$16 sps:$4 sm:$0xff]  }
  0x9f   :  { %1726 = vmatprep.subr.bf16.mxu1 %v7528_v34  ;;  %v7611_v31 = vld [vmem:[#allocation5 + $0x2c0] ss:$16 sps:$4 sm:$0xff]   ;;  %v7619_v33 = vld [vmem:[#allocation5 + $0x2e4] ss:$16 sps:$4 sm:$0xff]  }
  0xa0   :  { %v7673_v34 = vld [vmem:[#allocation2 + $0xc] ss:$28 sps:$4 sm:$0xff]  }
  0xa1   :  { %1716 = vmatmul.mubr.bf16.vlgmr.msra.gmra.mrb[0].mxu1 %v7525_v35  ;;  %1571 = vmatpush1.bf16.msra.mxu0 %v7529_v37  ;;  %v7622_v35 = vld [vmem:[#allocation5 + $0x1ec] ss:$16 sps:$4 sm:$0xff]   ;;  %v7620_v37 = vld [vmem:[#allocation5 + $0x1e8] ss:$16 sps:$4 sm:$0xff]  }
  0xa2   :  { %1727 = vmatpush1.bf16.msra.mxu1 %v7526_v36  ;;  %1572 = vmatprep.subr.bf16.mxu0 %v7530_v38  ;;  %v7617_v36 = vld [vmem:[#allocation5 + $0x2e0] ss:$16 sps:$4 sm:$0xff]   ;;  %v7625_v38 = vld [vmem:[#allocation5 + $0x304] ss:$16 sps:$4 sm:$0xff]  }
  0xa3   :  { %1728 = vmatprep.subr.bf16.mxu1 %v7534_v39  ;;  %1758 = vmatprep.mubr.bf16.mxu1 %v7574_v51  ;;  %v7628_v39 = vld [vmem:[#allocation5 + $0x20c] ss:$16 sps:$4 sm:$0xff]  }
  0xa4   :  { %v7646_v51 = vld [vmem:[#allocation5 + $0x26c] ss:$16 sps:$4 sm:$0xff]  }
  0xa5   :  { %1573 = vmatpush1.bf16.msra.mxu0 %v7535_v41  ;;  %v7626_v41 = vld [vmem:[#allocation5 + $0x208] ss:$16 sps:$4 sm:$0xff]  }
  0xa6   :  { %1729 = vmatpush1.bf16.msra.mxu1 %v7532_v40  ;;  %1574 = vmatprep.subr.bf16.mxu0 %v7536_v42  ;;  %v7623_v40 = vld [vmem:[#allocation5 + $0x300] ss:$16 sps:$4 sm:$0xff]   ;;  %v7631_v42 = vld [vmem:[#allocation5 + $0x324] ss:$16 sps:$4 sm:$0xff]  }
  0xa7   :  { %1730 = vmatprep.subr.bf16.mxu1 %v7540_v43  ;;  %v7634_v43 = vld [vmem:[#allocation5 + $0x22c] ss:$16 sps:$4 sm:$0xff]  }
  0xa9   :  { %1575 = vmatpush1.bf16.msra.mxu0 %v7541_v45  ;;  %v7632_v45 = vld [vmem:[#allocation5 + $0x228] ss:$16 sps:$4 sm:$0xff]  }
  0xaa   :  { %1731 = vmatpush1.bf16.msra.mxu1 %v7538_v44  ;;  %1576 = vmatprep.subr.bf16.mxu0 %v7542_v46  ;;  %v7629_v44 = vld [vmem:[#allocation5 + $0x320] ss:$16 sps:$4 sm:$0xff]   ;;  %v7637_v46 = vld [vmem:[#allocation5 + $0x344] ss:$16 sps:$4 sm:$0xff]  }
  0xab   :  { %1732 = vmatprep.subr.bf16.mxu1 %v7546_v47  ;;  %v7640_v47 = vld [vmem:[#allocation5 + $0x24c] ss:$16 sps:$4 sm:$0xff]  }
  0xad   :  { %1577 = vmatpush1.bf16.msra.mxu0 %v7547_v49  ;;  %v7638_v49 = vld [vmem:[#allocation5 + $0x248] ss:$16 sps:$4 sm:$0xff]  }
  0xae   :  { %1733 = vmatpush1.bf16.msra.mxu1 %v7544_v48  ;;  %1578 = vmatprep.subr.bf16.mxu0 %v7548_v50  ;;  %v7635_v48 = vld [vmem:[#allocation5 + $0x340] ss:$16 sps:$4 sm:$0xff]   ;;  %v7643_v50 = vld [vmem:[#allocation5 + $0x364] ss:$16 sps:$4 sm:$0xff]  }
  0xaf   :  { %1734 = vmatprep.subr.bf16.mxu1 %v7552_v52  ;;  %v7641_v52 = vld [vmem:[#allocation5 + $0x360] ss:$16 sps:$4 sm:$0xff]  }
  0xb1   :  { %1579 = vmatpush1.bf16.msra.mxu0 %v7553_v54  ;;  %v7649_v54 = vld [vmem:[#allocation5 + $0x384] ss:$16 sps:$4 sm:$0xff]  }
  0xb2   :  { %1735 = vmatpush1.bf16.msra.mxu1 %v7550_v53  ;;  %1580 = vmatprep.subr.bf16.mxu0 %v7554_v55  ;;  %v7644_v53 = vld [vmem:[#allocation5 + $0x268] ss:$16 sps:$4 sm:$0xff]   ;;  %v7652_v55 = vld [vmem:[#allocation5 + $0x28c] ss:$16 sps:$4 sm:$0xff]  }
  0xb3   :  { %1736 = vmatprep.subr.bf16.mxu1 %v7558_v56  ;;  %v7647_v56 = vld [vmem:[#allocation5 + $0x380] ss:$16 sps:$4 sm:$0xff]  }
  0xb5   :  { %1581 = vmatpush1.bf16.msra.mxu0 %v7559_v58  ;;  %v7655_v58 = vld [vmem:[#allocation5 + $0x3a4] ss:$16 sps:$4 sm:$0xff]  }
  0xb6   :  { %1737 = vmatpush1.bf16.msra.mxu1 %v7556_v57  ;;  %1582 = vmatprep.subr.bf16.mxu0 %v7560_v59  ;;  %v7650_v57 = vld [vmem:[#allocation5 + $0x288] ss:$16 sps:$4 sm:$0xff]   ;;  %v7658_v59 = vld [vmem:[#allocation5 + $0x2ac] ss:$16 sps:$4 sm:$0xff]  }
  0xb7   :  { %1738 = vmatprep.subr.bf16.mxu1 %v7564_v60  ;;  %v7653_v60 = vld [vmem:[#allocation5 + $0x3a0] ss:$16 sps:$4 sm:$0xff]  }
  0xb9   :  { %1583 = vmatpush1.bf16.msra.mxu0 %v7565_v62  ;;  %v7661_v62 = vld [vmem:[#allocation5 + $0x3c4] ss:$16 sps:$4 sm:$0xff]  }
  0xba   :  { %1739 = vmatpush1.bf16.msra.mxu1 %v7562_v61  ;;  %1584 = vmatprep.subr.bf16.mxu0 %v7566_v63  ;;  %v7656_v61 = vld [vmem:[#allocation5 + $0x2a8] ss:$16 sps:$4 sm:$0xff]   ;;  %v7664_v63 = vld [vmem:[#allocation5 + $0x2cc] ss:$16 sps:$4 sm:$0xff]  }
  0xbb   :  { %1740 = vmatprep.subr.bf16.mxu1 %v7570_v1  ;;  %v7659_v1 = vld [vmem:[#allocation5 + $0x3c0] ss:$16 sps:$4 sm:$0xff]  }
  0xbd   :  { %1585 = vmatpush1.bf16.msra.mxu0 %v7571_v3  ;;  %v7667_v3 = vld [vmem:[#allocation5 + $0x3e4] ss:$16 sps:$4 sm:$0xff]  }
  0xbe   :  { %1741 = vmatpush1.bf16.msra.mxu1 %v7568_v2  ;;  %1597 = vmatprep.subr.bf16.mxu0 %v7577_v4  ;;  %v7662_v2 = vld [vmem:[#allocation5 + $0x2c8] ss:$16 sps:$4 sm:$0xff]   ;;  %v7670_v4 = vld [vmem:[#allocation5 + $0x2ec] ss:$16 sps:$4 sm:$0xff]  }
  0xbf   :  { %1742 = vmatprep.subr.bf16.mxu1 %v7580_v5  ;;  %v7665_v5 = vld [vmem:[#allocation5 + $0x3e0] ss:$16 sps:$4 sm:$0xff]  }
  0xc0   :  { %1587 = vmatmul.mubr.bf16.vlgmr.msra.gmra.mrb[0].mxu0 %v9082_v6 }
  0xc1   :  { %1598 = vmatpush1.bf16.msra.mxu0 %v7575_v7  ;;  %1629 = vmatprep.mubr.bf16.mxu0 %v7673_v34  ;;  %v7676_v7 = vld [vmem:[#allocation5 + $0x404] ss:$16 sps:$4 sm:$0xff]  }
  0xc2   :  { %1743 = vmatpush1.bf16.msra.mxu1 %v7578_v8  ;;  %1599 = vmatprep.subr.bf16.mxu0 %v7583_v9  ;;  %v7679_v8 = vld [vmem:[#allocation5 + $0x30c] ss:$16 sps:$4 sm:$0xff]  }
  0xc3   :  { %1744 = vmatprep.subr.bf16.mxu1 %v7586_v10  ;;  %v9086_v9 = vld [vmem:[#allocation2 + $0x8] ss:$28 sps:$4 sm:$0xff]  }
  0xc4   :  { %v7674_v10 = vld [vmem:[#allocation5 + $0x400] ss:$16 sps:$4 sm:$0xff]  }
  0xc5   :  { %1600 = vmatpush1.bf16.msra.mxu0 %v7581_v11  ;;  %v7677_v11 = vld [vmem:[#allocation5 + $0x308] ss:$16 sps:$4 sm:$0xff]  }
  0xc6   :  { %1745 = vmatpush1.bf16.msra.mxu1 %v7584_v12  ;;  %1601 = vmatprep.subr.bf16.mxu0 %v7589_v13  ;;  %v7682_v12 = vld [vmem:[#allocation5 + $0x424] ss:$16 sps:$4 sm:$0xff]   ;;  %v7685_v13 = vld [vmem:[#allocation5 + $0x32c] ss:$16 sps:$4 sm:$0xff]  }
  0xc7   :  { %1746 = vmatprep.subr.bf16.mxu1 %v7592_v14  ;;  %v7680_v14 = vld [vmem:[#allocation5 + $0x420] ss:$16 sps:$4 sm:$0xff]  }
  0xc9   :  { %1602 = vmatpush1.bf16.msra.mxu0 %v7587_v15  ;;  %v7683_v15 = vld [vmem:[#allocation5 + $0x328] ss:$16 sps:$4 sm:$0xff]  }
  0xca   :  { %1747 = vmatpush1.bf16.msra.mxu1 %v7590_v16  ;;  %1603 = vmatprep.subr.bf16.mxu0 %v7595_v17  ;;  %v7688_v16 = vld [vmem:[#allocation5 + $0x444] ss:$16 sps:$4 sm:$0xff]   ;;  %v9089_v17 = vld [vmem:[#allocation2 + $0x14] ss:$28 sps:$4 sm:$0xff]  }
  0xcb   :  { %1748 = vmatprep.subr.bf16.mxu1 %v7598_v18  ;;  %v7691_v18 = vld [vmem:[#allocation5 + $0x34c] ss:$16 sps:$4 sm:$0xff]  }
  0xcd   :  { %1604 = vmatpush1.bf16.msra.mxu0 %v7593_v19  ;;  %v7686_v19 = vld [vmem:[#allocation5 + $0x440] ss:$16 sps:$4 sm:$0xff]  }
  0xce   :  { %1749 = vmatpush1.bf16.msra.mxu1 %v7596_v20  ;;  %1605 = vmatprep.subr.bf16.mxu0 %v7601_v21  ;;  %v7689_v20 = vld [vmem:[#allocation5 + $0x348] ss:$16 sps:$4 sm:$0xff]   ;;  %v7694_v21 = vld [vmem:[#allocation5 + $0x464] ss:$16 sps:$4 sm:$0xff]  }
  0xcf   :  { %1750 = vmatprep.subr.bf16.mxu1 %v7604_v22  ;;  %v7697_v22 = vld [vmem:[#allocation5 + $0x36c] ss:$16 sps:$4 sm:$0xff]  }
  0xd1   :  { %1606 = vmatpush1.bf16.msra.mxu0 %v7599_v23  ;;  %v7692_v23 = vld [vmem:[#allocation5 + $0x460] ss:$16 sps:$4 sm:$0xff]  }
  0xd2   :  { %1751 = vmatpush1.bf16.msra.mxu1 %v7602_v24  ;;  %1607 = vmatprep.subr.bf16.mxu0 %v7607_v25  ;;  %v7695_v24 = vld [vmem:[#allocation5 + $0x368] ss:$16 sps:$4 sm:$0xff]   ;;  %v7700_v25 = vld [vmem:[#allocation5 + $0x484] ss:$16 sps:$4 sm:$0xff]  }
  0xd3   :  { %1752 = vmatprep.subr.bf16.mxu1 %v7610_v26  ;;  %v7703_v26 = vld [vmem:[#allocation5 + $0x38c] ss:$16 sps:$4 sm:$0xff]  }
  0xd5   :  { %1608 = vmatpush1.bf16.msra.mxu0 %v7605_v27  ;;  %v7698_v27 = vld [vmem:[#allocation5 + $0x480] ss:$16 sps:$4 sm:$0xff]  }
  0xd6   :  { %1753 = vmatpush1.bf16.msra.mxu1 %v7608_v28  ;;  %1609 = vmatprep.subr.bf16.mxu0 %v7613_v29  ;;  %v7701_v28 = vld [vmem:[#allocation5 + $0x388] ss:$16 sps:$4 sm:$0xff]   ;;  %v7706_v29 = vld [vmem:[#allocation5 + $0x4a4] ss:$16 sps:$4 sm:$0xff]  }
  0xd7   :  { %1754 = vmatprep.subr.bf16.mxu1 %v7616_v30  ;;  %v7709_v30 = vld [vmem:[#allocation5 + $0x3ac] ss:$16 sps:$4 sm:$0xff]  }
  0xd9   :  { %1610 = vmatpush1.bf16.msra.mxu0 %v7611_v31  ;;  %v7704_v31 = vld [vmem:[#allocation5 + $0x4a0] ss:$16 sps:$4 sm:$0xff]  }
  0xda   :  { %1755 = vmatpush1.bf16.msra.mxu1 %v7614_v32  ;;  %1611 = vmatprep.subr.bf16.mxu0 %v7619_v33  ;;  %v7707_v32 = vld [vmem:[#allocation5 + $0x3a8] ss:$16 sps:$4 sm:$0xff]   ;;  %v7712_v33 = vld [vmem:[#allocation5 + $0x4c4] ss:$16 sps:$4 sm:$0xff]  }
  0xdb   :  { %1756 = vmatprep.subr.bf16.mxu1 %v7622_v35  ;;  %v7710_v35 = vld [vmem:[#allocation5 + $0x4c0] ss:$16 sps:$4 sm:$0xff]  }
  0xdd   :  { %1612 = vmatpush1.bf16.msra.mxu0 %v7617_v36  ;;  %v7713_v36 = vld [vmem:[#allocation5 + $0x3c8] ss:$16 sps:$4 sm:$0xff]  }
  0xde   :  { %1757 = vmatpush1.bf16.msra.mxu1 %v7620_v37  ;;  %1613 = vmatprep.subr.bf16.mxu0 %v7625_v38  ;;  %v7718_v37 = vld [vmem:[#allocation5 + $0x4e4] ss:$16 sps:$4 sm:$0xff]   ;;  %v7721_v38 = vld [vmem:[#allocation5 + $0x3ec] ss:$16 sps:$4 sm:$0xff]  }
  0xdf   :  { %1769 = vmatprep.subr.bf16.mxu1 %v7628_v39  ;;  %v7716_v39 = vld [vmem:[#allocation5 + $0x4e0] ss:$16 sps:$4 sm:$0xff]  }
  0xe1   :  { %1759 = vmatmul.mubr.bf16.vlgmr.msra.gmra.mrb[4].mxu1 %v9082_v6  ;;  %1614 = vmatpush1.bf16.msra.mxu0 %v7623_v40  ;;  %v7668_v6 = vld [vmem:[#allocation5 + $0x2e8] ss:$16 sps:$4 sm:$0xff]  }
  0xe2   :  { %1770 = vmatpush1.bf16.msra.mxu1 %v7626_v41  ;;  %1615 = vmatprep.subr.bf16.mxu0 %v7631_v42  ;;  %v7719_v40 = vld [vmem:[#allocation5 + $0x3e8] ss:$16 sps:$4 sm:$0xff]   ;;  %v7724_v41 = vld [vmem:[#allocation5 + $0x504] ss:$16 sps:$4 sm:$0xff]   ;;  %v7727_v42 = vld [vmem:[#allocation5 + $0x40c] ss:$16 sps:$4 sm:$0xff]  }
  0xe3   :  { %1771 = vmatprep.subr.bf16.mxu1 %v7634_v43  ;;  %1801 = vmatprep.mubr.bf16.mxu1 %v7673_v34  ;;  %v7715_v34 = vld [vmem:[#allocation5 + $0x3cc] ss:$16 sps:$4 sm:$0xff]   ;;  %v7722_v43 = vld [vmem:[#allocation5 + $0x500] ss:$16 sps:$4 sm:$0xff]  }
  0xe5   :  { %1616 = vmatpush1.bf16.msra.mxu0 %v7629_v44  ;;  %v7725_v44 = vld [vmem:[#allocation5 + $0x408] ss:$16 sps:$4 sm:$0xff]  }
  0xe6   :  { %1772 = vmatpush1.bf16.msra.mxu1 %v7632_v45  ;;  %1617 = vmatprep.subr.bf16.mxu0 %v7637_v46  ;;  %v7730_v45 = vld [vmem:[#allocation5 + $0x524] ss:$16 sps:$4 sm:$0xff]   ;;  %v7733_v46 = vld [vmem:[#allocation5 + $0x42c] ss:$16 sps:$4 sm:$0xff]  }
  0xe7   :  { %1773 = vmatprep.subr.bf16.mxu1 %v7640_v47  ;;  %v7728_v47 = vld [vmem:[#allocation5 + $0x520] ss:$16 sps:$4 sm:$0xff]  }
  0xe9   :  { %1618 = vmatpush1.bf16.msra.mxu0 %v7635_v48  ;;  %v7731_v48 = vld [vmem:[#allocation5 + $0x428] ss:$16 sps:$4 sm:$0xff]  }
  0xea   :  { %1774 = vmatpush1.bf16.msra.mxu1 %v7638_v49  ;;  %1619 = vmatprep.subr.bf16.mxu0 %v7643_v50  ;;  %v7736_v49 = vld [vmem:[#allocation5 + $0x544] ss:$16 sps:$4 sm:$0xff]   ;;  %v7739_v50 = vld [vmem:[#allocation5 + $0x44c] ss:$16 sps:$4 sm:$0xff]  }
  0xeb   :  { %1775 = vmatprep.subr.bf16.mxu1 %v7646_v51  ;;  %v7734_v51 = vld [vmem:[#allocation5 + $0x540] ss:$16 sps:$4 sm:$0xff]  }
  0xed   :  { %1620 = vmatpush1.bf16.msra.mxu0 %v7641_v52  ;;  %v7737_v52 = vld [vmem:[#allocation5 + $0x448] ss:$16 sps:$4 sm:$0xff]  }
  0xee   :  { %1776 = vmatpush1.bf16.msra.mxu1 %v7644_v53  ;;  %1621 = vmatprep.subr.bf16.mxu0 %v7649_v54  ;;  %v7742_v53 = vld [vmem:[#allocation5 + $0x564] ss:$16 sps:$4 sm:$0xff]   ;;  %v7745_v54 = vld [vmem:[#allocation5 + $0x46c] ss:$16 sps:$4 sm:$0xff]  }
  0xef   :  { %1777 = vmatprep.subr.bf16.mxu1 %v7652_v55  ;;  %v7740_v55 = vld [vmem:[#allocation5 + $0x560] ss:$16 sps:$4 sm:$0xff]  }
  0xf1   :  { %1622 = vmatpush1.bf16.msra.mxu0 %v7647_v56  ;;  %v7743_v56 = vld [vmem:[#allocation5 + $0x468] ss:$16 sps:$4 sm:$0xff]  }
  0xf2   :  { %1778 = vmatpush1.bf16.msra.mxu1 %v7650_v57  ;;  %1623 = vmatprep.subr.bf16.mxu0 %v7655_v58  ;;  %v7748_v57 = vld [vmem:[#allocation5 + $0x584] ss:$16 sps:$4 sm:$0xff]   ;;  %v7751_v58 = vld [vmem:[#allocation5 + $0x48c] ss:$16 sps:$4 sm:$0xff]  }
  0xf3   :  { %1779 = vmatprep.subr.bf16.mxu1 %v7658_v59  ;;  %v7746_v59 = vld [vmem:[#allocation5 + $0x580] ss:$16 sps:$4 sm:$0xff]  }
  0xf5   :  { %1624 = vmatpush1.bf16.msra.mxu0 %v7653_v60  ;;  %v7749_v60 = vld [vmem:[#allocation5 + $0x488] ss:$16 sps:$4 sm:$0xff]  }
  0xf6   :  { %1780 = vmatpush1.bf16.msra.mxu1 %v7656_v61  ;;  %1625 = vmatprep.subr.bf16.mxu0 %v7661_v62  ;;  %v7754_v61 = vld [vmem:[#allocation5 + $0x5a4] ss:$16 sps:$4 sm:$0xff]   ;;  %v7757_v62 = vld [vmem:[#allocation5 + $0x4ac] ss:$16 sps:$4 sm:$0xff]  }
  0xf7   :  { %1781 = vmatprep.subr.bf16.mxu1 %v7664_v63  ;;  %v7752_v63 = vld [vmem:[#allocation5 + $0x5a0] ss:$16 sps:$4 sm:$0xff]  }
  0xf9   :  { %1626 = vmatpush1.bf16.msra.mxu0 %v7659_v1  ;;  %v7755_v1 = vld [vmem:[#allocation5 + $0x4a8] ss:$16 sps:$4 sm:$0xff]  }
  0xfa   :  { %1782 = vmatpush1.bf16.msra.mxu1 %v7662_v2  ;;  %1627 = vmatprep.subr.bf16.mxu0 %v7667_v3  ;;  %v7760_v2 = vld [vmem:[#allocation5 + $0x5c4] ss:$16 sps:$4 sm:$0xff]   ;;  %v7763_v3 = vld [vmem:[#allocation5 + $0x4cc] ss:$16 sps:$4 sm:$0xff]  }
  0xfb   :  { %1783 = vmatprep.subr.bf16.mxu1 %v7670_v4  ;;  %v7758_v4 = vld [vmem:[#allocation5 + $0x5c0] ss:$16 sps:$4 sm:$0xff]  }
  0xfd   :  { %1628 = vmatpush1.bf16.msra.mxu0 %v7665_v5  ;;  %v7761_v5 = vld [vmem:[#allocation5 + $0x4c8] ss:$16 sps:$4 sm:$0xff]  }
  0xfe   :  { %1784 = vmatpush1.bf16.msra.mxu1 %v7668_v6  ;;  %1640 = vmatprep.subr.bf16.mxu0 %v7676_v7  ;;  %v7766_v6 = vld [vmem:[#allocation5 + $0x5e4] ss:$16 sps:$4 sm:$0xff]   ;;  %v7769_v7 = vld [vmem:[#allocation5 + $0x4ec] ss:$16 sps:$4 sm:$0xff]  }
  0xff   :  { %1785 = vmatprep.subr.bf16.mxu1 %v7679_v8  ;;  %v7764_v8 = vld [vmem:[#allocation5 + $0x5e0] ss:$16 sps:$4 sm:$0xff]  }
 0x100   :  { %1630 = vmatmul.mubr.bf16.vlgmr.msra.gmra.mrb[0].mxu0 %v9086_v9 }
 0x101   :  { %1641 = vmatpush1.bf16.msra.mxu0 %v7674_v10  ;;  %1672 = vmatprep.mubr.bf16.mxu0 %v9089_v17  ;;  %v7775_v10 = vld [vmem:[#allocation5 + $0x50c] ss:$16 sps:$4 sm:$0xff]  }
 0x102   :  { %1786 = vmatpush1.bf16.msra.mxu1 %v7677_v11  ;;  %1642 = vmatprep.subr.bf16.mxu0 %v7682_v12  ;;  %v9094_v11 = vld [vmem:[#allocation2 + $0x10] ss:$28 sps:$4 sm:$0xff]  }
 0x103   :  { %1787 = vmatprep.subr.bf16.mxu1 %v7685_v13  ;;  %v7823_v12 = vld [vmem:[#allocation7 + $0x4] ss:$16 sps:$4 sm:$0xff]   ;;  %v7773_v13 = vld [vmem:[#allocation5 + $0x508] ss:$16 sps:$4 sm:$0xff]  }
 0x105   :  { %1643 = vmatpush1.bf16.msra.mxu0 %v7680_v14  ;;  %v7821_v14 = vld [vmem:[#allocation7] ss:$16 sps:$4 sm:$0xff]  }
 0x106   :  { %1788 = vmatpush1.bf16.msra.mxu1 %v7683_v15  ;;  %1644 = vmatprep.subr.bf16.mxu0 %v7688_v16  ;;  %v7778_v15 = vld [vmem:[#allocation5 + $0x52c] ss:$16 sps:$4 sm:$0xff]   ;;  %v7829_v16 = vld [vmem:[#allocation7 + $0x24] ss:$16 sps:$4 sm:$0xff]  }
 0x107   :  { %1789 = vmatprep.subr.bf16.mxu1 %v7691_v18  ;;  %v7827_v18 = vld [vmem:[#allocation7 + $0x20] ss:$16 sps:$4 sm:$0xff]  }
 0x109   :  { %1645 = vmatpush1.bf16.msra.mxu0 %v7686_v19  ;;  %v7781_v19 = vld [vmem:[#allocation5 + $0x54c] ss:$16 sps:$4 sm:$0xff]  }
 0x10a   :  { %1790 = vmatpush1.bf16.msra.mxu1 %v7689_v20  ;;  %1646 = vmatprep.subr.bf16.mxu0 %v7694_v21  ;;  %v7835_v20 = vld [vmem:[#allocation7 + $0x44] ss:$16 sps:$4 sm:$0xff]   ;;  %v7779_v21 = vld [vmem:[#allocation5 + $0x548] ss:$16 sps:$4 sm:$0xff]  }
 0x10b   :  { %1791 = vmatprep.subr.bf16.mxu1 %v7697_v22  ;;  %v7833_v22 = vld [vmem:[#allocation7 + $0x40] ss:$16 sps:$4 sm:$0xff]  }
 0x10d   :  { %1647 = vmatpush1.bf16.msra.mxu0 %v7692_v23  ;;  %v7784_v23 = vld [vmem:[#allocation5 + $0x56c] ss:$16 sps:$4 sm:$0xff]  }
 0x10e   :  { %1792 = vmatpush1.bf16.msra.mxu1 %v7695_v24  ;;  %1648 = vmatprep.subr.bf16.mxu0 %v7700_v25  ;;  %v7841_v24 = vld [vmem:[#allocation7 + $0x64] ss:$16 sps:$4 sm:$0xff]   ;;  %v7782_v25 = vld [vmem:[#allocation5 + $0x568] ss:$16 sps:$4 sm:$0xff]  }
 0x10f   :  { %1793 = vmatprep.subr.bf16.mxu1 %v7703_v26  ;;  %v7839_v26 = vld [vmem:[#allocation7 + $0x60] ss:$16 sps:$4 sm:$0xff]  }
 0x111   :  { %1649 = vmatpush1.bf16.msra.mxu0 %v7698_v27  ;;  %v7787_v27 = vld [vmem:[#allocation5 + $0x58c] ss:$16 sps:$4 sm:$0xff]  }
 0x112   :  { %1794 = vmatpush1.bf16.msra.mxu1 %v7701_v28  ;;  %1650 = vmatprep.subr.bf16.mxu0 %v7706_v29  ;;  %v7847_v28 = vld [vmem:[#allocation7 + $0x84] ss:$16 sps:$4 sm:$0xff]   ;;  %v7785_v29 = vld [vmem:[#allocation5 + $0x588] ss:$16 sps:$4 sm:$0xff]  }
 0x113   :  { %1795 = vmatprep.subr.bf16.mxu1 %v7709_v30  ;;  %v7845_v30 = vld [vmem:[#allocation7 + $0x80] ss:$16 sps:$4 sm:$0xff]  }
 0x115   :  { %1651 = vmatpush1.bf16.msra.mxu0 %v7704_v31  ;;  %v7790_v31 = vld [vmem:[#allocation5 + $0x5ac] ss:$16 sps:$4 sm:$0xff]  }
 0x116   :  { %1796 = vmatpush1.bf16.msra.mxu1 %v7707_v32  ;;  %1652 = vmatprep.subr.bf16.mxu0 %v7712_v33  ;;  %v7853_v32 = vld [vmem:[#allocation7 + $0xa4] ss:$16 sps:$4 sm:$0xff]   ;;  %v7788_v33 = vld [vmem:[#allocation5 + $0x5a8] ss:$16 sps:$4 sm:$0xff]  }
 0x117   :  { %1797 = vmatprep.subr.bf16.mxu1 %v7715_v34  ;;  %v7851_v34 = vld [vmem:[#allocation7 + $0xa0] ss:$16 sps:$4 sm:$0xff]  }
 0x119   :  { %1653 = vmatpush1.bf16.msra.mxu0 %v7710_v35  ;;  %v7793_v35 = vld [vmem:[#allocation5 + $0x5cc] ss:$16 sps:$4 sm:$0xff]  }
 0x11a   :  { %1798 = vmatpush1.bf16.msra.mxu1 %v7713_v36  ;;  %1654 = vmatprep.subr.bf16.mxu0 %v7718_v37  ;;  %v7859_v36 = vld [vmem:[#allocation7 + $0xc4] ss:$16 sps:$4 sm:$0xff]   ;;  %v7791_v37 = vld [vmem:[#allocation5 + $0x5c8] ss:$16 sps:$4 sm:$0xff]  }
 0x11b   :  { %1799 = vmatprep.subr.bf16.mxu1 %v7721_v38  ;;  %v7857_v38 = vld [vmem:[#allocation7 + $0xc0] ss:$16 sps:$4 sm:$0xff]  }
 0x11d   :  { %1655 = vmatpush1.bf16.msra.mxu0 %v7716_v39  ;;  %v7796_v39 = vld [vmem:[#allocation5 + $0x5ec] ss:$16 sps:$4 sm:$0xff]  }
 0x11e   :  { %1800 = vmatpush1.bf16.msra.mxu1 %v7719_v40  ;;  %1656 = vmatprep.subr.bf16.mxu0 %v7724_v41  ;;  %v7865_v40 = vld [vmem:[#allocation7 + $0xe4] ss:$16 sps:$4 sm:$0xff]   ;;  %v7794_v41 = vld [vmem:[#allocation5 + $0x5e8] ss:$16 sps:$4 sm:$0xff]  }
 0x11f   :  { %1812 = vmatprep.subr.bf16.mxu1 %v7727_v42  ;;  %v7863_v42 = vld [vmem:[#allocation7 + $0xe0] ss:$16 sps:$4 sm:$0xff]  }
 0x121   :  { %1802 = vmatmul.mubr.bf16.vlgmr.msra.gmra.mrb[4].mxu1 %v9086_v9  ;;  %1657 = vmatpush1.bf16.msra.mxu0 %v7722_v43  ;;  %v7767_v9 = vld [vmem:[#allocation5 + $0x4e8] ss:$16 sps:$4 sm:$0xff]   ;;  %v7799_v43 = vld [vmem:[#allocation5 + $0x60c] ss:$16 sps:$4 sm:$0xff]  }
 0x122   :  { %1813 = vmatpush1.bf16.msra.mxu1 %v7725_v44  ;;  %1658 = vmatprep.subr.bf16.mxu0 %v7730_v45  ;;  %v7871_v44 = vld [vmem:[#allocation7 + $0x104] ss:$16 sps:$4 sm:$0xff]   ;;  %v7797_v45 = vld [vmem:[#allocation5 + $0x608] ss:$16 sps:$4 sm:$0xff]  }
 0x123   :  { %1814 = vmatprep.subr.bf16.mxu1 %v7733_v46  ;;  %1844 = vmatprep.mubr.bf16.mxu1 %v9089_v17  ;;  %v7776_v17 = vld [vmem:[#allocation5 + $0x528] ss:$16 sps:$4 sm:$0xff]   ;;  %v7802_v46 = vld [vmem:[#allocation5 + $0x62c] ss:$16 sps:$4 sm:$0xff]  }
 0x125   :  { %1659 = vmatpush1.bf16.msra.mxu0 %v7728_v47  ;;  %v7869_v47 = vld [vmem:[#allocation7 + $0x100] ss:$16 sps:$4 sm:$0xff]  }
 0x126   :  { %1815 = vmatpush1.bf16.msra.mxu1 %v7731_v48  ;;  %1660 = vmatprep.subr.bf16.mxu0 %v7736_v49  ;;  %v7877_v48 = vld [vmem:[#allocation7 + $0x124] ss:$16 sps:$4 sm:$0xff]   ;;  %v7800_v49 = vld [vmem:[#allocation5 + $0x628] ss:$16 sps:$4 sm:$0xff]  }
 0x127   :  { %1816 = vmatprep.subr.bf16.mxu1 %v7739_v50  ;;  %v7805_v50 = vld [vmem:[#allocation5 + $0x64c] ss:$16 sps:$4 sm:$0xff]  }
 0x129   :  { %1661 = vmatpush1.bf16.msra.mxu0 %v7734_v51  ;;  %v7875_v51 = vld [vmem:[#allocation7 + $0x120] ss:$16 sps:$4 sm:$0xff]  }
 0x12a   :  { %1817 = vmatpush1.bf16.msra.mxu1 %v7737_v52  ;;  %1662 = vmatprep.subr.bf16.mxu0 %v7742_v53  ;;  %v7883_v52 = vld [vmem:[#allocation7 + $0x144] ss:$16 sps:$4 sm:$0xff]   ;;  %v7803_v53 = vld [vmem:[#allocation5 + $0x648] ss:$16 sps:$4 sm:$0xff]  }
 0x12b   :  { %1818 = vmatprep.subr.bf16.mxu1 %v7745_v54  ;;  %v7808_v54 = vld [vmem:[#allocation5 + $0x66c] ss:$16 sps:$4 sm:$0xff]  }
 0x12d   :  { %1663 = vmatpush1.bf16.msra.mxu0 %v7740_v55  ;;  %v7881_v55 = vld [vmem:[#allocation7 + $0x140] ss:$16 sps:$4 sm:$0xff]  }
 0x12e   :  { %1819 = vmatpush1.bf16.msra.mxu1 %v7743_v56  ;;  %1664 = vmatprep.subr.bf16.mxu0 %v7748_v57  ;;  %v7889_v56 = vld [vmem:[#allocation7 + $0x164] ss:$16 sps:$4 sm:$0xff]   ;;  %v7806_v57 = vld [vmem:[#allocation5 + $0x668] ss:$16 sps:$4 sm:$0xff]  }
 0x12f   :  { %1820 = vmatprep.subr.bf16.mxu1 %v7751_v58  ;;  %v7811_v58 = vld [vmem:[#allocation5 + $0x68c] ss:$16 sps:$4 sm:$0xff]  }
 0x131   :  { %1665 = vmatpush1.bf16.msra.mxu0 %v7746_v59  ;;  %v7887_v59 = vld [vmem:[#allocation7 + $0x160] ss:$16 sps:$4 sm:$0xff]  }
 0x132   :  { %1821 = vmatpush1.bf16.msra.mxu1 %v7749_v60  ;;  %1666 = vmatprep.subr.bf16.mxu0 %v7754_v61  ;;  %v7895_v60 = vld [vmem:[#allocation7 + $0x184] ss:$16 sps:$4 sm:$0xff]   ;;  %v7809_v61 = vld [vmem:[#allocation5 + $0x688] ss:$16 sps:$4 sm:$0xff]  }
 0x133   :  { %1822 = vmatprep.subr.bf16.mxu1 %v7757_v62  ;;  %v7814_v62 = vld [vmem:[#allocation5 + $0x6ac] ss:$16 sps:$4 sm:$0xff]  }
 0x135   :  { %1667 = vmatpush1.bf16.msra.mxu0 %v7752_v63  ;;  %v7893_v63 = vld [vmem:[#allocation7 + $0x180] ss:$16 sps:$4 sm:$0xff]  }
 0x136   :  { %1823 = vmatpush1.bf16.msra.mxu1 %v7755_v1  ;;  %1668 = vmatprep.subr.bf16.mxu0 %v7760_v2  ;;  %v7812_v1 = vld [vmem:[#allocation5 + $0x6a8] ss:$16 sps:$4 sm:$0xff]   ;;  %v7817_v2 = vld [vmem:[#allocation5 + $0x6cc] ss:$16 sps:$4 sm:$0xff]  }
 0x137   :  { %1824 = vmatprep.subr.bf16.mxu1 %v7763_v3 }
 0x139   :  { %1669 = vmatpush1.bf16.msra.mxu0 %v7758_v4  ;;  %v7815_v4 = vld [vmem:[#allocation5 + $0x6c8] ss:$16 sps:$4 sm:$0xff]  }
 0x13a   :  { %1825 = vmatpush1.bf16.msra.mxu1 %v7761_v5  ;;  %1670 = vmatprep.subr.bf16.mxu0 %v7766_v6  ;;  %v7820_v6 = vld [vmem:[#allocation5 + $0x6ec] ss:$16 sps:$4 sm:$0xff]  }
 0x13b   :  { %1826 = vmatprep.subr.bf16.mxu1 %v7769_v7 }
 0x13d   :  { %1671 = vmatpush1.bf16.msra.mxu0 %v7764_v8 }
 0x13e   :  { %1827 = vmatpush1.bf16.msra.mxu1 %v7767_v9  ;;  %2700 = vmatprep.subr.bf16.mxu0 %v7823_v12  ;;  %v7818_v9 = vld [vmem:[#allocation5 + $0x6e8] ss:$16 sps:$4 sm:$0xff]   ;;  %v7832_v12 = vld [vmem:[#allocation7 + $0x2c] ss:$16 sps:$4 sm:$0xff]  }
 0x13f   :  { %1828 = vmatprep.subr.bf16.mxu1 %v7775_v10  ;;  %v7826_v10 = vld [vmem:[#allocation7 + $0xc] ss:$16 sps:$4 sm:$0xff]  }
 0x140   :  { %1673 = vmatmul.mubr.bf16.vlgmr.msra.gmra.mrb[0].mxu0 %v9094_v11 }
 0x141   :  { %2701 = vmatpush1.bf16.msra.mxu0 %v7821_v14  ;;  %v8661_v14 = vld [vmem:[#allocation2 + $0x18] ss:$28 sps:$4 sm:$0xff]  }
 0x142   :  { %1829 = vmatpush1.bf16.msra.mxu1 %v7773_v13  ;;  %2702 = vmatprep.subr.bf16.mxu0 %v7829_v16  ;;  %v7830_v13 = vld [vmem:[#allocation7 + $0x28] ss:$16 sps:$4 sm:$0xff]  }
 0x143   :  { %1830 = vmatprep.subr.bf16.mxu1 %v7778_v15  ;;  %v7838_v15 = vld [vmem:[#allocation7 + $0x4c] ss:$16 sps:$4 sm:$0xff]   ;;  %v7836_v16 = vld [vmem:[#allocation7 + $0x48] ss:$16 sps:$4 sm:$0xff]  }
 0x145   :  { %2703 = vmatpush1.bf16.msra.mxu0 %v7827_v18  ;;  %v7842_v18 = vld [vmem:[#allocation7 + $0x68] ss:$16 sps:$4 sm:$0xff]  }
 0x146   :  { %1831 = vmatpush1.bf16.msra.mxu1 %v7776_v17  ;;  %2704 = vmatprep.subr.bf16.mxu0 %v7835_v20  ;;  %v7844_v17 = vld [vmem:[#allocation7 + $0x6c] ss:$16 sps:$4 sm:$0xff]   ;;  %v7848_v20 = vld [vmem:[#allocation7 + $0x88] ss:$16 sps:$4 sm:$0xff]  }
 0x147   :  { %1832 = vmatprep.subr.bf16.mxu1 %v7781_v19  ;;  %v7850_v19 = vld [vmem:[#allocation7 + $0x8c] ss:$16 sps:$4 sm:$0xff]  }
 0x149   :  { %2705 = vmatpush1.bf16.msra.mxu0 %v7833_v22  ;;  %v7854_v22 = vld [vmem:[#allocation7 + $0xa8] ss:$16 sps:$4 sm:$0xff]  }
 0x14a   :  { %1833 = vmatpush1.bf16.msra.mxu1 %v7779_v21  ;;  %2706 = vmatprep.subr.bf16.mxu0 %v7841_v24  ;;  %v7856_v21 = vld [vmem:[#allocation7 + $0xac] ss:$16 sps:$4 sm:$0xff]  }
 0x14b   :  { %1834 = vmatprep.subr.bf16.mxu1 %v7784_v23  ;;  %v7901_v23 = vld [vmem:[#allocation7 + $0x1a4] ss:$16 sps:$4 sm:$0xff]   ;;  %v7862_v24 = vld [vmem:[#allocation7 + $0xcc] ss:$16 sps:$4 sm:$0xff]  }
 0x14d   :  { %2707 = vmatpush1.bf16.msra.mxu0 %v7839_v26  ;;  %v7860_v26 = vld [vmem:[#allocation7 + $0xc8] ss:$16 sps:$4 sm:$0xff]  }
 0x14e   :  { %1835 = vmatpush1.bf16.msra.mxu1 %v7782_v25  ;;  %2708 = vmatprep.subr.bf16.mxu0 %v7847_v28  ;;  %v7899_v25 = vld [vmem:[#allocation7 + $0x1a0] ss:$16 sps:$4 sm:$0xff]   ;;  %v7868_v28 = vld [vmem:[#allocation7 + $0xec] ss:$16 sps:$4 sm:$0xff]  }
 0x14f   :  { %1836 = vmatprep.subr.bf16.mxu1 %v7787_v27  ;;  %v7907_v27 = vld [vmem:[#allocation7 + $0x1c4] ss:$16 sps:$4 sm:$0xff]  }
 0x151   :  { %2709 = vmatpush1.bf16.msra.mxu0 %v7845_v30  ;;  %v7866_v30 = vld [vmem:[#allocation7 + $0xe8] ss:$16 sps:$4 sm:$0xff]  }
 0x152   :  { %1837 = vmatpush1.bf16.msra.mxu1 %v7785_v29  ;;  %2710 = vmatprep.subr.bf16.mxu0 %v7853_v32  ;;  %v7905_v29 = vld [vmem:[#allocation7 + $0x1c0] ss:$16 sps:$4 sm:$0xff]   ;;  %v7874_v32 = vld [vmem:[#allocation7 + $0x10c] ss:$16 sps:$4 sm:$0xff]  }
 0x153   :  { %1838 = vmatprep.subr.bf16.mxu1 %v7790_v31  ;;  %v7913_v31 = vld [vmem:[#allocation7 + $0x1e4] ss:$16 sps:$4 sm:$0xff]  }
 0x155   :  { %2711 = vmatpush1.bf16.msra.mxu0 %v7851_v34  ;;  %v7872_v34 = vld [vmem:[#allocation7 + $0x108] ss:$16 sps:$4 sm:$0xff]  }
 0x156   :  { %1839 = vmatpush1.bf16.msra.mxu1 %v7788_v33  ;;  %2712 = vmatprep.subr.bf16.mxu0 %v7859_v36  ;;  %v7911_v33 = vld [vmem:[#allocation7 + $0x1e0] ss:$16 sps:$4 sm:$0xff]   ;;  %v7880_v36 = vld [vmem:[#allocation7 + $0x12c] ss:$16 sps:$4 sm:$0xff]  }
 0x157   :  { %1840 = vmatprep.subr.bf16.mxu1 %v7793_v35  ;;  %v7919_v35 = vld [vmem:[#allocation7 + $0x204] ss:$16 sps:$4 sm:$0xff]  }
 0x159   :  { %2713 = vmatpush1.bf16.msra.mxu0 %v7857_v38  ;;  %v7886_v38 = vld [vmem:[#allocation7 + $0x14c] ss:$16 sps:$4 sm:$0xff]  }
 0x15a   :  { %1841 = vmatpush1.bf16.msra.mxu1 %v7791_v37  ;;  %2714 = vmatprep.subr.bf16.mxu0 %v7865_v40  ;;  %v7878_v37 = vld [vmem:[#allocation7 + $0x128] ss:$16 sps:$4 sm:$0xff]   ;;  %v7892_v40 = vld [vmem:[#allocation7 + $0x16c] ss:$16 sps:$4 sm:$0xff]  }
 0x15b   :  { %1842 = vmatprep.subr.bf16.mxu1 %v7796_v39  ;;  %v7884_v39 = vld [vmem:[#allocation7 + $0x148] ss:$16 sps:$4 sm:$0xff]  }
 0x15d   :  { %2715 = vmatpush1.bf16.msra.mxu0 %v7863_v42  ;;  %v7898_v42 = vld [vmem:[#allocation7 + $0x18c] ss:$16 sps:$4 sm:$0xff]  }
 0x15e   :  { %1843 = vmatpush1.bf16.msra.mxu1 %v7794_v41  ;;  %2716 = vmatprep.subr.bf16.mxu0 %v7871_v44  ;;  %v7890_v41 = vld [vmem:[#allocation7 + $0x168] ss:$16 sps:$4 sm:$0xff]   ;;  %v7904_v44 = vld [vmem:[#allocation7 + $0x1ac] ss:$16 sps:$4 sm:$0xff]  }
 0x15f   :  { %1855 = vmatprep.subr.bf16.mxu1 %v7799_v43  ;;  %v7896_v43 = vld [vmem:[#allocation7 + $0x188] ss:$16 sps:$4 sm:$0xff]  }
 0x161   :  { %1845 = vmatmul.mubr.bf16.vlgmr.msra.gmra.mrb[4].mxu1 %v9094_v11  ;;  %2717 = vmatpush1.bf16.msra.mxu0 %v7869_v47  ;;  %v7824_v11 = vld [vmem:[#allocation7 + $0x8] ss:$16 sps:$4 sm:$0xff]  }
 0x162   :  { %1856 = vmatpush1.bf16.msra.mxu1 %v7797_v45  ;;  %1887 = vmatprep.mubr.bf16.mxu1 %v8885_v0  ;;  %v7902_v45 = vld [vmem:[#allocation7 + $0x1a8] ss:$16 sps:$4 sm:$0xff]  }
 0x163   :  { %1857 = vmatprep.subr.bf16.mxu1 %v7802_v46  ;;  %2718 = vmatprep.subr.bf16.mxu0 %v7877_v48  ;;  %v7910_v46 = vld [vmem:[#allocation7 + $0x1cc] ss:$16 sps:$4 sm:$0xff]   ;;  %v7908_v47 = vld [vmem:[#allocation7 + $0x1c8] ss:$16 sps:$4 sm:$0xff]  }
 0x164   :  { %v7916_v48 = vld [vmem:[#allocation7 + $0x1ec] ss:$16 sps:$4 sm:$0xff]  }
 0x165   :  { %2719 = vmatpush1.bf16.msra.mxu0 %v7875_v51  ;;  %v378_v51 = vlaneseq }
 0x166   :  { %1858 = vmatpush1.bf16.msra.mxu1 %v7800_v49  ;;  %2720 = vmatprep.subr.bf16.mxu0 %v7883_v52  ;;  %v7914_v49 = vld [vmem:[#allocation7 + $0x1e8] ss:$16 sps:$4 sm:$0xff]  }
 0x167   :  { %1859 = vmatprep.subr.bf16.mxu1 %v7805_v50  ;;  %v7922_v50 = vld [vmem:[#allocation7 + $0x20c] ss:$16 sps:$4 sm:$0xff]   ;;  %v9107_v52 = vshrl.u32 %v378_v51, 7  ;;  %v7979_v51 = vld [vmem:[#allocation7 + $0x344] ss:$16 sps:$4 sm:$0xff]  }
 0x169   :  { %2721 = vmatpush1.bf16.msra.mxu0 %v7881_v55  ;;  %v9118_v55 = vsub.s32 1, %v9107_v52 }
 0x16a   :  { %1860 = vmatpush1.bf16.msra.mxu1 %v7803_v53  ;;  %2722 = vmatprep.subr.bf16.mxu0 %v7889_v56  ;;  %v9112_v53 = vld [vmem:[%s9240_s2] sm:$0xf] }
 0x16b   :  { %1861 = vmatprep.subr.bf16.mxu1 %v7808_v54  ;;  %v9115_v54 = vsub.s32 0, %v9107_v52 }
 0x16d   :  { %2723 = vmatpush1.bf16.msra.mxu0 %v7887_v59  ;;  %v381_v56 = vrot.slane %v9112_v53, %v9115_v54 }
 0x16e   :  { %1862 = vmatpush1.bf16.msra.mxu1 %v7806_v57  ;;  %2724 = vmatprep.subr.bf16.mxu0 %v7895_v60  ;;  %v385_v57 = vrot.slane %v9112_v53, %v9118_v55 }
 0x16f   :  { %1863 = vmatprep.subr.bf16.mxu1 %v7811_v58 }
 0x171   :  { %2725 = vmatpush1.bf16.msra.mxu0 %v7893_v63 }
 0x172   :  { %1864 = vmatpush1.bf16.msra.mxu1 %v7809_v61  ;;  %2726 = vmatprep.subr.bf16.mxu0 %v7901_v23  ;;  %v7937_v23 = vld [vmem:[#allocation7 + $0x264] ss:$16 sps:$4 sm:$0xff]  }
 0x173   :  { %1865 = vmatprep.subr.bf16.mxu1 %v7814_v62 }
 0x174   :  { %v9099_v3 = vpop.f32.mrb[0].mxu1 }
 0x175   :  { %v9101_v5 = vpop.f32.mrb[1].mxu1  ;;  %2727 = vmatpush1.bf16.msra.mxu0 %v7899_v25  ;;  %v7935_v25 = vld [vmem:[#allocation7 + $0x260] ss:$16 sps:$4 sm:$0xff]  }
 0x176   :  { %v9103_v7 = vpop.f32.mrb[2].mxu1  ;;  %1866 = vmatpush1.bf16.msra.mxu1 %v7812_v1  ;;  %2728 = vmatprep.subr.bf16.mxu0 %v7907_v27  ;;  %v7943_v27 = vld [vmem:[#allocation7 + $0x284] ss:$16 sps:$4 sm:$0xff]  }
 0x177   :  { %v9105_v8 = vpop.f32.mrb[3].mxu1  ;;  %1867 = vmatprep.subr.bf16.mxu1 %v7817_v2 }
 0x179   :  { %2729 = vmatpush1.bf16.msra.mxu0 %v7905_v29  ;;  %v7941_v29 = vld [vmem:[#allocation7 + $0x280] ss:$16 sps:$4 sm:$0xff]  }
 0x17a   :  { %1868 = vmatpush1.bf16.msra.mxu1 %v7815_v4  ;;  %2730 = vmatprep.subr.bf16.mxu0 %v7913_v31  ;;  %v7949_v31 = vld [vmem:[#allocation7 + $0x2a4] ss:$16 sps:$4 sm:$0xff]  }
 0x17b   :  { %1869 = vmatprep.subr.bf16.mxu1 %v7820_v6 }
 0x17d   :  { %2731 = vmatpush1.bf16.msra.mxu0 %v7911_v33  ;;  %v7947_v33 = vld [vmem:[#allocation7 + $0x2a0] ss:$16 sps:$4 sm:$0xff]  }
 0x17e   :  { %1870 = vmatpush1.bf16.msra.mxu1 %v7818_v9  ;;  %2743 = vmatprep.subr.bf16.mxu0 %v7919_v35  ;;  %v7955_v35 = vld [vmem:[#allocation7 + $0x2c4] ss:$16 sps:$4 sm:$0xff]  }
 0x17f   :  { %2786 = vmatprep.subr.bf16.mxu1 %v7826_v10 }
 0x181   :  { %1888 = vmatmul.mubr.bf16.vlgmr.msra.gmra.mrb[4].mxu1 %v8661_v14 }
 0x182   :  { %2787 = vmatpush1.bf16.msra.mxu1 %v7824_v11 }
 0x183   :  { %2788 = vmatprep.subr.bf16.mxu1 %v7832_v12 }
 0x186   :  { %2789 = vmatpush1.bf16.msra.mxu1 %v7830_v13 }
 0x187   :  { %2790 = vmatprep.subr.bf16.mxu1 %v7838_v15 }
 0x18a   :  { %2791 = vmatpush1.bf16.msra.mxu1 %v7836_v16 }
 0x18b   :  { %2792 = vmatprep.subr.bf16.mxu1 %v7844_v17  ;;  %v7917_v17 = vld [vmem:[#allocation7 + $0x200] ss:$16 sps:$4 sm:$0xff]  }
 0x18e   :  { %2793 = vmatpush1.bf16.msra.mxu1 %v7842_v18  ;;  %v7920_v18 = vld [vmem:[#allocation7 + $0x208] ss:$16 sps:$4 sm:$0xff]  }
 0x18f   :  { %2794 = vmatprep.subr.bf16.mxu1 %v7850_v19  ;;  %v7925_v19 = vld [vmem:[#allocation7 + $0x224] ss:$16 sps:$4 sm:$0xff]  }
 0x192   :  { %2795 = vmatpush1.bf16.msra.mxu1 %v7848_v20  ;;  %v7928_v20 = vld [vmem:[#allocation7 + $0x22c] ss:$16 sps:$4 sm:$0xff]  }
 0x193   :  { %2796 = vmatprep.subr.bf16.mxu1 %v7856_v21  ;;  %v7929_v21 = vld [vmem:[#allocation7 + $0x240] ss:$16 sps:$4 sm:$0xff]  }
 0x196   :  { %2797 = vmatpush1.bf16.msra.mxu1 %v7854_v22  ;;  %v7932_v22 = vld [vmem:[#allocation7 + $0x248] ss:$16 sps:$4 sm:$0xff]  }
 0x197   :  { %2798 = vmatprep.subr.bf16.mxu1 %v7862_v24  ;;  %v7940_v24 = vld [vmem:[#allocation7 + $0x26c] ss:$16 sps:$4 sm:$0xff]  }
 0x19a   :  { %2799 = vmatpush1.bf16.msra.mxu1 %v7860_v26  ;;  %v7938_v26 = vld [vmem:[#allocation7 + $0x268] ss:$16 sps:$4 sm:$0xff]  }
 0x19b   :  { %2800 = vmatprep.subr.bf16.mxu1 %v7868_v28  ;;  %v7946_v28 = vld [vmem:[#allocation7 + $0x28c] ss:$16 sps:$4 sm:$0xff]  }
 0x19e   :  { %2801 = vmatpush1.bf16.msra.mxu1 %v7866_v30  ;;  %v7944_v30 = vld [vmem:[#allocation7 + $0x288] ss:$16 sps:$4 sm:$0xff]  }
 0x19f   :  { %2802 = vmatprep.subr.bf16.mxu1 %v7874_v32  ;;  %v7952_v32 = vld [vmem:[#allocation7 + $0x2ac] ss:$16 sps:$4 sm:$0xff]  }
 0x1a2   :  { %2803 = vmatpush1.bf16.msra.mxu1 %v7872_v34  ;;  %v7950_v34 = vld [vmem:[#allocation7 + $0x2a8] ss:$16 sps:$4 sm:$0xff]  }
 0x1a3   :  { %2804 = vmatprep.subr.bf16.mxu1 %v7880_v36  ;;  %v7958_v36 = vld [vmem:[#allocation7 + $0x2cc] ss:$16 sps:$4 sm:$0xff]  }
 0x1a6   :  { %2805 = vmatpush1.bf16.msra.mxu1 %v7878_v37  ;;  %v7953_v37 = vld [vmem:[#allocation7 + $0x2c0] ss:$16 sps:$4 sm:$0xff]  }
 0x1a7   :  { %2806 = vmatprep.subr.bf16.mxu1 %v7886_v38  ;;  %v7956_v38 = vld [vmem:[#allocation7 + $0x2c8] ss:$16 sps:$4 sm:$0xff]  }
 0x1aa   :  { %2807 = vmatpush1.bf16.msra.mxu1 %v7884_v39  ;;  %v7961_v39 = vld [vmem:[#allocation7 + $0x2e4] ss:$16 sps:$4 sm:$0xff]  }
 0x1ab   :  { %2808 = vmatprep.subr.bf16.mxu1 %v7892_v40  ;;  %v7964_v40 = vld [vmem:[#allocation7 + $0x2ec] ss:$16 sps:$4 sm:$0xff]  }
 0x1ae   :  { %2809 = vmatpush1.bf16.msra.mxu1 %v7890_v41  ;;  %v7959_v41 = vld [vmem:[#allocation7 + $0x2e0] ss:$16 sps:$4 sm:$0xff]  }
 0x1af   :  { %2810 = vmatprep.subr.bf16.mxu1 %v7898_v42  ;;  %v7962_v42 = vld [vmem:[#allocation7 + $0x2e8] ss:$16 sps:$4 sm:$0xff]  }
 0x1b2   :  { %2811 = vmatpush1.bf16.msra.mxu1 %v7896_v43  ;;  %v7967_v43 = vld [vmem:[#allocation7 + $0x304] ss:$16 sps:$4 sm:$0xff]  }
 0x1b3   :  { %2812 = vmatprep.subr.bf16.mxu1 %v7904_v44  ;;  %v7970_v44 = vld [vmem:[#allocation7 + $0x30c] ss:$16 sps:$4 sm:$0xff]  }
 0x1b6   :  { %2813 = vmatpush1.bf16.msra.mxu1 %v7902_v45  ;;  %v7965_v45 = vld [vmem:[#allocation7 + $0x300] ss:$16 sps:$4 sm:$0xff]  }
 0x1b7   :  { %2814 = vmatprep.subr.bf16.mxu1 %v7910_v46  ;;  %v7968_v46 = vld [vmem:[#allocation7 + $0x308] ss:$16 sps:$4 sm:$0xff]  }
 0x1ba   :  { %2815 = vmatpush1.bf16.msra.mxu1 %v7908_v47  ;;  %v7973_v47 = vld [vmem:[#allocation7 + $0x324] ss:$16 sps:$4 sm:$0xff]  }
 0x1bb   :  { %2816 = vmatprep.subr.bf16.mxu1 %v7916_v48  ;;  %v7976_v48 = vld [vmem:[#allocation7 + $0x32c] ss:$16 sps:$4 sm:$0xff]  }
 0x1be   :  { %2817 = vmatpush1.bf16.msra.mxu1 %v7914_v49  ;;  %v7971_v49 = vld [vmem:[#allocation7 + $0x320] ss:$16 sps:$4 sm:$0xff]  }
 0x1bf   :  { %2829 = vmatprep.subr.bf16.mxu1 %v7922_v50  ;;  %v7974_v50 = vld [vmem:[#allocation7 + $0x328] ss:$16 sps:$4 sm:$0xff]  }
 0x213   :  { %v1674_v58 = vpop.f32.mrb[0].mxu0 }
 0x214   :  { %v7369_v59 = vadd.f32 %v1674_v58, %v381_v56  ;;  %v1676_v60 = vpop.f32.mrb[1].mxu0  ;;  %v7980_v58 = vld [vmem:[#allocation7 + $0x348] ss:$16 sps:$4 sm:$0xff]  }
 0x215   :  { %v7371_v61 = vadd.f32 %v1676_v60, %v385_v57  ;;  %v1678_v62 = vpop.f32.mrb[2].mxu0  ;;  %v7988_v60 = vld [vmem:[#allocation7 + $0x36c] ss:$16 sps:$4 sm:$0xff]  }
 0x216   :  { %v7370_v63 = vadd.f32 %v7369_v59, %v9099_v3  ;;  %v7373_v1 = vadd.f32 %v1678_v62, %v381_v56  ;;  %v1680_v2 = vpop.f32.mrb[3].mxu0  ;;  %v7923_v3 = vld [vmem:[#allocation7 + $0x220] ss:$16 sps:$4 sm:$0xff]   ;;  %v7982_v56 = vld [vmem:[#allocation7 + $0x34c] ss:$16 sps:$4 sm:$0xff]  }
 0x217   :  { %v7372_v4 = vadd.f32 %v7371_v61, %v9101_v5  ;;  %v7375_v6 = vadd.f32 %v1680_v2, %v385_v57  ;;  %v7926_v5 = vld [vmem:[#allocation7 + $0x228] ss:$16 sps:$4 sm:$0xff]   ;;  %v7977_v57 = vld [vmem:[#allocation7 + $0x340] ss:$16 sps:$4 sm:$0xff]   ;;  %v7985_v59 = vld [vmem:[#allocation7 + $0x364] ss:$16 sps:$4 sm:$0xff]  }
 0x218   :  { %v7374_v9 = vadd.f32 %v7373_v1, %v9103_v7  ;;  %v1898_v11 = vmax.f32 %v7370_v63, 0.0  ;;  %v7931_v7 = vld [vmem:[#allocation7 + $0x244] ss:$16 sps:$4 sm:$0xff]   ;;  %v7983_v61 = vld [vmem:[#allocation7 + $0x360] ss:$16 sps:$4 sm:$0xff]   ;;  %v9129_v2 = vsub.s32 2, %v9107_v52 }
 0x219   :  { %v7376_v10 = vadd.f32 %v7375_v6, %v9105_v8  ;;  %v1899_v13 = vmax.f32 %v7372_v4, 0.0  ;;  %v7934_v8 = vld [vmem:[#allocation7 + $0x24c] ss:$16 sps:$4 sm:$0xff]   ;;  %v7986_v62 = vld [vmem:[#allocation7 + $0x368] ss:$16 sps:$4 sm:$0xff]  }
 0x21a   :  { %v1902_v12 = vmax.f32 %v7374_v9, 0.0  ;;  %v7991_v63 = vld [vmem:[#allocation7 + $0x384] ss:$16 sps:$4 sm:$0xff]   ;;  %v7994_v1 = vld [vmem:[#allocation7 + $0x38c] ss:$16 sps:$4 sm:$0xff]   ;;  %v9132_v9 = vsub.s32 3, %v9107_v52 }
 0x21b   :  { %v1903_v14 = vmax.f32 %v7376_v10, 0.0  ;;  %v7989_v4 = vld [vmem:[#allocation7 + $0x380] ss:$16 sps:$4 sm:$0xff]   ;;  %v7992_v6 = vld [vmem:[#allocation7 + $0x388] ss:$16 sps:$4 sm:$0xff]  }
 0x21c   :  { %v1906_v15 = vpack.c.bf16 %v1902_v12, %v1898_v11  ;;  %v7997_v10 = vld [vmem:[#allocation7 + $0x3a4] ss:$16 sps:$4 sm:$0xff]   ;;  %v8000_v11 = vld [vmem:[#allocation7 + $0x3ac] ss:$16 sps:$4 sm:$0xff]   ;;  %v389_v12 = vrot.slane %v9112_v53, %v9129_v2 }
 0x21d   :  { %v1907_v16 = vpack.c.bf16 %v1903_v14, %v1899_v13  ;;  %v7995_v13 = vld [vmem:[#allocation7 + $0x3a0] ss:$16 sps:$4 sm:$0xff]   ;;  %v7998_v14 = vld [vmem:[#allocation7 + $0x3a8] ss:$16 sps:$4 sm:$0xff]  }
 0x21f   :  { %2732 = vmatprep.mubr.bf16.mxu0 %v1907_v16  ;;  %2818 = vmatprep.mubr.bf16.mxu1 %v1907_v16  ;;  %v8003_v16 = vld [vmem:[#allocation7 + $0x3c4] ss:$16 sps:$4 sm:$0xff]  }
 0x220   :  { %2733 = vmatmul.mubr.bf16.vlgmr.msra.gmra.mrb[4].mxu0 %v1906_v15  ;;  %2819 = vmatmul.mubr.bf16.vlgmr.msra.gmra.mrb[8].mxu1 %v1906_v15  ;;  %v393_v15 = vrot.slane %v9112_v53, %v9132_v9 }
 0x221   :  { %2744 = vmatpush1.bf16.msra.mxu0 %v7917_v17  ;;  %2830 = vmatpush1.bf16.msra.mxu1 %v7920_v18  ;;  %v8006_v17 = vld [vmem:[#allocation7 + $0x3cc] ss:$16 sps:$4 sm:$0xff]  }
 0x222   :  { %2745 = vmatprep.subr.bf16.mxu0 %v7925_v19  ;;  %2831 = vmatprep.subr.bf16.mxu1 %v7928_v20 }
 0x225   :  { %2746 = vmatpush1.bf16.msra.mxu0 %v7923_v3  ;;  %2832 = vmatpush1.bf16.msra.mxu1 %v7926_v5 }
 0x226   :  { %2747 = vmatprep.subr.bf16.mxu0 %v7931_v7  ;;  %2833 = vmatprep.subr.bf16.mxu1 %v7934_v8  ;;  %v8001_v7 = vld [vmem:[#allocation7 + $0x3c0] ss:$16 sps:$4 sm:$0xff]   ;;  %v8004_v8 = vld [vmem:[#allocation7 + $0x3c8] ss:$16 sps:$4 sm:$0xff]  }
 0x229   :  { %2748 = vmatpush1.bf16.msra.mxu0 %v7929_v21  ;;  %2834 = vmatpush1.bf16.msra.mxu1 %v7932_v22 }
 0x22a   :  { %2749 = vmatprep.subr.bf16.mxu0 %v7937_v23  ;;  %2835 = vmatprep.subr.bf16.mxu1 %v7940_v24  ;;  %v8009_v23 = vld [vmem:[#allocation7 + $0x3e4] ss:$16 sps:$4 sm:$0xff]   ;;  %v8012_v24 = vld [vmem:[#allocation7 + $0x3ec] ss:$16 sps:$4 sm:$0xff]  }
 0x22d   :  { %2750 = vmatpush1.bf16.msra.mxu0 %v7935_v25  ;;  %2836 = vmatpush1.bf16.msra.mxu1 %v7938_v26 }
 0x22e   :  { %2751 = vmatprep.subr.bf16.mxu0 %v7943_v27  ;;  %2837 = vmatprep.subr.bf16.mxu1 %v7946_v28 }
 0x231   :  { %2752 = vmatpush1.bf16.msra.mxu0 %v7941_v29  ;;  %2838 = vmatpush1.bf16.msra.mxu1 %v7944_v30  ;;  %v8007_v29 = vld [vmem:[#allocation7 + $0x3e0] ss:$16 sps:$4 sm:$0xff]   ;;  %v8010_v30 = vld [vmem:[#allocation7 + $0x3e8] ss:$16 sps:$4 sm:$0xff]  }
 0x232   :  { %2753 = vmatprep.subr.bf16.mxu0 %v7949_v31  ;;  %2839 = vmatprep.subr.bf16.mxu1 %v7952_v32 }
 0x235   :  { %2754 = vmatpush1.bf16.msra.mxu0 %v7947_v33  ;;  %2840 = vmatpush1.bf16.msra.mxu1 %v7950_v34  ;;  %v8013_v33 = vld [vmem:[#allocation8 + $0x40] sm:$0xff]  }
 0x236   :  { %2755 = vmatprep.subr.bf16.mxu0 %v7955_v35  ;;  %2841 = vmatprep.subr.bf16.mxu1 %v7958_v36  ;;  %v8014_v34 = vld [vmem:[#allocation8 + $0xc0] sm:$0xff]  }
 0x237   :  { %v8015_v35 = vld [vmem:[#allocation8] sm:$0xff]  }
 0x238   :  { %v8016_v36 = vld [vmem:[#allocation8 + $0x80] sm:$0xff]  }
 0x239   :  { %2756 = vmatpush1.bf16.msra.mxu0 %v7953_v37  ;;  %2842 = vmatpush1.bf16.msra.mxu1 %v7956_v38  ;;  %v8017_v37 = vld [vmem:[#allocation8 + $0x48] sm:$0xff]  }
 0x23a   :  { %2757 = vmatprep.subr.bf16.mxu0 %v7961_v39  ;;  %2843 = vmatprep.subr.bf16.mxu1 %v7964_v40  ;;  %v8018_v38 = vld [vmem:[#allocation8 + $0xc8] sm:$0xff]  }
 0x23b   :  { %v8019_v39 = vld [vmem:[#allocation8 + $0x8] sm:$0xff]  }
 0x23c   :  { %v8020_v40 = vld [vmem:[#allocation8 + $0x88] sm:$0xff]  }
 0x23d   :  { %2758 = vmatpush1.bf16.msra.mxu0 %v7959_v41  ;;  %2844 = vmatpush1.bf16.msra.mxu1 %v7962_v42  ;;  %v8021_v41 = vld [vmem:[#allocation8 + $0x50] sm:$0xff]  }
 0x23e   :  { %2759 = vmatprep.subr.bf16.mxu0 %v7967_v43  ;;  %2845 = vmatprep.subr.bf16.mxu1 %v7970_v44  ;;  %v8022_v42 = vld [vmem:[#allocation8 + $0xd0] sm:$0xff]  }
 0x23f   :  { %v8023_v43 = vld [vmem:[#allocation8 + $0x10] sm:$0xff]  }
 0x240   :  { %v8024_v44 = vld [vmem:[#allocation8 + $0x90] sm:$0xff]  }
 0x241   :  { %2760 = vmatpush1.bf16.msra.mxu0 %v7965_v45  ;;  %2846 = vmatpush1.bf16.msra.mxu1 %v7968_v46  ;;  %v8025_v45 = vld [vmem:[#allocation8 + $0x58] sm:$0xff]  }
 0x242   :  { %2761 = vmatprep.subr.bf16.mxu0 %v7973_v47  ;;  %2847 = vmatprep.subr.bf16.mxu1 %v7976_v48  ;;  %v8026_v46 = vld [vmem:[#allocation8 + $0xd8] sm:$0xff]  }
 0x243   :  { %v8027_v47 = vld [vmem:[#allocation8 + $0x18] sm:$0xff]  }
 0x244   :  { %v8028_v48 = vld [vmem:[#allocation8 + $0x98] sm:$0xff]  }
 0x245   :  { %2762 = vmatpush1.bf16.msra.mxu0 %v7971_v49  ;;  %2848 = vmatpush1.bf16.msra.mxu1 %v7974_v50  ;;  %v8029_v49 = vld [vmem:[#allocation8 + $0x60] sm:$0xff]  }
 0x246   :  { %2763 = vmatprep.subr.bf16.mxu0 %v7979_v51  ;;  %2849 = vmatprep.subr.bf16.mxu1 %v7982_v56  ;;  %v8030_v50 = vld [vmem:[#allocation8 + $0xe0] sm:$0xff]  }
 0x247   :  { %v8031_v51 = vld [vmem:[#allocation8 + $0x20] sm:$0xff]  }
 0x248   :  { %v8032_v56 = vld [vmem:[#allocation8 + $0xa0] sm:$0xff]  }
 0x249   :  { %2764 = vmatpush1.bf16.msra.mxu0 %v7977_v57  ;;  %2850 = vmatpush1.bf16.msra.mxu1 %v7980_v58  ;;  %v8033_v57 = vld [vmem:[#allocation8 + $0x68] sm:$0xff]  }
 0x24a   :  { %2765 = vmatprep.subr.bf16.mxu0 %v7985_v59  ;;  %2851 = vmatprep.subr.bf16.mxu1 %v7988_v60  ;;  %v8034_v58 = vld [vmem:[#allocation8 + $0xe8] sm:$0xff]  }
 0x24b   :  { %v8035_v59 = vld [vmem:[#allocation8 + $0x28] sm:$0xff]  }
 0x24c   :  { %v8036_v60 = vld [vmem:[#allocation8 + $0xa8] sm:$0xff]  }
 0x24d   :  { %2766 = vmatpush1.bf16.msra.mxu0 %v7983_v61  ;;  %2852 = vmatpush1.bf16.msra.mxu1 %v7986_v62  ;;  %v8037_v61 = vld [vmem:[#allocation8 + $0x70] sm:$0xff]  }
 0x24e   :  { %2767 = vmatprep.subr.bf16.mxu0 %v7991_v63  ;;  %2853 = vmatprep.subr.bf16.mxu1 %v7994_v1  ;;  %v8038_v62 = vld [vmem:[#allocation8 + $0xf0] sm:$0xff]  }
 0x24f   :  { %v8039_v63 = vld [vmem:[#allocation8 + $0x30] sm:$0xff]  }
 0x250   :  { %v8040_v1 = vld [vmem:[#allocation8 + $0xb0] sm:$0xff]  }
 0x251   :  { %2768 = vmatpush1.bf16.msra.mxu0 %v7989_v4  ;;  %2854 = vmatpush1.bf16.msra.mxu1 %v7992_v6  ;;  %v8041_v4 = vld [vmem:[#allocation8 + $0x78] sm:$0xff]  }
 0x252   :  { %2769 = vmatprep.subr.bf16.mxu0 %v7997_v10  ;;  %2855 = vmatprep.subr.bf16.mxu1 %v8000_v11  ;;  %v8042_v6 = vld [vmem:[#allocation8 + $0xf8] sm:$0xff]  }
 0x253   :  { %v8043_v10 = vld [vmem:[#allocation8 + $0x38] sm:$0xff]  }
 0x254   :  { %v1889_v18 = vpop.f32.mrb[4].mxu1  ;;  %v8044_v11 = vld [vmem:[#allocation8 + $0xb8] sm:$0xff]  }
 0x255   :  { %v7377_v19 = vadd.f32 %v1889_v18, %v389_v12  ;;  %v1891_v20 = vpop.f32.mrb[5].mxu1  ;;  %2770 = vmatpush1.bf16.msra.mxu0 %v7995_v13  ;;  %2856 = vmatpush1.bf16.msra.mxu1 %v7998_v14  ;;  %v8050_v13 = vld [vmem:[#allocation10 + $0xc] ss:$16 sps:$4 sm:$0xff]   ;;  %v2038_v14 = vld [vmem:[%s9242_s4] sm:$0xf] }
 0x256   :  { %v7378_v3 = vadd.f32 %v1891_v20, %v393_v15  ;;  %v1893_v5 = vpop.f32.mrb[6].mxu1  ;;  %2771 = vmatprep.subr.bf16.mxu0 %v8003_v16  ;;  %2857 = vmatprep.subr.bf16.mxu1 %v8006_v17  ;;  %v2051_v16 = vrot.slane %v2038_v14, %v9129_v2  ;;  %v2047_v17 = vrot.slane %v2038_v14, %v9118_v55 }
 0x257   :  { %v7379_v21 = vadd.f32 %v1893_v5, %v389_v12  ;;  %v1895_v22 = vpop.f32.mrb[7].mxu1  ;;  %v1900_v25 = vmax.f32 %v7377_v19, 0.0  ;;  %v8047_v12 = vld [vmem:[#allocation10 + $0x4] ss:$16 sps:$4 sm:$0xff]   ;;  %v2055_v18 = vrot.slane %v2038_v14, %v9132_v9 }
 0x258   :  { %v7380_v53 = vadd.f32 %v1895_v22, %v393_v15  ;;  %v1901_v27 = vmax.f32 %v7378_v3, 0.0  ;;  %v2043_v15 = vrot.slane %v2038_v14, %v9115_v54  ;;  %v8089_v14 = vld [vmem:[#allocation10 + $0xe4] ss:$16 sps:$4 sm:$0xff]  }
 0x259   :  { %v1904_v26 = vmax.f32 %v7379_v21, 0.0  ;;  %2772 = vmatpush1.bf16.msra.mxu0 %v8001_v7  ;;  %2858 = vmatpush1.bf16.msra.mxu1 %v8004_v8 }
 0x25a   :  { %v1905_v28 = vmax.f32 %v7380_v53, 0.0  ;;  %2773 = vmatprep.subr.bf16.mxu0 %v8009_v23  ;;  %2859 = vmatprep.subr.bf16.mxu1 %v8012_v24 }
 0x25b   :  { %v1908_v31 = vpack.c.bf16 %v1904_v26, %v1900_v25 }
 0x25c   :  { %v1909_v32 = vpack.c.bf16 %v1905_v28, %v1901_v27 }
 0x25d   :  { %2774 = vmatpush1.bf16.msra.mxu0 %v8007_v29  ;;  %2860 = vmatpush1.bf16.msra.mxu1 %v8010_v30 }
 0x25e   :  { %2775 = vmatprep.mubr.bf16.mxu0 %v1909_v32  ;;  %2861 = vmatprep.mubr.bf16.mxu1 %v1909_v32 }
 0x25f   :  { %7281 = vmatprep.subr.bf16.mxu0 %v8013_v33  ;;  %7303 = vmatprep.subr.bf16.mxu1 %v8014_v34 }
 0x260   :  { %2776 = vmatmul.mubr.bf16.vlgmr.msra.gmra.mrb[4].mxu0 %v1908_v31  ;;  %2862 = vmatmul.mubr.bf16.vlgmr.msra.gmra.mrb[8].mxu1 %v1908_v31 }
 0x261   :  { %7282 = vmatpush3.bf16.msra.mxu0 %v8015_v35  ;;  %7304 = vmatpush3.bf16.msra.mxu1 %v8016_v36 }
 0x262   :  { %7283 = vmatprep.subr.bf16.mxu0 %v8017_v37  ;;  %7305 = vmatprep.subr.bf16.mxu1 %v8018_v38 }
 0x265   :  { %7284 = vmatpush3.bf16.msra.mxu0 %v8019_v39  ;;  %7306 = vmatpush3.bf16.msra.mxu1 %v8020_v40 }
 0x266   :  { %7285 = vmatprep.subr.bf16.mxu0 %v8021_v41  ;;  %7307 = vmatprep.subr.bf16.mxu1 %v8022_v42  ;;  %v8045_v42 = vld [vmem:[#allocation10] ss:$16 sps:$4 sm:$0xff]  }
 0x269   :  { %7286 = vmatpush3.bf16.msra.mxu0 %v8023_v43  ;;  %7308 = vmatpush3.bf16.msra.mxu1 %v8024_v44  ;;  %v8048_v43 = vld [vmem:[#allocation10 + $0x8] ss:$16 sps:$4 sm:$0xff]   ;;  %v8053_v44 = vld [vmem:[#allocation10 + $0x24] ss:$16 sps:$4 sm:$0xff]  }
 0x26a   :  { %7287 = vmatprep.subr.bf16.mxu0 %v8025_v45  ;;  %7309 = vmatprep.subr.bf16.mxu1 %v8026_v46  ;;  %v8056_v45 = vld [vmem:[#allocation10 + $0x2c] ss:$16 sps:$4 sm:$0xff]   ;;  %v8051_v46 = vld [vmem:[#allocation10 + $0x20] ss:$16 sps:$4 sm:$0xff]  }
 0x26d   :  { %7288 = vmatpush3.bf16.msra.mxu0 %v8027_v47  ;;  %7310 = vmatpush3.bf16.msra.mxu1 %v8028_v48  ;;  %v8054_v47 = vld [vmem:[#allocation10 + $0x28] ss:$16 sps:$4 sm:$0xff]   ;;  %v8059_v48 = vld [vmem:[#allocation10 + $0x44] ss:$16 sps:$4 sm:$0xff]  }
 0x26e   :  { %7289 = vmatprep.subr.bf16.mxu0 %v8029_v49  ;;  %7311 = vmatprep.subr.bf16.mxu1 %v8030_v50  ;;  %v8062_v49 = vld [vmem:[#allocation10 + $0x4c] ss:$16 sps:$4 sm:$0xff]   ;;  %v8057_v50 = vld [vmem:[#allocation10 + $0x40] ss:$16 sps:$4 sm:$0xff]  }
 0x271   :  { %7290 = vmatpush3.bf16.msra.mxu0 %v8031_v51  ;;  %7312 = vmatpush3.bf16.msra.mxu1 %v8032_v56  ;;  %v8060_v51 = vld [vmem:[#allocation10 + $0x48] ss:$16 sps:$4 sm:$0xff]   ;;  %v8065_v56 = vld [vmem:[#allocation10 + $0x64] ss:$16 sps:$4 sm:$0xff]  }
 0x272   :  { %7291 = vmatprep.subr.bf16.mxu0 %v8033_v57  ;;  %7313 = vmatprep.subr.bf16.mxu1 %v8034_v58  ;;  %v8068_v57 = vld [vmem:[#allocation10 + $0x6c] ss:$16 sps:$4 sm:$0xff]   ;;  %v8063_v58 = vld [vmem:[#allocation10 + $0x60] ss:$16 sps:$4 sm:$0xff]  }
 0x275   :  { %7292 = vmatpush3.bf16.msra.mxu0 %v8035_v59  ;;  %7314 = vmatpush3.bf16.msra.mxu1 %v8036_v60  ;;  %v8066_v59 = vld [vmem:[#allocation10 + $0x68] ss:$16 sps:$4 sm:$0xff]   ;;  %v8071_v60 = vld [vmem:[#allocation10 + $0x84] ss:$16 sps:$4 sm:$0xff]  }
 0x276   :  { %7293 = vmatprep.subr.bf16.mxu0 %v8037_v61  ;;  %7315 = vmatprep.subr.bf16.mxu1 %v8038_v62  ;;  %v8074_v61 = vld [vmem:[#allocation10 + $0x8c] ss:$16 sps:$4 sm:$0xff]   ;;  %v8069_v62 = vld [vmem:[#allocation10 + $0x80] ss:$16 sps:$4 sm:$0xff]  }
 0x279   :  { %7294 = vmatpush3.bf16.msra.mxu0 %v8039_v63  ;;  %7316 = vmatpush3.bf16.msra.mxu1 %v8040_v1  ;;  %v8077_v63 = vld [vmem:[#allocation10 + $0xa4] ss:$16 sps:$4 sm:$0xff]   ;;  %v8080_v1 = vld [vmem:[#allocation10 + $0xac] ss:$16 sps:$4 sm:$0xff]  }
 0x27a   :  { %7295 = vmatprep.subr.bf16.mxu0 %v8041_v4  ;;  %7317 = vmatprep.subr.bf16.mxu1 %v8042_v6  ;;  %v8075_v4 = vld [vmem:[#allocation10 + $0xa0] ss:$16 sps:$4 sm:$0xff]   ;;  %v8078_v6 = vld [vmem:[#allocation10 + $0xa8] ss:$16 sps:$4 sm:$0xff]  }
 0x27d   :  { %7296 = vmatpush3.bf16.msra.mxu0 %v8043_v10  ;;  %7318 = vmatpush3.bf16.msra.mxu1 %v8044_v11  ;;  %v8083_v10 = vld [vmem:[#allocation10 + $0xc4] ss:$16 sps:$4 sm:$0xff]   ;;  %v8086_v11 = vld [vmem:[#allocation10 + $0xcc] ss:$16 sps:$4 sm:$0xff]  }
 0x27e   :  { %3444 = vmatprep.subr.bf16.mxu0 %v8047_v12  ;;  %3487 = vmatprep.subr.bf16.mxu1 %v8050_v13  ;;  %v8081_v12 = vld [vmem:[#allocation10 + $0xc0] ss:$16 sps:$4 sm:$0xff]   ;;  %v8084_v13 = vld [vmem:[#allocation10 + $0xc8] ss:$16 sps:$4 sm:$0xff]  }
 0x333   :  { %v2777_v19 = vpop.f32.mrb[4].mxu0  ;;  %v2863_v20 = vpop.f32.mrb[8].mxu1 }
 0x334   :  { %v7381_v3 = vadd.f32 %v2777_v19, %v2043_v15  ;;  %v7385_v5 = vadd.f32 %v2863_v20, %v2051_v16  ;;  %v2779_v7 = vpop.f32.mrb[5].mxu0  ;;  %v2865_v8 = vpop.f32.mrb[9].mxu1  ;;  %v8098_v19 = vld [vmem:[#allocation11 + $0xc] ss:$16 sps:$4 sm:$0xff]  }
 0x335   :  { %v7382_v21 = vadd.f32 %v2779_v7, %v2047_v17  ;;  %v7386_v22 = vadd.f32 %v2865_v8, %v2055_v18  ;;  %v2781_v23 = vpop.f32.mrb[6].mxu0  ;;  %v2867_v24 = vpop.f32.mrb[10].mxu1 }
 0x336   :  { %v7383_v53 = vadd.f32 %v2781_v23, %v2043_v15  ;;  %v7387_v25 = vadd.f32 %v2867_v24, %v2051_v16  ;;  %v2783_v26 = vpop.f32.mrb[7].mxu0  ;;  %v2869_v27 = vpop.f32.mrb[11].mxu1  ;;  %v2872_v30 = vmax.f32 %v7381_v3, 0.0  ;;  %v2874_v31 = vmax.f32 %v7385_v5, 0.0  ;;  %v8092_v15 = vld [vmem:[#allocation10 + $0xec] ss:$16 sps:$4 sm:$0xff]  }
 0x337   :  { %v7384_v28 = vadd.f32 %v2783_v26, %v2047_v17  ;;  %v7388_v29 = vadd.f32 %v2869_v27, %v2055_v18  ;;  %v2873_v34 = vmax.f32 %v7382_v21, 0.0  ;;  %v2875_v35 = vmax.f32 %v7386_v22, 0.0  ;;  %v8087_v16 = vld [vmem:[#allocation10 + $0xe0] ss:$16 sps:$4 sm:$0xff]   ;;  %v8090_v17 = vld [vmem:[#allocation10 + $0xe8] ss:$16 sps:$4 sm:$0xff]  }
 0x338   :  { %v2876_v32 = vmax.f32 %v7383_v53, 0.0  ;;  %v2878_v33 = vmax.f32 %v7387_v25, 0.0  ;;  %v8095_v18 = vld [vmem:[#allocation11 + $0x4] ss:$16 sps:$4 sm:$0xff]   ;;  %v6834_v5 = vld [vmem:[%s9244_s6] ss:$0 sm:$0xff] }
 0x339   :  { %v2877_v36 = vmax.f32 %v7384_v28, 0.0  ;;  %v2879_v37 = vmax.f32 %v7388_v29, 0.0 }
 0x33a   :  { %v2880_v38 = vpack.c.bf16 %v2876_v32, %v2872_v30  ;;  %v2882_v39 = vpack.c.bf16 %v2878_v33, %v2874_v31  ;;  %v8093_v32 = vld [vmem:[#allocation11] ss:$16 sps:$4 sm:$0xff]   ;;  %v8096_v33 = vld [vmem:[#allocation11 + $0x8] ss:$16 sps:$4 sm:$0xff]  }
 0x33b   :  { %v2881_v40 = vpack.c.bf16 %v2877_v36, %v2873_v34  ;;  %v2883_v41 = vpack.c.bf16 %v2879_v37, %v2875_v35  ;;  %v8101_v35 = vld [vmem:[#allocation11 + $0x24] ss:$16 sps:$4 sm:$0xff]   ;;  %v8104_v36 = vld [vmem:[#allocation11 + $0x2c] ss:$16 sps:$4 sm:$0xff]   ;;  %v8099_v37 = vld [vmem:[#allocation11 + $0x20] ss:$16 sps:$4 sm:$0xff]  }
 0x33d   :  { %3179 = vmatprep.mubr.bf16.mxu0 %v2881_v40  ;;  %3220 = vmatprep.mubr.bf16.mxu1 %v2883_v41  ;;  %v8110_v40 = vld [vmem:[#allocation11 + $0x4c] ss:$16 sps:$4 sm:$0xff]   ;;  %v8105_v41 = vld [vmem:[#allocation11 + $0x40] ss:$16 sps:$4 sm:$0xff]  }
 0x33e   :  { %3180 = vmatmul.mubr.bf16.vlgmr.msra.gmra.mrb[8].mxu0 %v2880_v38  ;;  %3221 = vmatmul.mubr.bf16.vlgmr.msra.gmra.mrb[12].mxu1 %v2882_v39  ;;  %v8102_v38 = vld [vmem:[#allocation11 + $0x28] ss:$16 sps:$4 sm:$0xff]   ;;  %v8107_v39 = vld [vmem:[#allocation11 + $0x44] ss:$16 sps:$4 sm:$0xff]  }
 0x33f   :  { %3445 = vmatpush1.bf16.msra.mxu0 %v8045_v42  ;;  %3488 = vmatpush1.bf16.msra.mxu1 %v8048_v43  ;;  %v8108_v42 = vld [vmem:[#allocation11 + $0x48] ss:$16 sps:$4 sm:$0xff]   ;;  %v8113_v43 = vld [vmem:[#allocation11 + $0x64] ss:$16 sps:$4 sm:$0xff]  }
 0x340   :  { %3446 = vmatprep.subr.bf16.mxu0 %v8053_v44  ;;  %3489 = vmatprep.subr.bf16.mxu1 %v8056_v45  ;;  %v8116_v44 = vld [vmem:[#allocation11 + $0x6c] ss:$16 sps:$4 sm:$0xff]   ;;  %v8111_v45 = vld [vmem:[#allocation11 + $0x60] ss:$16 sps:$4 sm:$0xff]  }
 0x341   :  { %3476 = vmatprep.mubr.bf16.mxu0 %v8885_v0  ;;  %3519 = vmatprep.mubr.bf16.mxu1 %v8885_v0  ;;  %v8072_v0 = vld [vmem:[#allocation10 + $0x88] ss:$16 sps:$4 sm:$0xff]  }
 0x343   :  { %3447 = vmatpush1.bf16.msra.mxu0 %v8051_v46  ;;  %3490 = vmatpush1.bf16.msra.mxu1 %v8054_v47  ;;  %v8114_v46 = vld [vmem:[#allocation11 + $0x68] ss:$16 sps:$4 sm:$0xff]   ;;  %v8119_v47 = vld [vmem:[#allocation11 + $0x84] ss:$16 sps:$4 sm:$0xff]  }
 0x344   :  { %3448 = vmatprep.subr.bf16.mxu0 %v8059_v48  ;;  %3491 = vmatprep.subr.bf16.mxu1 %v8062_v49  ;;  %v8122_v48 = vld [vmem:[#allocation11 + $0x8c] ss:$16 sps:$4 sm:$0xff]   ;;  %v8117_v49 = vld [vmem:[#allocation11 + $0x80] ss:$16 sps:$4 sm:$0xff]  }
 0x347   :  { %3449 = vmatpush1.bf16.msra.mxu0 %v8057_v50  ;;  %3492 = vmatpush1.bf16.msra.mxu1 %v8060_v51  ;;  %v8120_v50 = vld [vmem:[#allocation11 + $0x88] ss:$16 sps:$4 sm:$0xff]   ;;  %v8125_v51 = vld [vmem:[#allocation11 + $0xa4] ss:$16 sps:$4 sm:$0xff]  }
 0x348   :  { %3450 = vmatprep.subr.bf16.mxu0 %v8065_v56  ;;  %3493 = vmatprep.subr.bf16.mxu1 %v8068_v57  ;;  %v8128_v56 = vld [vmem:[#allocation11 + $0xac] ss:$16 sps:$4 sm:$0xff]   ;;  %v8123_v57 = vld [vmem:[#allocation11 + $0xa0] ss:$16 sps:$4 sm:$0xff]  }
 0x34b   :  { %3451 = vmatpush1.bf16.msra.mxu0 %v8063_v58  ;;  %3494 = vmatpush1.bf16.msra.mxu1 %v8066_v59  ;;  %v8126_v58 = vld [vmem:[#allocation11 + $0xa8] ss:$16 sps:$4 sm:$0xff]   ;;  %v8131_v59 = vld [vmem:[#allocation11 + $0xc4] ss:$16 sps:$4 sm:$0xff]  }
 0x34c   :  { %3452 = vmatprep.subr.bf16.mxu0 %v8071_v60  ;;  %3495 = vmatprep.subr.bf16.mxu1 %v8074_v61  ;;  %v8134_v60 = vld [vmem:[#allocation11 + $0xcc] ss:$16 sps:$4 sm:$0xff]   ;;  %v8129_v61 = vld [vmem:[#allocation11 + $0xc0] ss:$16 sps:$4 sm:$0xff]  }
 0x34f   :  { %3453 = vmatpush1.bf16.msra.mxu0 %v8069_v62  ;;  %3496 = vmatpush1.bf16.msra.mxu1 %v8072_v0  ;;  %v8132_v62 = vld [vmem:[#allocation11 + $0xc8] ss:$16 sps:$4 sm:$0xff]   ;;  %v8137_v0 = vld [vmem:[#allocation11 + $0xe4] ss:$16 sps:$4 sm:$0xff]  }
 0x350   :  { %3454 = vmatprep.subr.bf16.mxu0 %v8077_v63  ;;  %3497 = vmatprep.subr.bf16.mxu1 %v8080_v1  ;;  %v8140_v63 = vld [vmem:[#allocation11 + $0xec] ss:$16 sps:$4 sm:$0xff]   ;;  %v8135_v1 = vld [vmem:[#allocation11 + $0xe0] ss:$16 sps:$4 sm:$0xff]  }
 0x353   :  { %3455 = vmatpush1.bf16.msra.mxu0 %v8075_v4  ;;  %3498 = vmatpush1.bf16.msra.mxu1 %v8078_v6  ;;  %v8138_v4 = vld [vmem:[#allocation11 + $0xe8] ss:$16 sps:$4 sm:$0xff]   ;;  %v8143_v6 = vld [vmem:[#allocation11 + $0x104] ss:$16 sps:$4 sm:$0xff]  }
 0x354   :  { %3456 = vmatprep.subr.bf16.mxu0 %v8083_v10  ;;  %3499 = vmatprep.subr.bf16.mxu1 %v8086_v11  ;;  %v8146_v10 = vld [vmem:[#allocation11 + $0x10c] ss:$16 sps:$4 sm:$0xff]   ;;  %v8141_v11 = vld [vmem:[#allocation11 + $0x100] ss:$16 sps:$4 sm:$0xff]  }
 0x357   :  { %3457 = vmatpush1.bf16.msra.mxu0 %v8081_v12  ;;  %3500 = vmatpush1.bf16.msra.mxu1 %v8084_v13  ;;  %v8144_v12 = vld [vmem:[#allocation11 + $0x108] ss:$16 sps:$4 sm:$0xff]   ;;  %v8149_v13 = vld [vmem:[#allocation11 + $0x124] ss:$16 sps:$4 sm:$0xff]  }
 0x358   :  { %3458 = vmatprep.subr.bf16.mxu0 %v8089_v14  ;;  %3501 = vmatprep.subr.bf16.mxu1 %v8092_v15  ;;  %v8152_v14 = vld [vmem:[#allocation11 + $0x12c] ss:$16 sps:$4 sm:$0xff]   ;;  %v8147_v15 = vld [vmem:[#allocation11 + $0x120] ss:$16 sps:$4 sm:$0xff]  }
 0x35b   :  { %3459 = vmatpush1.bf16.msra.mxu0 %v8087_v16  ;;  %3502 = vmatpush1.bf16.msra.mxu1 %v8090_v17  ;;  %v8150_v16 = vld [vmem:[#allocation11 + $0x128] ss:$16 sps:$4 sm:$0xff]   ;;  %v8155_v17 = vld [vmem:[#allocation11 + $0x144] ss:$16 sps:$4 sm:$0xff]  }
 0x35c   :  { %4332 = vmatprep.subr.bf16.mxu0 %v8095_v18  ;;  %4418 = vmatprep.subr.bf16.mxu1 %v8098_v19  ;;  %v8158_v18 = vld [vmem:[#allocation11 + $0x14c] ss:$16 sps:$4 sm:$0xff]   ;;  %v8153_v19 = vld [vmem:[#allocation11 + $0x140] ss:$16 sps:$4 sm:$0xff]  }
 0x411   :  { %v7297_v20 = vpop.f32.mrb[8].mxu0  ;;  %v7319_v3 = vpop.f32.mrb[12].mxu1 }
 0x412   :  { %v7298_v7 = vpop.f32.mrb[9].mxu0  ;;  %v7320_v8 = vpop.f32.mrb[13].mxu1 }
 0x413   :  { %v7299_v21 = vadd.f32 %v7298_v7, %v7297_v20  ;;  %v7321_v22 = vadd.f32 %v7320_v8, %v7319_v3  ;;  %v7300_v23 = vpop.f32.mrb[10].mxu0  ;;  %v7322_v24 = vpop.f32.mrb[14].mxu1  ;;  %v8156_v20 = vld [vmem:[#allocation11 + $0x148] ss:$16 sps:$4 sm:$0xff]   ;;  %v8161_v3 = vld [vmem:[#allocation11 + $0x164] ss:$16 sps:$4 sm:$0xff]  }
 0x414   :  { %v7301_v53 = vpop.f32.mrb[11].mxu0  ;;  %v7323_v25 = vpop.f32.mrb[15].mxu1  ;;  %v8159_v7 = vld [vmem:[#allocation11 + $0x160] ss:$16 sps:$4 sm:$0xff]   ;;  %v8162_v8 = vld [vmem:[#allocation11 + $0x168] ss:$16 sps:$4 sm:$0xff]  }
 0x415   :  { %v3182_v26 = vadd.f32 %v7299_v21, %v6834_v5  ;;  %v7302_v27 = vadd.f32 %v7301_v53, %v7300_v23  ;;  %v7324_v28 = vadd.f32 %v7323_v25, %v7322_v24  ;;  %v8167_v21 = vld [vmem:[#allocation11 + $0x184] ss:$16 sps:$4 sm:$0xff]   ;;  %v8165_v23 = vld [vmem:[#allocation11 + $0x180] ss:$16 sps:$4 sm:$0xff]   ;;  %v8168_v24 = vld [vmem:[#allocation11 + $0x188] ss:$16 sps:$4 sm:$0xff]  }
 0x416   :  { %v8173_v53 = vld [vmem:[#allocation11 + $0x1a4] ss:$16 sps:$4 sm:$0xff]   ;;  %v8176_v25 = vld [vmem:[#allocation11 + $0x1ac] ss:$16 sps:$4 sm:$0xff]  }
 0x417   :  { %v3223_v29 = vadd.f32 %v7321_v22, %v3182_v26  ;;  %v3185_v30 = vadd.f32 %v7302_v27, %v6834_v5  ;;  %v8164_v5 = vld [vmem:[#allocation11 + $0x16c] ss:$16 sps:$4 sm:$0xff]   ;;  %v8171_v26 = vld [vmem:[#allocation11 + $0x1a0] ss:$16 sps:$4 sm:$0xff]   ;;  %v8174_v27 = vld [vmem:[#allocation11 + $0x1a8] ss:$16 sps:$4 sm:$0xff]  }
 0x418   :  { %v8170_v22 = vld [vmem:[#allocation11 + $0x18c] ss:$16 sps:$4 sm:$0xff]  }
 0x419   :  { %6437 = vst [vmem:[#allocation15] sm:$0xff] %v3223_v29  ;;  %v3226_v31 = vadd.f32 %v7324_v28, %v3185_v30  ;;  %v8179_v28 = vld [vmem:[#allocation11 + $0x1c4] ss:$16 sps:$4 sm:$0xff]   ;;  %v8177_v30 = vld [vmem:[#allocation11 + $0x1c0] ss:$16 sps:$4 sm:$0xff]  }
 0x41b   :  { %v3229_v34 = vpack.c.bf16 %v3226_v31, %v3223_v29  ;;  %6438 = vst [vmem:[#allocation15 + $0x8] sm:$0xff] %v3226_v31  ;;  %v8182_v29 = vld [vmem:[#allocation11 + $0x1cc] ss:$16 sps:$4 sm:$0xff]   ;;  %v8180_v31 = vld [vmem:[#allocation11 + $0x1c8] ss:$16 sps:$4 sm:$0xff]  }
 0x41d   :  { %3477 = vmatmul.mubr.bf16.vlgmr.msra.gmra.mrb[12].mxu0 %v3229_v34  ;;  %3520 = vmatmul.mubr.bf16.vlgmr.msra.gmra.mrb[16].mxu1 %v3229_v34  ;;  %v8183_v34 = vld [vmem:[#allocation11 + $0x1e0] ss:$16 sps:$4 sm:$0xff]  }
 0x41e   :  { %4333 = vmatpush1.bf16.msra.mxu0 %v8093_v32  ;;  %4419 = vmatpush1.bf16.msra.mxu1 %v8096_v33  ;;  %v8185_v32 = vld [vmem:[#allocation11 + $0x1e4] ss:$16 sps:$4 sm:$0xff]   ;;  %v8188_v33 = vld [vmem:[#allocation11 + $0x1ec] ss:$16 sps:$4 sm:$0xff]  }
 0x41f   :  { %4334 = vmatprep.subr.bf16.mxu0 %v8101_v35  ;;  %4420 = vmatprep.subr.bf16.mxu1 %v8104_v36  ;;  %v8186_v35 = vld [vmem:[#allocation11 + $0x1e8] ss:$16 sps:$4 sm:$0xff]   ;;  %v8191_v36 = vld [vmem:[#allocation11 + $0x204] ss:$16 sps:$4 sm:$0xff]  }
 0x422   :  { %4335 = vmatpush1.bf16.msra.mxu0 %v8099_v37  ;;  %4421 = vmatpush1.bf16.msra.mxu1 %v8102_v38  ;;  %v8194_v37 = vld [vmem:[#allocation11 + $0x20c] ss:$16 sps:$4 sm:$0xff]   ;;  %v3262_v38 = vld [vmem:[%s9246_s8] sm:$0xf] }
 0x423   :  { %4336 = vmatprep.subr.bf16.mxu0 %v8107_v39  ;;  %4422 = vmatprep.subr.bf16.mxu1 %v8110_v40  ;;  %v3267_v39 = vrot.slane %v3262_v38, %v9115_v54  ;;  %v3275_v40 = vrot.slane %v3262_v38, %v9129_v2 }
 0x426   :  { %4337 = vmatpush1.bf16.msra.mxu0 %v8105_v41  ;;  %4423 = vmatpush1.bf16.msra.mxu1 %v8108_v42  ;;  %v3271_v41 = vrot.slane %v3262_v38, %v9118_v55  ;;  %v3279_v42 = vrot.slane %v3262_v38, %v9132_v9  ;;  %v8233_v38 = vld [vmem:[#allocation11 + $0x2e4] ss:$16 sps:$4 sm:$0xff]  }
 0x427   :  { %4338 = vmatprep.subr.bf16.mxu0 %v8113_v43  ;;  %4424 = vmatprep.subr.bf16.mxu1 %v8116_v44 }
 0x42a   :  { %4339 = vmatpush1.bf16.msra.mxu0 %v8111_v45  ;;  %4425 = vmatpush1.bf16.msra.mxu1 %v8114_v46 }
 0x42b   :  { %4340 = vmatprep.subr.bf16.mxu0 %v8119_v47  ;;  %4426 = vmatprep.subr.bf16.mxu1 %v8122_v48 }
 0x42e   :  { %4341 = vmatpush1.bf16.msra.mxu0 %v8117_v49  ;;  %4427 = vmatpush1.bf16.msra.mxu1 %v8120_v50 }
 0x42f   :  { %4342 = vmatprep.subr.bf16.mxu0 %v8125_v51  ;;  %4428 = vmatprep.subr.bf16.mxu1 %v8128_v56 }
 0x432   :  { %4343 = vmatpush1.bf16.msra.mxu0 %v8123_v57  ;;  %4429 = vmatpush1.bf16.msra.mxu1 %v8126_v58 }
 0x433   :  { %4344 = vmatprep.subr.bf16.mxu0 %v8131_v59  ;;  %4430 = vmatprep.subr.bf16.mxu1 %v8134_v60 }
 0x436   :  { %4345 = vmatpush1.bf16.msra.mxu0 %v8129_v61  ;;  %4431 = vmatpush1.bf16.msra.mxu1 %v8132_v62 }
 0x437   :  { %4346 = vmatprep.subr.bf16.mxu0 %v8137_v0  ;;  %4432 = vmatprep.subr.bf16.mxu1 %v8140_v63 }
 0x43a   :  { %4347 = vmatpush1.bf16.msra.mxu0 %v8135_v1  ;;  %4433 = vmatpush1.bf16.msra.mxu1 %v8138_v4 }
 0x43b   :  { %4348 = vmatprep.subr.bf16.mxu0 %v8143_v6  ;;  %4434 = vmatprep.subr.bf16.mxu1 %v8146_v10 }
 0x43e   :  { %4349 = vmatpush1.bf16.msra.mxu0 %v8141_v11  ;;  %4435 = vmatpush1.bf16.msra.mxu1 %v8144_v12 }
 0x43f   :  { %4350 = vmatprep.subr.bf16.mxu0 %v8149_v13  ;;  %4436 = vmatprep.subr.bf16.mxu1 %v8152_v14 }
 0x442   :  { %4351 = vmatpush1.bf16.msra.mxu0 %v8147_v15  ;;  %4437 = vmatpush1.bf16.msra.mxu1 %v8150_v16 }
 0x443   :  { %4352 = vmatprep.subr.bf16.mxu0 %v8155_v17  ;;  %4438 = vmatprep.subr.bf16.mxu1 %v8158_v18  ;;  %v8189_v17 = vld [vmem:[#allocation11 + $0x200] ss:$16 sps:$4 sm:$0xff]   ;;  %v8192_v18 = vld [vmem:[#allocation11 + $0x208] ss:$16 sps:$4 sm:$0xff]  }
 0x446   :  { %4353 = vmatpush1.bf16.msra.mxu0 %v8153_v19  ;;  %4439 = vmatpush1.bf16.msra.mxu1 %v8156_v20  ;;  %v8197_v19 = vld [vmem:[#allocation11 + $0x224] ss:$16 sps:$4 sm:$0xff]   ;;  %v8200_v20 = vld [vmem:[#allocation11 + $0x22c] ss:$16 sps:$4 sm:$0xff]  }
 0x447   :  { %4354 = vmatprep.subr.bf16.mxu0 %v8161_v3  ;;  %4440 = vmatprep.subr.bf16.mxu1 %v8164_v5  ;;  %v8195_v3 = vld [vmem:[#allocation11 + $0x220] ss:$16 sps:$4 sm:$0xff]   ;;  %v8198_v5 = vld [vmem:[#allocation11 + $0x228] ss:$16 sps:$4 sm:$0xff]  }
 0x44a   :  { %4355 = vmatpush1.bf16.msra.mxu0 %v8159_v7  ;;  %4441 = vmatpush1.bf16.msra.mxu1 %v8162_v8  ;;  %v8203_v7 = vld [vmem:[#allocation11 + $0x244] ss:$16 sps:$4 sm:$0xff]   ;;  %v8206_v8 = vld [vmem:[#allocation11 + $0x24c] ss:$16 sps:$4 sm:$0xff]  }
 0x44b   :  { %4356 = vmatprep.subr.bf16.mxu0 %v8167_v21  ;;  %4442 = vmatprep.subr.bf16.mxu1 %v8170_v22  ;;  %v8201_v21 = vld [vmem:[#allocation11 + $0x240] ss:$16 sps:$4 sm:$0xff]   ;;  %v8204_v22 = vld [vmem:[#allocation11 + $0x248] ss:$16 sps:$4 sm:$0xff]  }
 0x44e   :  { %4357 = vmatpush1.bf16.msra.mxu0 %v8165_v23  ;;  %4443 = vmatpush1.bf16.msra.mxu1 %v8168_v24  ;;  %v8209_v23 = vld [vmem:[#allocation11 + $0x264] ss:$16 sps:$4 sm:$0xff]   ;;  %v8212_v24 = vld [vmem:[#allocation11 + $0x26c] ss:$16 sps:$4 sm:$0xff]  }
 0x44f   :  { %4358 = vmatprep.subr.bf16.mxu0 %v8173_v53  ;;  %4444 = vmatprep.subr.bf16.mxu1 %v8176_v25  ;;  %v8207_v53 = vld [vmem:[#allocation11 + $0x260] ss:$16 sps:$4 sm:$0xff]   ;;  %v8210_v25 = vld [vmem:[#allocation11 + $0x268] ss:$16 sps:$4 sm:$0xff]  }
 0x452   :  { %4359 = vmatpush1.bf16.msra.mxu0 %v8171_v26  ;;  %4445 = vmatpush1.bf16.msra.mxu1 %v8174_v27  ;;  %v8215_v26 = vld [vmem:[#allocation11 + $0x284] ss:$16 sps:$4 sm:$0xff]   ;;  %v8218_v27 = vld [vmem:[#allocation11 + $0x28c] ss:$16 sps:$4 sm:$0xff]  }
 0x453   :  { %4360 = vmatprep.subr.bf16.mxu0 %v8179_v28  ;;  %4446 = vmatprep.subr.bf16.mxu1 %v8182_v29  ;;  %v8213_v28 = vld [vmem:[#allocation11 + $0x280] ss:$16 sps:$4 sm:$0xff]   ;;  %v8216_v29 = vld [vmem:[#allocation11 + $0x288] ss:$16 sps:$4 sm:$0xff]  }
 0x456   :  { %4361 = vmatpush1.bf16.msra.mxu0 %v8177_v30  ;;  %4447 = vmatpush1.bf16.msra.mxu1 %v8180_v31  ;;  %v8221_v30 = vld [vmem:[#allocation11 + $0x2a4] ss:$16 sps:$4 sm:$0xff]   ;;  %v8224_v31 = vld [vmem:[#allocation11 + $0x2ac] ss:$16 sps:$4 sm:$0xff]  }
 0x457   :  { %4362 = vmatprep.subr.bf16.mxu0 %v8185_v32  ;;  %4448 = vmatprep.subr.bf16.mxu1 %v8188_v33  ;;  %v8219_v32 = vld [vmem:[#allocation11 + $0x2a0] ss:$16 sps:$4 sm:$0xff]   ;;  %v8222_v33 = vld [vmem:[#allocation11 + $0x2a8] ss:$16 sps:$4 sm:$0xff]  }
 0x45a   :  { %4363 = vmatpush1.bf16.msra.mxu0 %v8183_v34  ;;  %4449 = vmatpush1.bf16.msra.mxu1 %v8186_v35  ;;  %v8227_v34 = vld [vmem:[#allocation11 + $0x2c4] ss:$16 sps:$4 sm:$0xff]   ;;  %v8230_v35 = vld [vmem:[#allocation11 + $0x2cc] ss:$16 sps:$4 sm:$0xff]  }
 0x45b   :  { %4375 = vmatprep.subr.bf16.mxu0 %v8191_v36  ;;  %4461 = vmatprep.subr.bf16.mxu1 %v8194_v37  ;;  %v8225_v36 = vld [vmem:[#allocation11 + $0x2c0] ss:$16 sps:$4 sm:$0xff]   ;;  %v8228_v37 = vld [vmem:[#allocation11 + $0x2c8] ss:$16 sps:$4 sm:$0xff]  }
 0x4f0   :  { %v3478_v43 = vpop.f32.mrb[12].mxu0  ;;  %v3521_v44 = vpop.f32.mrb[16].mxu1 }
 0x4f1   :  { %v3479_v45 = vadd.f32 %v3478_v43, %v3267_v39  ;;  %v3522_v46 = vadd.f32 %v3521_v44, %v3275_v40  ;;  %v3480_v47 = vpop.f32.mrb[13].mxu0  ;;  %v3523_v48 = vpop.f32.mrb[17].mxu1  ;;  %v8242_v43 = vld [vmem:[#allocation11 + $0x30c] ss:$16 sps:$4 sm:$0xff]   ;;  %v8237_v44 = vld [vmem:[#allocation11 + $0x300] ss:$16 sps:$4 sm:$0xff]  }
 0x4f2   :  { %v3481_v49 = vadd.f32 %v3480_v47, %v3271_v41  ;;  %v3524_v50 = vadd.f32 %v3523_v48, %v3279_v42  ;;  %v3482_v51 = vpop.f32.mrb[14].mxu0  ;;  %v3525_v56 = vpop.f32.mrb[18].mxu1  ;;  %v8248_v47 = vld [vmem:[#allocation11 + $0x32c] ss:$16 sps:$4 sm:$0xff]   ;;  %v8243_v48 = vld [vmem:[#allocation11 + $0x320] ss:$16 sps:$4 sm:$0xff]  }
 0x4f3   :  { %v3483_v57 = vadd.f32 %v3482_v51, %v3267_v39  ;;  %v3526_v58 = vadd.f32 %v3525_v56, %v3275_v40  ;;  %v3484_v59 = vpop.f32.mrb[15].mxu0  ;;  %v3527_v60 = vpop.f32.mrb[19].mxu1  ;;  %v3530_v0 = vmax.f32 %v3479_v45, 0.0  ;;  %v3532_v63 = vmax.f32 %v3522_v46, 0.0  ;;  %v8236_v39 = vld [vmem:[#allocation11 + $0x2ec] ss:$16 sps:$4 sm:$0xff]  }
 0x4f4   :  { %v3485_v61 = vadd.f32 %v3484_v59, %v3271_v41  ;;  %v3528_v62 = vadd.f32 %v3527_v60, %v3279_v42  ;;  %v3531_v6 = vmax.f32 %v3481_v49, 0.0  ;;  %v3533_v10 = vmax.f32 %v3524_v50, 0.0  ;;  %v8231_v40 = vld [vmem:[#allocation11 + $0x2e0] ss:$16 sps:$4 sm:$0xff]   ;;  %v8234_v41 = vld [vmem:[#allocation11 + $0x2e8] ss:$16 sps:$4 sm:$0xff]  }
 0x4f5   :  { %v3534_v1 = vmax.f32 %v3483_v57, 0.0  ;;  %v3536_v4 = vmax.f32 %v3526_v58, 0.0  ;;  %v8239_v42 = vld [vmem:[#allocation11 + $0x304] ss:$16 sps:$4 sm:$0xff]   ;;  %v8240_v45 = vld [vmem:[#allocation11 + $0x308] ss:$16 sps:$4 sm:$0xff]  }
 0x4f6   :  { %v3535_v11 = vmax.f32 %v3485_v61, 0.0  ;;  %v3537_v12 = vmax.f32 %v3528_v62, 0.0  ;;  %v8245_v46 = vld [vmem:[#allocation11 + $0x324] ss:$16 sps:$4 sm:$0xff]   ;;  %v8246_v49 = vld [vmem:[#allocation11 + $0x328] ss:$16 sps:$4 sm:$0xff]  }
 0x4f7   :  { %v3538_v13 = vpack.c.bf16 %v3534_v1, %v3530_v0  ;;  %v9157_v14 = vpack.c.bf16 %v3536_v4, %v3532_v63  ;;  %v8251_v50 = vld [vmem:[#allocation11 + $0x344] ss:$16 sps:$4 sm:$0xff]   ;;  %v8254_v51 = vld [vmem:[#allocation11 + $0x34c] ss:$16 sps:$4 sm:$0xff]   ;;  %v8249_v56 = vld [vmem:[#allocation11 + $0x340] ss:$16 sps:$4 sm:$0xff]  }
 0x4f8   :  { %v3539_v15 = vpack.c.bf16 %v3535_v11, %v3531_v6  ;;  %v3541_v16 = vpack.c.bf16 %v3537_v12, %v3533_v10  ;;  %v8252_v57 = vld [vmem:[#allocation11 + $0x348] ss:$16 sps:$4 sm:$0xff]   ;;  %v8257_v58 = vld [vmem:[#allocation11 + $0x364] ss:$16 sps:$4 sm:$0xff]   ;;  %v8260_v59 = vld [vmem:[#allocation11 + $0x36c] ss:$16 sps:$4 sm:$0xff]  }
 0x4f9   :  { %v8255_v60 = vld [vmem:[#allocation11 + $0x360] ss:$16 sps:$4 sm:$0xff]   ;;  %v8258_v61 = vld [vmem:[#allocation11 + $0x368] ss:$16 sps:$4 sm:$0xff]   ;;  %v8263_v62 = vld [vmem:[#allocation11 + $0x384] ss:$16 sps:$4 sm:$0xff]  }
 0x4fa   :  { %4364 = vmatprep.mubr.bf16.mxu0 %v3539_v15  ;;  %4450 = vmatprep.mubr.bf16.mxu1 %v3539_v15  ;;  %v8266_v0 = vld [vmem:[#allocation11 + $0x38c] ss:$16 sps:$4 sm:$0xff]   ;;  %v8261_v63 = vld [vmem:[#allocation11 + $0x380] ss:$16 sps:$4 sm:$0xff]   ;;  %v8264_v1 = vld [vmem:[#allocation11 + $0x388] ss:$16 sps:$4 sm:$0xff]  }
 0x4fb   :  { %4365 = vmatmul.mubr.bf16.vlgmr.msra.gmra.mrb[16].mxu0 %v3538_v13  ;;  %4451 = vmatmul.mubr.bf16.vlgmr.msra.gmra.mrb[20].mxu1 %v3538_v13  ;;  %v8269_v4 = vld [vmem:[#allocation11 + $0x3a4] ss:$16 sps:$4 sm:$0xff]   ;;  %v8272_v6 = vld [vmem:[#allocation11 + $0x3ac] ss:$16 sps:$4 sm:$0xff]   ;;  %v8267_v10 = vld [vmem:[#allocation11 + $0x3a0] ss:$16 sps:$4 sm:$0xff]  }
 0x4fc   :  { %4376 = vmatpush1.bf16.msra.mxu0 %v8189_v17  ;;  %4462 = vmatpush1.bf16.msra.mxu1 %v8192_v18  ;;  %v8270_v11 = vld [vmem:[#allocation11 + $0x3a8] ss:$16 sps:$4 sm:$0xff]   ;;  %v8275_v12 = vld [vmem:[#allocation11 + $0x3c4] ss:$16 sps:$4 sm:$0xff]   ;;  %v8278_v13 = vld [vmem:[#allocation11 + $0x3cc] ss:$16 sps:$4 sm:$0xff]  }
 0x4fd   :  { %4407 = vmatprep.mubr.bf16.mxu0 %v3541_v16  ;;  %4493 = vmatprep.mubr.bf16.mxu1 %v3541_v16  ;;  %v8273_v15 = vld [vmem:[#allocation11 + $0x3c0] ss:$16 sps:$4 sm:$0xff]   ;;  %v8276_v16 = vld [vmem:[#allocation11 + $0x3c8] ss:$16 sps:$4 sm:$0xff]   ;;  %v8281_v17 = vld [vmem:[#allocation11 + $0x3e4] ss:$16 sps:$4 sm:$0xff]  }
 0x4fe   :  { %4377 = vmatprep.subr.bf16.mxu0 %v8197_v19  ;;  %4463 = vmatprep.subr.bf16.mxu1 %v8200_v20  ;;  %v8284_v18 = vld [vmem:[#allocation11 + $0x3ec] ss:$16 sps:$4 sm:$0xff]   ;;  %v8279_v19 = vld [vmem:[#allocation11 + $0x3e0] ss:$16 sps:$4 sm:$0xff]   ;;  %v8282_v20 = vld [vmem:[#allocation11 + $0x3e8] ss:$16 sps:$4 sm:$0xff]  }
 0x500   :  { %4378 = vmatpush1.bf16.msra.mxu0 %v8195_v3  ;;  %4464 = vmatpush1.bf16.msra.mxu1 %v8198_v5  ;;  %v8287_v3 = vld [vmem:[#allocation13 + $0x4] ss:$28 sps:$4 sm:$0xff]   ;;  %v8290_v5 = vld [vmem:[#allocation13 + $0xc] ss:$28 sps:$4 sm:$0xff]  }
 0x501   :  { %4379 = vmatprep.subr.bf16.mxu0 %v8203_v7  ;;  %4465 = vmatprep.subr.bf16.mxu1 %v8206_v8  ;;  %v8285_v7 = vld [vmem:[#allocation13] ss:$28 sps:$4 sm:$0xff]   ;;  %v8288_v8 = vld [vmem:[#allocation13 + $0x8] ss:$28 sps:$4 sm:$0xff]  }
 0x504   :  { %4380 = vmatpush1.bf16.msra.mxu0 %v8201_v21  ;;  %4466 = vmatpush1.bf16.msra.mxu1 %v8204_v22  ;;  %v8293_v21 = vld [vmem:[#allocation13 + $0x3c] ss:$28 sps:$4 sm:$0xff]   ;;  %v8296_v22 = vld [vmem:[#allocation13 + $0x44] ss:$28 sps:$4 sm:$0xff]  }
 0x505   :  { %4381 = vmatprep.subr.bf16.mxu0 %v8209_v23  ;;  %4467 = vmatprep.subr.bf16.mxu1 %v8212_v24  ;;  %v8291_v23 = vld [vmem:[#allocation13 + $0x38] ss:$28 sps:$4 sm:$0xff]   ;;  %v8294_v24 = vld [vmem:[#allocation13 + $0x40] ss:$28 sps:$4 sm:$0xff]  }
 0x508   :  { %4382 = vmatpush1.bf16.msra.mxu0 %v8207_v53  ;;  %4468 = vmatpush1.bf16.msra.mxu1 %v8210_v25  ;;  %v8299_v53 = vld [vmem:[#allocation13 + $0x74] ss:$28 sps:$4 sm:$0xff]   ;;  %v8302_v25 = vld [vmem:[#allocation13 + $0x7c] ss:$28 sps:$4 sm:$0xff]  }
 0x509   :  { %4383 = vmatprep.subr.bf16.mxu0 %v8215_v26  ;;  %4469 = vmatprep.subr.bf16.mxu1 %v8218_v27  ;;  %v8297_v26 = vld [vmem:[#allocation13 + $0x70] ss:$28 sps:$4 sm:$0xff]   ;;  %v8300_v27 = vld [vmem:[#allocation13 + $0x78] ss:$28 sps:$4 sm:$0xff]  }
 0x50c   :  { %4384 = vmatpush1.bf16.msra.mxu0 %v8213_v28  ;;  %4470 = vmatpush1.bf16.msra.mxu1 %v8216_v29  ;;  %v8305_v28 = vld [vmem:[#allocation13 + $0xac] ss:$28 sps:$4 sm:$0xff]   ;;  %v8308_v29 = vld [vmem:[#allocation13 + $0xb4] ss:$28 sps:$4 sm:$0xff]  }
 0x50d   :  { %4385 = vmatprep.subr.bf16.mxu0 %v8221_v30  ;;  %4471 = vmatprep.subr.bf16.mxu1 %v8224_v31  ;;  %v8303_v30 = vld [vmem:[#allocation13 + $0xa8] ss:$28 sps:$4 sm:$0xff]  }
 0x50e   :  { %v8311_v31 = vld [vmem:[#allocation13 + $0xe4] ss:$28 sps:$4 sm:$0xff]  }
 0x510   :  { %4386 = vmatpush1.bf16.msra.mxu0 %v8219_v32  ;;  %4472 = vmatpush1.bf16.msra.mxu1 %v8222_v33  ;;  %v8314_v32 = vld [vmem:[#allocation13 + $0xec] ss:$28 sps:$4 sm:$0xff]   ;;  %v8309_v33 = vld [vmem:[#allocation13 + $0xe0] ss:$28 sps:$4 sm:$0xff]  }
 0x511   :  { %4387 = vmatprep.subr.bf16.mxu0 %v8227_v34  ;;  %4473 = vmatprep.subr.bf16.mxu1 %v8230_v35  ;;  %v8312_v34 = vld [vmem:[#allocation13 + $0xe8] ss:$28 sps:$4 sm:$0xff]   ;;  %v8317_v35 = vld [vmem:[#allocation13 + $0x11c] ss:$28 sps:$4 sm:$0xff]  }
 0x514   :  { %4388 = vmatpush1.bf16.msra.mxu0 %v8225_v36  ;;  %4474 = vmatpush1.bf16.msra.mxu1 %v8228_v37  ;;  %v8320_v36 = vld [vmem:[#allocation13 + $0x124] ss:$28 sps:$4 sm:$0xff]   ;;  %v8315_v37 = vld [vmem:[#allocation13 + $0x118] ss:$28 sps:$4 sm:$0xff]  }
 0x515   :  { %4389 = vmatprep.subr.bf16.mxu0 %v8233_v38  ;;  %4475 = vmatprep.subr.bf16.mxu1 %v8236_v39  ;;  %v8318_v38 = vld [vmem:[#allocation13 + $0x120] ss:$28 sps:$4 sm:$0xff]   ;;  %v8323_v39 = vld [vmem:[#allocation13 + $0x154] ss:$28 sps:$4 sm:$0xff]  }
 0x518   :  { %4390 = vmatpush1.bf16.msra.mxu0 %v8231_v40  ;;  %4476 = vmatpush1.bf16.msra.mxu1 %v8234_v41  ;;  %v8326_v40 = vld [vmem:[#allocation13 + $0x15c] ss:$28 sps:$4 sm:$0xff]   ;;  %v8321_v41 = vld [vmem:[#allocation13 + $0x150] ss:$28 sps:$4 sm:$0xff]  }
 0x519   :  { %4391 = vmatprep.subr.bf16.mxu0 %v8239_v42  ;;  %4477 = vmatprep.subr.bf16.mxu1 %v8242_v43  ;;  %v8324_v42 = vld [vmem:[#allocation13 + $0x158] ss:$28 sps:$4 sm:$0xff]   ;;  %v8329_v43 = vld [vmem:[#allocation13 + $0x18c] ss:$28 sps:$4 sm:$0xff]  }
 0x51c   :  { %4392 = vmatpush1.bf16.msra.mxu0 %v8237_v44  ;;  %4478 = vmatpush1.bf16.msra.mxu1 %v8240_v45  ;;  %v8332_v44 = vld [vmem:[#allocation13 + $0x194] ss:$28 sps:$4 sm:$0xff]   ;;  %v8327_v45 = vld [vmem:[#allocation13 + $0x188] ss:$28 sps:$4 sm:$0xff]  }
 0x51d   :  { %4393 = vmatprep.subr.bf16.mxu0 %v8245_v46  ;;  %4479 = vmatprep.subr.bf16.mxu1 %v8248_v47  ;;  %v8330_v46 = vld [vmem:[#allocation13 + $0x190] ss:$28 sps:$4 sm:$0xff]   ;;  %v8335_v47 = vld [vmem:[#allocation13 + $0x1c4] ss:$28 sps:$4 sm:$0xff]  }
 0x520   :  { %4394 = vmatpush1.bf16.msra.mxu0 %v8243_v48  ;;  %4480 = vmatpush1.bf16.msra.mxu1 %v8246_v49  ;;  %v8338_v48 = vld [vmem:[#allocation13 + $0x1cc] ss:$28 sps:$4 sm:$0xff]   ;;  %v8333_v49 = vld [vmem:[#allocation13 + $0x1c0] ss:$28 sps:$4 sm:$0xff]  }
 0x521   :  { %4395 = vmatprep.subr.bf16.mxu0 %v8251_v50  ;;  %4481 = vmatprep.subr.bf16.mxu1 %v8254_v51  ;;  %v8336_v50 = vld [vmem:[#allocation13 + $0x1c8] ss:$28 sps:$4 sm:$0xff]   ;;  %v8341_v51 = vld [vmem:[#allocation13 + $0x1fc] ss:$28 sps:$4 sm:$0xff]  }
 0x524   :  { %4396 = vmatpush1.bf16.msra.mxu0 %v8249_v56  ;;  %4482 = vmatpush1.bf16.msra.mxu1 %v8252_v57  ;;  %v8344_v56 = vld [vmem:[#allocation13 + $0x204] ss:$28 sps:$4 sm:$0xff]   ;;  %v8339_v57 = vld [vmem:[#allocation13 + $0x1f8] ss:$28 sps:$4 sm:$0xff]  }
 0x525   :  { %4397 = vmatprep.subr.bf16.mxu0 %v8257_v58  ;;  %4483 = vmatprep.subr.bf16.mxu1 %v8260_v59  ;;  %v8342_v58 = vld [vmem:[#allocation13 + $0x200] ss:$28 sps:$4 sm:$0xff]   ;;  %v8347_v59 = vld [vmem:[#allocation13 + $0x234] ss:$28 sps:$4 sm:$0xff]  }
 0x528   :  { %4398 = vmatpush1.bf16.msra.mxu0 %v8255_v60  ;;  %4484 = vmatpush1.bf16.msra.mxu1 %v8258_v61  ;;  %v8350_v60 = vld [vmem:[#allocation13 + $0x23c] ss:$28 sps:$4 sm:$0xff]   ;;  %v8345_v61 = vld [vmem:[#allocation13 + $0x230] ss:$28 sps:$4 sm:$0xff]  }
 0x529   :  { %4399 = vmatprep.subr.bf16.mxu0 %v8263_v62  ;;  %4485 = vmatprep.subr.bf16.mxu1 %v8266_v0  ;;  %v8348_v62 = vld [vmem:[#allocation13 + $0x238] ss:$28 sps:$4 sm:$0xff]   ;;  %v8353_v0 = vld [vmem:[#allocation13 + $0x26c] ss:$28 sps:$4 sm:$0xff]  }
 0x52c   :  { %4400 = vmatpush1.bf16.msra.mxu0 %v8261_v63  ;;  %4486 = vmatpush1.bf16.msra.mxu1 %v8264_v1  ;;  %v8356_v63 = vld [vmem:[#allocation13 + $0x274] ss:$28 sps:$4 sm:$0xff]   ;;  %v8351_v1 = vld [vmem:[#allocation13 + $0x268] ss:$28 sps:$4 sm:$0xff]  }
 0x52d   :  { %4401 = vmatprep.subr.bf16.mxu0 %v8269_v4  ;;  %4487 = vmatprep.subr.bf16.mxu1 %v8272_v6  ;;  %v8354_v4 = vld [vmem:[#allocation13 + $0x270] ss:$28 sps:$4 sm:$0xff]   ;;  %v8359_v6 = vld [vmem:[#allocation13 + $0x2a4] ss:$28 sps:$4 sm:$0xff]  }
 0x530   :  { %4402 = vmatpush1.bf16.msra.mxu0 %v8267_v10  ;;  %4488 = vmatpush1.bf16.msra.mxu1 %v8270_v11  ;;  %v8362_v10 = vld [vmem:[#allocation13 + $0x2ac] ss:$28 sps:$4 sm:$0xff]   ;;  %v8357_v11 = vld [vmem:[#allocation13 + $0x2a0] ss:$28 sps:$4 sm:$0xff]  }
 0x531   :  { %4403 = vmatprep.subr.bf16.mxu0 %v8275_v12  ;;  %4489 = vmatprep.subr.bf16.mxu1 %v8278_v13  ;;  %v8360_v12 = vld [vmem:[#allocation13 + $0x2a8] ss:$28 sps:$4 sm:$0xff]   ;;  %v8365_v13 = vld [vmem:[#allocation13 + $0x2dc] ss:$28 sps:$4 sm:$0xff]  }
 0x534   :  { %4404 = vmatpush1.bf16.msra.mxu0 %v8273_v15  ;;  %4490 = vmatpush1.bf16.msra.mxu1 %v8276_v16  ;;  %v8368_v15 = vld [vmem:[#allocation13 + $0x2e4] ss:$28 sps:$4 sm:$0xff]   ;;  %v8363_v16 = vld [vmem:[#allocation13 + $0x2d8] ss:$28 sps:$4 sm:$0xff]  }
 0x535   :  { %4405 = vmatprep.subr.bf16.mxu0 %v8281_v17  ;;  %4491 = vmatprep.subr.bf16.mxu1 %v8284_v18  ;;  %v8366_v17 = vld [vmem:[#allocation13 + $0x2e0] ss:$28 sps:$4 sm:$0xff]   ;;  %v8371_v18 = vld [vmem:[#allocation13 + $0x314] ss:$28 sps:$4 sm:$0xff]  }
 0x538   :  { %4406 = vmatpush1.bf16.msra.mxu0 %v8279_v19  ;;  %4492 = vmatpush1.bf16.msra.mxu1 %v8282_v20  ;;  %v8374_v19 = vld [vmem:[#allocation13 + $0x31c] ss:$28 sps:$4 sm:$0xff]   ;;  %v8369_v20 = vld [vmem:[#allocation13 + $0x310] ss:$28 sps:$4 sm:$0xff]  }
 0x539   :  { %5961 = vmatprep.subr.bf16.mxu0 %v8287_v3  ;;  %6047 = vmatprep.subr.bf16.mxu1 %v8290_v5  ;;  %v8372_v3 = vld [vmem:[#allocation13 + $0x318] ss:$28 sps:$4 sm:$0xff]   ;;  %v8377_v5 = vld [vmem:[#allocation13 + $0x34c] ss:$28 sps:$4 sm:$0xff]  }
 0x53b   :  { %4408 = vmatmul.mubr.bf16.vlgmr.msra.gmra.mrb[16].mxu0 %v9157_v14  ;;  %4494 = vmatmul.mubr.bf16.vlgmr.msra.gmra.mrb[20].mxu1 %v9157_v14  ;;  %v8306_v14 = vld [vmem:[#allocation13 + $0xb0] ss:$28 sps:$4 sm:$0xff]  }
 0x53c   :  { %5962 = vmatpush1.bf16.msra.mxu0 %v8285_v7  ;;  %6048 = vmatpush1.bf16.msra.mxu1 %v8288_v8  ;;  %v8380_v7 = vld [vmem:[#allocation13 + $0x354] ss:$28 sps:$4 sm:$0xff]   ;;  %v8375_v8 = vld [vmem:[#allocation13 + $0x348] ss:$28 sps:$4 sm:$0xff]  }
 0x53d   :  { %5963 = vmatprep.subr.bf16.mxu0 %v8293_v21  ;;  %6049 = vmatprep.subr.bf16.mxu1 %v8296_v22  ;;  %v8378_v21 = vld [vmem:[#allocation13 + $0x350] ss:$28 sps:$4 sm:$0xff]   ;;  %v8383_v22 = vld [vmem:[#allocation13 + $0x384] ss:$28 sps:$4 sm:$0xff]  }
 0x540   :  { %5964 = vmatpush1.bf16.msra.mxu0 %v8291_v23  ;;  %6050 = vmatpush1.bf16.msra.mxu1 %v8294_v24  ;;  %v8386_v23 = vld [vmem:[#allocation13 + $0x38c] ss:$28 sps:$4 sm:$0xff]  }
 0x541   :  { %5965 = vmatprep.subr.bf16.mxu0 %v8299_v53  ;;  %6051 = vmatprep.subr.bf16.mxu1 %v8302_v25  ;;  %v3670_v24 = vld [vmem:[%s9248_s10] sm:$0xf] }
 0x542   :  { %v3675_v53 = vrot.slane %v3670_v24, %v9115_v54  ;;  %v3683_v25 = vrot.slane %v3670_v24, %v9129_v2 }
 0x544   :  { %5966 = vmatpush1.bf16.msra.mxu0 %v8297_v26  ;;  %6052 = vmatpush1.bf16.msra.mxu1 %v8300_v27  ;;  %v3679_v26 = vrot.slane %v3670_v24, %v9118_v55  ;;  %v3687_v27 = vrot.slane %v3670_v24, %v9132_v9  ;;  %v8425_v24 = vld [vmem:[#allocation13 + $0x50c] ss:$28 sps:$4 sm:$0xff]  }
 0x545   :  { %5967 = vmatprep.subr.bf16.mxu0 %v8305_v28  ;;  %6053 = vmatprep.subr.bf16.mxu1 %v8308_v29 }
 0x548   :  { %5968 = vmatpush1.bf16.msra.mxu0 %v8303_v30  ;;  %6054 = vmatpush1.bf16.msra.mxu1 %v8306_v14 }
 0x549   :  { %5969 = vmatprep.subr.bf16.mxu0 %v8311_v31  ;;  %6055 = vmatprep.subr.bf16.mxu1 %v8314_v32 }
 0x54c   :  { %5970 = vmatpush1.bf16.msra.mxu0 %v8309_v33  ;;  %6056 = vmatpush1.bf16.msra.mxu1 %v8312_v34 }
 0x54d   :  { %5971 = vmatprep.subr.bf16.mxu0 %v8317_v35  ;;  %6057 = vmatprep.subr.bf16.mxu1 %v8320_v36 }
 0x550   :  { %5972 = vmatpush1.bf16.msra.mxu0 %v8315_v37  ;;  %6058 = vmatpush1.bf16.msra.mxu1 %v8318_v38 }
 0x551   :  { %5973 = vmatprep.subr.bf16.mxu0 %v8323_v39  ;;  %6059 = vmatprep.subr.bf16.mxu1 %v8326_v40 }
 0x554   :  { %5974 = vmatpush1.bf16.msra.mxu0 %v8321_v41  ;;  %6060 = vmatpush1.bf16.msra.mxu1 %v8324_v42 }
 0x555   :  { %5975 = vmatprep.subr.bf16.mxu0 %v8329_v43  ;;  %6061 = vmatprep.subr.bf16.mxu1 %v8332_v44 }
 0x558   :  { %5976 = vmatpush1.bf16.msra.mxu0 %v8327_v45  ;;  %6062 = vmatpush1.bf16.msra.mxu1 %v8330_v46 }
 0x559   :  { %5977 = vmatprep.subr.bf16.mxu0 %v8335_v47  ;;  %6063 = vmatprep.subr.bf16.mxu1 %v8338_v48 }
 0x55c   :  { %5978 = vmatpush1.bf16.msra.mxu0 %v8333_v49  ;;  %6064 = vmatpush1.bf16.msra.mxu1 %v8336_v50 }
 0x55d   :  { %5979 = vmatprep.subr.bf16.mxu0 %v8341_v51  ;;  %6065 = vmatprep.subr.bf16.mxu1 %v8344_v56 }
 0x560   :  { %5980 = vmatpush1.bf16.msra.mxu0 %v8339_v57  ;;  %6066 = vmatpush1.bf16.msra.mxu1 %v8342_v58 }
 0x561   :  { %5981 = vmatprep.subr.bf16.mxu0 %v8347_v59  ;;  %6067 = vmatprep.subr.bf16.mxu1 %v8350_v60  ;;  %v8381_v59 = vld [vmem:[#allocation13 + $0x380] ss:$28 sps:$4 sm:$0xff]   ;;  %v8384_v60 = vld [vmem:[#allocation13 + $0x388] ss:$28 sps:$4 sm:$0xff]  }
 0x564   :  { %5982 = vmatpush1.bf16.msra.mxu0 %v8345_v61  ;;  %6068 = vmatpush1.bf16.msra.mxu1 %v8348_v62  ;;  %v8389_v61 = vld [vmem:[#allocation13 + $0x3bc] ss:$28 sps:$4 sm:$0xff]   ;;  %v8392_v62 = vld [vmem:[#allocation13 + $0x3c4] ss:$28 sps:$4 sm:$0xff]  }
 0x565   :  { %5983 = vmatprep.subr.bf16.mxu0 %v8353_v0  ;;  %6069 = vmatprep.subr.bf16.mxu1 %v8356_v63  ;;  %v8387_v0 = vld [vmem:[#allocation13 + $0x3b8] ss:$28 sps:$4 sm:$0xff]   ;;  %v8390_v63 = vld [vmem:[#allocation13 + $0x3c0] ss:$28 sps:$4 sm:$0xff]  }
 0x568   :  { %5984 = vmatpush1.bf16.msra.mxu0 %v8351_v1  ;;  %6070 = vmatpush1.bf16.msra.mxu1 %v8354_v4  ;;  %v8395_v1 = vld [vmem:[#allocation13 + $0x3f4] ss:$28 sps:$4 sm:$0xff]   ;;  %v8398_v4 = vld [vmem:[#allocation13 + $0x3fc] ss:$28 sps:$4 sm:$0xff]  }
 0x569   :  { %5985 = vmatprep.subr.bf16.mxu0 %v8359_v6  ;;  %6071 = vmatprep.subr.bf16.mxu1 %v8362_v10  ;;  %v8393_v6 = vld [vmem:[#allocation13 + $0x3f0] ss:$28 sps:$4 sm:$0xff]   ;;  %v8396_v10 = vld [vmem:[#allocation13 + $0x3f8] ss:$28 sps:$4 sm:$0xff]  }
 0x56c   :  { %5986 = vmatpush1.bf16.msra.mxu0 %v8357_v11  ;;  %6072 = vmatpush1.bf16.msra.mxu1 %v8360_v12  ;;  %v8401_v11 = vld [vmem:[#allocation13 + $0x42c] ss:$28 sps:$4 sm:$0xff]   ;;  %v8404_v12 = vld [vmem:[#allocation13 + $0x434] ss:$28 sps:$4 sm:$0xff]  }
 0x56d   :  { %5987 = vmatprep.subr.bf16.mxu0 %v8365_v13  ;;  %6073 = vmatprep.subr.bf16.mxu1 %v8368_v15  ;;  %v8399_v13 = vld [vmem:[#allocation13 + $0x428] ss:$28 sps:$4 sm:$0xff]   ;;  %v8402_v15 = vld [vmem:[#allocation13 + $0x430] ss:$28 sps:$4 sm:$0xff]  }
 0x570   :  { %5988 = vmatpush1.bf16.msra.mxu0 %v8363_v16  ;;  %6074 = vmatpush1.bf16.msra.mxu1 %v8366_v17  ;;  %v8407_v16 = vld [vmem:[#allocation13 + $0x464] ss:$28 sps:$4 sm:$0xff]   ;;  %v8410_v17 = vld [vmem:[#allocation13 + $0x46c] ss:$28 sps:$4 sm:$0xff]  }
 0x571   :  { %5989 = vmatprep.subr.bf16.mxu0 %v8371_v18  ;;  %6075 = vmatprep.subr.bf16.mxu1 %v8374_v19  ;;  %v8405_v18 = vld [vmem:[#allocation13 + $0x460] ss:$28 sps:$4 sm:$0xff]   ;;  %v8408_v19 = vld [vmem:[#allocation13 + $0x468] ss:$28 sps:$4 sm:$0xff]  }
 0x574   :  { %5990 = vmatpush1.bf16.msra.mxu0 %v8369_v20  ;;  %6076 = vmatpush1.bf16.msra.mxu1 %v8372_v3  ;;  %v8413_v20 = vld [vmem:[#allocation13 + $0x49c] ss:$28 sps:$4 sm:$0xff]   ;;  %v8416_v3 = vld [vmem:[#allocation13 + $0x4a4] ss:$28 sps:$4 sm:$0xff]  }
 0x575   :  { %5991 = vmatprep.subr.bf16.mxu0 %v8377_v5  ;;  %6077 = vmatprep.subr.bf16.mxu1 %v8380_v7  ;;  %v8411_v5 = vld [vmem:[#allocation13 + $0x498] ss:$28 sps:$4 sm:$0xff]   ;;  %v8414_v7 = vld [vmem:[#allocation13 + $0x4a0] ss:$28 sps:$4 sm:$0xff]  }
 0x578   :  { %5992 = vmatpush1.bf16.msra.mxu0 %v8375_v8  ;;  %6078 = vmatpush1.bf16.msra.mxu1 %v8378_v21  ;;  %v8419_v8 = vld [vmem:[#allocation13 + $0x4d4] ss:$28 sps:$4 sm:$0xff]   ;;  %v8422_v21 = vld [vmem:[#allocation13 + $0x4dc] ss:$28 sps:$4 sm:$0xff]  }
 0x579   :  { %6004 = vmatprep.subr.bf16.mxu0 %v8383_v22  ;;  %6090 = vmatprep.subr.bf16.mxu1 %v8386_v23  ;;  %v8417_v22 = vld [vmem:[#allocation13 + $0x4d0] ss:$28 sps:$4 sm:$0xff]   ;;  %v8420_v23 = vld [vmem:[#allocation13 + $0x4d8] ss:$28 sps:$4 sm:$0xff]  }
 0x60e   :  { %v4409_v28 = vpop.f32.mrb[16].mxu0  ;;  %v4495_v29 = vpop.f32.mrb[20].mxu1 }
 0x60f   :  { %v7389_v30 = vadd.f32 %v4409_v28, %v3675_v53  ;;  %v7393_v14 = vadd.f32 %v4495_v29, %v3683_v25  ;;  %v4411_v31 = vpop.f32.mrb[17].mxu0  ;;  %v4497_v32 = vpop.f32.mrb[21].mxu1  ;;  %v8434_v28 = vld [vmem:[#allocation13 + $0x54c] ss:$28 sps:$4 sm:$0xff]   ;;  %v8429_v29 = vld [vmem:[#allocation13 + $0x540] ss:$28 sps:$4 sm:$0xff]  }
 0x610   :  { %v7390_v33 = vadd.f32 %v4411_v31, %v3679_v26  ;;  %v7394_v34 = vadd.f32 %v4497_v32, %v3687_v27  ;;  %v4413_v35 = vpop.f32.mrb[18].mxu0  ;;  %v4499_v36 = vpop.f32.mrb[22].mxu1  ;;  %v8440_v31 = vld [vmem:[#allocation13 + $0x584] ss:$28 sps:$4 sm:$0xff]   ;;  %v8435_v32 = vld [vmem:[#allocation13 + $0x578] ss:$28 sps:$4 sm:$0xff]  }
 0x611   :  { %v7391_v37 = vadd.f32 %v4413_v35, %v3675_v53  ;;  %v7395_v38 = vadd.f32 %v4499_v36, %v3683_v25  ;;  %v4415_v39 = vpop.f32.mrb[19].mxu0  ;;  %v4501_v40 = vpop.f32.mrb[23].mxu1  ;;  %v4504_v43 = vmax.f32 %v7389_v30, 0.0  ;;  %v4506_v44 = vmax.f32 %v7393_v14, 0.0  ;;  %v8428_v53 = vld [vmem:[#allocation13 + $0x514] ss:$28 sps:$4 sm:$0xff]  }
 0x612   :  { %v7392_v41 = vadd.f32 %v4415_v39, %v3679_v26  ;;  %v7396_v42 = vadd.f32 %v4501_v40, %v3687_v27  ;;  %v4505_v47 = vmax.f32 %v7390_v33, 0.0  ;;  %v4507_v48 = vmax.f32 %v7394_v34, 0.0  ;;  %v8423_v25 = vld [vmem:[#allocation13 + $0x508] ss:$28 sps:$4 sm:$0xff]   ;;  %v8426_v26 = vld [vmem:[#allocation13 + $0x510] ss:$28 sps:$4 sm:$0xff]  }
 0x613   :  { %v4508_v45 = vmax.f32 %v7391_v37, 0.0  ;;  %v4510_v46 = vmax.f32 %v7395_v38, 0.0  ;;  %v8431_v27 = vld [vmem:[#allocation13 + $0x544] ss:$28 sps:$4 sm:$0xff]   ;;  %v8437_v14 = vld [vmem:[#allocation13 + $0x57c] ss:$28 sps:$4 sm:$0xff]  }
 0x614   :  { %v4509_v49 = vmax.f32 %v7392_v41, 0.0  ;;  %v4511_v50 = vmax.f32 %v7396_v42, 0.0  ;;  %v8432_v30 = vld [vmem:[#allocation13 + $0x548] ss:$28 sps:$4 sm:$0xff]   ;;  %v8438_v33 = vld [vmem:[#allocation13 + $0x580] ss:$28 sps:$4 sm:$0xff]  }
 0x615   :  { %v9168_v51 = vpack.c.bf16 %v4508_v45, %v4504_v43  ;;  %v9170_v56 = vpack.c.bf16 %v4510_v46, %v4506_v44  ;;  %v8443_v34 = vld [vmem:[#allocation13 + $0x5b4] ss:$28 sps:$4 sm:$0xff]   ;;  %v8446_v35 = vld [vmem:[#allocation13 + $0x5bc] ss:$28 sps:$4 sm:$0xff]   ;;  %v8449_v38 = vld [vmem:[#allocation13 + $0x5ec] ss:$28 sps:$4 sm:$0xff]  }
 0x616   :  { %v9172_v57 = vpack.c.bf16 %v4509_v49, %v4505_v47  ;;  %v9174_v58 = vpack.c.bf16 %v4511_v50, %v4507_v48  ;;  %v8441_v36 = vld [vmem:[#allocation13 + $0x5b0] ss:$28 sps:$4 sm:$0xff]   ;;  %v8444_v37 = vld [vmem:[#allocation13 + $0x5b8] ss:$28 sps:$4 sm:$0xff]   ;;  %v8447_v40 = vld [vmem:[#allocation13 + $0x5e8] ss:$28 sps:$4 sm:$0xff]  }
 0x617   :  { %v8452_v39 = vld [vmem:[#allocation13 + $0x5f4] ss:$28 sps:$4 sm:$0xff]   ;;  %v8455_v42 = vld [vmem:[#allocation13 + $0x624] ss:$28 sps:$4 sm:$0xff]   ;;  %v8458_v43 = vld [vmem:[#allocation13 + $0x62c] ss:$28 sps:$4 sm:$0xff]  }
 0x618   :  { %5993 = vmatprep.mubr.bf16.mxu0 %v9172_v57  ;;  %6079 = vmatprep.mubr.bf16.mxu1 %v9172_v57  ;;  %v8450_v41 = vld [vmem:[#allocation13 + $0x5f0] ss:$28 sps:$4 sm:$0xff]   ;;  %v8453_v44 = vld [vmem:[#allocation13 + $0x620] ss:$28 sps:$4 sm:$0xff]   ;;  %v8456_v45 = vld [vmem:[#allocation13 + $0x628] ss:$28 sps:$4 sm:$0xff]  }
 0x619   :  { %5994 = vmatmul.mubr.bf16.vlgmr.msra.gmra.mrb[20].mxu0 %v9168_v51  ;;  %6080 = vmatmul.mubr.bf16.vlgmr.msra.gmra.mrb[24].mxu1 %v9168_v51  ;;  %v8461_v46 = vld [vmem:[#allocation13 + $0x65c] ss:$28 sps:$4 sm:$0xff]   ;;  %v8464_v47 = vld [vmem:[#allocation13 + $0x664] ss:$28 sps:$4 sm:$0xff]   ;;  %v8467_v50 = vld [vmem:[#allocation13 + $0x694] ss:$28 sps:$4 sm:$0xff]  }
 0x61a   :  { %6005 = vmatpush1.bf16.msra.mxu0 %v8381_v59  ;;  %6091 = vmatpush1.bf16.msra.mxu1 %v8384_v60  ;;  %v8459_v48 = vld [vmem:[#allocation13 + $0x658] ss:$28 sps:$4 sm:$0xff]   ;;  %v8462_v49 = vld [vmem:[#allocation13 + $0x660] ss:$28 sps:$4 sm:$0xff]   ;;  %v8465_v60 = vld [vmem:[#allocation13 + $0x690] ss:$28 sps:$4 sm:$0xff]  }
 0x61b   :  { %6036 = vmatprep.mubr.bf16.mxu0 %v9174_v58  ;;  %6122 = vmatprep.mubr.bf16.mxu1 %v9174_v58  ;;  %v8470_v59 = vld [vmem:[#allocation13 + $0x69c] ss:$28 sps:$4 sm:$0xff]  }
 0x61c   :  { %6006 = vmatprep.subr.bf16.mxu0 %v8389_v61  ;;  %6092 = vmatprep.subr.bf16.mxu1 %v8392_v62  ;;  %v8468_v61 = vld [vmem:[#allocation13 + $0x698] ss:$28 sps:$4 sm:$0xff]   ;;  %v8473_v62 = vld [vmem:[#allocation13 + $0x6cc] ss:$28 sps:$4 sm:$0xff]  }
 0x61e   :  { %6007 = vmatpush1.bf16.msra.mxu0 %v8387_v0  ;;  %6093 = vmatpush1.bf16.msra.mxu1 %v8390_v63  ;;  %v8476_v0 = vld [vmem:[#allocation13 + $0x6d4] ss:$28 sps:$4 sm:$0xff]   ;;  %v8471_v63 = vld [vmem:[#allocation13 + $0x6c8] ss:$28 sps:$4 sm:$0xff]  }
 0x61f   :  { %6008 = vmatprep.subr.bf16.mxu0 %v8395_v1  ;;  %6094 = vmatprep.subr.bf16.mxu1 %v8398_v4  ;;  %v8474_v1 = vld [vmem:[#allocation13 + $0x6d0] ss:$28 sps:$4 sm:$0xff]  }
 0x620   :  { %v8479_v4 = vld [vmem:[#allocation13 + $0x14] ss:$28 sps:$4 sm:$0xff]  }
 0x622   :  { %6009 = vmatpush1.bf16.msra.mxu0 %v8393_v6  ;;  %6095 = vmatpush1.bf16.msra.mxu1 %v8396_v10  ;;  %v8480_v6 = vld [vmem:[#allocation13 + $0x1d8] ss:$28 sps:$4 sm:$0xff]   ;;  %v8477_v10 = vld [vmem:[#allocation13 + $0x10] ss:$28 sps:$4 sm:$0xff]  }
 0x623   :  { %6010 = vmatprep.subr.bf16.mxu0 %v8401_v11  ;;  %6096 = vmatprep.subr.bf16.mxu1 %v8404_v12  ;;  %v8481_v11 = vld [vmem:[#allocation13 + $0x18] ss:$28 sps:$4 sm:$0xff]   ;;  %v8484_v12 = vld [vmem:[#allocation13 + $0x4c] ss:$28 sps:$4 sm:$0xff]  }
 0x626   :  { %6011 = vmatpush1.bf16.msra.mxu0 %v8399_v13  ;;  %6097 = vmatpush1.bf16.msra.mxu1 %v8402_v15  ;;  %v8485_v13 = vld [vmem:[#allocation13 + $0x210] ss:$28 sps:$4 sm:$0xff]   ;;  %v8482_v15 = vld [vmem:[#allocation13 + $0x48] ss:$28 sps:$4 sm:$0xff]  }
 0x627   :  { %6012 = vmatprep.subr.bf16.mxu0 %v8407_v16  ;;  %6098 = vmatprep.subr.bf16.mxu1 %v8410_v17  ;;  %v8486_v16 = vld [vmem:[#allocation13 + $0x50] ss:$28 sps:$4 sm:$0xff]   ;;  %v8489_v17 = vld [vmem:[#allocation13 + $0x84] ss:$28 sps:$4 sm:$0xff]  }
 0x62a   :  { %6013 = vmatpush1.bf16.msra.mxu0 %v8405_v18  ;;  %6099 = vmatpush1.bf16.msra.mxu1 %v8408_v19  ;;  %v8490_v18 = vld [vmem:[#allocation13 + $0x248] ss:$28 sps:$4 sm:$0xff]   ;;  %v8487_v19 = vld [vmem:[#allocation13 + $0x80] ss:$28 sps:$4 sm:$0xff]  }
 0x62b   :  { %6014 = vmatprep.subr.bf16.mxu0 %v8413_v20  ;;  %6100 = vmatprep.subr.bf16.mxu1 %v8416_v3  ;;  %v8491_v20 = vld [vmem:[#allocation13 + $0x88] ss:$28 sps:$4 sm:$0xff]   ;;  %v8494_v3 = vld [vmem:[#allocation13 + $0xbc] ss:$28 sps:$4 sm:$0xff]  }
 0x62e   :  { %6015 = vmatpush1.bf16.msra.mxu0 %v8411_v5  ;;  %6101 = vmatpush1.bf16.msra.mxu1 %v8414_v7  ;;  %v8495_v5 = vld [vmem:[#allocation13 + $0x280] ss:$28 sps:$4 sm:$0xff]   ;;  %v8492_v7 = vld [vmem:[#allocation13 + $0xb8] ss:$28 sps:$4 sm:$0xff]  }
 0x62f   :  { %6016 = vmatprep.subr.bf16.mxu0 %v8419_v8  ;;  %6102 = vmatprep.subr.bf16.mxu1 %v8422_v21  ;;  %v8496_v8 = vld [vmem:[#allocation13 + $0xc0] ss:$28 sps:$4 sm:$0xff]   ;;  %v8499_v21 = vld [vmem:[#allocation13 + $0xf4] ss:$28 sps:$4 sm:$0xff]  }
 0x632   :  { %6017 = vmatpush1.bf16.msra.mxu0 %v8417_v22  ;;  %6103 = vmatpush1.bf16.msra.mxu1 %v8420_v23  ;;  %v8497_v22 = vld [vmem:[#allocation13 + $0xf0] ss:$28 sps:$4 sm:$0xff]   ;;  %v8501_v23 = vld [vmem:[#allocation13 + $0xf8] ss:$28 sps:$4 sm:$0xff]  }
 0x633   :  { %6018 = vmatprep.subr.bf16.mxu0 %v8425_v24  ;;  %6104 = vmatprep.subr.bf16.mxu1 %v8428_v53  ;;  %v8504_v24 = vld [vmem:[#allocation13 + $0x12c] ss:$28 sps:$4 sm:$0xff]  }
 0x634   :  { %v8505_v53 = vld [vmem:[#allocation13 + $0x2f0] ss:$28 sps:$4 sm:$0xff]  }
 0x636   :  { %6019 = vmatpush1.bf16.msra.mxu0 %v8423_v25  ;;  %6105 = vmatpush1.bf16.msra.mxu1 %v8426_v26  ;;  %v8502_v25 = vld [vmem:[#allocation13 + $0x128] ss:$28 sps:$4 sm:$0xff]   ;;  %v8506_v26 = vld [vmem:[#allocation13 + $0x130] ss:$28 sps:$4 sm:$0xff]  }
 0x637   :  { %6020 = vmatprep.subr.bf16.mxu0 %v8431_v27  ;;  %6106 = vmatprep.subr.bf16.mxu1 %v8434_v28  ;;  %v8509_v27 = vld [vmem:[#allocation13 + $0x164] ss:$28 sps:$4 sm:$0xff]  }
 0x638   :  { %v8510_v28 = vld [vmem:[#allocation13 + $0x328] ss:$28 sps:$4 sm:$0xff]  }
 0x63a   :  { %6021 = vmatpush1.bf16.msra.mxu0 %v8429_v29  ;;  %6107 = vmatpush1.bf16.msra.mxu1 %v8432_v30  ;;  %v8507_v29 = vld [vmem:[#allocation13 + $0x160] ss:$28 sps:$4 sm:$0xff]   ;;  %v8511_v30 = vld [vmem:[#allocation13 + $0x168] ss:$28 sps:$4 sm:$0xff]  }
 0x63b   :  { %6022 = vmatprep.subr.bf16.mxu0 %v8437_v14  ;;  %6108 = vmatprep.subr.bf16.mxu1 %v8440_v31  ;;  %v8514_v14 = vld [vmem:[#allocation13 + $0x19c] ss:$28 sps:$4 sm:$0xff]  }
 0x63c   :  { %v8515_v31 = vld [vmem:[#allocation13 + $0x360] ss:$28 sps:$4 sm:$0xff]  }
 0x63e   :  { %6023 = vmatpush1.bf16.msra.mxu0 %v8435_v32  ;;  %6109 = vmatpush1.bf16.msra.mxu1 %v8438_v33  ;;  %v8512_v32 = vld [vmem:[#allocation13 + $0x198] ss:$28 sps:$4 sm:$0xff]   ;;  %v8516_v33 = vld [vmem:[#allocation13 + $0x1a0] ss:$28 sps:$4 sm:$0xff]  }
 0x63f   :  { %6024 = vmatprep.subr.bf16.mxu0 %v8443_v34  ;;  %6110 = vmatprep.subr.bf16.mxu1 %v8446_v35  ;;  %v8519_v34 = vld [vmem:[#allocation13 + $0x1d4] ss:$28 sps:$4 sm:$0xff]  }
 0x640   :  { %v8520_v35 = vld [vmem:[#allocation13 + $0x558] ss:$28 sps:$4 sm:$0xff]  }
 0x642   :  { %6025 = vmatpush1.bf16.msra.mxu0 %v8441_v36  ;;  %6111 = vmatpush1.bf16.msra.mxu1 %v8444_v37  ;;  %v8517_v36 = vld [vmem:[#allocation13 + $0x1d0] ss:$28 sps:$4 sm:$0xff]   ;;  %v8521_v37 = vld [vmem:[#allocation13 + $0x398] ss:$28 sps:$4 sm:$0xff]  }
 0x643   :  { %6026 = vmatprep.subr.bf16.mxu0 %v8449_v38  ;;  %6112 = vmatprep.subr.bf16.mxu1 %v8452_v39  ;;  %v8524_v38 = vld [vmem:[#allocation13 + $0x20c] ss:$28 sps:$4 sm:$0xff]  }
 0x644   :  { %v8525_v39 = vld [vmem:[#allocation13 + $0x590] ss:$28 sps:$4 sm:$0xff]  }
 0x646   :  { %6027 = vmatpush1.bf16.msra.mxu0 %v8447_v40  ;;  %6113 = vmatpush1.bf16.msra.mxu1 %v8450_v41  ;;  %v8522_v40 = vld [vmem:[#allocation13 + $0x208] ss:$28 sps:$4 sm:$0xff]   ;;  %v8526_v41 = vld [vmem:[#allocation13 + $0x3d0] ss:$28 sps:$4 sm:$0xff]  }
 0x647   :  { %6028 = vmatprep.subr.bf16.mxu0 %v8455_v42  ;;  %6114 = vmatprep.subr.bf16.mxu1 %v8458_v43  ;;  %v8529_v42 = vld [vmem:[#allocation13 + $0x244] ss:$28 sps:$4 sm:$0xff]  }
 0x648   :  { %v8530_v43 = vld [vmem:[#allocation13 + $0x5c8] ss:$28 sps:$4 sm:$0xff]  }
 0x64a   :  { %6029 = vmatpush1.bf16.msra.mxu0 %v8453_v44  ;;  %6115 = vmatpush1.bf16.msra.mxu1 %v8456_v45  ;;  %v8527_v44 = vld [vmem:[#allocation13 + $0x240] ss:$28 sps:$4 sm:$0xff]   ;;  %v8531_v45 = vld [vmem:[#allocation13 + $0x408] ss:$28 sps:$4 sm:$0xff]  }
 0x64b   :  { %6030 = vmatprep.subr.bf16.mxu0 %v8461_v46  ;;  %6116 = vmatprep.subr.bf16.mxu1 %v8464_v47  ;;  %v8534_v46 = vld [vmem:[#allocation13 + $0x27c] ss:$28 sps:$4 sm:$0xff]  }
 0x64c   :  { %v8535_v47 = vld [vmem:[#allocation13 + $0x600] ss:$28 sps:$4 sm:$0xff]  }
 0x64e   :  { %6031 = vmatpush1.bf16.msra.mxu0 %v8459_v48  ;;  %6117 = vmatpush1.bf16.msra.mxu1 %v8462_v49  ;;  %v8532_v48 = vld [vmem:[#allocation13 + $0x278] ss:$28 sps:$4 sm:$0xff]   ;;  %v8536_v49 = vld [vmem:[#allocation13 + $0x440] ss:$28 sps:$4 sm:$0xff]  }
 0x64f   :  { %6032 = vmatprep.subr.bf16.mxu0 %v8467_v50  ;;  %6118 = vmatprep.subr.bf16.mxu1 %v8470_v59  ;;  %v8539_v50 = vld [vmem:[#allocation13 + $0x2b4] ss:$28 sps:$4 sm:$0xff]  }
 0x650   :  { %v8540_v59 = vld [vmem:[#allocation13 + $0x638] ss:$28 sps:$4 sm:$0xff]  }
 0x652   :  { %6033 = vmatpush1.bf16.msra.mxu0 %v8465_v60  ;;  %6119 = vmatpush1.bf16.msra.mxu1 %v8468_v61  ;;  %v8537_v60 = vld [vmem:[#allocation13 + $0x2b0] ss:$28 sps:$4 sm:$0xff]   ;;  %v8541_v61 = vld [vmem:[#allocation13 + $0x478] ss:$28 sps:$4 sm:$0xff]  }
 0x653   :  { %6034 = vmatprep.subr.bf16.mxu0 %v8473_v62  ;;  %6120 = vmatprep.subr.bf16.mxu1 %v8476_v0  ;;  %v8544_v62 = vld [vmem:[#allocation13 + $0x2ec] ss:$28 sps:$4 sm:$0xff]  }
 0x654   :  { %v8545_v0 = vld [vmem:[#allocation13 + $0x670] ss:$28 sps:$4 sm:$0xff]  }
 0x656   :  { %6035 = vmatpush1.bf16.msra.mxu0 %v8471_v63  ;;  %6121 = vmatpush1.bf16.msra.mxu1 %v8474_v1  ;;  %v8542_v63 = vld [vmem:[#allocation13 + $0x2e8] ss:$28 sps:$4 sm:$0xff]   ;;  %v8546_v1 = vld [vmem:[#allocation13 + $0x4b0] ss:$28 sps:$4 sm:$0xff]  }
 0x657   :  { %6133 = vmatprep.subr.bf16.mxu0 %v8479_v4  ;;  %7325 = vmatprep.subr.bf16.mxu1 %v8480_v6  ;;  %v8549_v4 = vld [vmem:[#allocation13 + $0x324] ss:$28 sps:$4 sm:$0xff]  }
 0x658   :  { %v8550_v6 = vld [vmem:[#allocation13 + $0x6a8] ss:$28 sps:$4 sm:$0xff]  }
 0x659   :  { %6037 = vmatmul.mubr.bf16.vlgmr.msra.gmra.mrb[20].mxu0 %v9170_v56  ;;  %6123 = vmatmul.mubr.bf16.vlgmr.msra.gmra.mrb[24].mxu1 %v9170_v56 }
 0x65a   :  { %6134 = vmatpush1.bf16.msra.mxu0 %v8477_v10  ;;  %6165 = vmatprep.mubr.bf16.mxu0 %v9172_v57  ;;  %v8547_v10 = vld [vmem:[#allocation13 + $0x320] ss:$28 sps:$4 sm:$0xff]  }
 0x65b   :  { %7326 = vmatpush3.bf16.msra.mxu1 %v8481_v11  ;;  %6251 = vmatprep.mubr.bf16.mxu1 %v9172_v57  ;;  %v8500_v57 = vld [vmem:[#allocation13 + $0x2b8] ss:$28 sps:$4 sm:$0xff]   ;;  %v8551_v11 = vld [vmem:[#allocation13 + $0x4e8] ss:$28 sps:$4 sm:$0xff]  }
 0x65c   :  { %6135 = vmatprep.subr.bf16.mxu0 %v8484_v12  ;;  %7327 = vmatprep.subr.bf16.mxu1 %v8485_v13  ;;  %v8554_v12 = vld [vmem:[#allocation13 + $0x35c] ss:$28 sps:$4 sm:$0xff]  }
 0x65d   :  { %v8555_v13 = vld [vmem:[#allocation13 + $0x6e0] ss:$28 sps:$4 sm:$0xff]  }
 0x65e   :  { %6136 = vmatpush1.bf16.msra.mxu0 %v8482_v15  ;;  %v8552_v15 = vld [vmem:[#allocation13 + $0x358] ss:$28 sps:$4 sm:$0xff]  }
 0x65f   :  { %7328 = vmatpush3.bf16.msra.mxu1 %v8486_v16  ;;  %6137 = vmatprep.subr.bf16.mxu0 %v8489_v17  ;;  %v8556_v16 = vld [vmem:[#allocation13 + $0x520] ss:$28 sps:$4 sm:$0xff]   ;;  %v8559_v17 = vld [vmem:[#allocation13 + $0x394] ss:$28 sps:$4 sm:$0xff]  }
 0x660   :  { %7329 = vmatprep.subr.bf16.mxu1 %v8490_v18  ;;  %v8557_v18 = vld [vmem:[#allocation13 + $0x390] ss:$28 sps:$4 sm:$0xff]  }
 0x662   :  { %6138 = vmatpush1.bf16.msra.mxu0 %v8487_v19  ;;  %v8562_v19 = vld [vmem:[#allocation13 + $0x3cc] ss:$28 sps:$4 sm:$0xff]  }
 0x663   :  { %7330 = vmatpush3.bf16.msra.mxu1 %v8491_v20  ;;  %6139 = vmatprep.subr.bf16.mxu0 %v8494_v3  ;;  %v8560_v20 = vld [vmem:[#allocation13 + $0x3c8] ss:$28 sps:$4 sm:$0xff]  }
 0x664   :  { %7331 = vmatprep.subr.bf16.mxu1 %v8495_v5  ;;  %v8565_v3 = vld [vmem:[#allocation13 + $0x404] ss:$28 sps:$4 sm:$0xff]  }
 0x665   :  { %v8563_v5 = vld [vmem:[#allocation13 + $0x400] ss:$28 sps:$4 sm:$0xff]  }
 0x666   :  { %6140 = vmatpush1.bf16.msra.mxu0 %v8492_v7  ;;  %v8568_v7 = vld [vmem:[#allocation13 + $0x43c] ss:$28 sps:$4 sm:$0xff]  }
 0x667   :  { %7332 = vmatpush3.bf16.msra.mxu1 %v8496_v8  ;;  %6141 = vmatprep.subr.bf16.mxu0 %v8499_v21  ;;  %v8566_v8 = vld [vmem:[#allocation13 + $0x438] ss:$28 sps:$4 sm:$0xff]  }
 0x668   :  { %7333 = vmatprep.subr.bf16.mxu1 %v8500_v57  ;;  %v8571_v21 = vld [vmem:[#allocation13 + $0x474] ss:$28 sps:$4 sm:$0xff]  }
 0x669   :  { %v8569_v57 = vld [vmem:[#allocation13 + $0x470] ss:$28 sps:$4 sm:$0xff]  }
 0x66a   :  { %6142 = vmatpush1.bf16.msra.mxu0 %v8497_v22  ;;  %v8572_v22 = vld [vmem:[#allocation13 + $0x4a8] ss:$28 sps:$4 sm:$0xff]  }
 0x66b   :  { %7334 = vmatpush3.bf16.msra.mxu1 %v8501_v23  ;;  %6143 = vmatprep.subr.bf16.mxu0 %v8504_v24  ;;  %v8577_v23 = vld [vmem:[#allocation13 + $0x4e4] ss:$28 sps:$4 sm:$0xff]   ;;  %v8580_v24 = vld [vmem:[#allocation13 + $0x51c] ss:$28 sps:$4 sm:$0xff]  }
 0x66c   :  { %7335 = vmatprep.subr.bf16.mxu1 %v8505_v53  ;;  %v8578_v53 = vld [vmem:[#allocation13 + $0x518] ss:$28 sps:$4 sm:$0xff]  }
 0x66e   :  { %6144 = vmatpush1.bf16.msra.mxu0 %v8502_v25  ;;  %v8583_v25 = vld [vmem:[#allocation13 + $0x554] ss:$28 sps:$4 sm:$0xff]  }
 0x66f   :  { %7336 = vmatpush3.bf16.msra.mxu1 %v8506_v26  ;;  %6145 = vmatprep.subr.bf16.mxu0 %v8509_v27  ;;  %v8581_v26 = vld [vmem:[#allocation13 + $0x550] ss:$28 sps:$4 sm:$0xff]  }
 0x670   :  { %7337 = vmatprep.subr.bf16.mxu1 %v8510_v28  ;;  %v8586_v27 = vld [vmem:[#allocation13 + $0x58c] ss:$28 sps:$4 sm:$0xff]  }
 0x671   :  { %v8584_v28 = vld [vmem:[#allocation13 + $0x588] ss:$28 sps:$4 sm:$0xff]  }
 0x672   :  { %6146 = vmatpush1.bf16.msra.mxu0 %v8507_v29  ;;  %v8589_v29 = vld [vmem:[#allocation13 + $0x5c4] ss:$28 sps:$4 sm:$0xff]  }
 0x673   :  { %7338 = vmatpush3.bf16.msra.mxu1 %v8511_v30  ;;  %6147 = vmatprep.subr.bf16.mxu0 %v8514_v14  ;;  %v8587_v30 = vld [vmem:[#allocation13 + $0x5c0] ss:$28 sps:$4 sm:$0xff]  }
 0x674   :  { %7339 = vmatprep.subr.bf16.mxu1 %v8515_v31  ;;  %v8592_v14 = vld [vmem:[#allocation13 + $0x5fc] ss:$28 sps:$4 sm:$0xff]  }
 0x675   :  { %v8590_v31 = vld [vmem:[#allocation13 + $0x5f8] ss:$28 sps:$4 sm:$0xff]  }
 0x676   :  { %6148 = vmatpush1.bf16.msra.mxu0 %v8512_v32  ;;  %v8595_v32 = vld [vmem:[#allocation13 + $0x634] ss:$28 sps:$4 sm:$0xff]  }
 0x677   :  { %7340 = vmatpush3.bf16.msra.mxu1 %v8516_v33  ;;  %6149 = vmatprep.subr.bf16.mxu0 %v8519_v34  ;;  %v8593_v33 = vld [vmem:[#allocation13 + $0x630] ss:$28 sps:$4 sm:$0xff]  }
 0x678   :  { %7347 = vmatprep.subr.bf16.mxu1 %v8520_v35  ;;  %v8598_v34 = vld [vmem:[#allocation13 + $0x66c] ss:$28 sps:$4 sm:$0xff]  }
 0x679   :  { %v8596_v35 = vld [vmem:[#allocation13 + $0x668] ss:$28 sps:$4 sm:$0xff]  }
 0x67a   :  { %6252 = vmatmul.mubr.bf16.vlgmr.msra.gmra.mrb[28].mxu1 %v9168_v51  ;;  %6150 = vmatpush1.bf16.msra.mxu0 %v8517_v36  ;;  %v8601_v36 = vld [vmem:[#allocation13 + $0x6a4] ss:$28 sps:$4 sm:$0xff]  }
 0x67b   :  { %7348 = vmatpush3.bf16.msra.mxu1 %v8521_v37  ;;  %6292 = vmatprep.mubr.bf16.mxu1 %v9174_v58  ;;  %v8599_v37 = vld [vmem:[#allocation13 + $0x6a0] ss:$28 sps:$4 sm:$0xff]  }
 0x67c   :  { %6151 = vmatprep.subr.bf16.mxu0 %v8524_v38  ;;  %7349 = vmatprep.subr.bf16.mxu1 %v8525_v39  ;;  %v8604_v38 = vld [vmem:[#allocation13 + $0x6dc] ss:$28 sps:$4 sm:$0xff]  }
 0x67d   :  { %v8602_v39 = vld [vmem:[#allocation13 + $0x6d8] ss:$28 sps:$4 sm:$0xff]  }
 0x67e   :  { %6152 = vmatpush1.bf16.msra.mxu0 %v8522_v40  ;;  %v9195_v40 = vld [vmem:[%s9250_s12] sm:$0xff]  ;;  %s8886_s12 = smov [#allocation15]  }
 0x67f   :  { %7350 = vmatpush3.bf16.msra.mxu1 %v8526_v41  ;;  %6153 = vmatprep.subr.bf16.mxu0 %v8529_v42  ;;  %v4777_v41 = vrot.slane %v9195_v40, %v9115_v54  ;;  %v4785_v42 = vrot.slane %v9195_v40, %v9129_v2  ;;  %s6456_s3 = sshll.u32 %s8886_s12, 4  ;;  %s6457_s3 = int_to_ptr.vmem [resolvable:$true] %s6456_s3 }
 0x680   :  { %7351 = vmatprep.subr.bf16.mxu1 %v8530_v43  ;;  %v4781_v43 = vrot.slane %v9195_v40, %v9118_v55  ;;  %s8816_s5 = scalar_lea.vmem %s6457_s3, 256  ;;  %p8821_p1 = scmp.lt.s32.totalorder %s6457_s3, %s6457_s3 }
 0x681   :  { %p8817_p0 = scmp.ne.s32.totalorder %s6457_s3, %s8816_s5  ;;  %p8822_p2 = scmp.lt.s32.totalorder %s8816_s5, %s8816_s5 }
 0x682   :  { %6154 = vmatpush1.bf16.msra.mxu0 %v8527_v44  ;;  %v4789_v44 = vrot.slane %v9195_v40, %v9132_v9 }
 0x683   :  { %7352 = vmatpush3.bf16.msra.mxu1 %v8531_v45  ;;  %6155 = vmatprep.subr.bf16.mxu0 %v8534_v46  ;;  %p8823_p3 = por %p8822_p2, %p8821_p1 }
 0x684   :  { %7353 = vmatprep.subr.bf16.mxu1 %v8535_v47 }
 0x685   :  { %p8824_p4 = pnand %p8823_p3, %p8817_p0 }
 0x686   :  { %6156 = vmatpush1.bf16.msra.mxu0 %v8532_v48 }
 0x687   :  { %7354 = vmatpush3.bf16.msra.mxu1 %v8536_v49  ;;  %6157 = vmatprep.subr.bf16.mxu0 %v8539_v50 }
 0x688   :  { %7355 = vmatprep.subr.bf16.mxu1 %v8540_v59 }
 0x68a   :  { %6158 = vmatpush1.bf16.msra.mxu0 %v8537_v60 }
 0x68b   :  { %7356 = vmatpush3.bf16.msra.mxu1 %v8541_v61  ;;  %6159 = vmatprep.subr.bf16.mxu0 %v8544_v62 }
 0x68c   :  { %7357 = vmatprep.subr.bf16.mxu1 %v8545_v0 }
 0x68e   :  { %6160 = vmatpush1.bf16.msra.mxu0 %v8542_v63 }
 0x68f   :  { %7358 = vmatpush3.bf16.msra.mxu1 %v8546_v1  ;;  %6161 = vmatprep.subr.bf16.mxu0 %v8549_v4 }
 0x690   :  { %7359 = vmatprep.subr.bf16.mxu1 %v8550_v6 }
 0x692   :  { %6162 = vmatpush1.bf16.msra.mxu0 %v8547_v10 }
 0x693   :  { %7360 = vmatpush3.bf16.msra.mxu1 %v8551_v11  ;;  %6163 = vmatprep.subr.bf16.mxu0 %v8554_v12 }
 0x694   :  { %7361 = vmatprep.subr.bf16.mxu1 %v8555_v13 }
 0x696   :  { %6164 = vmatpush1.bf16.msra.mxu0 %v8552_v15 }
 0x697   :  { %7362 = vmatpush3.bf16.msra.mxu1 %v8556_v16  ;;  %6176 = vmatprep.subr.bf16.mxu0 %v8559_v17 }
 0x699   :  { %6166 = vmatmul.mubr.bf16.vlgmr.msra.gmra.mrb[24].mxu0 %v9168_v51  ;;  %v8574_v51 = vld [vmem:[#allocation13 + $0x4ac] ss:$28 sps:$4 sm:$0xff]  }
 0x69a   :  { %6293 = vmatmul.mubr.bf16.vlgmr.msra.gmra.mrb[32].mxu1 %v9170_v56  ;;  %6177 = vmatpush1.bf16.msra.mxu0 %v8557_v18 }
 0x69b   :  { %6208 = vmatprep.mubr.bf16.mxu0 %v9174_v58  ;;  %6178 = vmatprep.subr.bf16.mxu0 %v8562_v19  ;;  %v8575_v58 = vld [vmem:[#allocation13 + $0x4e0] ss:$28 sps:$4 sm:$0xff]  }
 0x69e   :  { %6179 = vmatpush1.bf16.msra.mxu0 %v8560_v20 }
 0x69f   :  { %6180 = vmatprep.subr.bf16.mxu0 %v8565_v3 }
 0x6a2   :  { %6181 = vmatpush1.bf16.msra.mxu0 %v8563_v5 }
 0x6a3   :  { %6182 = vmatprep.subr.bf16.mxu0 %v8568_v7 }
 0x6a6   :  { %6183 = vmatpush1.bf16.msra.mxu0 %v8566_v8 }
 0x6a7   :  { %6184 = vmatprep.subr.bf16.mxu0 %v8571_v21 }
 0x6aa   :  { %6185 = vmatpush1.bf16.msra.mxu0 %v8569_v57 }
 0x6ab   :  { %6186 = vmatprep.subr.bf16.mxu0 %v8574_v51 }
 0x6ae   :  { %6187 = vmatpush1.bf16.msra.mxu0 %v8572_v22 }
 0x6af   :  { %6188 = vmatprep.subr.bf16.mxu0 %v8577_v23 }
 0x6b2   :  { %6189 = vmatpush1.bf16.msra.mxu0 %v8575_v58 }
 0x6b3   :  { %6190 = vmatprep.subr.bf16.mxu0 %v8580_v24 }
 0x6b6   :  { %6191 = vmatpush1.bf16.msra.mxu0 %v8578_v53 }
 0x6b7   :  { %6192 = vmatprep.subr.bf16.mxu0 %v8583_v25 }
 0x6ba   :  { %6193 = vmatpush1.bf16.msra.mxu0 %v8581_v26 }
 0x6bb   :  { %6194 = vmatprep.subr.bf16.mxu0 %v8586_v27 }
 0x6be   :  { %6195 = vmatpush1.bf16.msra.mxu0 %v8584_v28 }
 0x6bf   :  { %6196 = vmatprep.subr.bf16.mxu0 %v8589_v29 }
 0x6c2   :  { %6197 = vmatpush1.bf16.msra.mxu0 %v8587_v30 }
 0x6c3   :  { %6198 = vmatprep.subr.bf16.mxu0 %v8592_v14 }
 0x6c6   :  { %6199 = vmatpush1.bf16.msra.mxu0 %v8590_v31 }
 0x6c7   :  { %6200 = vmatprep.subr.bf16.mxu0 %v8595_v32 }
 0x6ca   :  { %6201 = vmatpush1.bf16.msra.mxu0 %v8593_v33 }
 0x6cb   :  { %6202 = vmatprep.subr.bf16.mxu0 %v8598_v34 }
 0x6ce   :  { %6203 = vmatpush1.bf16.msra.mxu0 %v8596_v35 }
 0x6cf   :  { %6204 = vmatprep.subr.bf16.mxu0 %v8601_v36 }
 0x6d2   :  { %6205 = vmatpush1.bf16.msra.mxu0 %v8599_v37 }
 0x6d3   :  { %6206 = vmatprep.subr.bf16.mxu0 %v8604_v38 }
 0x6d6   :  { %6207 = vmatpush1.bf16.msra.mxu0 %v8602_v39 }
 0x6d9   :  { %6209 = vmatmul.mubr.bf16.vlgmr.msra.gmra.mrb[24].mxu0 %v9170_v56 }
 0x72c   :  { %v6038_v45 = vpop.f32.mrb[20].mxu0  ;;  %v6124_v46 = vpop.f32.mrb[24].mxu1 }
 0x72d   :  { %v7397_v56 = vadd.f32 %v6038_v45, %v4777_v41  ;;  %v7401_v47 = vadd.f32 %v6124_v46, %v4785_v42  ;;  %v6040_v48 = vpop.f32.mrb[21].mxu0  ;;  %v6126_v49 = vpop.f32.mrb[25].mxu1 }
 0x72e   :  { %v7398_v50 = vadd.f32 %v6040_v48, %v4781_v43  ;;  %v7402_v59 = vadd.f32 %v6126_v49, %v4789_v44  ;;  %v6042_v60 = vpop.f32.mrb[22].mxu0  ;;  %v6128_v61 = vpop.f32.mrb[26].mxu1 }
 0x72f   :  { %v7251_v54 = vmul.f32 -1.442695, %v7397_v56  ;;  %v7253_v62 = vmul.f32 -1.442695, %v7401_v47  ;;  %v7399_v0 = vadd.f32 %v6042_v60, %v4777_v41  ;;  %v7403_v2 = vadd.f32 %v6128_v61, %v4785_v42  ;;  %v6044_v63 = vpop.f32.mrb[23].mxu0  ;;  %v6130_v1 = vpop.f32.mrb[27].mxu1 }
 0x730   :  { %v7252_v55 = vmul.f32 -1.442695, %v7398_v50  ;;  %v7254_v4 = vmul.f32 -1.442695, %v7402_v59  ;;  %v7400_v6 = vadd.f32 %v6044_v63, %v4781_v43  ;;  %v7404_v9 = vadd.f32 %v6130_v1, %v4789_v44 }
 0x731   :  { %8605 = vpow2.f32 %v7251_v54  ;;  %v7258_v10 = vmul.f32 -1.442695, %v7399_v0  ;;  %v7260_v11 = vmul.f32 -1.442695, %v7403_v2 }
 0x732   :  { %8607 = vpow2.f32 %v7253_v62  ;;  %v7259_v12 = vmul.f32 -1.442695, %v7400_v6  ;;  %v7261_v13 = vmul.f32 -1.442695, %v7404_v9 }
 0x733   :  { %8609 = vpow2.f32 %v7252_v55 }
 0x734   :  { %8611 = vpow2.f32 %v7254_v4 }
 0x735   :  { %8613 = vpow2.f32 %v7258_v10 }
 0x736   :  { %8615 = vpow2.f32 %v7260_v11 }
 0x737   :  { %8617 = vpow2.f32 %v7259_v12 }
 0x738   :  { %8619 = vpow2.f32 %v7261_v13 }
 0x73b   :  { %v8606_v15 = vpop.eup %8605 }
 0x73c   :  { %v8608_v16 = vpop.eup %8607  ;;  %v6343_v17 = vadd.f32 1.0, %v8606_v15 }
 0x73d   :  { %v8610_v18 = vpop.eup %8609  ;;  %v6345_v19 = vadd.f32 1.0, %v8608_v16 }
 0x73e   :  { %v8612_v20 = vpop.eup %8611  ;;  %8621 = vrcp.f32 %v6343_v17  ;;  %v6344_v3 = vadd.f32 1.0, %v8610_v18 }
 0x73f   :  { %v8614_v5 = vpop.eup %8613  ;;  %8623 = vrcp.f32 %v6345_v19  ;;  %v6346_v7 = vadd.f32 1.0, %v8612_v20 }
 0x740   :  { %v8616_v8 = vpop.eup %8615  ;;  %8625 = vrcp.f32 %v6344_v3  ;;  %v6350_v21 = vadd.f32 1.0, %v8614_v5 }
 0x741   :  { %v8618_v57 = vpop.eup %8617  ;;  %8627 = vrcp.f32 %v6346_v7  ;;  %v6352_v51 = vadd.f32 1.0, %v8616_v8 }
 0x742   :  { %v8620_v22 = vpop.eup %8619  ;;  %8629 = vrcp.f32 %v6350_v21  ;;  %v6351_v23 = vadd.f32 1.0, %v8618_v57 }
 0x743   :  { %8631 = vrcp.f32 %v6352_v51  ;;  %v6353_v58 = vadd.f32 1.0, %v8620_v22 }
 0x744   :  { %8633 = vrcp.f32 %v6351_v23 }
 0x745   :  { %8635 = vrcp.f32 %v6353_v58 }
 0x748   :  { %v8622_v24 = vpop.eup %8621 }
 0x749   :  { %v8624_v53 = vpop.eup %8623 }
 0x74a   :  { %v8626_v25 = vpop.eup %8625 }
 0x74b   :  { %v8628_v26 = vpop.eup %8627  ;;  %v7273_v27 = vpack.c.bf16 %v8626_v25, %v8622_v24 }
 0x74c   :  { %v8630_v28 = vpop.eup %8629  ;;  %v7274_v29 = vpack.c.bf16 %v8628_v26, %v8624_v53 }
 0x74d   :  { %v8632_v30 = vpop.eup %8631  ;;  %6429 = vst [vmem:[#allocation14] sm:$0xff] %v7273_v27  ;;  %v7341_v14 = vpop.f32.mrb[28].mxu1 }
 0x74e   :  { %v8634_v31 = vpop.eup %8633  ;;  %6430 = vst [vmem:[#allocation14 + $0x8] sm:$0xff] %v7274_v29  ;;  %v7342_v32 = vpop.f32.mrb[29].mxu1 }
 0x74f   :  { %v8636_v33 = vpop.eup %8635  ;;  %v7277_v34 = vpack.c.bf16 %v8634_v31, %v8630_v28  ;;  %v7343_v35 = vadd.f32 %v7342_v32, %v7341_v14  ;;  %v7344_v36 = vpop.f32.mrb[30].mxu1 }
 0x750   :  { %v7278_v37 = vpack.c.bf16 %v8636_v33, %v8632_v30  ;;  %v7345_v38 = vpop.f32.mrb[31].mxu1 }
 0x751   :  { %6433 = vst [vmem:[#allocation14 + $0x1c] sm:$0xff] %v7277_v34  ;;  %v7346_v39 = vadd.f32 %v7345_v38, %v7344_v36 }
 0x752   :  { %6434 = vst [vmem:[#allocation14 + $0x24] sm:$0xff] %v7278_v37 }
 0x753   :  { %8827 = shalt.err (!%p8824_p4)
}
 0x754   :  { %s8828_s17 = scalar_lea.hbm %s9252_s14, 256 }
 0x755   :  { %p8829_p5 = scmp.ne.s32.totalorder %s9252_s14, %s8828_s17  ;;  %p8832_p6 = scmp.lt.u32.totalorder %s8828_s17, %s9252_s14 }
 0x757   :  { %p8834_p7 = pnand %p8832_p6, %p8829_p5 }
 0x759   :  { %8837 = shalt.err (!%p8834_p7)
}
 0x75a   :  { %s8887_s20 = smov 128   ;;  %s8888_s21 = smov 8   ;;  %v4800_v41 = vsub.s32 6, %v9107_v52  ;;  %v4792_v6 = vsub.s32 4, %v9107_v52  ;;  %v4796_v9 = vsub.s32 5, %v9107_v52 }
 0x75b   :  { %6462 = dma.vmem_to_hbm [thread:$0]  %s6457_s3, 256, %s9252_s14, [#allocation16], %s8887_s20, %s8887_s20, %s8888_s21  }
 0x75c   :  { %v4801_v42 = vrot.slane %v9195_v40, %v4800_v41  ;;  %v4793_v10 = vrot.slane %v9195_v40, %v4792_v6  ;;  %v4797_v11 = vrot.slane %v9195_v40, %v4796_v9  ;;  %s8889_s14 = smov [#allocation14]  }
 0x75d   :  { %s6444_s24 = sshll.u32 %s8889_s14, 4  ;;  %s6445_s24 = int_to_ptr.vmem [resolvable:$true] %s6444_s24 }
 0x75e   :  { %v6254_v45 = vadd.f32 %v7343_v35, %v4801_v42  ;;  %v6257_v48 = vadd.f32 %v7346_v39, %v4801_v42  ;;  %s8838_s11 = scalar_lea.vmem %s6445_s24, 896  ;;  %p8843_p9 = scmp.lt.s32.totalorder %s6445_s24, %s6445_s24 }
 0x75f   :  { %p8839_p8 = scmp.ne.s32.totalorder %s6445_s24, %s8838_s11  ;;  %p8844_p10 = scmp.lt.s32.totalorder %s8838_s11, %s8838_s11 }
 0x761   :  { %p8845_p11 = por %p8844_p10, %p8843_p9 }
 0x763   :  { %p8846_p12 = pnand %p8845_p11, %p8839_p8 }
 0x76d   :  { %v7363_v43 = vpop.f32.mrb[32].mxu1 }
 0x76e   :  { %v7364_v44 = vpop.f32.mrb[33].mxu1 }
 0x76f   :  { %v7365_v46 = vadd.f32 %v7364_v44, %v7363_v43  ;;  %v7366_v56 = vpop.f32.mrb[34].mxu1 }
 0x770   :  { %v7367_v47 = vpop.f32.mrb[35].mxu1 }
 0x771   :  { %v6295_v49 = vadd.f32 %v7365_v46, %v6254_v45  ;;  %v7368_v50 = vadd.f32 %v7367_v47, %v7366_v56 }
 0x773   :  { %v7257_v59 = vmul.f32 -1.442695, %v6295_v49  ;;  %v6298_v60 = vadd.f32 %v7368_v50, %v6257_v48 }
 0x775   :  { %8637 = vpow2.f32 %v7257_v59  ;;  %v7264_v61 = vmul.f32 -1.442695, %v6298_v60 }
 0x777   :  { %8639 = vpow2.f32 %v7264_v61 }
 0x77f   :  { %v8638_v54 = vpop.eup %8637 }
 0x780   :  { %v6349_v62 = vadd.f32 1.0, %v8638_v54 }
 0x781   :  { %v8640_v0 = vpop.eup %8639 }
 0x782   :  { %8641 = vrcp.f32 %v6349_v62  ;;  %v6356_v2 = vadd.f32 1.0, %v8640_v0 }
 0x784   :  { %8643 = vrcp.f32 %v6356_v2 }
 0x78c   :  { %v8642_v63 = vpop.eup %8641 }
 0x78d   :  { %v7276_v1 = vpack.c.bf16 %v8642_v63, %v8642_v63 }
 0x78e   :  { %v8644_v55 = vpop.eup %8643 }
 0x78f   :  { %6432 = vst [vmem:[#allocation14 + $0x18] sm:$0xf] %v7276_v1  ;;  %v7280_v4 = vpack.c.bf16 %v8644_v55, %v8644_v55 }
 0x791   :  { %6436 = vst [vmem:[#allocation14 + $0x34] sm:$0xf] %v7280_v4 }
 0x7ac   :  { %v6210_v12 = vpop.f32.mrb[24].mxu0 }
 0x7ad   :  { %v7405_v13 = vadd.f32 %v6210_v12, %v4793_v10  ;;  %v6212_v15 = vpop.f32.mrb[25].mxu0 }
 0x7ae   :  { %v7406_v16 = vadd.f32 %v6212_v15, %v4797_v11  ;;  %v6214_v17 = vpop.f32.mrb[26].mxu0 }
 0x7af   :  { %v7255_v18 = vmul.f32 -1.442695, %v7405_v13  ;;  %v7407_v19 = vadd.f32 %v6214_v17, %v4793_v10  ;;  %v6216_v20 = vpop.f32.mrb[27].mxu0 }
 0x7b0   :  { %v7256_v3 = vmul.f32 -1.442695, %v7406_v16  ;;  %v7408_v5 = vadd.f32 %v6216_v20, %v4797_v11 }
 0x7b1   :  { %8645 = vpow2.f32 %v7255_v18  ;;  %v7262_v7 = vmul.f32 -1.442695, %v7407_v19 }
 0x7b2   :  { %8647 = vpow2.f32 %v7256_v3  ;;  %v7263_v8 = vmul.f32 -1.442695, %v7408_v5 }
 0x7b3   :  { %8649 = vpow2.f32 %v7262_v7 }
 0x7b4   :  { %8651 = vpow2.f32 %v7263_v8 }
 0x7bb   :  { %v8646_v52 = vpop.eup %8645 }
 0x7bc   :  { %v8648_v21 = vpop.eup %8647  ;;  %v6347_v57 = vadd.f32 1.0, %v8646_v52 }
 0x7bd   :  { %v8650_v40 = vpop.eup %8649  ;;  %v6348_v51 = vadd.f32 1.0, %v8648_v21 }
 0x7be   :  { %v8652_v22 = vpop.eup %8651  ;;  %8653 = vrcp.f32 %v6347_v57  ;;  %v6354_v23 = vadd.f32 1.0, %v8650_v40 }
 0x7bf   :  { %8655 = vrcp.f32 %v6348_v51  ;;  %v6355_v58 = vadd.f32 1.0, %v8652_v22 }
 0x7c0   :  { %8657 = vrcp.f32 %v6354_v23 }
 0x7c1   :  { %8659 = vrcp.f32 %v6355_v58 }
 0x7c8   :  { %v8654_v24 = vpop.eup %8653 }
 0x7c9   :  { %v8656_v53 = vpop.eup %8655 }
 0x7ca   :  { %v8658_v25 = vpop.eup %8657  ;;  %v7275_v26 = vpack.c.bf16 %v8656_v53, %v8654_v24 }
 0x7cb   :  { %v8660_v27 = vpop.eup %8659 }
 0x7cc   :  { %6431 = vst [vmem:[#allocation14 + $0x10] sm:$0xff] %v7275_v26  ;;  %v7279_v28 = vpack.c.bf16 %v8660_v27, %v8658_v25 }
 0x7ce   :  { %6435 = vst [vmem:[#allocation14 + $0x2c] sm:$0xff] %v7279_v28 }
 0x7cf   :  { %8849 = shalt.err (!%p8846_p12)
}
 0x7d0   :  { %s8850_s30 = scalar_lea.hbm %s9251_s13, 896 }
 0x7d1   :  { %p8851_p13 = scmp.ne.s32.totalorder %s9251_s13, %s8850_s30  ;;  %p8854_p0 = scmp.lt.u32.totalorder %s8850_s30, %s9251_s13 }
 0x7d3   :  { %p8856_p1 = pnand %p8854_p0, %p8851_p13 }
 0x7d5   :  { %8859 = shalt.err (!%p8856_p1)
}
 0x7d6   :  { %6450 = dma.vmem_to_hbm [thread:$0]  %s6445_s24, 896, %s9251_s13, [#allocation4], %s8880_s9, %s8880_s9, %s8881_s27  }
 0x7d7   :  { %8868 = dma.done.wait [#allocation4], 896  }
 0x7d8   :  { %8869 = vsyncadd [#allocation4], 4294966400 }
 0x7d9   :  { %8870 = dma.done.wait [#allocation16], 256  }
 0x7da   :  { %8871 = vsyncadd [#allocation16], 4294967040 }
 0x7db   :  { %6469 = vsyncpa [#allocation3], 1 }
 0x7dc   :  { %6470 = vsyncpa [#allocation6], 1 }
 0x7dd   :  { %6471 = vsyncpa [#allocation9], 1 }
 0x7de   :  { %6472 = vsyncpa [#allocation12], 1 }
 0x7df   :  { %6473 = vsyncpa [#allocation4], 1 }
 0x7e0   :  { %6474 = vsyncpa [#allocation16], 1 }

// kernel: tpu_custom_call.1
= control target key start
LH: loop header
LB: loop body
LE: loop exit
PB: predicated region body
PF: predicated region fallthrough
CT: control target
= control target key end

     0   :  { %20 = vsyncpa [#allocation3], 0  ;;  %s9238_s0 = inlined_call_operand.hbm [shape: bf16[16,896], index: 0, kind: input, shape index: {}]   ;;  %s9239_s1 = inlined_call_operand.hbm [shape: bf16[896,512], index: 1, kind: input, shape index: {}]   ;;  %s9240_s2 = inlined_call_operand.vmem [shape: f32[1,512], index: 2, kind: input, shape index: {}]   ;;  %s9241_s3 = inlined_call_operand.hbm [shape: bf16[512,512], index: 3, kind: input, shape index: {}]   ;;  %s9242_s4 = inlined_call_operand.vmem [shape: f32[1,512], index: 4, kind: input, shape index: {}]   ;;  %s9243_s5 = inlined_call_operand.hbm [shape: bf16[512,128], index: 5, kind: input, shape index: {}]   ;;  %s9244_s6 = inlined_call_operand.vmem [shape: f32[1,128], index: 6, kind: input, shape index: {}]   ;;  %s9245_s7 = inlined_call_operand.hbm [shape: bf16[128,512], index: 7, kind: input, shape index: {}]   ;;  %s9246_s8 = inlined_call_operand.vmem [shape: f32[1,512], index: 8, kind: input, shape index: {}]   ;;  %s9247_s9 = inlined_call_operand.hbm [shape: bf16[512,512], index: 9, kind: input, shape index: {}]   ;;  %s9248_s10 = inlined_call_operand.vmem [shape: f32[1,512], index: 10, kind: input, shape index: {}]   ;;  %s9249_s11 = inlined_call_operand.hbm [shape: bf16[512,896], index: 11, kind: input, shape index: {}]   ;;  %s9250_s12 = inlined_call_operand.vmem [shape: f32[1,896], index: 12, kind: input, shape index: {}]   ;;  %s9251_s13 = inlined_call_operand.hbm [shape: bf16[16,896], index: 13, kind: output, shape index: {0}]   ;;  %s9252_s14 = inlined_call_operand.hbm [shape: f32[16,128], index: 14, kind: output, shape index: {1}]  }
   0x1   :  { %21 = vsyncpa [#allocation6], 0 }
   0x2   :  { %22 = vsyncpa [#allocation9], 0 }
   0x3   :  { %23 = vsyncpa [#allocation12], 0 }
   0x4   :  { %24 = vsyncpa [#allocation4], 0 }
   0x5   :  { %25 = vsyncpa [#allocation16], 0  ;;  %s8872_s29 = smov [#allocation5]   ;;  %s8662_s17 = scalar_lea.hbm %s9239_s1, 28672 }
   0x6   :  { %s43_s30 = sshll.u32 %s8872_s29, 4  ;;  %p8663_p0 = scmp.ne.s32.totalorder %s9239_s1, %s8662_s17  ;;  %s44_s30 = int_to_ptr.vmem [resolvable:$true] %s43_s30 }
   0x7   :  { %p8666_p1 = scmp.lt.u32.totalorder %s8662_s17, %s9239_s1 }
   0x9   :  { %p8668_p2 = pnand %p8666_p1, %p8663_p0 }
   0xb   :  { %8671 = shalt.err (!%p8668_p2)
}
   0xc   :  { %s8672_s22 = scalar_lea.vmem %s44_s30, 28672  ;;  %p8677_p4 = scmp.lt.s32.totalorder %s44_s30, %s44_s30 }
   0xd   :  { %p8673_p3 = scmp.ne.s32.totalorder %s44_s30, %s8672_s22  ;;  %p8678_p5 = scmp.lt.s32.totalorder %s8672_s22, %s8672_s22 }
   0xf   :  { %p8679_p6 = por %p8678_p5, %p8677_p4 }
  0x11   :  { %p8680_p7 = pnand %p8679_p6, %p8673_p3 }
  0x13   :  { %8683 = shalt.err (!%p8680_p7)
}
  0x14   :  { %s9253_s23 = smov 256   ;;  %s8874_s24 = smov 16  }
  0x15   :  { %49 = dma.hbm_to_vmem [thread:$0]  %s9239_s1, 28672, %s44_s30, [#allocation6], %s9253_s23, %s9253_s23, %s8874_s24  }
  0x16   :  { %s8875_s27 = smov [#allocation8]   ;;  %s8684_s16 = scalar_lea.hbm %s9243_s5, 4096 }
  0x17   :  { %s71_s28 = sshll.u32 %s8875_s27, 4  ;;  %p8685_p8 = scmp.ne.s32.totalorder %s9243_s5, %s8684_s16  ;;  %s72_s28 = int_to_ptr.vmem [resolvable:$true] %s71_s28 }
  0x18   :  { %p8688_p9 = scmp.lt.u32.totalorder %s8684_s16, %s9243_s5 }
  0x1a   :  { %p8690_p10 = pnand %p8688_p9, %p8685_p8 }
  0x1c   :  { %8693 = shalt.err (!%p8690_p10)
}
  0x1d   :  { %s8694_s21 = scalar_lea.vmem %s72_s28, 4096  ;;  %p8699_p12 = scmp.lt.s32.totalorder %s72_s28, %s72_s28 }
  0x1e   :  { %p8695_p11 = scmp.ne.s32.totalorder %s72_s28, %s8694_s21  ;;  %p8700_p13 = scmp.lt.s32.totalorder %s8694_s21, %s8694_s21 }
  0x20   :  { %p8701_p0 = por %p8700_p13, %p8699_p12 }
  0x22   :  { %p8702_p1 = pnand %p8701_p0, %p8695_p11 }
  0x24   :  { %8705 = shalt.err (!%p8702_p1)
}
  0x25   :  { %s8876_s1 = smov 64   ;;  %s8877_s30 = smov 4  }
  0x26   :  { %77 = dma.hbm_to_vmem [thread:$0]  %s9243_s5, 4096, %s72_s28, [#allocation9], %s8876_s1, %s8876_s1, %s8877_s30  }
  0x27   :  { %s8878_s26 = smov [#allocation11]   ;;  %s8879_s29 = smov [#allocation2]  }
  0x28   :  { %s99_s27 = sshll.u32 %s8878_s26, 4  ;;  %s31_s15 = sshll.u32 %s8879_s29, 4  ;;  %s100_s27 = int_to_ptr.vmem [resolvable:$true] %s99_s27  ;;  %s8992_s15 = int_to_ptr.vmem [resolvable:$true] %s31_s15 }
  0x29   :  { %s8706_s18 = scalar_lea.hbm %s9247_s9, 16384 }
  0x2a   :  { %p8707_p2 = scmp.ne.s32.totalorder %s9247_s9, %s8706_s18  ;;  %p8710_p3 = scmp.lt.u32.totalorder %s8706_s18, %s9247_s9 }
  0x2c   :  { %p8712_p4 = pnand %p8710_p3, %p8707_p2 }
  0x2e   :  { %8715 = shalt.err (!%p8712_p4)
}
  0x2f   :  { %s8716_s5 = scalar_lea.vmem %s100_s27, 16384  ;;  %p8721_p6 = scmp.lt.s32.totalorder %s100_s27, %s100_s27 }
  0x30   :  { %p8717_p5 = scmp.ne.s32.totalorder %s100_s27, %s8716_s5  ;;  %p8722_p7 = scmp.lt.s32.totalorder %s8716_s5, %s8716_s5 }
  0x32   :  { %p8723_p8 = por %p8722_p7, %p8721_p6 }
  0x34   :  { %p8724_p9 = pnand %p8723_p8, %p8717_p5 }
  0x36   :  { %8727 = shalt.err (!%p8724_p9)
}
  0x37   :  { %s9255_s28 = smov 256   ;;  %s8728_s23 = scalar_lea.hbm %s9238_s0, 896 }
  0x38   :  { %105 = dma.hbm_to_vmem [thread:$0]  %s9247_s9, 16384, %s100_s27, [#allocation12], %s9255_s28, %s9255_s28, %s8874_s24  }
  0x39   :  { %p8729_p10 = scmp.ne.s32.totalorder %s9238_s0, %s8728_s23  ;;  %p8732_p11 = scmp.lt.u32.totalorder %s8728_s23, %s9238_s0 }
  0x3b   :  { %p8734_p12 = pnand %p8732_p11, %p8729_p10 }
  0x3d   :  { %8737 = shalt.err (!%p8734_p12)
}
  0x3e   :  { %s8738_s18 = scalar_lea.vmem %s8992_s15, 896  ;;  %p8743_p0 = scmp.lt.s32.totalorder %s8992_s15, %s8992_s15 }
  0x3f   :  { %p8739_p13 = scmp.ne.s32.totalorder %s8992_s15, %s8738_s18  ;;  %p8744_p1 = scmp.lt.s32.totalorder %s8738_s18, %s8738_s18 }
  0x41   :  { %p8745_p2 = por %p8744_p1, %p8743_p0 }
  0x43   :  { %p8746_p3 = pnand %p8745_p2, %p8739_p13 }
  0x45   :  { %8749 = shalt.err (!%p8746_p3)
}
  0x46   :  { %s8880_s9 = smov 448   ;;  %s8881_s27 = smov 28  }
  0x47   :  { %37 = dma.hbm_to_vmem [thread:$0]  %s9238_s0, 896, %s8992_s15, [#allocation3], %s8880_s9, %s8880_s9, %s8881_s27  }
  0x48   :  { %s8882_s21 = smov [#allocation7]   ;;  %s8883_s1 = smov [#allocation10]  }
  0x49   :  { %s57_s5 = sshll.u32 %s8882_s21, 4  ;;  %s85_s30 = sshll.u32 %s8883_s1, 4  ;;  %s58_s5 = int_to_ptr.vmem [resolvable:$true] %s57_s5  ;;  %s9029_s30 = int_to_ptr.vmem [resolvable:$true] %s85_s30 }
  0x4a   :  { %s8750_s23 = scalar_lea.hbm %s9241_s3, 16384 }
  0x4b   :  { %p8751_p4 = scmp.ne.s32.totalorder %s9241_s3, %s8750_s23  ;;  %p8754_p5 = scmp.lt.u32.totalorder %s8750_s23, %s9241_s3 }
  0x4d   :  { %p8756_p6 = pnand %p8754_p5, %p8751_p4 }
  0x4f   :  { %8759 = shalt.err (!%p8756_p6)
}
  0x50   :  { %s8760_s0 = scalar_lea.vmem %s58_s5, 16384  ;;  %p8765_p8 = scmp.lt.s32.totalorder %s58_s5, %s58_s5 }
  0x51   :  { %p8761_p7 = scmp.ne.s32.totalorder %s58_s5, %s8760_s0  ;;  %p8766_p9 = scmp.lt.s32.totalorder %s8760_s0, %s8760_s0 }
  0x53   :  { %p8767_p10 = por %p8766_p9, %p8765_p8 }
  0x55   :  { %p8768_p11 = pnand %p8767_p10, %p8761_p7 }
  0x57   :  { %8771 = shalt.err (!%p8768_p11)
}
  0x58   :  { %63 = dma.hbm_to_vmem [thread:$0]  %s9241_s3, 16384, %s58_s5, [#allocation6], %s9255_s28, %s9255_s28, %s8874_s24  }
  0x59   :  { %s8772_s21 = scalar_lea.hbm %s9245_s7, 4096 }
  0x5a   :  { %p8773_p12 = scmp.ne.s32.totalorder %s9245_s7, %s8772_s21  ;;  %p8776_p13 = scmp.lt.u32.totalorder %s8772_s21, %s9245_s7 }
  0x5c   :  { %p8778_p0 = pnand %p8776_p13, %p8773_p12 }
  0x5e   :  { %8781 = shalt.err (!%p8778_p0)
}
  0x5f   :  { %s8782_s26 = scalar_lea.vmem %s9029_s30, 4096  ;;  %p8787_p2 = scmp.lt.s32.totalorder %s9029_s30, %s9029_s30 }
  0x60   :  { %p8783_p1 = scmp.ne.s32.totalorder %s9029_s30, %s8782_s26  ;;  %p8788_p3 = scmp.lt.s32.totalorder %s8782_s26, %s8782_s26 }
  0x62   :  { %p8789_p4 = por %p8788_p3, %p8787_p2 }
  0x64   :  { %p8790_p5 = pnand %p8789_p4, %p8783_p1 }
  0x66   :  { %8793 = shalt.err (!%p8790_p5)
}
  0x67   :  { %91 = dma.hbm_to_vmem [thread:$0]  %s9245_s7, 4096, %s9029_s30, [#allocation9], %s9255_s28, %s9255_s28, %s8874_s24  }
  0x68   :  { %s8884_s29 = smov [#allocation13]   ;;  %s8794_s15 = scalar_lea.hbm %s9249_s11, 28672 }
  0x69   :  { %s113_s16 = sshll.u32 %s8884_s29, 4  ;;  %p8795_p6 = scmp.ne.s32.totalorder %s9249_s11, %s8794_s15  ;;  %s114_s16 = int_to_ptr.vmem [resolvable:$true] %s113_s16 }
  0x6a   :  { %p8798_p7 = scmp.lt.u32.totalorder %s8794_s15, %s9249_s11 }
  0x6c   :  { %p8800_p8 = pnand %p8798_p7, %p8795_p6 }
  0x6e   :  { %8803 = shalt.err (!%p8800_p8)
}
  0x6f   :  { %s8804_s1 = scalar_lea.vmem %s114_s16, 28672  ;;  %p8809_p10 = scmp.lt.s32.totalorder %s114_s16, %s114_s16 }
  0x70   :  { %p8805_p9 = scmp.ne.s32.totalorder %s114_s16, %s8804_s1  ;;  %p8810_p11 = scmp.lt.s32.totalorder %s8804_s1, %s8804_s1 }
  0x72   :  { %p8811_p12 = por %p8810_p11, %p8809_p10 }
  0x74   :  { %p8812_p13 = pnand %p8811_p12, %p8805_p9 }
  0x76   :  { %8815 = shalt.err (!%p8812_p13)
}
  0x77   :  { %119 = dma.hbm_to_vmem [thread:$0]  %s9249_s11, 28672, %s114_s16, [#allocation12], %s8880_s9, %s8880_s9, %s8881_s27  }
  0x78   :  { %8860 = dma.done.wait [#allocation3], 896  }
  0x79   :  { %8861 = vsyncadd [#allocation3], 4294966400 }
  0x7a   :  { %8862 = dma.done.wait [#allocation6], 45056  }
  0x7b   :  { %8863 = vsyncadd [#allocation6], 4294922240 }
  0x7c   :  { %8864 = dma.done.wait [#allocation9], 8192  }
  0x7d   :  { %8865 = vsyncadd [#allocation9], 4294959104 }
  0x7e   :  { %8866 = dma.done.wait [#allocation12], 45056  }
  0x7f   :  { %8867 = vsyncadd [#allocation12], 4294922240  ;;  %v8885_v0 = vmov 0   ;;  %v7475_v1 = vld [vmem:[#allocation5 + $0x4] ss:$16 sps:$4 sm:$0xff]  }
  0x80   :  { %1715 = vmatprep.mubr.bf16.mxu1 %v8885_v0  ;;  %v7477_v2 = vld [vmem:[#allocation5 + $0x604] ss:$16 sps:$4 sm:$0xff]   ;;  %1554 = vmatprep.subr.bf16.mxu0 %v7475_v1  ;;  %v7479_v3 = vld [vmem:[#allocation5] ss:$16 sps:$4 sm:$0xff]   ;;  %v7528_v34 = vld [vmem:[#allocation5 + $0xc] ss:$16 sps:$4 sm:$0xff]  }
  0x81   :  { %v7480_v4 = vld [vmem:[#allocation5 + $0x600] ss:$16 sps:$4 sm:$0xff]   ;;  %1683 = vmatprep.subr.bf16.mxu1 %v7477_v2  ;;  %v7481_v5 = vld [vmem:[#allocation5 + $0x24] ss:$16 sps:$4 sm:$0xff]   ;;  %1555 = vmatpush1.bf16.msra.mxu0 %v7479_v3  ;;  %v7526_v36 = vld [vmem:[#allocation5 + $0x8] ss:$16 sps:$4 sm:$0xff]  }
  0x82   :  { %1684 = vmatpush1.bf16.msra.mxu1 %v7480_v4  ;;  %v7483_v6 = vld [vmem:[#allocation5 + $0x624] ss:$16 sps:$4 sm:$0xff]   ;;  %v7485_v7 = vld [vmem:[#allocation5 + $0x20] ss:$16 sps:$4 sm:$0xff]   ;;  %1556 = vmatprep.subr.bf16.mxu0 %v7481_v5  ;;  %v7534_v39 = vld [vmem:[#allocation5 + $0x2c] ss:$16 sps:$4 sm:$0xff]  }
  0x83   :  { %v7486_v8 = vld [vmem:[#allocation5 + $0x620] ss:$16 sps:$4 sm:$0xff]   ;;  %1685 = vmatprep.subr.bf16.mxu1 %v7483_v6  ;;  %v7487_v9 = vld [vmem:[#allocation5 + $0x44] ss:$16 sps:$4 sm:$0xff]   ;;  %v7532_v40 = vld [vmem:[#allocation5 + $0x28] ss:$16 sps:$4 sm:$0xff]  }
  0x84   :  { %v7489_v10 = vld [vmem:[#allocation5 + $0x644] ss:$16 sps:$4 sm:$0xff]   ;;  %v7491_v11 = vld [vmem:[#allocation5 + $0x40] ss:$16 sps:$4 sm:$0xff]   ;;  %v7540_v43 = vld [vmem:[#allocation5 + $0x4c] ss:$16 sps:$4 sm:$0xff]  }
  0x85   :  { %v7492_v12 = vld [vmem:[#allocation5 + $0x640] ss:$16 sps:$4 sm:$0xff]   ;;  %1557 = vmatpush1.bf16.msra.mxu0 %v7485_v7  ;;  %v7493_v13 = vld [vmem:[#allocation5 + $0x64] ss:$16 sps:$4 sm:$0xff]   ;;  %v7538_v44 = vld [vmem:[#allocation5 + $0x48] ss:$16 sps:$4 sm:$0xff]  }
  0x86   :  { %1686 = vmatpush1.bf16.msra.mxu1 %v7486_v8  ;;  %1558 = vmatprep.subr.bf16.mxu0 %v7487_v9  ;;  %v7495_v14 = vld [vmem:[#allocation5 + $0x664] ss:$16 sps:$4 sm:$0xff]   ;;  %v7497_v15 = vld [vmem:[#allocation5 + $0x60] ss:$16 sps:$4 sm:$0xff]   ;;  %v7546_v47 = vld [vmem:[#allocation5 + $0x6c] ss:$16 sps:$4 sm:$0xff]  }
  0x87   :  { %1687 = vmatprep.subr.bf16.mxu1 %v7489_v10  ;;  %v7498_v16 = vld [vmem:[#allocation5 + $0x660] ss:$16 sps:$4 sm:$0xff]   ;;  %v7499_v17 = vld [vmem:[#allocation5 + $0x84] ss:$16 sps:$4 sm:$0xff]   ;;  %v7544_v48 = vld [vmem:[#allocation5 + $0x68] ss:$16 sps:$4 sm:$0xff]  }
  0x88   :  { %v7501_v18 = vld [vmem:[#allocation5 + $0x684] ss:$16 sps:$4 sm:$0xff]   ;;  %v7503_v19 = vld [vmem:[#allocation5 + $0x80] ss:$16 sps:$4 sm:$0xff]   ;;  %v7574_v51 = vld [vmem:[#allocation2 + $0x4] ss:$28 sps:$4 sm:$0xff]  }
  0x89   :  { %1559 = vmatpush1.bf16.msra.mxu0 %v7491_v11  ;;  %v7504_v20 = vld [vmem:[#allocation5 + $0x680] ss:$16 sps:$4 sm:$0xff]   ;;  %v7505_v21 = vld [vmem:[#allocation5 + $0xa4] ss:$16 sps:$4 sm:$0xff]   ;;  %v7552_v52 = vld [vmem:[#allocation5 + $0x8c] ss:$16 sps:$4 sm:$0xff]   ;;  %1586 = vmatprep.mubr.bf16.mxu0 %v7574_v51 }
  0x8a   :  { %1688 = vmatpush1.bf16.msra.mxu1 %v7492_v12  ;;  %1560 = vmatprep.subr.bf16.mxu0 %v7493_v13  ;;  %v7507_v22 = vld [vmem:[#allocation5 + $0x6a4] ss:$16 sps:$4 sm:$0xff]   ;;  %v7509_v23 = vld [vmem:[#allocation5 + $0xa0] ss:$16 sps:$4 sm:$0xff]   ;;  %v7550_v53 = vld [vmem:[#allocation5 + $0x88] ss:$16 sps:$4 sm:$0xff]  }
  0x8b   :  { %1689 = vmatprep.subr.bf16.mxu1 %v7495_v14  ;;  %v7510_v24 = vld [vmem:[#allocation5 + $0x6a0] ss:$16 sps:$4 sm:$0xff]   ;;  %v7511_v25 = vld [vmem:[#allocation5 + $0xc4] ss:$16 sps:$4 sm:$0xff]   ;;  %v7558_v56 = vld [vmem:[#allocation5 + $0xac] ss:$16 sps:$4 sm:$0xff]  }
  0x8c   :  { %v7513_v26 = vld [vmem:[#allocation5 + $0x6c4] ss:$16 sps:$4 sm:$0xff]   ;;  %v7515_v27 = vld [vmem:[#allocation5 + $0xc0] ss:$16 sps:$4 sm:$0xff]   ;;  %v7556_v57 = vld [vmem:[#allocation5 + $0xa8] ss:$16 sps:$4 sm:$0xff]  }
  0x8d   :  { %1561 = vmatpush1.bf16.msra.mxu0 %v7497_v15  ;;  %v7516_v28 = vld [vmem:[#allocation5 + $0x6c0] ss:$16 sps:$4 sm:$0xff]   ;;  %v7517_v29 = vld [vmem:[#allocation5 + $0xe4] ss:$16 sps:$4 sm:$0xff]   ;;  %v7564_v60 = vld [vmem:[#allocation5 + $0xcc] ss:$16 sps:$4 sm:$0xff]  }
  0x8e   :  { %1690 = vmatpush1.bf16.msra.mxu1 %v7498_v16  ;;  %1562 = vmatprep.subr.bf16.mxu0 %v7499_v17  ;;  %v7519_v30 = vld [vmem:[#allocation5 + $0x6e4] ss:$16 sps:$4 sm:$0xff]   ;;  %v7521_v31 = vld [vmem:[#allocation5 + $0xe0] ss:$16 sps:$4 sm:$0xff]   ;;  %v7562_v61 = vld [vmem:[#allocation5 + $0xc8] ss:$16 sps:$4 sm:$0xff]  }
  0x8f   :  { %1691 = vmatprep.subr.bf16.mxu1 %v7501_v18  ;;  %v7522_v32 = vld [vmem:[#allocation5 + $0x6e0] ss:$16 sps:$4 sm:$0xff]   ;;  %v7523_v33 = vld [vmem:[#allocation5 + $0x104] ss:$16 sps:$4 sm:$0xff]   ;;  %v7570_v1 = vld [vmem:[#allocation5 + $0xec] ss:$16 sps:$4 sm:$0xff]  }
  0x90   :  { %v7525_v35 = vld [vmem:[#allocation2 + $0x18] ss:$28 sps:$4 sm:$0xff]   ;;  %v7530_v38 = vld [vmem:[#allocation5 + $0x124] ss:$16 sps:$4 sm:$0xff]   ;;  %v7568_v2 = vld [vmem:[#allocation5 + $0xe8] ss:$16 sps:$4 sm:$0xff]  }
  0x91   :  { %1563 = vmatpush1.bf16.msra.mxu0 %v7503_v19  ;;  %v7529_v37 = vld [vmem:[#allocation5 + $0x100] ss:$16 sps:$4 sm:$0xff]   ;;  %v7536_v42 = vld [vmem:[#allocation5 + $0x144] ss:$16 sps:$4 sm:$0xff]   ;;  %v7580_v5 = vld [vmem:[#allocation5 + $0x10c] ss:$16 sps:$4 sm:$0xff]  }
  0x92   :  { %1692 = vmatpush1.bf16.msra.mxu1 %v7504_v20  ;;  %1564 = vmatprep.subr.bf16.mxu0 %v7505_v21  ;;  %v7535_v41 = vld [vmem:[#allocation5 + $0x120] ss:$16 sps:$4 sm:$0xff]   ;;  %v7542_v46 = vld [vmem:[#allocation5 + $0x164] ss:$16 sps:$4 sm:$0xff]   ;;  %v7578_v8 = vld [vmem:[#allocation5 + $0x108] ss:$16 sps:$4 sm:$0xff]  }
  0x93   :  { %1693 = vmatprep.subr.bf16.mxu1 %v7507_v22  ;;  %v7541_v45 = vld [vmem:[#allocation5 + $0x140] ss:$16 sps:$4 sm:$0xff]   ;;  %v7548_v50 = vld [vmem:[#allocation5 + $0x184] ss:$16 sps:$4 sm:$0xff]   ;;  %v7586_v10 = vld [vmem:[#allocation5 + $0x12c] ss:$16 sps:$4 sm:$0xff]  }
  0x94   :  { %v7547_v49 = vld [vmem:[#allocation5 + $0x160] ss:$16 sps:$4 sm:$0xff]   ;;  %v7554_v55 = vld [vmem:[#allocation5 + $0x1a4] ss:$16 sps:$4 sm:$0xff]   ;;  %v7584_v12 = vld [vmem:[#allocation5 + $0x128] ss:$16 sps:$4 sm:$0xff]  }
  0x95   :  { %1565 = vmatpush1.bf16.msra.mxu0 %v7509_v23  ;;  %v7553_v54 = vld [vmem:[#allocation5 + $0x180] ss:$16 sps:$4 sm:$0xff]   ;;  %v7560_v59 = vld [vmem:[#allocation5 + $0x1c4] ss:$16 sps:$4 sm:$0xff]   ;;  %v7592_v14 = vld [vmem:[#allocation5 + $0x14c] ss:$16 sps:$4 sm:$0xff]  }
  0x96   :  { %1694 = vmatpush1.bf16.msra.mxu1 %v7510_v24  ;;  %1566 = vmatprep.subr.bf16.mxu0 %v7511_v25  ;;  %v7559_v58 = vld [vmem:[#allocation5 + $0x1a0] ss:$16 sps:$4 sm:$0xff]   ;;  %v7566_v63 = vld [vmem:[#allocation5 + $0x1e4] ss:$16 sps:$4 sm:$0xff]   ;;  %v7590_v16 = vld [vmem:[#allocation5 + $0x148] ss:$16 sps:$4 sm:$0xff]  }
  0x97   :  { %1695 = vmatprep.subr.bf16.mxu1 %v7513_v26  ;;  %v7565_v62 = vld [vmem:[#allocation5 + $0x1c0] ss:$16 sps:$4 sm:$0xff]   ;;  %v7577_v4 = vld [vmem:[#allocation5 + $0x204] ss:$16 sps:$4 sm:$0xff]   ;;  %v7598_v18 = vld [vmem:[#allocation5 + $0x16c] ss:$16 sps:$4 sm:$0xff]  }
  0x98   :  { %v7571_v3 = vld [vmem:[#allocation5 + $0x1e0] ss:$16 sps:$4 sm:$0xff]   ;;  %v9082_v6 = vld [vmem:[#allocation2] ss:$28 sps:$4 sm:$0xff]   ;;  %v7604_v22 = vld [vmem:[#allocation5 + $0x18c] ss:$16 sps:$4 sm:$0xff]  }
  0x99   :  { %1567 = vmatpush1.bf16.msra.mxu0 %v7515_v27  ;;  %v7575_v7 = vld [vmem:[#allocation5 + $0x200] ss:$16 sps:$4 sm:$0xff]   ;;  %v7583_v9 = vld [vmem:[#allocation5 + $0x224] ss:$16 sps:$4 sm:$0xff]   ;;  %v7596_v20 = vld [vmem:[#allocation5 + $0x168] ss:$16 sps:$4 sm:$0xff]  }
  0x9a   :  { %1696 = vmatpush1.bf16.msra.mxu1 %v7516_v28  ;;  %1568 = vmatprep.subr.bf16.mxu0 %v7517_v29  ;;  %v7581_v11 = vld [vmem:[#allocation5 + $0x220] ss:$16 sps:$4 sm:$0xff]   ;;  %v7589_v13 = vld [vmem:[#allocation5 + $0x244] ss:$16 sps:$4 sm:$0xff]   ;;  %v7602_v24 = vld [vmem:[#allocation5 + $0x188] ss:$16 sps:$4 sm:$0xff]  }
  0x9b   :  { %1697 = vmatprep.subr.bf16.mxu1 %v7519_v30  ;;  %v7587_v15 = vld [vmem:[#allocation5 + $0x240] ss:$16 sps:$4 sm:$0xff]   ;;  %v7595_v17 = vld [vmem:[#allocation5 + $0x264] ss:$16 sps:$4 sm:$0xff]   ;;  %v7610_v26 = vld [vmem:[#allocation5 + $0x1ac] ss:$16 sps:$4 sm:$0xff]  }
  0x9c   :  { %v7593_v19 = vld [vmem:[#allocation5 + $0x260] ss:$16 sps:$4 sm:$0xff]   ;;  %v7601_v21 = vld [vmem:[#allocation5 + $0x284] ss:$16 sps:$4 sm:$0xff]   ;;  %v7608_v28 = vld [vmem:[#allocation5 + $0x1a8] ss:$16 sps:$4 sm:$0xff]  }
  0x9d   :  { %1569 = vmatpush1.bf16.msra.mxu0 %v7521_v31  ;;  %v7599_v23 = vld [vmem:[#allocation5 + $0x280] ss:$16 sps:$4 sm:$0xff]   ;;  %v7607_v25 = vld [vmem:[#allocation5 + $0x2a4] ss:$16 sps:$4 sm:$0xff]   ;;  %v7616_v30 = vld [vmem:[#allocation5 + $0x1cc] ss:$16 sps:$4 sm:$0xff]  }
  0x9e   :  { %1698 = vmatpush1.bf16.msra.mxu1 %v7522_v32  ;;  %1570 = vmatprep.subr.bf16.mxu0 %v7523_v33  ;;  %v7605_v27 = vld [vmem:[#allocation5 + $0x2a0] ss:$16 sps:$4 sm:$0xff]   ;;  %v7613_v29 = vld [vmem:[#allocation5 + $0x2c4] ss:$16 sps:$4 sm:$0xff]   ;;  %v7614_v32 = vld [vmem:[#allocation5 + $0x1c8] ss:$16 sps:$4 sm:$0xff]  }
  0x9f   :  { %1726 = vmatprep.subr.bf16.mxu1 %v7528_v34  ;;  %v7611_v31 = vld [vmem:[#allocation5 + $0x2c0] ss:$16 sps:$4 sm:$0xff]   ;;  %v7619_v33 = vld [vmem:[#allocation5 + $0x2e4] ss:$16 sps:$4 sm:$0xff]  }
  0xa0   :  { %v7673_v34 = vld [vmem:[#allocation2 + $0xc] ss:$28 sps:$4 sm:$0xff]  }
  0xa1   :  { %1716 = vmatmul.mubr.bf16.vlgmr.msra.gmra.mrb[0].mxu1 %v7525_v35  ;;  %1571 = vmatpush1.bf16.msra.mxu0 %v7529_v37  ;;  %v7622_v35 = vld [vmem:[#allocation5 + $0x1ec] ss:$16 sps:$4 sm:$0xff]   ;;  %v7620_v37 = vld [vmem:[#allocation5 + $0x1e8] ss:$16 sps:$4 sm:$0xff]  }
  0xa2   :  { %1727 = vmatpush1.bf16.msra.mxu1 %v7526_v36  ;;  %1572 = vmatprep.subr.bf16.mxu0 %v7530_v38  ;;  %v7617_v36 = vld [vmem:[#allocation5 + $0x2e0] ss:$16 sps:$4 sm:$0xff]   ;;  %v7625_v38 = vld [vmem:[#allocation5 + $0x304] ss:$16 sps:$4 sm:$0xff]  }
  0xa3   :  { %1728 = vmatprep.subr.bf16.mxu1 %v7534_v39  ;;  %1758 = vmatprep.mubr.bf16.mxu1 %v7574_v51  ;;  %v7628_v39 = vld [vmem:[#allocation5 + $0x20c] ss:$16 sps:$4 sm:$0xff]  }
  0xa4   :  { %v7646_v51 = vld [vmem:[#allocation5 + $0x26c] ss:$16 sps:$4 sm:$0xff]  }
  0xa5   :  { %1573 = vmatpush1.bf16.msra.mxu0 %v7535_v41  ;;  %v7626_v41 = vld [vmem:[#allocation5 + $0x208] ss:$16 sps:$4 sm:$0xff]  }
  0xa6   :  { %1729 = vmatpush1.bf16.msra.mxu1 %v7532_v40  ;;  %1574 = vmatprep.subr.bf16.mxu0 %v7536_v42  ;;  %v7623_v40 = vld [vmem:[#allocation5 + $0x300] ss:$16 sps:$4 sm:$0xff]   ;;  %v7631_v42 = vld [vmem:[#allocation5 + $0x324] ss:$16 sps:$4 sm:$0xff]  }
  0xa7   :  { %1730 = vmatprep.subr.bf16.mxu1 %v7540_v43  ;;  %v7634_v43 = vld [vmem:[#allocation5 + $0x22c] ss:$16 sps:$4 sm:$0xff]  }
  0xa9   :  { %1575 = vmatpush1.bf16.msra.mxu0 %v7541_v45  ;;  %v7632_v45 = vld [vmem:[#allocation5 + $0x228] ss:$16 sps:$4 sm:$0xff]  }
  0xaa   :  { %1731 = vmatpush1.bf16.msra.mxu1 %v7538_v44  ;;  %1576 = vmatprep.subr.bf16.mxu0 %v7542_v46  ;;  %v7629_v44 = vld [vmem:[#allocation5 + $0x320] ss:$16 sps:$4 sm:$0xff]   ;;  %v7637_v46 = vld [vmem:[#allocation5 + $0x344] ss:$16 sps:$4 sm:$0xff]  }
  0xab   :  { %1732 = vmatprep.subr.bf16.mxu1 %v7546_v47  ;;  %v7640_v47 = vld [vmem:[#allocation5 + $0x24c] ss:$16 sps:$4 sm:$0xff]  }
  0xad   :  { %1577 = vmatpush1.bf16.msra.mxu0 %v7547_v49  ;;  %v7638_v49 = vld [vmem:[#allocation5 + $0x248] ss:$16 sps:$4 sm:$0xff]  }
  0xae   :  { %1733 = vmatpush1.bf16.msra.mxu1 %v7544_v48  ;;  %1578 = vmatprep.subr.bf16.mxu0 %v7548_v50  ;;  %v7635_v48 = vld [vmem:[#allocation5 + $0x340] ss:$16 sps:$4 sm:$0xff]   ;;  %v7643_v50 = vld [vmem:[#allocation5 + $0x364] ss:$16 sps:$4 sm:$0xff]  }
  0xaf   :  { %1734 = vmatprep.subr.bf16.mxu1 %v7552_v52  ;;  %v7641_v52 = vld [vmem:[#allocation5 + $0x360] ss:$16 sps:$4 sm:$0xff]  }
  0xb1   :  { %1579 = vmatpush1.bf16.msra.mxu0 %v7553_v54  ;;  %v7649_v54 = vld [vmem:[#allocation5 + $0x384] ss:$16 sps:$4 sm:$0xff]  }
  0xb2   :  { %1735 = vmatpush1.bf16.msra.mxu1 %v7550_v53  ;;  %1580 = vmatprep.subr.bf16.mxu0 %v7554_v55  ;;  %v7644_v53 = vld [vmem:[#allocation5 + $0x268] ss:$16 sps:$4 sm:$0xff]   ;;  %v7652_v55 = vld [vmem:[#allocation5 + $0x28c] ss:$16 sps:$4 sm:$0xff]  }
  0xb3   :  { %1736 = vmatprep.subr.bf16.mxu1 %v7558_v56  ;;  %v7647_v56 = vld [vmem:[#allocation5 + $0x380] ss:$16 sps:$4 sm:$0xff]  }
  0xb5   :  { %1581 = vmatpush1.bf16.msra.mxu0 %v7559_v58  ;;  %v7655_v58 = vld [vmem:[#allocation5 + $0x3a4] ss:$16 sps:$4 sm:$0xff]  }
  0xb6   :  { %1737 = vmatpush1.bf16.msra.mxu1 %v7556_v57  ;;  %1582 = vmatprep.subr.bf16.mxu0 %v7560_v59  ;;  %v7650_v57 = vld [vmem:[#allocation5 + $0x288] ss:$16 sps:$4 sm:$0xff]   ;;  %v7658_v59 = vld [vmem:[#allocation5 + $0x2ac] ss:$16 sps:$4 sm:$0xff]  }
  0xb7   :  { %1738 = vmatprep.subr.bf16.mxu1 %v7564_v60  ;;  %v7653_v60 = vld [vmem:[#allocation5 + $0x3a0] ss:$16 sps:$4 sm:$0xff]  }
  0xb9   :  { %1583 = vmatpush1.bf16.msra.mxu0 %v7565_v62  ;;  %v7661_v62 = vld [vmem:[#allocation5 + $0x3c4] ss:$16 sps:$4 sm:$0xff]  }
  0xba   :  { %1739 = vmatpush1.bf16.msra.mxu1 %v7562_v61  ;;  %1584 = vmatprep.subr.bf16.mxu0 %v7566_v63  ;;  %v7656_v61 = vld [vmem:[#allocation5 + $0x2a8] ss:$16 sps:$4 sm:$0xff]   ;;  %v7664_v63 = vld [vmem:[#allocation5 + $0x2cc] ss:$16 sps:$4 sm:$0xff]  }
  0xbb   :  { %1740 = vmatprep.subr.bf16.mxu1 %v7570_v1  ;;  %v7659_v1 = vld [vmem:[#allocation5 + $0x3c0] ss:$16 sps:$4 sm:$0xff]  }
  0xbd   :  { %1585 = vmatpush1.bf16.msra.mxu0 %v7571_v3  ;;  %v7667_v3 = vld [vmem:[#allocation5 + $0x3e4] ss:$16 sps:$4 sm:$0xff]  }
  0xbe   :  { %1741 = vmatpush1.bf16.msra.mxu1 %v7568_v2  ;;  %1597 = vmatprep.subr.bf16.mxu0 %v7577_v4  ;;  %v7662_v2 = vld [vmem:[#allocation5 + $0x2c8] ss:$16 sps:$4 sm:$0xff]   ;;  %v7670_v4 = vld [vmem:[#allocation5 + $0x2ec] ss:$16 sps:$4 sm:$0xff]  }
  0xbf   :  { %1742 = vmatprep.subr.bf16.mxu1 %v7580_v5  ;;  %v7665_v5 = vld [vmem:[#allocation5 + $0x3e0] ss:$16 sps:$4 sm:$0xff]  }
  0xc0   :  { %1587 = vmatmul.mubr.bf16.vlgmr.msra.gmra.mrb[0].mxu0 %v9082_v6 }
  0xc1   :  { %1598 = vmatpush1.bf16.msra.mxu0 %v7575_v7  ;;  %1629 = vmatprep.mubr.bf16.mxu0 %v7673_v34  ;;  %v7676_v7 = vld [vmem:[#allocation5 + $0x404] ss:$16 sps:$4 sm:$0xff]  }
  0xc2   :  { %1743 = vmatpush1.bf16.msra.mxu1 %v7578_v8  ;;  %1599 = vmatprep.subr.bf16.mxu0 %v7583_v9  ;;  %v7679_v8 = vld [vmem:[#allocation5 + $0x30c] ss:$16 sps:$4 sm:$0xff]  }
  0xc3   :  { %1744 = vmatprep.subr.bf16.mxu1 %v7586_v10  ;;  %v9086_v9 = vld [vmem:[#allocation2 + $0x8] ss:$28 sps:$4 sm:$0xff]  }
  0xc4   :  { %v7674_v10 = vld [vmem:[#allocation5 + $0x400] ss:$16 sps:$4 sm:$0xff]  }
  0xc5   :  { %1600 = vmatpush1.bf16.msra.mxu0 %v7581_v11  ;;  %v7677_v11 = vld [vmem:[#allocation5 + $0x308] ss:$16 sps:$4 sm:$0xff]  }
  0xc6   :  { %1745 = vmatpush1.bf16.msra.mxu1 %v7584_v12  ;;  %1601 = vmatprep.subr.bf16.mxu0 %v7589_v13  ;;  %v7682_v12 = vld [vmem:[#allocation5 + $0x424] ss:$16 sps:$4 sm:$0xff]   ;;  %v7685_v13 = vld [vmem:[#allocation5 + $0x32c] ss:$16 sps:$4 sm:$0xff]  }
  0xc7   :  { %1746 = vmatprep.subr.bf16.mxu1 %v7592_v14  ;;  %v7680_v14 = vld [vmem:[#allocation5 + $0x420] ss:$16 sps:$4 sm:$0xff]  }
  0xc9   :  { %1602 = vmatpush1.bf16.msra.mxu0 %v7587_v15  ;;  %v7683_v15 = vld [vmem:[#allocation5 + $0x328] ss:$16 sps:$4 sm:$0xff]  }
  0xca   :  { %1747 = vmatpush1.bf16.msra.mxu1 %v7590_v16  ;;  %1603 = vmatprep.subr.bf16.mxu0 %v7595_v17  ;;  %v7688_v16 = vld [vmem:[#allocation5 + $0x444] ss:$16 sps:$4 sm:$0xff]   ;;  %v9089_v17 = vld [vmem:[#allocation2 + $0x14] ss:$28 sps:$4 sm:$0xff]  }
  0xcb   :  { %1748 = vmatprep.subr.bf16.mxu1 %v7598_v18  ;;  %v7691_v18 = vld [vmem:[#allocation5 + $0x34c] ss:$16 sps:$4 sm:$0xff]  }
  0xcd   :  { %1604 = vmatpush1.bf16.msra.mxu0 %v7593_v19  ;;  %v7686_v19 = vld [vmem:[#allocation5 + $0x440] ss:$16 sps:$4 sm:$0xff]  }
  0xce   :  { %1749 = vmatpush1.bf16.msra.mxu1 %v7596_v20  ;;  %1605 = vmatprep.subr.bf16.mxu0 %v7601_v21  ;;  %v7689_v20 = vld [vmem:[#allocation5 + $0x348] ss:$16 sps:$4 sm:$0xff]   ;;  %v7694_v21 = vld [vmem:[#allocation5 + $0x464] ss:$16 sps:$4 sm:$0xff]  }
  0xcf   :  { %1750 = vmatprep.subr.bf16.mxu1 %v7604_v22  ;;  %v7697_v22 = vld [vmem:[#allocation5 + $0x36c] ss:$16 sps:$4 sm:$0xff]  }
  0xd1   :  { %1606 = vmatpush1.bf16.msra.mxu0 %v7599_v23  ;;  %v7692_v23 = vld [vmem:[#allocation5 + $0x460] ss:$16 sps:$4 sm:$0xff]  }
  0xd2   :  { %1751 = vmatpush1.bf16.msra.mxu1 %v7602_v24  ;;  %1607 = vmatprep.subr.bf16.mxu0 %v7607_v25  ;;  %v7695_v24 = vld [vmem:[#allocation5 + $0x368] ss:$16 sps:$4 sm:$0xff]   ;;  %v7700_v25 = vld [vmem:[#allocation5 + $0x484] ss:$16 sps:$4 sm:$0xff]  }
  0xd3   :  { %1752 = vmatprep.subr.bf16.mxu1 %v7610_v26  ;;  %v7703_v26 = vld [vmem:[#allocation5 + $0x38c] ss:$16 sps:$4 sm:$0xff]  }
  0xd5   :  { %1608 = vmatpush1.bf16.msra.mxu0 %v7605_v27  ;;  %v7698_v27 = vld [vmem:[#allocation5 + $0x480] ss:$16 sps:$4 sm:$0xff]  }
  0xd6   :  { %1753 = vmatpush1.bf16.msra.mxu1 %v7608_v28  ;;  %1609 = vmatprep.subr.bf16.mxu0 %v7613_v29  ;;  %v7701_v28 = vld [vmem:[#allocation5 + $0x388] ss:$16 sps:$4 sm:$0xff]   ;;  %v7706_v29 = vld [vmem:[#allocation5 + $0x4a4] ss:$16 sps:$4 sm:$0xff]  }
  0xd7   :  { %1754 = vmatprep.subr.bf16.mxu1 %v7616_v30  ;;  %v7709_v30 = vld [vmem:[#allocation5 + $0x3ac] ss:$16 sps:$4 sm:$0xff]  }
  0xd9   :  { %1610 = vmatpush1.bf16.msra.mxu0 %v7611_v31  ;;  %v7704_v31 = vld [vmem:[#allocation5 + $0x4a0] ss:$16 sps:$4 sm:$0xff]  }
  0xda   :  { %1755 = vmatpush1.bf16.msra.mxu1 %v7614_v32  ;;  %1611 = vmatprep.subr.bf16.mxu0 %v7619_v33  ;;  %v7707_v32 = vld [vmem:[#allocation5 + $0x3a8] ss:$16 sps:$4 sm:$0xff]   ;;  %v7712_v33 = vld [vmem:[#allocation5 + $0x4c4] ss:$16 sps:$4 sm:$0xff]  }
  0xdb   :  { %1756 = vmatprep.subr.bf16.mxu1 %v7622_v35  ;;  %v7710_v35 = vld [vmem:[#allocation5 + $0x4c0] ss:$16 sps:$4 sm:$0xff]  }
  0xdd   :  { %1612 = vmatpush1.bf16.msra.mxu0 %v7617_v36  ;;  %v7713_v36 = vld [vmem:[#allocation5 + $0x3c8] ss:$16 sps:$4 sm:$0xff]  }
  0xde   :  { %1757 = vmatpush1.bf16.msra.mxu1 %v7620_v37  ;;  %1613 = vmatprep.subr.bf16.mxu0 %v7625_v38  ;;  %v7718_v37 = vld [vmem:[#allocation5 + $0x4e4] ss:$16 sps:$4 sm:$0xff]   ;;  %v7721_v38 = vld [vmem:[#allocation5 + $0x3ec] ss:$16 sps:$4 sm:$0xff]  }
  0xdf   :  { %1769 = vmatprep.subr.bf16.mxu1 %v7628_v39  ;;  %v7716_v39 = vld [vmem:[#allocation5 + $0x4e0] ss:$16 sps:$4 sm:$0xff]  }
  0xe1   :  { %1759 = vmatmul.mubr.bf16.vlgmr.msra.gmra.mrb[4].mxu1 %v9082_v6  ;;  %1614 = vmatpush1.bf16.msra.mxu0 %v7623_v40  ;;  %v7668_v6 = vld [vmem:[#allocation5 + $0x2e8] ss:$16 sps:$4 sm:$0xff]  }
  0xe2   :  { %1770 = vmatpush1.bf16.msra.mxu1 %v7626_v41  ;;  %1615 = vmatprep.subr.bf16.mxu0 %v7631_v42  ;;  %v7719_v40 = vld [vmem:[#allocation5 + $0x3e8] ss:$16 sps:$4 sm:$0xff]   ;;  %v7724_v41 = vld [vmem:[#allocation5 + $0x504] ss:$16 sps:$4 sm:$0xff]   ;;  %v7727_v42 = vld [vmem:[#allocation5 + $0x40c] ss:$16 sps:$4 sm:$0xff]  }
  0xe3   :  { %1771 = vmatprep.subr.bf16.mxu1 %v7634_v43  ;;  %1801 = vmatprep.mubr.bf16.mxu1 %v7673_v34  ;;  %v7715_v34 = vld [vmem:[#allocation5 + $0x3cc] ss:$16 sps:$4 sm:$0xff]   ;;  %v7722_v43 = vld [vmem:[#allocation5 + $0x500] ss:$16 sps:$4 sm:$0xff]  }
  0xe5   :  { %1616 = vmatpush1.bf16.msra.mxu0 %v7629_v44  ;;  %v7725_v44 = vld [vmem:[#allocation5 + $0x408] ss:$16 sps:$4 sm:$0xff]  }
  0xe6   :  { %1772 = vmatpush1.bf16.msra.mxu1 %v7632_v45  ;;  %1617 = vmatprep.subr.bf16.mxu0 %v7637_v46  ;;  %v7730_v45 = vld [vmem:[#allocation5 + $0x524] ss:$16 sps:$4 sm:$0xff]   ;;  %v7733_v46 = vld [vmem:[#allocation5 + $0x42c] ss:$16 sps:$4 sm:$0xff]  }
  0xe7   :  { %1773 = vmatprep.subr.bf16.mxu1 %v7640_v47  ;;  %v7728_v47 = vld [vmem:[#allocation5 + $0x520] ss:$16 sps:$4 sm:$0xff]  }
  0xe9   :  { %1618 = vmatpush1.bf16.msra.mxu0 %v7635_v48  ;;  %v7731_v48 = vld [vmem:[#allocation5 + $0x428] ss:$16 sps:$4 sm:$0xff]  }
  0xea   :  { %1774 = vmatpush1.bf16.msra.mxu1 %v7638_v49  ;;  %1619 = vmatprep.subr.bf16.mxu0 %v7643_v50  ;;  %v7736_v49 = vld [vmem:[#allocation5 + $0x544] ss:$16 sps:$4 sm:$0xff]   ;;  %v7739_v50 = vld [vmem:[#allocation5 + $0x44c] ss:$16 sps:$4 sm:$0xff]  }
  0xeb   :  { %1775 = vmatprep.subr.bf16.mxu1 %v7646_v51  ;;  %v7734_v51 = vld [vmem:[#allocation5 + $0x540] ss:$16 sps:$4 sm:$0xff]  }
  0xed   :  { %1620 = vmatpush1.bf16.msra.mxu0 %v7641_v52  ;;  %v7737_v52 = vld [vmem:[#allocation5 + $0x448] ss:$16 sps:$4 sm:$0xff]  }
  0xee   :  { %1776 = vmatpush1.bf16.msra.mxu1 %v7644_v53  ;;  %1621 = vmatprep.subr.bf16.mxu0 %v7649_v54  ;;  %v7742_v53 = vld [vmem:[#allocation5 + $0x564] ss:$16 sps:$4 sm:$0xff]   ;;  %v7745_v54 = vld [vmem:[#allocation5 + $0x46c] ss:$16 sps:$4 sm:$0xff]  }
  0xef   :  { %1777 = vmatprep.subr.bf16.mxu1 %v7652_v55  ;;  %v7740_v55 = vld [vmem:[#allocation5 + $0x560] ss:$16 sps:$4 sm:$0xff]  }
  0xf1   :  { %1622 = vmatpush1.bf16.msra.mxu0 %v7647_v56  ;;  %v7743_v56 = vld [vmem:[#allocation5 + $0x468] ss:$16 sps:$4 sm:$0xff]  }
  0xf2   :  { %1778 = vmatpush1.bf16.msra.mxu1 %v7650_v57  ;;  %1623 = vmatprep.subr.bf16.mxu0 %v7655_v58  ;;  %v7748_v57 = vld [vmem:[#allocation5 + $0x584] ss:$16 sps:$4 sm:$0xff]   ;;  %v7751_v58 = vld [vmem:[#allocation5 + $0x48c] ss:$16 sps:$4 sm:$0xff]  }
  0xf3   :  { %1779 = vmatprep.subr.bf16.mxu1 %v7658_v59  ;;  %v7746_v59 = vld [vmem:[#allocation5 + $0x580] ss:$16 sps:$4 sm:$0xff]  }
  0xf5   :  { %1624 = vmatpush1.bf16.msra.mxu0 %v7653_v60  ;;  %v7749_v60 = vld [vmem:[#allocation5 + $0x488] ss:$16 sps:$4 sm:$0xff]  }
  0xf6   :  { %1780 = vmatpush1.bf16.msra.mxu1 %v7656_v61  ;;  %1625 = vmatprep.subr.bf16.mxu0 %v7661_v62  ;;  %v7754_v61 = vld [vmem:[#allocation5 + $0x5a4] ss:$16 sps:$4 sm:$0xff]   ;;  %v7757_v62 = vld [vmem:[#allocation5 + $0x4ac] ss:$16 sps:$4 sm:$0xff]  }
  0xf7   :  { %1781 = vmatprep.subr.bf16.mxu1 %v7664_v63  ;;  %v7752_v63 = vld [vmem:[#allocation5 + $0x5a0] ss:$16 sps:$4 sm:$0xff]  }
  0xf9   :  { %1626 = vmatpush1.bf16.msra.mxu0 %v7659_v1  ;;  %v7755_v1 = vld [vmem:[#allocation5 + $0x4a8] ss:$16 sps:$4 sm:$0xff]  }
  0xfa   :  { %1782 = vmatpush1.bf16.msra.mxu1 %v7662_v2  ;;  %1627 = vmatprep.subr.bf16.mxu0 %v7667_v3  ;;  %v7760_v2 = vld [vmem:[#allocation5 + $0x5c4] ss:$16 sps:$4 sm:$0xff]   ;;  %v7763_v3 = vld [vmem:[#allocation5 + $0x4cc] ss:$16 sps:$4 sm:$0xff]  }
  0xfb   :  { %1783 = vmatprep.subr.bf16.mxu1 %v7670_v4  ;;  %v7758_v4 = vld [vmem:[#allocation5 + $0x5c0] ss:$16 sps:$4 sm:$0xff]  }
  0xfd   :  { %1628 = vmatpush1.bf16.msra.mxu0 %v7665_v5  ;;  %v7761_v5 = vld [vmem:[#allocation5 + $0x4c8] ss:$16 sps:$4 sm:$0xff]  }
  0xfe   :  { %1784 = vmatpush1.bf16.msra.mxu1 %v7668_v6  ;;  %1640 = vmatprep.subr.bf16.mxu0 %v7676_v7  ;;  %v7766_v6 = vld [vmem:[#allocation5 + $0x5e4] ss:$16 sps:$4 sm:$0xff]   ;;  %v7769_v7 = vld [vmem:[#allocation5 + $0x4ec] ss:$16 sps:$4 sm:$0xff]  }
  0xff   :  { %1785 = vmatprep.subr.bf16.mxu1 %v7679_v8  ;;  %v7764_v8 = vld [vmem:[#allocation5 + $0x5e0] ss:$16 sps:$4 sm:$0xff]  }
 0x100   :  { %1630 = vmatmul.mubr.bf16.vlgmr.msra.gmra.mrb[0].mxu0 %v9086_v9 }
 0x101   :  { %1641 = vmatpush1.bf16.msra.mxu0 %v7674_v10  ;;  %1672 = vmatprep.mubr.bf16.mxu0 %v9089_v17  ;;  %v7775_v10 = vld [vmem:[#allocation5 + $0x50c] ss:$16 sps:$4 sm:$0xff]  }
 0x102   :  { %1786 = vmatpush1.bf16.msra.mxu1 %v7677_v11  ;;  %1642 = vmatprep.subr.bf16.mxu0 %v7682_v12  ;;  %v9094_v11 = vld [vmem:[#allocation2 + $0x10] ss:$28 sps:$4 sm:$0xff]  }
 0x103   :  { %1787 = vmatprep.subr.bf16.mxu1 %v7685_v13  ;;  %v7823_v12 = vld [vmem:[#allocation7 + $0x4] ss:$16 sps:$4 sm:$0xff]   ;;  %v7773_v13 = vld [vmem:[#allocation5 + $0x508] ss:$16 sps:$4 sm:$0xff]  }
 0x105   :  { %1643 = vmatpush1.bf16.msra.mxu0 %v7680_v14  ;;  %v7821_v14 = vld [vmem:[#allocation7] ss:$16 sps:$4 sm:$0xff]  }
 0x106   :  { %1788 = vmatpush1.bf16.msra.mxu1 %v7683_v15  ;;  %1644 = vmatprep.subr.bf16.mxu0 %v7688_v16  ;;  %v7778_v15 = vld [vmem:[#allocation5 + $0x52c] ss:$16 sps:$4 sm:$0xff]   ;;  %v7829_v16 = vld [vmem:[#allocation7 + $0x24] ss:$16 sps:$4 sm:$0xff]  }
 0x107   :  { %1789 = vmatprep.subr.bf16.mxu1 %v7691_v18  ;;  %v7827_v18 = vld [vmem:[#allocation7 + $0x20] ss:$16 sps:$4 sm:$0xff]  }
 0x109   :  { %1645 = vmatpush1.bf16.msra.mxu0 %v7686_v19  ;;  %v7781_v19 = vld [vmem:[#allocation5 + $0x54c] ss:$16 sps:$4 sm:$0xff]  }
 0x10a   :  { %1790 = vmatpush1.bf16.msra.mxu1 %v7689_v20  ;;  %1646 = vmatprep.subr.bf16.mxu0 %v7694_v21  ;;  %v7835_v20 = vld [vmem:[#allocation7 + $0x44] ss:$16 sps:$4 sm:$0xff]   ;;  %v7779_v21 = vld [vmem:[#allocation5 + $0x548] ss:$16 sps:$4 sm:$0xff]  }
 0x10b   :  { %1791 = vmatprep.subr.bf16.mxu1 %v7697_v22  ;;  %v7833_v22 = vld [vmem:[#allocation7 + $0x40] ss:$16 sps:$4 sm:$0xff]  }
 0x10d   :  { %1647 = vmatpush1.bf16.msra.mxu0 %v7692_v23  ;;  %v7784_v23 = vld [vmem:[#allocation5 + $0x56c] ss:$16 sps:$4 sm:$0xff]  }
 0x10e   :  { %1792 = vmatpush1.bf16.msra.mxu1 %v7695_v24  ;;  %1648 = vmatprep.subr.bf16.mxu0 %v7700_v25  ;;  %v7841_v24 = vld [vmem:[#allocation7 + $0x64] ss:$16 sps:$4 sm:$0xff]   ;;  %v7782_v25 = vld [vmem:[#allocation5 + $0x568] ss:$16 sps:$4 sm:$0xff]  }
 0x10f   :  { %1793 = vmatprep.subr.bf16.mxu1 %v7703_v26  ;;  %v7839_v26 = vld [vmem:[#allocation7 + $0x60] ss:$16 sps:$4 sm:$0xff]  }
 0x111   :  { %1649 = vmatpush1.bf16.msra.mxu0 %v7698_v27  ;;  %v7787_v27 = vld [vmem:[#allocation5 + $0x58c] ss:$16 sps:$4 sm:$0xff]  }
 0x112   :  { %1794 = vmatpush1.bf16.msra.mxu1 %v7701_v28  ;;  %1650 = vmatprep.subr.bf16.mxu0 %v7706_v29  ;;  %v7847_v28 = vld [vmem:[#allocation7 + $0x84] ss:$16 sps:$4 sm:$0xff]   ;;  %v7785_v29 = vld [vmem:[#allocation5 + $0x588] ss:$16 sps:$4 sm:$0xff]  }
 0x113   :  { %1795 = vmatprep.subr.bf16.mxu1 %v7709_v30  ;;  %v7845_v30 = vld [vmem:[#allocation7 + $0x80] ss:$16 sps:$4 sm:$0xff]  }
 0x115   :  { %1651 = vmatpush1.bf16.msra.mxu0 %v7704_v31  ;;  %v7790_v31 = vld [vmem:[#allocation5 + $0x5ac] ss:$16 sps:$4 sm:$0xff]  }
 0x116   :  { %1796 = vmatpush1.bf16.msra.mxu1 %v7707_v32  ;;  %1652 = vmatprep.subr.bf16.mxu0 %v7712_v33  ;;  %v7853_v32 = vld [vmem:[#allocation7 + $0xa4] ss:$16 sps:$4 sm:$0xff]   ;;  %v7788_v33 = vld [vmem:[#allocation5 + $0x5a8] ss:$16 sps:$4 sm:$0xff]  }
 0x117   :  { %1797 = vmatprep.subr.bf16.mxu1 %v7715_v34  ;;  %v7851_v34 = vld [vmem:[#allocation7 + $0xa0] ss:$16 sps:$4 sm:$0xff]  }
 0x119   :  { %1653 = vmatpush1.bf16.msra.mxu0 %v7710_v35  ;;  %v7793_v35 = vld [vmem:[#allocation5 + $0x5cc] ss:$16 sps:$4 sm:$0xff]  }
 0x11a   :  { %1798 = vmatpush1.bf16.msra.mxu1 %v7713_v36  ;;  %1654 = vmatprep.subr.bf16.mxu0 %v7718_v37  ;;  %v7859_v36 = vld [vmem:[#allocation7 + $0xc4] ss:$16 sps:$4 sm:$0xff]   ;;  %v7791_v37 = vld [vmem:[#allocation5 + $0x5c8] ss:$16 sps:$4 sm:$0xff]  }
 0x11b   :  { %1799 = vmatprep.subr.bf16.mxu1 %v7721_v38  ;;  %v7857_v38 = vld [vmem:[#allocation7 + $0xc0] ss:$16 sps:$4 sm:$0xff]  }
 0x11d   :  { %1655 = vmatpush1.bf16.msra.mxu0 %v7716_v39  ;;  %v7796_v39 = vld [vmem:[#allocation5 + $0x5ec] ss:$16 sps:$4 sm:$0xff]  }
 0x11e   :  { %1800 = vmatpush1.bf16.msra.mxu1 %v7719_v40  ;;  %1656 = vmatprep.subr.bf16.mxu0 %v7724_v41  ;;  %v7865_v40 = vld [vmem:[#allocation7 + $0xe4] ss:$16 sps:$4 sm:$0xff]   ;;  %v7794_v41 = vld [vmem:[#allocation5 + $0x5e8] ss:$16 sps:$4 sm:$0xff]  }
 0x11f   :  { %1812 = vmatprep.subr.bf16.mxu1 %v7727_v42  ;;  %v7863_v42 = vld [vmem:[#allocation7 + $0xe0] ss:$16 sps:$4 sm:$0xff]  }
 0x121   :  { %1802 = vmatmul.mubr.bf16.vlgmr.msra.gmra.mrb[4].mxu1 %v9086_v9  ;;  %1657 = vmatpush1.bf16.msra.mxu0 %v7722_v43  ;;  %v7767_v9 = vld [vmem:[#allocation5 + $0x4e8] ss:$16 sps:$4 sm:$0xff]   ;;  %v7799_v43 = vld [vmem:[#allocation5 + $0x60c] ss:$16 sps:$4 sm:$0xff]  }
 0x122   :  { %1813 = vmatpush1.bf16.msra.mxu1 %v7725_v44  ;;  %1658 = vmatprep.subr.bf16.mxu0 %v7730_v45  ;;  %v7871_v44 = vld [vmem:[#allocation7 + $0x104] ss:$16 sps:$4 sm:$0xff]   ;;  %v7797_v45 = vld [vmem:[#allocation5 + $0x608] ss:$16 sps:$4 sm:$0xff]  }
 0x123   :  { %1814 = vmatprep.subr.bf16.mxu1 %v7733_v46  ;;  %1844 = vmatprep.mubr.bf16.mxu1 %v9089_v17  ;;  %v7776_v17 = vld [vmem:[#allocation5 + $0x528] ss:$16 sps:$4 sm:$0xff]   ;;  %v7802_v46 = vld [vmem:[#allocation5 + $0x62c] ss:$16 sps:$4 sm:$0xff]  }
 0x125   :  { %1659 = vmatpush1.bf16.msra.mxu0 %v7728_v47  ;;  %v7869_v47 = vld [vmem:[#allocation7 + $0x100] ss:$16 sps:$4 sm:$0xff]  }
 0x126   :  { %1815 = vmatpush1.bf16.msra.mxu1 %v7731_v48  ;;  %1660 = vmatprep.subr.bf16.mxu0 %v7736_v49  ;;  %v7877_v48 = vld [vmem:[#allocation7 + $0x124] ss:$16 sps:$4 sm:$0xff]   ;;  %v7800_v49 = vld [vmem:[#allocation5 + $0x628] ss:$16 sps:$4 sm:$0xff]  }
 0x127   :  { %1816 = vmatprep.subr.bf16.mxu1 %v7739_v50  ;;  %v7805_v50 = vld [vmem:[#allocation5 + $0x64c] ss:$16 sps:$4 sm:$0xff]  }
 0x129   :  { %1661 = vmatpush1.bf16.msra.mxu0 %v7734_v51  ;;  %v7875_v51 = vld [vmem:[#allocation7 + $0x120] ss:$16 sps:$4 sm:$0xff]  }
 0x12a   :  { %1817 = vmatpush1.bf16.msra.mxu1 %v7737_v52  ;;  %1662 = vmatprep.subr.bf16.mxu0 %v7742_v53  ;;  %v7883_v52 = vld [vmem:[#allocation7 + $0x144] ss:$16 sps:$4 sm:$0xff]   ;;  %v7803_v53 = vld [vmem:[#allocation5 + $0x648] ss:$16 sps:$4 sm:$0xff]  }
 0x12b   :  { %1818 = vmatprep.subr.bf16.mxu1 %v7745_v54  ;;  %v7808_v54 = vld [vmem:[#allocation5 + $0x66c] ss:$16 sps:$4 sm:$0xff]  }
 0x12d   :  { %1663 = vmatpush1.bf16.msra.mxu0 %v7740_v55  ;;  %v7881_v55 = vld [vmem:[#allocation7 + $0x140] ss:$16 sps:$4 sm:$0xff]  }
 0x12e   :  { %1819 = vmatpush1.bf16.msra.mxu1 %v7743_v56  ;;  %1664 = vmatprep.subr.bf16.mxu0 %v7748_v57  ;;  %v7889_v56 = vld [vmem:[#allocation7 + $0x164] ss:$16 sps:$4 sm:$0xff]   ;;  %v7806_v57 = vld [vmem:[#allocation5 + $0x668] ss:$16 sps:$4 sm:$0xff]  }
 0x12f   :  { %1820 = vmatprep.subr.bf16.mxu1 %v7751_v58  ;;  %v7811_v58 = vld [vmem:[#allocation5 + $0x68c] ss:$16 sps:$4 sm:$0xff]  }
 0x131   :  { %1665 = vmatpush1.bf16.msra.mxu0 %v7746_v59  ;;  %v7887_v59 = vld [vmem:[#allocation7 + $0x160] ss:$16 sps:$4 sm:$0xff]  }
 0x132   :  { %1821 = vmatpush1.bf16.msra.mxu1 %v7749_v60  ;;  %1666 = vmatprep.subr.bf16.mxu0 %v7754_v61  ;;  %v7895_v60 = vld [vmem:[#allocation7 + $0x184] ss:$16 sps:$4 sm:$0xff]   ;;  %v7809_v61 = vld [vmem:[#allocation5 + $0x688] ss:$16 sps:$4 sm:$0xff]  }
 0x133   :  { %1822 = vmatprep.subr.bf16.mxu1 %v7757_v62  ;;  %v7814_v62 = vld [vmem:[#allocation5 + $0x6ac] ss:$16 sps:$4 sm:$0xff]  }
 0x135   :  { %1667 = vmatpush1.bf16.msra.mxu0 %v7752_v63  ;;  %v7893_v63 = vld [vmem:[#allocation7 + $0x180] ss:$16 sps:$4 sm:$0xff]  }
 0x136   :  { %1823 = vmatpush1.bf16.msra.mxu1 %v7755_v1  ;;  %1668 = vmatprep.subr.bf16.mxu0 %v7760_v2  ;;  %v7812_v1 = vld [vmem:[#allocation5 + $0x6a8] ss:$16 sps:$4 sm:$0xff]   ;;  %v7817_v2 = vld [vmem:[#allocation5 + $0x6cc] ss:$16 sps:$4 sm:$0xff]  }
 0x137   :  { %1824 = vmatprep.subr.bf16.mxu1 %v7763_v3 }
 0x139   :  { %1669 = vmatpush1.bf16.msra.mxu0 %v7758_v4  ;;  %v7815_v4 = vld [vmem:[#allocation5 + $0x6c8] ss:$16 sps:$4 sm:$0xff]  }
 0x13a   :  { %1825 = vmatpush1.bf16.msra.mxu1 %v7761_v5  ;;  %1670 = vmatprep.subr.bf16.mxu0 %v7766_v6  ;;  %v7820_v6 = vld [vmem:[#allocation5 + $0x6ec] ss:$16 sps:$4 sm:$0xff]  }
 0x13b   :  { %1826 = vmatprep.subr.bf16.mxu1 %v7769_v7 }
 0x13d   :  { %1671 = vmatpush1.bf16.msra.mxu0 %v7764_v8 }
 0x13e   :  { %1827 = vmatpush1.bf16.msra.mxu1 %v7767_v9  ;;  %2700 = vmatprep.subr.bf16.mxu0 %v7823_v12  ;;  %v7818_v9 = vld [vmem:[#allocation5 + $0x6e8] ss:$16 sps:$4 sm:$0xff]   ;;  %v7832_v12 = vld [vmem:[#allocation7 + $0x2c] ss:$16 sps:$4 sm:$0xff]  }
 0x13f   :  { %1828 = vmatprep.subr.bf16.mxu1 %v7775_v10  ;;  %v7826_v10 = vld [vmem:[#allocation7 + $0xc] ss:$16 sps:$4 sm:$0xff]  }
 0x140   :  { %1673 = vmatmul.mubr.bf16.vlgmr.msra.gmra.mrb[0].mxu0 %v9094_v11 }
 0x141   :  { %2701 = vmatpush1.bf16.msra.mxu0 %v7821_v14  ;;  %v8661_v14 = vld [vmem:[#allocation2 + $0x18] ss:$28 sps:$4 sm:$0xff]  }
 0x142   :  { %1829 = vmatpush1.bf16.msra.mxu1 %v7773_v13  ;;  %2702 = vmatprep.subr.bf16.mxu0 %v7829_v16  ;;  %v7830_v13 = vld [vmem:[#allocation7 + $0x28] ss:$16 sps:$4 sm:$0xff]  }
 0x143   :  { %1830 = vmatprep.subr.bf16.mxu1 %v7778_v15  ;;  %v7838_v15 = vld [vmem:[#allocation7 + $0x4c] ss:$16 sps:$4 sm:$0xff]   ;;  %v7836_v16 = vld [vmem:[#allocation7 + $0x48] ss:$16 sps:$4 sm:$0xff]  }
 0x145   :  { %2703 = vmatpush1.bf16.msra.mxu0 %v7827_v18  ;;  %v7842_v18 = vld [vmem:[#allocation7 + $0x68] ss:$16 sps:$4 sm:$0xff]  }
 0x146   :  { %1831 = vmatpush1.bf16.msra.mxu1 %v7776_v17  ;;  %2704 = vmatprep.subr.bf16.mxu0 %v7835_v20  ;;  %v7844_v17 = vld [vmem:[#allocation7 + $0x6c] ss:$16 sps:$4 sm:$0xff]   ;;  %v7848_v20 = vld [vmem:[#allocation7 + $0x88] ss:$16 sps:$4 sm:$0xff]  }
 0x147   :  { %1832 = vmatprep.subr.bf16.mxu1 %v7781_v19  ;;  %v7850_v19 = vld [vmem:[#allocation7 + $0x8c] ss:$16 sps:$4 sm:$0xff]  }
 0x149   :  { %2705 = vmatpush1.bf16.msra.mxu0 %v7833_v22  ;;  %v7854_v22 = vld [vmem:[#allocation7 + $0xa8] ss:$16 sps:$4 sm:$0xff]  }
 0x14a   :  { %1833 = vmatpush1.bf16.msra.mxu1 %v7779_v21  ;;  %2706 = vmatprep.subr.bf16.mxu0 %v7841_v24  ;;  %v7856_v21 = vld [vmem:[#allocation7 + $0xac] ss:$16 sps:$4 sm:$0xff]  }
 0x14b   :  { %1834 = vmatprep.subr.bf16.mxu1 %v7784_v23  ;;  %v7901_v23 = vld [vmem:[#allocation7 + $0x1a4] ss:$16 sps:$4 sm:$0xff]   ;;  %v7862_v24 = vld [vmem:[#allocation7 + $0xcc] ss:$16 sps:$4 sm:$0xff]  }
 0x14d   :  { %2707 = vmatpush1.bf16.msra.mxu0 %v7839_v26  ;;  %v7860_v26 = vld [vmem:[#allocation7 + $0xc8] ss:$16 sps:$4 sm:$0xff]  }
 0x14e   :  { %1835 = vmatpush1.bf16.msra.mxu1 %v7782_v25  ;;  %2708 = vmatprep.subr.bf16.mxu0 %v7847_v28  ;;  %v7899_v25 = vld [vmem:[#allocation7 + $0x1a0] ss:$16 sps:$4 sm:$0xff]   ;;  %v7868_v28 = vld [vmem:[#allocation7 + $0xec] ss:$16 sps:$4 sm:$0xff]  }
 0x14f   :  { %1836 = vmatprep.subr.bf16.mxu1 %v7787_v27  ;;  %v7907_v27 = vld [vmem:[#allocation7 + $0x1c4] ss:$16 sps:$4 sm:$0xff]  }
 0x151   :  { %2709 = vmatpush1.bf16.msra.mxu0 %v7845_v30  ;;  %v7866_v30 = vld [vmem:[#allocation7 + $0xe8] ss:$16 sps:$4 sm:$0xff]  }
 0x152   :  { %1837 = vmatpush1.bf16.msra.mxu1 %v7785_v29  ;;  %2710 = vmatprep.subr.bf16.mxu0 %v7853_v32  ;;  %v7905_v29 = vld [vmem:[#allocation7 + $0x1c0] ss:$16 sps:$4 sm:$0xff]   ;;  %v7874_v32 = vld [vmem:[#allocation7 + $0x10c] ss:$16 sps:$4 sm:$0xff]  }
 0x153   :  { %1838 = vmatprep.subr.bf16.mxu1 %v7790_v31  ;;  %v7913_v31 = vld [vmem:[#allocation7 + $0x1e4] ss:$16 sps:$4 sm:$0xff]  }
 0x155   :  { %2711 = vmatpush1.bf16.msra.mxu0 %v7851_v34  ;;  %v7872_v34 = vld [vmem:[#allocation7 + $0x108] ss:$16 sps:$4 sm:$0xff]  }
 0x156   :  { %1839 = vmatpush1.bf16.msra.mxu1 %v7788_v33  ;;  %2712 = vmatprep.subr.bf16.mxu0 %v7859_v36  ;;  %v7911_v33 = vld [vmem:[#allocation7 + $0x1e0] ss:$16 sps:$4 sm:$0xff]   ;;  %v7880_v36 = vld [vmem:[#allocation7 + $0x12c] ss:$16 sps:$4 sm:$0xff]  }
 0x157   :  { %1840 = vmatprep.subr.bf16.mxu1 %v7793_v35  ;;  %v7919_v35 = vld [vmem:[#allocation7 + $0x204] ss:$16 sps:$4 sm:$0xff]  }
 0x159   :  { %2713 = vmatpush1.bf16.msra.mxu0 %v7857_v38  ;;  %v7886_v38 = vld [vmem:[#allocation7 + $0x14c] ss:$16 sps:$4 sm:$0xff]  }
 0x15a   :  { %1841 = vmatpush1.bf16.msra.mxu1 %v7791_v37  ;;  %2714 = vmatprep.subr.bf16.mxu0 %v7865_v40  ;;  %v7878_v37 = vld [vmem:[#allocation7 + $0x128] ss:$16 sps:$4 sm:$0xff]   ;;  %v7892_v40 = vld [vmem:[#allocation7 + $0x16c] ss:$16 sps:$4 sm:$0xff]  }
 0x15b   :  { %1842 = vmatprep.subr.bf16.mxu1 %v7796_v39  ;;  %v7884_v39 = vld [vmem:[#allocation7 + $0x148] ss:$16 sps:$4 sm:$0xff]  }
 0x15d   :  { %2715 = vmatpush1.bf16.msra.mxu0 %v7863_v42  ;;  %v7898_v42 = vld [vmem:[#allocation7 + $0x18c] ss:$16 sps:$4 sm:$0xff]  }
 0x15e   :  { %1843 = vmatpush1.bf16.msra.mxu1 %v7794_v41  ;;  %2716 = vmatprep.subr.bf16.mxu0 %v7871_v44  ;;  %v7890_v41 = vld [vmem:[#allocation7 + $0x168] ss:$16 sps:$4 sm:$0xff]   ;;  %v7904_v44 = vld [vmem:[#allocation7 + $0x1ac] ss:$16 sps:$4 sm:$0xff]  }
 0x15f   :  { %1855 = vmatprep.subr.bf16.mxu1 %v7799_v43  ;;  %v7896_v43 = vld [vmem:[#allocation7 + $0x188] ss:$16 sps:$4 sm:$0xff]  }
 0x161   :  { %1845 = vmatmul.mubr.bf16.vlgmr.msra.gmra.mrb[4].mxu1 %v9094_v11  ;;  %2717 = vmatpush1.bf16.msra.mxu0 %v7869_v47  ;;  %v7824_v11 = vld [vmem:[#allocation7 + $0x8] ss:$16 sps:$4 sm:$0xff]  }
 0x162   :  { %1856 = vmatpush1.bf16.msra.mxu1 %v7797_v45  ;;  %1887 = vmatprep.mubr.bf16.mxu1 %v8885_v0  ;;  %v7902_v45 = vld [vmem:[#allocation7 + $0x1a8] ss:$16 sps:$4 sm:$0xff]  }
 0x163   :  { %1857 = vmatprep.subr.bf16.mxu1 %v7802_v46  ;;  %2718 = vmatprep.subr.bf16.mxu0 %v7877_v48  ;;  %v7910_v46 = vld [vmem:[#allocation7 + $0x1cc] ss:$16 sps:$4 sm:$0xff]   ;;  %v7908_v47 = vld [vmem:[#allocation7 + $0x1c8] ss:$16 sps:$4 sm:$0xff]  }
 0x164   :  { %v7916_v48 = vld [vmem:[#allocation7 + $0x1ec] ss:$16 sps:$4 sm:$0xff]  }
 0x165   :  { %2719 = vmatpush1.bf16.msra.mxu0 %v7875_v51  ;;  %v378_v51 = vlaneseq }
 0x166   :  { %1858 = vmatpush1.bf16.msra.mxu1 %v7800_v49  ;;  %2720 = vmatprep.subr.bf16.mxu0 %v7883_v52  ;;  %v7914_v49 = vld [vmem:[#allocation7 + $0x1e8] ss:$16 sps:$4 sm:$0xff]  }
 0x167   :  { %1859 = vmatprep.subr.bf16.mxu1 %v7805_v50  ;;  %v7922_v50 = vld [vmem:[#allocation7 + $0x20c] ss:$16 sps:$4 sm:$0xff]   ;;  %v9107_v52 = vshrl.u32 %v378_v51, 7  ;;  %v7979_v51 = vld [vmem:[#allocation7 + $0x344] ss:$16 sps:$4 sm:$0xff]  }
 0x169   :  { %2721 = vmatpush1.bf16.msra.mxu0 %v7881_v55  ;;  %v9118_v55 = vsub.s32 1, %v9107_v52 }
 0x16a   :  { %1860 = vmatpush1.bf16.msra.mxu1 %v7803_v53  ;;  %2722 = vmatprep.subr.bf16.mxu0 %v7889_v56  ;;  %v9112_v53 = vld [vmem:[%s9240_s2] sm:$0xf] }
 0x16b   :  { %1861 = vmatprep.subr.bf16.mxu1 %v7808_v54  ;;  %v9115_v54 = vsub.s32 0, %v9107_v52 }
 0x16d   :  { %2723 = vmatpush1.bf16.msra.mxu0 %v7887_v59  ;;  %v381_v56 = vrot.slane %v9112_v53, %v9115_v54 }
 0x16e   :  { %1862 = vmatpush1.bf16.msra.mxu1 %v7806_v57  ;;  %2724 = vmatprep.subr.bf16.mxu0 %v7895_v60  ;;  %v385_v57 = vrot.slane %v9112_v53, %v9118_v55 }
 0x16f   :  { %1863 = vmatprep.subr.bf16.mxu1 %v7811_v58 }
 0x171   :  { %2725 = vmatpush1.bf16.msra.mxu0 %v7893_v63 }
 0x172   :  { %1864 = vmatpush1.bf16.msra.mxu1 %v7809_v61  ;;  %2726 = vmatprep.subr.bf16.mxu0 %v7901_v23  ;;  %v7937_v23 = vld [vmem:[#allocation7 + $0x264] ss:$16 sps:$4 sm:$0xff]  }
 0x173   :  { %1865 = vmatprep.subr.bf16.mxu1 %v7814_v62 }
 0x174   :  { %v9099_v3 = vpop.f32.mrb[0].mxu1 }
 0x175   :  { %v9101_v5 = vpop.f32.mrb[1].mxu1  ;;  %2727 = vmatpush1.bf16.msra.mxu0 %v7899_v25  ;;  %v7935_v25 = vld [vmem:[#allocation7 + $0x260] ss:$16 sps:$4 sm:$0xff]  }
 0x176   :  { %v9103_v7 = vpop.f32.mrb[2].mxu1  ;;  %1866 = vmatpush1.bf16.msra.mxu1 %v7812_v1  ;;  %2728 = vmatprep.subr.bf16.mxu0 %v7907_v27  ;;  %v7943_v27 = vld [vmem:[#allocation7 + $0x284] ss:$16 sps:$4 sm:$0xff]  }
 0x177   :  { %v9105_v8 = vpop.f32.mrb[3].mxu1  ;;  %1867 = vmatprep.subr.bf16.mxu1 %v7817_v2 }
 0x179   :  { %2729 = vmatpush1.bf16.msra.mxu0 %v7905_v29  ;;  %v7941_v29 = vld [vmem:[#allocation7 + $0x280] ss:$16 sps:$4 sm:$0xff]  }
 0x17a   :  { %1868 = vmatpush1.bf16.msra.mxu1 %v7815_v4  ;;  %2730 = vmatprep.subr.bf16.mxu0 %v7913_v31  ;;  %v7949_v31 = vld [vmem:[#allocation7 + $0x2a4] ss:$16 sps:$4 sm:$0xff]  }
 0x17b   :  { %1869 = vmatprep.subr.bf16.mxu1 %v7820_v6 }
 0x17d   :  { %2731 = vmatpush1.bf16.msra.mxu0 %v7911_v33  ;;  %v7947_v33 = vld [vmem:[#allocation7 + $0x2a0] ss:$16 sps:$4 sm:$0xff]  }
 0x17e   :  { %1870 = vmatpush1.bf16.msra.mxu1 %v7818_v9  ;;  %2743 = vmatprep.subr.bf16.mxu0 %v7919_v35  ;;  %v7955_v35 = vld [vmem:[#allocation7 + $0x2c4] ss:$16 sps:$4 sm:$0xff]  }
 0x17f   :  { %2786 = vmatprep.subr.bf16.mxu1 %v7826_v10 }
 0x181   :  { %1888 = vmatmul.mubr.bf16.vlgmr.msra.gmra.mrb[4].mxu1 %v8661_v14 }
 0x182   :  { %2787 = vmatpush1.bf16.msra.mxu1 %v7824_v11 }
 0x183   :  { %2788 = vmatprep.subr.bf16.mxu1 %v7832_v12 }
 0x186   :  { %2789 = vmatpush1.bf16.msra.mxu1 %v7830_v13 }
 0x187   :  { %2790 = vmatprep.subr.bf16.mxu1 %v7838_v15 }
 0x18a   :  { %2791 = vmatpush1.bf16.msra.mxu1 %v7836_v16 }
 0x18b   :  { %2792 = vmatprep.subr.bf16.mxu1 %v7844_v17  ;;  %v7917_v17 = vld [vmem:[#allocation7 + $0x200] ss:$16 sps:$4 sm:$0xff]  }
 0x18e   :  { %2793 = vmatpush1.bf16.msra.mxu1 %v7842_v18  ;;  %v7920_v18 = vld [vmem:[#allocation7 + $0x208] ss:$16 sps:$4 sm:$0xff]  }
 0x18f   :  { %2794 = vmatprep.subr.bf16.mxu1 %v7850_v19  ;;  %v7925_v19 = vld [vmem:[#allocation7 + $0x224] ss:$16 sps:$4 sm:$0xff]  }
 0x192   :  { %2795 = vmatpush1.bf16.msra.mxu1 %v7848_v20  ;;  %v7928_v20 = vld [vmem:[#allocation7 + $0x22c] ss:$16 sps:$4 sm:$0xff]  }
 0x193   :  { %2796 = vmatprep.subr.bf16.mxu1 %v7856_v21  ;;  %v7929_v21 = vld [vmem:[#allocation7 + $0x240] ss:$16 sps:$4 sm:$0xff]  }
 0x196   :  { %2797 = vmatpush1.bf16.msra.mxu1 %v7854_v22  ;;  %v7932_v22 = vld [vmem:[#allocation7 + $0x248] ss:$16 sps:$4 sm:$0xff]  }
 0x197   :  { %2798 = vmatprep.subr.bf16.mxu1 %v7862_v24  ;;  %v7940_v24 = vld [vmem:[#allocation7 + $0x26c] ss:$16 sps:$4 sm:$0xff]  }
 0x19a   :  { %2799 = vmatpush1.bf16.msra.mxu1 %v7860_v26  ;;  %v7938_v26 = vld [vmem:[#allocation7 + $0x268] ss:$16 sps:$4 sm:$0xff]  }
 0x19b   :  { %2800 = vmatprep.subr.bf16.mxu1 %v7868_v28  ;;  %v7946_v28 = vld [vmem:[#allocation7 + $0x28c] ss:$16 sps:$4 sm:$0xff]  }
 0x19e   :  { %2801 = vmatpush1.bf16.msra.mxu1 %v7866_v30  ;;  %v7944_v30 = vld [vmem:[#allocation7 + $0x288] ss:$16 sps:$4 sm:$0xff]  }
 0x19f   :  { %2802 = vmatprep.subr.bf16.mxu1 %v7874_v32  ;;  %v7952_v32 = vld [vmem:[#allocation7 + $0x2ac] ss:$16 sps:$4 sm:$0xff]  }
 0x1a2   :  { %2803 = vmatpush1.bf16.msra.mxu1 %v7872_v34  ;;  %v7950_v34 = vld [vmem:[#allocation7 + $0x2a8] ss:$16 sps:$4 sm:$0xff]  }
 0x1a3   :  { %2804 = vmatprep.subr.bf16.mxu1 %v7880_v36  ;;  %v7958_v36 = vld [vmem:[#allocation7 + $0x2cc] ss:$16 sps:$4 sm:$0xff]  }
 0x1a6   :  { %2805 = vmatpush1.bf16.msra.mxu1 %v7878_v37  ;;  %v7953_v37 = vld [vmem:[#allocation7 + $0x2c0] ss:$16 sps:$4 sm:$0xff]  }
 0x1a7   :  { %2806 = vmatprep.subr.bf16.mxu1 %v7886_v38  ;;  %v7956_v38 = vld [vmem:[#allocation7 + $0x2c8] ss:$16 sps:$4 sm:$0xff]  }
 0x1aa   :  { %2807 = vmatpush1.bf16.msra.mxu1 %v7884_v39  ;;  %v7961_v39 = vld [vmem:[#allocation7 + $0x2e4] ss:$16 sps:$4 sm:$0xff]  }
 0x1ab   :  { %2808 = vmatprep.subr.bf16.mxu1 %v7892_v40  ;;  %v7964_v40 = vld [vmem:[#allocation7 + $0x2ec] ss:$16 sps:$4 sm:$0xff]  }
 0x1ae   :  { %2809 = vmatpush1.bf16.msra.mxu1 %v7890_v41  ;;  %v7959_v41 = vld [vmem:[#allocation7 + $0x2e0] ss:$16 sps:$4 sm:$0xff]  }
 0x1af   :  { %2810 = vmatprep.subr.bf16.mxu1 %v7898_v42  ;;  %v7962_v42 = vld [vmem:[#allocation7 + $0x2e8] ss:$16 sps:$4 sm:$0xff]  }
 0x1b2   :  { %2811 = vmatpush1.bf16.msra.mxu1 %v7896_v43  ;;  %v7967_v43 = vld [vmem:[#allocation7 + $0x304] ss:$16 sps:$4 sm:$0xff]  }
 0x1b3   :  { %2812 = vmatprep.subr.bf16.mxu1 %v7904_v44  ;;  %v7970_v44 = vld [vmem:[#allocation7 + $0x30c] ss:$16 sps:$4 sm:$0xff]  }
 0x1b6   :  { %2813 = vmatpush1.bf16.msra.mxu1 %v7902_v45  ;;  %v7965_v45 = vld [vmem:[#allocation7 + $0x300] ss:$16 sps:$4 sm:$0xff]  }
 0x1b7   :  { %2814 = vmatprep.subr.bf16.mxu1 %v7910_v46  ;;  %v7968_v46 = vld [vmem:[#allocation7 + $0x308] ss:$16 sps:$4 sm:$0xff]  }
 0x1ba   :  { %2815 = vmatpush1.bf16.msra.mxu1 %v7908_v47  ;;  %v7973_v47 = vld [vmem:[#allocation7 + $0x324] ss:$16 sps:$4 sm:$0xff]  }
 0x1bb   :  { %2816 = vmatprep.subr.bf16.mxu1 %v7916_v48  ;;  %v7976_v48 = vld [vmem:[#allocation7 + $0x32c] ss:$16 sps:$4 sm:$0xff]  }
 0x1be   :  { %2817 = vmatpush1.bf16.msra.mxu1 %v7914_v49  ;;  %v7971_v49 = vld [vmem:[#allocation7 + $0x320] ss:$16 sps:$4 sm:$0xff]  }
 0x1bf   :  { %2829 = vmatprep.subr.bf16.mxu1 %v7922_v50  ;;  %v7974_v50 = vld [vmem:[#allocation7 + $0x328] ss:$16 sps:$4 sm:$0xff]  }
 0x213   :  { %v1674_v58 = vpop.f32.mrb[0].mxu0 }
 0x214   :  { %v7369_v59 = vadd.f32 %v1674_v58, %v381_v56  ;;  %v1676_v60 = vpop.f32.mrb[1].mxu0  ;;  %v7980_v58 = vld [vmem:[#allocation7 + $0x348] ss:$16 sps:$4 sm:$0xff]  }
 0x215   :  { %v7371_v61 = vadd.f32 %v1676_v60, %v385_v57  ;;  %v1678_v62 = vpop.f32.mrb[2].mxu0  ;;  %v7988_v60 = vld [vmem:[#allocation7 + $0x36c] ss:$16 sps:$4 sm:$0xff]  }
 0x216   :  { %v7370_v63 = vadd.f32 %v7369_v59, %v9099_v3  ;;  %v7373_v1 = vadd.f32 %v1678_v62, %v381_v56  ;;  %v1680_v2 = vpop.f32.mrb[3].mxu0  ;;  %v7923_v3 = vld [vmem:[#allocation7 + $0x220] ss:$16 sps:$4 sm:$0xff]   ;;  %v7982_v56 = vld [vmem:[#allocation7 + $0x34c] ss:$16 sps:$4 sm:$0xff]  }
 0x217   :  { %v7372_v4 = vadd.f32 %v7371_v61, %v9101_v5  ;;  %v7375_v6 = vadd.f32 %v1680_v2, %v385_v57  ;;  %v7926_v5 = vld [vmem:[#allocation7 + $0x228] ss:$16 sps:$4 sm:$0xff]   ;;  %v7977_v57 = vld [vmem:[#allocation7 + $0x340] ss:$16 sps:$4 sm:$0xff]   ;;  %v7985_v59 = vld [vmem:[#allocation7 + $0x364] ss:$16 sps:$4 sm:$0xff]  }
 0x218   :  { %v7374_v9 = vadd.f32 %v7373_v1, %v9103_v7  ;;  %v1898_v11 = vmax.f32 %v7370_v63, 0.0  ;;  %v7931_v7 = vld [vmem:[#allocation7 + $0x244] ss:$16 sps:$4 sm:$0xff]   ;;  %v7983_v61 = vld [vmem:[#allocation7 + $0x360] ss:$16 sps:$4 sm:$0xff]   ;;  %v9129_v2 = vsub.s32 2, %v9107_v52 }
 0x219   :  { %v7376_v10 = vadd.f32 %v7375_v6, %v9105_v8  ;;  %v1899_v13 = vmax.f32 %v7372_v4, 0.0  ;;  %v7934_v8 = vld [vmem:[#allocation7 + $0x24c] ss:$16 sps:$4 sm:$0xff]   ;;  %v7986_v62 = vld [vmem:[#allocation7 + $0x368] ss:$16 sps:$4 sm:$0xff]  }
 0x21a   :  { %v1902_v12 = vmax.f32 %v7374_v9, 0.0  ;;  %v7991_v63 = vld [vmem:[#allocation7 + $0x384] ss:$16 sps:$4 sm:$0xff]   ;;  %v7994_v1 = vld [vmem:[#allocation7 + $0x38c] ss:$16 sps:$4 sm:$0xff]   ;;  %v9132_v9 = vsub.s32 3, %v9107_v52 }
 0x21b   :  { %v1903_v14 = vmax.f32 %v7376_v10, 0.0  ;;  %v7989_v4 = vld [vmem:[#allocation7 + $0x380] ss:$16 sps:$4 sm:$0xff]   ;;  %v7992_v6 = vld [vmem:[#allocation7 + $0x388] ss:$16 sps:$4 sm:$0xff]  }
 0x21c   :  { %v1906_v15 = vpack.c.bf16 %v1902_v12, %v1898_v11  ;;  %v7997_v10 = vld [vmem:[#allocation7 + $0x3a4] ss:$16 sps:$4 sm:$0xff]   ;;  %v8000_v11 = vld [vmem:[#allocation7 + $0x3ac] ss:$16 sps:$4 sm:$0xff]   ;;  %v389_v12 = vrot.slane %v9112_v53, %v9129_v2 }
 0x21d   :  { %v1907_v16 = vpack.c.bf16 %v1903_v14, %v1899_v13  ;;  %v7995_v13 = vld [vmem:[#allocation7 + $0x3a0] ss:$16 sps:$4 sm:$0xff]   ;;  %v7998_v14 = vld [vmem:[#allocation7 + $0x3a8] ss:$16 sps:$4 sm:$0xff]  }
 0x21f   :  { %2732 = vmatprep.mubr.bf16.mxu0 %v1907_v16  ;;  %2818 = vmatprep.mubr.bf16.mxu1 %v1907_v16  ;;  %v8003_v16 = vld [vmem:[#allocation7 + $0x3c4] ss:$16 sps:$4 sm:$0xff]  }
 0x220   :  { %2733 = vmatmul.mubr.bf16.vlgmr.msra.gmra.mrb[4].mxu0 %v1906_v15  ;;  %2819 = vmatmul.mubr.bf16.vlgmr.msra.gmra.mrb[8].mxu1 %v1906_v15  ;;  %v393_v15 = vrot.slane %v9112_v53, %v9132_v9 }
 0x221   :  { %2744 = vmatpush1.bf16.msra.mxu0 %v7917_v17  ;;  %2830 = vmatpush1.bf16.msra.mxu1 %v7920_v18  ;;  %v8006_v17 = vld [vmem:[#allocation7 + $0x3cc] ss:$16 sps:$4 sm:$0xff]  }
 0x222   :  { %2745 = vmatprep.subr.bf16.mxu0 %v7925_v19  ;;  %2831 = vmatprep.subr.bf16.mxu1 %v7928_v20 }
 0x225   :  { %2746 = vmatpush1.bf16.msra.mxu0 %v7923_v3  ;;  %2832 = vmatpush1.bf16.msra.mxu1 %v7926_v5 }
 0x226   :  { %2747 = vmatprep.subr.bf16.mxu0 %v7931_v7  ;;  %2833 = vmatprep.subr.bf16.mxu1 %v7934_v8  ;;  %v8001_v7 = vld [vmem:[#allocation7 + $0x3c0] ss:$16 sps:$4 sm:$0xff]   ;;  %v8004_v8 = vld [vmem:[#allocation7 + $0x3c8] ss:$16 sps:$4 sm:$0xff]  }
 0x229   :  { %2748 = vmatpush1.bf16.msra.mxu0 %v7929_v21  ;;  %2834 = vmatpush1.bf16.msra.mxu1 %v7932_v22 }
 0x22a   :  { %2749 = vmatprep.subr.bf16.mxu0 %v7937_v23  ;;  %2835 = vmatprep.subr.bf16.mxu1 %v7940_v24  ;;  %v8009_v23 = vld [vmem:[#allocation7 + $0x3e4] ss:$16 sps:$4 sm:$0xff]   ;;  %v8012_v24 = vld [vmem:[#allocation7 + $0x3ec] ss:$16 sps:$4 sm:$0xff]  }
 0x22d   :  { %2750 = vmatpush1.bf16.msra.mxu0 %v7935_v25  ;;  %2836 = vmatpush1.bf16.msra.mxu1 %v7938_v26 }
 0x22e   :  { %2751 = vmatprep.subr.bf16.mxu0 %v7943_v27  ;;  %2837 = vmatprep.subr.bf16.mxu1 %v7946_v28 }
 0x231   :  { %2752 = vmatpush1.bf16.msra.mxu0 %v7941_v29  ;;  %2838 = vmatpush1.bf16.msra.mxu1 %v7944_v30  ;;  %v8007_v29 = vld [vmem:[#allocation7 + $0x3e0] ss:$16 sps:$4 sm:$0xff]   ;;  %v8010_v30 = vld [vmem:[#allocation7 + $0x3e8] ss:$16 sps:$4 sm:$0xff]  }
 0x232   :  { %2753 = vmatprep.subr.bf16.mxu0 %v7949_v31  ;;  %2839 = vmatprep.subr.bf16.mxu1 %v7952_v32 }
 0x235   :  { %2754 = vmatpush1.bf16.msra.mxu0 %v7947_v33  ;;  %2840 = vmatpush1.bf16.msra.mxu1 %v7950_v34  ;;  %v8013_v33 = vld [vmem:[#allocation8 + $0x40] sm:$0xff]  }
 0x236   :  { %2755 = vmatprep.subr.bf16.mxu0 %v7955_v35  ;;  %2841 = vmatprep.subr.bf16.mxu1 %v7958_v36  ;;  %v8014_v34 = vld [vmem:[#allocation8 + $0xc0] sm:$0xff]  }
 0x237   :  { %v8015_v35 = vld [vmem:[#allocation8] sm:$0xff]  }
 0x238   :  { %v8016_v36 = vld [vmem:[#allocation8 + $0x80] sm:$0xff]  }
 0x239   :  { %2756 = vmatpush1.bf16.msra.mxu0 %v7953_v37  ;;  %2842 = vmatpush1.bf16.msra.mxu1 %v7956_v38  ;;  %v8017_v37 = vld [vmem:[#allocation8 + $0x48] sm:$0xff]  }
 0x23a   :  { %2757 = vmatprep.subr.bf16.mxu0 %v7961_v39  ;;  %2843 = vmatprep.subr.bf16.mxu1 %v7964_v40  ;;  %v8018_v38 = vld [vmem:[#allocation8 + $0xc8] sm:$0xff]  }
 0x23b   :  { %v8019_v39 = vld [vmem:[#allocation8 + $0x8] sm:$0xff]  }
 0x23c   :  { %v8020_v40 = vld [vmem:[#allocation8 + $0x88] sm:$0xff]  }
 0x23d   :  { %2758 = vmatpush1.bf16.msra.mxu0 %v7959_v41  ;;  %2844 = vmatpush1.bf16.msra.mxu1 %v7962_v42  ;;  %v8021_v41 = vld [vmem:[#allocation8 + $0x50] sm:$0xff]  }
 0x23e   :  { %2759 = vmatprep.subr.bf16.mxu0 %v7967_v43  ;;  %2845 = vmatprep.subr.bf16.mxu1 %v7970_v44  ;;  %v8022_v42 = vld [vmem:[#allocation8 + $0xd0] sm:$0xff]  }
 0x23f   :  { %v8023_v43 = vld [vmem:[#allocation8 + $0x10] sm:$0xff]  }
 0x240   :  { %v8024_v44 = vld [vmem:[#allocation8 + $0x90] sm:$0xff]  }
 0x241   :  { %2760 = vmatpush1.bf16.msra.mxu0 %v7965_v45  ;;  %2846 = vmatpush1.bf16.msra.mxu1 %v7968_v46  ;;  %v8025_v45 = vld [vmem:[#allocation8 + $0x58] sm:$0xff]  }
 0x242   :  { %2761 = vmatprep.subr.bf16.mxu0 %v7973_v47  ;;  %2847 = vmatprep.subr.bf16.mxu1 %v7976_v48  ;;  %v8026_v46 = vld [vmem:[#allocation8 + $0xd8] sm:$0xff]  }
 0x243   :  { %v8027_v47 = vld [vmem:[#allocation8 + $0x18] sm:$0xff]  }
 0x244   :  { %v8028_v48 = vld [vmem:[#allocation8 + $0x98] sm:$0xff]  }
 0x245   :  { %2762 = vmatpush1.bf16.msra.mxu0 %v7971_v49  ;;  %2848 = vmatpush1.bf16.msra.mxu1 %v7974_v50  ;;  %v8029_v49 = vld [vmem:[#allocation8 + $0x60] sm:$0xff]  }
 0x246   :  { %2763 = vmatprep.subr.bf16.mxu0 %v7979_v51  ;;  %2849 = vmatprep.subr.bf16.mxu1 %v7982_v56  ;;  %v8030_v50 = vld [vmem:[#allocation8 + $0xe0] sm:$0xff]  }
 0x247   :  { %v8031_v51 = vld [vmem:[#allocation8 + $0x20] sm:$0xff]  }
 0x248   :  { %v8032_v56 = vld [vmem:[#allocation8 + $0xa0] sm:$0xff]  }
 0x249   :  { %2764 = vmatpush1.bf16.msra.mxu0 %v7977_v57  ;;  %2850 = vmatpush1.bf16.msra.mxu1 %v7980_v58  ;;  %v8033_v57 = vld [vmem:[#allocation8 + $0x68] sm:$0xff]  }
 0x24a   :  { %2765 = vmatprep.subr.bf16.mxu0 %v7985_v59  ;;  %2851 = vmatprep.subr.bf16.mxu1 %v7988_v60  ;;  %v8034_v58 = vld [vmem:[#allocation8 + $0xe8] sm:$0xff]  }
 0x24b   :  { %v8035_v59 = vld [vmem:[#allocation8 + $0x28] sm:$0xff]  }
 0x24c   :  { %v8036_v60 = vld [vmem:[#allocation8 + $0xa8] sm:$0xff]  }
 0x24d   :  { %2766 = vmatpush1.bf16.msra.mxu0 %v7983_v61  ;;  %2852 = vmatpush1.bf16.msra.mxu1 %v7986_v62  ;;  %v8037_v61 = vld [vmem:[#allocation8 + $0x70] sm:$0xff]  }
 0x24e   :  { %2767 = vmatprep.subr.bf16.mxu0 %v7991_v63  ;;  %2853 = vmatprep.subr.bf16.mxu1 %v7994_v1  ;;  %v8038_v62 = vld [vmem:[#allocation8 + $0xf0] sm:$0xff]  }
 0x24f   :  { %v8039_v63 = vld [vmem:[#allocation8 + $0x30] sm:$0xff]  }
 0x250   :  { %v8040_v1 = vld [vmem:[#allocation8 + $0xb0] sm:$0xff]  }
 0x251   :  { %2768 = vmatpush1.bf16.msra.mxu0 %v7989_v4  ;;  %2854 = vmatpush1.bf16.msra.mxu1 %v7992_v6  ;;  %v8041_v4 = vld [vmem:[#allocation8 + $0x78] sm:$0xff]  }
 0x252   :  { %2769 = vmatprep.subr.bf16.mxu0 %v7997_v10  ;;  %2855 = vmatprep.subr.bf16.mxu1 %v8000_v11  ;;  %v8042_v6 = vld [vmem:[#allocation8 + $0xf8] sm:$0xff]  }
 0x253   :  { %v8043_v10 = vld [vmem:[#allocation8 + $0x38] sm:$0xff]  }
 0x254   :  { %v1889_v18 = vpop.f32.mrb[4].mxu1  ;;  %v8044_v11 = vld [vmem:[#allocation8 + $0xb8] sm:$0xff]  }
 0x255   :  { %v7377_v19 = vadd.f32 %v1889_v18, %v389_v12  ;;  %v1891_v20 = vpop.f32.mrb[5].mxu1  ;;  %2770 = vmatpush1.bf16.msra.mxu0 %v7995_v13  ;;  %2856 = vmatpush1.bf16.msra.mxu1 %v7998_v14  ;;  %v8050_v13 = vld [vmem:[#allocation10 + $0xc] ss:$16 sps:$4 sm:$0xff]   ;;  %v2038_v14 = vld [vmem:[%s9242_s4] sm:$0xf] }
 0x256   :  { %v7378_v3 = vadd.f32 %v1891_v20, %v393_v15  ;;  %v1893_v5 = vpop.f32.mrb[6].mxu1  ;;  %2771 = vmatprep.subr.bf16.mxu0 %v8003_v16  ;;  %2857 = vmatprep.subr.bf16.mxu1 %v8006_v17  ;;  %v2051_v16 = vrot.slane %v2038_v14, %v9129_v2  ;;  %v2047_v17 = vrot.slane %v2038_v14, %v9118_v55 }
 0x257   :  { %v7379_v21 = vadd.f32 %v1893_v5, %v389_v12  ;;  %v1895_v22 = vpop.f32.mrb[7].mxu1  ;;  %v1900_v25 = vmax.f32 %v7377_v19, 0.0  ;;  %v8047_v12 = vld [vmem:[#allocation10 + $0x4] ss:$16 sps:$4 sm:$0xff]   ;;  %v2055_v18 = vrot.slane %v2038_v14, %v9132_v9 }
 0x258   :  { %v7380_v53 = vadd.f32 %v1895_v22, %v393_v15  ;;  %v1901_v27 = vmax.f32 %v7378_v3, 0.0  ;;  %v2043_v15 = vrot.slane %v2038_v14, %v9115_v54  ;;  %v8089_v14 = vld [vmem:[#allocation10 + $0xe4] ss:$16 sps:$4 sm:$0xff]  }
 0x259   :  { %v1904_v26 = vmax.f32 %v7379_v21, 0.0  ;;  %2772 = vmatpush1.bf16.msra.mxu0 %v8001_v7  ;;  %2858 = vmatpush1.bf16.msra.mxu1 %v8004_v8 }
 0x25a   :  { %v1905_v28 = vmax.f32 %v7380_v53, 0.0  ;;  %2773 = vmatprep.subr.bf16.mxu0 %v8009_v23  ;;  %2859 = vmatprep.subr.bf16.mxu1 %v8012_v24 }
 0x25b   :  { %v1908_v31 = vpack.c.bf16 %v1904_v26, %v1900_v25 }
 0x25c   :  { %v1909_v32 = vpack.c.bf16 %v1905_v28, %v1901_v27 }
 0x25d   :  { %2774 = vmatpush1.bf16.msra.mxu0 %v8007_v29  ;;  %2860 = vmatpush1.bf16.msra.mxu1 %v8010_v30 }
 0x25e   :  { %2775 = vmatprep.mubr.bf16.mxu0 %v1909_v32  ;;  %2861 = vmatprep.mubr.bf16.mxu1 %v1909_v32 }
 0x25f   :  { %7281 = vmatprep.subr.bf16.mxu0 %v8013_v33  ;;  %7303 = vmatprep.subr.bf16.mxu1 %v8014_v34 }
 0x260   :  { %2776 = vmatmul.mubr.bf16.vlgmr.msra.gmra.mrb[4].mxu0 %v1908_v31  ;;  %2862 = vmatmul.mubr.bf16.vlgmr.msra.gmra.mrb[8].mxu1 %v1908_v31 }
 0x261   :  { %7282 = vmatpush3.bf16.msra.mxu0 %v8015_v35  ;;  %7304 = vmatpush3.bf16.msra.mxu1 %v8016_v36 }
 0x262   :  { %7283 = vmatprep.subr.bf16.mxu0 %v8017_v37  ;;  %7305 = vmatprep.subr.bf16.mxu1 %v8018_v38 }
 0x265   :  { %7284 = vmatpush3.bf16.msra.mxu0 %v8019_v39  ;;  %7306 = vmatpush3.bf16.msra.mxu1 %v8020_v40 }
 0x266   :  { %7285 = vmatprep.subr.bf16.mxu0 %v8021_v41  ;;  %7307 = vmatprep.subr.bf16.mxu1 %v8022_v42  ;;  %v8045_v42 = vld [vmem:[#allocation10] ss:$16 sps:$4 sm:$0xff]  }
 0x269   :  { %7286 = vmatpush3.bf16.msra.mxu0 %v8023_v43  ;;  %7308 = vmatpush3.bf16.msra.mxu1 %v8024_v44  ;;  %v8048_v43 = vld [vmem:[#allocation10 + $0x8] ss:$16 sps:$4 sm:$0xff]   ;;  %v8053_v44 = vld [vmem:[#allocation10 + $0x24] ss:$16 sps:$4 sm:$0xff]  }
 0x26a   :  { %7287 = vmatprep.subr.bf16.mxu0 %v8025_v45  ;;  %7309 = vmatprep.subr.bf16.mxu1 %v8026_v46  ;;  %v8056_v45 = vld [vmem:[#allocation10 + $0x2c] ss:$16 sps:$4 sm:$0xff]   ;;  %v8051_v46 = vld [vmem:[#allocation10 + $0x20] ss:$16 sps:$4 sm:$0xff]  }
 0x26d   :  { %7288 = vmatpush3.bf16.msra.mxu0 %v8027_v47  ;;  %7310 = vmatpush3.bf16.msra.mxu1 %v8028_v48  ;;  %v8054_v47 = vld [vmem:[#allocation10 + $0x28] ss:$16 sps:$4 sm:$0xff]   ;;  %v8059_v48 = vld [vmem:[#allocation10 + $0x44] ss:$16 sps:$4 sm:$0xff]  }
 0x26e   :  { %7289 = vmatprep.subr.bf16.mxu0 %v8029_v49  ;;  %7311 = vmatprep.subr.bf16.mxu1 %v8030_v50  ;;  %v8062_v49 = vld [vmem:[#allocation10 + $0x4c] ss:$16 sps:$4 sm:$0xff]   ;;  %v8057_v50 = vld [vmem:[#allocation10 + $0x40] ss:$16 sps:$4 sm:$0xff]  }
 0x271   :  { %7290 = vmatpush3.bf16.msra.mxu0 %v8031_v51  ;;  %7312 = vmatpush3.bf16.msra.mxu1 %v8032_v56  ;;  %v8060_v51 = vld [vmem:[#allocation10 + $0x48] ss:$16 sps:$4 sm:$0xff]   ;;  %v8065_v56 = vld [vmem:[#allocation10 + $0x64] ss:$16 sps:$4 sm:$0xff]  }
 0x272   :  { %7291 = vmatprep.subr.bf16.mxu0 %v8033_v57  ;;  %7313 = vmatprep.subr.bf16.mxu1 %v8034_v58  ;;  %v8068_v57 = vld [vmem:[#allocation10 + $0x6c] ss:$16 sps:$4 sm:$0xff]   ;;  %v8063_v58 = vld [vmem:[#allocation10 + $0x60] ss:$16 sps:$4 sm:$0xff]  }
 0x275   :  { %7292 = vmatpush3.bf16.msra.mxu0 %v8035_v59  ;;  %7314 = vmatpush3.bf16.msra.mxu1 %v8036_v60  ;;  %v8066_v59 = vld [vmem:[#allocation10 + $0x68] ss:$16 sps:$4 sm:$0xff]   ;;  %v8071_v60 = vld [vmem:[#allocation10 + $0x84] ss:$16 sps:$4 sm:$0xff]  }
 0x276   :  { %7293 = vmatprep.subr.bf16.mxu0 %v8037_v61  ;;  %7315 = vmatprep.subr.bf16.mxu1 %v8038_v62  ;;  %v8074_v61 = vld [vmem:[#allocation10 + $0x8c] ss:$16 sps:$4 sm:$0xff]   ;;  %v8069_v62 = vld [vmem:[#allocation10 + $0x80] ss:$16 sps:$4 sm:$0xff]  }
 0x279   :  { %7294 = vmatpush3.bf16.msra.mxu0 %v8039_v63  ;;  %7316 = vmatpush3.bf16.msra.mxu1 %v8040_v1  ;;  %v8077_v63 = vld [vmem:[#allocation10 + $0xa4] ss:$16 sps:$4 sm:$0xff]   ;;  %v8080_v1 = vld [vmem:[#allocation10 + $0xac] ss:$16 sps:$4 sm:$0xff]  }
 0x27a   :  { %7295 = vmatprep.subr.bf16.mxu0 %v8041_v4  ;;  %7317 = vmatprep.subr.bf16.mxu1 %v8042_v6  ;;  %v8075_v4 = vld [vmem:[#allocation10 + $0xa0] ss:$16 sps:$4 sm:$0xff]   ;;  %v8078_v6 = vld [vmem:[#allocation10 + $0xa8] ss:$16 sps:$4 sm:$0xff]  }
 0x27d   :  { %7296 = vmatpush3.bf16.msra.mxu0 %v8043_v10  ;;  %7318 = vmatpush3.bf16.msra.mxu1 %v8044_v11  ;;  %v8083_v10 = vld [vmem:[#allocation10 + $0xc4] ss:$16 sps:$4 sm:$0xff]   ;;  %v8086_v11 = vld [vmem:[#allocation10 + $0xcc] ss:$16 sps:$4 sm:$0xff]  }
 0x27e   :  { %3444 = vmatprep.subr.bf16.mxu0 %v8047_v12  ;;  %3487 = vmatprep.subr.bf16.mxu1 %v8050_v13  ;;  %v8081_v12 = vld [vmem:[#allocation10 + $0xc0] ss:$16 sps:$4 sm:$0xff]   ;;  %v8084_v13 = vld [vmem:[#allocation10 + $0xc8] ss:$16 sps:$4 sm:$0xff]  }
 0x333   :  { %v2777_v19 = vpop.f32.mrb[4].mxu0  ;;  %v2863_v20 = vpop.f32.mrb[8].mxu1 }
 0x334   :  { %v7381_v3 = vadd.f32 %v2777_v19, %v2043_v15  ;;  %v7385_v5 = vadd.f32 %v2863_v20, %v2051_v16  ;;  %v2779_v7 = vpop.f32.mrb[5].mxu0  ;;  %v2865_v8 = vpop.f32.mrb[9].mxu1  ;;  %v8098_v19 = vld [vmem:[#allocation11 + $0xc] ss:$16 sps:$4 sm:$0xff]  }
 0x335   :  { %v7382_v21 = vadd.f32 %v2779_v7, %v2047_v17  ;;  %v7386_v22 = vadd.f32 %v2865_v8, %v2055_v18  ;;  %v2781_v23 = vpop.f32.mrb[6].mxu0  ;;  %v2867_v24 = vpop.f32.mrb[10].mxu1 }
 0x336   :  { %v7383_v53 = vadd.f32 %v2781_v23, %v2043_v15  ;;  %v7387_v25 = vadd.f32 %v2867_v24, %v2051_v16  ;;  %v2783_v26 = vpop.f32.mrb[7].mxu0  ;;  %v2869_v27 = vpop.f32.mrb[11].mxu1  ;;  %v2872_v30 = vmax.f32 %v7381_v3, 0.0  ;;  %v2874_v31 = vmax.f32 %v7385_v5, 0.0  ;;  %v8092_v15 = vld [vmem:[#allocation10 + $0xec] ss:$16 sps:$4 sm:$0xff]  }
 0x337   :  { %v7384_v28 = vadd.f32 %v2783_v26, %v2047_v17  ;;  %v7388_v29 = vadd.f32 %v2869_v27, %v2055_v18  ;;  %v2873_v34 = vmax.f32 %v7382_v21, 0.0  ;;  %v2875_v35 = vmax.f32 %v7386_v22, 0.0  ;;  %v8087_v16 = vld [vmem:[#allocation10 + $0xe0] ss:$16 sps:$4 sm:$0xff]   ;;  %v8090_v17 = vld [vmem:[#allocation10 + $0xe8] ss:$16 sps:$4 sm:$0xff]  }
 0x338   :  { %v2876_v32 = vmax.f32 %v7383_v53, 0.0  ;;  %v2878_v33 = vmax.f32 %v7387_v25, 0.0  ;;  %v8095_v18 = vld [vmem:[#allocation11 + $0x4] ss:$16 sps:$4 sm:$0xff]   ;;  %v6834_v5 = vld [vmem:[%s9244_s6] ss:$0 sm:$0xff] }
 0x339   :  { %v2877_v36 = vmax.f32 %v7384_v28, 0.0  ;;  %v2879_v37 = vmax.f32 %v7388_v29, 0.0 }
 0x33a   :  { %v2880_v38 = vpack.c.bf16 %v2876_v32, %v2872_v30  ;;  %v2882_v39 = vpack.c.bf16 %v2878_v33, %v2874_v31  ;;  %v8093_v32 = vld [vmem:[#allocation11] ss:$16 sps:$4 sm:$0xff]   ;;  %v8096_v33 = vld [vmem:[#allocation11 + $0x8] ss:$16 sps:$4 sm:$0xff]  }
 0x33b   :  { %v2881_v40 = vpack.c.bf16 %v2877_v36, %v2873_v34  ;;  %v2883_v41 = vpack.c.bf16 %v2879_v37, %v2875_v35  ;;  %v8101_v35 = vld [vmem:[#allocation11 + $0x24] ss:$16 sps:$4 sm:$0xff]   ;;  %v8104_v36 = vld [vmem:[#allocation11 + $0x2c] ss:$16 sps:$4 sm:$0xff]   ;;  %v8099_v37 = vld [vmem:[#allocation11 + $0x20] ss:$16 sps:$4 sm:$0xff]  }
 0x33d   :  { %3179 = vmatprep.mubr.bf16.mxu0 %v2881_v40  ;;  %3220 = vmatprep.mubr.bf16.mxu1 %v2883_v41  ;;  %v8110_v40 = vld [vmem:[#allocation11 + $0x4c] ss:$16 sps:$4 sm:$0xff]   ;;  %v8105_v41 = vld [vmem:[#allocation11 + $0x40] ss:$16 sps:$4 sm:$0xff]  }
 0x33e   :  { %3180 = vmatmul.mubr.bf16.vlgmr.msra.gmra.mrb[8].mxu0 %v2880_v38  ;;  %3221 = vmatmul.mubr.bf16.vlgmr.msra.gmra.mrb[12].mxu1 %v2882_v39  ;;  %v8102_v38 = vld [vmem:[#allocation11 + $0x28] ss:$16 sps:$4 sm:$0xff]   ;;  %v8107_v39 = vld [vmem:[#allocation11 + $0x44] ss:$16 sps:$4 sm:$0xff]  }
 0x33f   :  { %3445 = vmatpush1.bf16.msra.mxu0 %v8045_v42  ;;  %3488 = vmatpush1.bf16.msra.mxu1 %v8048_v43  ;;  %v8108_v42 = vld [vmem:[#allocation11 + $0x48] ss:$16 sps:$4 sm:$0xff]   ;;  %v8113_v43 = vld [vmem:[#allocation11 + $0x64] ss:$16 sps:$4 sm:$0xff]  }
 0x340   :  { %3446 = vmatprep.subr.bf16.mxu0 %v8053_v44  ;;  %3489 = vmatprep.subr.bf16.mxu1 %v8056_v45  ;;  %v8116_v44 = vld [vmem:[#allocation11 + $0x6c] ss:$16 sps:$4 sm:$0xff]   ;;  %v8111_v45 = vld [vmem:[#allocation11 + $0x60] ss:$16 sps:$4 sm:$0xff]  }
 0x341   :  { %3476 = vmatprep.mubr.bf16.mxu0 %v8885_v0  ;;  %3519 = vmatprep.mubr.bf16.mxu1 %v8885_v0  ;;  %v8072_v0 = vld [vmem:[#allocation10 + $0x88] ss:$16 sps:$4 sm:$0xff]  }
 0x343   :  { %3447 = vmatpush1.bf16.msra.mxu0 %v8051_v46  ;;  %3490 = vmatpush1.bf16.msra.mxu1 %v8054_v47  ;;  %v8114_v46 = vld [vmem:[#allocation11 + $0x68] ss:$16 sps:$4 sm:$0xff]   ;;  %v8119_v47 = vld [vmem:[#allocation11 + $0x84] ss:$16 sps:$4 sm:$0xff]  }
 0x344   :  { %3448 = vmatprep.subr.bf16.mxu0 %v8059_v48  ;;  %3491 = vmatprep.subr.bf16.mxu1 %v8062_v49  ;;  %v8122_v48 = vld [vmem:[#allocation11 + $0x8c] ss:$16 sps:$4 sm:$0xff]   ;;  %v8117_v49 = vld [vmem:[#allocation11 + $0x80] ss:$16 sps:$4 sm:$0xff]  }
 0x347   :  { %3449 = vmatpush1.bf16.msra.mxu0 %v8057_v50  ;;  %3492 = vmatpush1.bf16.msra.mxu1 %v8060_v51  ;;  %v8120_v50 = vld [vmem:[#allocation11 + $0x88] ss:$16 sps:$4 sm:$0xff]   ;;  %v8125_v51 = vld [vmem:[#allocation11 + $0xa4] ss:$16 sps:$4 sm:$0xff]  }
 0x348   :  { %3450 = vmatprep.subr.bf16.mxu0 %v8065_v56  ;;  %3493 = vmatprep.subr.bf16.mxu1 %v8068_v57  ;;  %v8128_v56 = vld [vmem:[#allocation11 + $0xac] ss:$16 sps:$4 sm:$0xff]   ;;  %v8123_v57 = vld [vmem:[#allocation11 + $0xa0] ss:$16 sps:$4 sm:$0xff]  }
 0x34b   :  { %3451 = vmatpush1.bf16.msra.mxu0 %v8063_v58  ;;  %3494 = vmatpush1.bf16.msra.mxu1 %v8066_v59  ;;  %v8126_v58 = vld [vmem:[#allocation11 + $0xa8] ss:$16 sps:$4 sm:$0xff]   ;;  %v8131_v59 = vld [vmem:[#allocation11 + $0xc4] ss:$16 sps:$4 sm:$0xff]  }
 0x34c   :  { %3452 = vmatprep.subr.bf16.mxu0 %v8071_v60  ;;  %3495 = vmatprep.subr.bf16.mxu1 %v8074_v61  ;;  %v8134_v60 = vld [vmem:[#allocation11 + $0xcc] ss:$16 sps:$4 sm:$0xff]   ;;  %v8129_v61 = vld [vmem:[#allocation11 + $0xc0] ss:$16 sps:$4 sm:$0xff]  }
 0x34f   :  { %3453 = vmatpush1.bf16.msra.mxu0 %v8069_v62  ;;  %3496 = vmatpush1.bf16.msra.mxu1 %v8072_v0  ;;  %v8132_v62 = vld [vmem:[#allocation11 + $0xc8] ss:$16 sps:$4 sm:$0xff]   ;;  %v8137_v0 = vld [vmem:[#allocation11 + $0xe4] ss:$16 sps:$4 sm:$0xff]  }
 0x350   :  { %3454 = vmatprep.subr.bf16.mxu0 %v8077_v63  ;;  %3497 = vmatprep.subr.bf16.mxu1 %v8080_v1  ;;  %v8140_v63 = vld [vmem:[#allocation11 + $0xec] ss:$16 sps:$4 sm:$0xff]   ;;  %v8135_v1 = vld [vmem:[#allocation11 + $0xe0] ss:$16 sps:$4 sm:$0xff]  }
 0x353   :  { %3455 = vmatpush1.bf16.msra.mxu0 %v8075_v4  ;;  %3498 = vmatpush1.bf16.msra.mxu1 %v8078_v6  ;;  %v8138_v4 = vld [vmem:[#allocation11 + $0xe8] ss:$16 sps:$4 sm:$0xff]   ;;  %v8143_v6 = vld [vmem:[#allocation11 + $0x104] ss:$16 sps:$4 sm:$0xff]  }
 0x354   :  { %3456 = vmatprep.subr.bf16.mxu0 %v8083_v10  ;;  %3499 = vmatprep.subr.bf16.mxu1 %v8086_v11  ;;  %v8146_v10 = vld [vmem:[#allocation11 + $0x10c] ss:$16 sps:$4 sm:$0xff]   ;;  %v8141_v11 = vld [vmem:[#allocation11 + $0x100] ss:$16 sps:$4 sm:$0xff]  }
 0x357   :  { %3457 = vmatpush1.bf16.msra.mxu0 %v8081_v12  ;;  %3500 = vmatpush1.bf16.msra.mxu1 %v8084_v13  ;;  %v8144_v12 = vld [vmem:[#allocation11 + $0x108] ss:$16 sps:$4 sm:$0xff]   ;;  %v8149_v13 = vld [vmem:[#allocation11 + $0x124] ss:$16 sps:$4 sm:$0xff]  }
 0x358   :  { %3458 = vmatprep.subr.bf16.mxu0 %v8089_v14  ;;  %3501 = vmatprep.subr.bf16.mxu1 %v8092_v15  ;;  %v8152_v14 = vld [vmem:[#allocation11 + $0x12c] ss:$16 sps:$4 sm:$0xff]   ;;  %v8147_v15 = vld [vmem:[#allocation11 + $0x120] ss:$16 sps:$4 sm:$0xff]  }
 0x35b   :  { %3459 = vmatpush1.bf16.msra.mxu0 %v8087_v16  ;;  %3502 = vmatpush1.bf16.msra.mxu1 %v8090_v17  ;;  %v8150_v16 = vld [vmem:[#allocation11 + $0x128] ss:$16 sps:$4 sm:$0xff]   ;;  %v8155_v17 = vld [vmem:[#allocation11 + $0x144] ss:$16 sps:$4 sm:$0xff]  }
 0x35c   :  { %4332 = vmatprep.subr.bf16.mxu0 %v8095_v18  ;;  %4418 = vmatprep.subr.bf16.mxu1 %v8098_v19  ;;  %v8158_v18 = vld [vmem:[#allocation11 + $0x14c] ss:$16 sps:$4 sm:$0xff]   ;;  %v8153_v19 = vld [vmem:[#allocation11 + $0x140] ss:$16 sps:$4 sm:$0xff]  }
 0x411   :  { %v7297_v20 = vpop.f32.mrb[8].mxu0  ;;  %v7319_v3 = vpop.f32.mrb[12].mxu1 }
 0x412   :  { %v7298_v7 = vpop.f32.mrb[9].mxu0  ;;  %v7320_v8 = vpop.f32.mrb[13].mxu1 }
 0x413   :  { %v7299_v21 = vadd.f32 %v7298_v7, %v7297_v20  ;;  %v7321_v22 = vadd.f32 %v7320_v8, %v7319_v3  ;;  %v7300_v23 = vpop.f32.mrb[10].mxu0  ;;  %v7322_v24 = vpop.f32.mrb[14].mxu1  ;;  %v8156_v20 = vld [vmem:[#allocation11 + $0x148] ss:$16 sps:$4 sm:$0xff]   ;;  %v8161_v3 = vld [vmem:[#allocation11 + $0x164] ss:$16 sps:$4 sm:$0xff]  }
 0x414   :  { %v7301_v53 = vpop.f32.mrb[11].mxu0  ;;  %v7323_v25 = vpop.f32.mrb[15].mxu1  ;;  %v8159_v7 = vld [vmem:[#allocation11 + $0x160] ss:$16 sps:$4 sm:$0xff]   ;;  %v8162_v8 = vld [vmem:[#allocation11 + $0x168] ss:$16 sps:$4 sm:$0xff]  }
 0x415   :  { %v3182_v26 = vadd.f32 %v7299_v21, %v6834_v5  ;;  %v7302_v27 = vadd.f32 %v7301_v53, %v7300_v23  ;;  %v7324_v28 = vadd.f32 %v7323_v25, %v7322_v24  ;;  %v8167_v21 = vld [vmem:[#allocation11 + $0x184] ss:$16 sps:$4 sm:$0xff]   ;;  %v8165_v23 = vld [vmem:[#allocation11 + $0x180] ss:$16 sps:$4 sm:$0xff]   ;;  %v8168_v24 = vld [vmem:[#allocation11 + $0x188] ss:$16 sps:$4 sm:$0xff]  }
 0x416   :  { %v8173_v53 = vld [vmem:[#allocation11 + $0x1a4] ss:$16 sps:$4 sm:$0xff]   ;;  %v8176_v25 = vld [vmem:[#allocation11 + $0x1ac] ss:$16 sps:$4 sm:$0xff]  }
 0x417   :  { %v3223_v29 = vadd.f32 %v7321_v22, %v3182_v26  ;;  %v3185_v30 = vadd.f32 %v7302_v27, %v6834_v5  ;;  %v8164_v5 = vld [vmem:[#allocation11 + $0x16c] ss:$16 sps:$4 sm:$0xff]   ;;  %v8171_v26 = vld [vmem:[#allocation11 + $0x1a0] ss:$16 sps:$4 sm:$0xff]   ;;  %v8174_v27 = vld [vmem:[#allocation11 + $0x1a8] ss:$16 sps:$4 sm:$0xff]  }
 0x418   :  { %v8170_v22 = vld [vmem:[#allocation11 + $0x18c] ss:$16 sps:$4 sm:$0xff]  }
 0x419   :  { %6437 = vst [vmem:[#allocation15] sm:$0xff] %v3223_v29  ;;  %v3226_v31 = vadd.f32 %v7324_v28, %v3185_v30  ;;  %v8179_v28 = vld [vmem:[#allocation11 + $0x1c4] ss:$16 sps:$4 sm:$0xff]   ;;  %v8177_v30 = vld [vmem:[#allocation11 + $0x1c0] ss:$16 sps:$4 sm:$0xff]  }
 0x41b   :  { %v3229_v34 = vpack.c.bf16 %v3226_v31, %v3223_v29  ;;  %6438 = vst [vmem:[#allocation15 + $0x8] sm:$0xff] %v3226_v31  ;;  %v8182_v29 = vld [vmem:[#allocation11 + $0x1cc] ss:$16 sps:$4 sm:$0xff]   ;;  %v8180_v31 = vld [vmem:[#allocation11 + $0x1c8] ss:$16 sps:$4 sm:$0xff]  }
 0x41d   :  { %3477 = vmatmul.mubr.bf16.vlgmr.msra.gmra.mrb[12].mxu0 %v3229_v34  ;;  %3520 = vmatmul.mubr.bf16.vlgmr.msra.gmra.mrb[16].mxu1 %v3229_v34  ;;  %v8183_v34 = vld [vmem:[#allocation11 + $0x1e0] ss:$16 sps:$4 sm:$0xff]  }
 0x41e   :  { %4333 = vmatpush1.bf16.msra.mxu0 %v8093_v32  ;;  %4419 = vmatpush1.bf16.msra.mxu1 %v8096_v33  ;;  %v8185_v32 = vld [vmem:[#allocation11 + $0x1e4] ss:$16 sps:$4 sm:$0xff]   ;;  %v8188_v33 = vld [vmem:[#allocation11 + $0x1ec] ss:$16 sps:$4 sm:$0xff]  }
 0x41f   :  { %4334 = vmatprep.subr.bf16.mxu0 %v8101_v35  ;;  %4420 = vmatprep.subr.bf16.mxu1 %v8104_v36  ;;  %v8186_v35 = vld [vmem:[#allocation11 + $0x1e8] ss:$16 sps:$4 sm:$0xff]   ;;  %v8191_v36 = vld [vmem:[#allocation11 + $0x204] ss:$16 sps:$4 sm:$0xff]  }
 0x422   :  { %4335 = vmatpush1.bf16.msra.mxu0 %v8099_v37  ;;  %4421 = vmatpush1.bf16.msra.mxu1 %v8102_v38  ;;  %v8194_v37 = vld [vmem:[#allocation11 + $0x20c] ss:$16 sps:$4 sm:$0xff]   ;;  %v3262_v38 = vld [vmem:[%s9246_s8] sm:$0xf] }
 0x423   :  { %4336 = vmatprep.subr.bf16.mxu0 %v8107_v39  ;;  %4422 = vmatprep.subr.bf16.mxu1 %v8110_v40  ;;  %v3267_v39 = vrot.slane %v3262_v38, %v9115_v54  ;;  %v3275_v40 = vrot.slane %v3262_v38, %v9129_v2 }
 0x426   :  { %4337 = vmatpush1.bf16.msra.mxu0 %v8105_v41  ;;  %4423 = vmatpush1.bf16.msra.mxu1 %v8108_v42  ;;  %v3271_v41 = vrot.slane %v3262_v38, %v9118_v55  ;;  %v3279_v42 = vrot.slane %v3262_v38, %v9132_v9  ;;  %v8233_v38 = vld [vmem:[#allocation11 + $0x2e4] ss:$16 sps:$4 sm:$0xff]  }
 0x427   :  { %4338 = vmatprep.subr.bf16.mxu0 %v8113_v43  ;;  %4424 = vmatprep.subr.bf16.mxu1 %v8116_v44 }
 0x42a   :  { %4339 = vmatpush1.bf16.msra.mxu0 %v8111_v45  ;;  %4425 = vmatpush1.bf16.msra.mxu1 %v8114_v46 }
 0x42b   :  { %4340 = vmatprep.subr.bf16.mxu0 %v8119_v47  ;;  %4426 = vmatprep.subr.bf16.mxu1 %v8122_v48 }
 0x42e   :  { %4341 = vmatpush1.bf16.msra.mxu0 %v8117_v49  ;;  %4427 = vmatpush1.bf16.msra.mxu1 %v8120_v50 }
 0x42f   :  { %4342 = vmatprep.subr.bf16.mxu0 %v8125_v51  ;;  %4428 = vmatprep.subr.bf16.mxu1 %v8128_v56 }
 0x432   :  { %4343 = vmatpush1.bf16.msra.mxu0 %v8123_v57  ;;  %4429 = vmatpush1.bf16.msra.mxu1 %v8126_v58 }
 0x433   :  { %4344 = vmatprep.subr.bf16.mxu0 %v8131_v59  ;;  %4430 = vmatprep.subr.bf16.mxu1 %v8134_v60 }
 0x436   :  { %4345 = vmatpush1.bf16.msra.mxu0 %v8129_v61  ;;  %4431 = vmatpush1.bf16.msra.mxu1 %v8132_v62 }
 0x437   :  { %4346 = vmatprep.subr.bf16.mxu0 %v8137_v0  ;;  %4432 = vmatprep.subr.bf16.mxu1 %v8140_v63 }
 0x43a   :  { %4347 = vmatpush1.bf16.msra.mxu0 %v8135_v1  ;;  %4433 = vmatpush1.bf16.msra.mxu1 %v8138_v4 }
 0x43b   :  { %4348 = vmatprep.subr.bf16.mxu0 %v8143_v6  ;;  %4434 = vmatprep.subr.bf16.mxu1 %v8146_v10 }
 0x43e   :  { %4349 = vmatpush1.bf16.msra.mxu0 %v8141_v11  ;;  %4435 = vmatpush1.bf16.msra.mxu1 %v8144_v12 }
 0x43f   :  { %4350 = vmatprep.subr.bf16.mxu0 %v8149_v13  ;;  %4436 = vmatprep.subr.bf16.mxu1 %v8152_v14 }
 0x442   :  { %4351 = vmatpush1.bf16.msra.mxu0 %v8147_v15  ;;  %4437 = vmatpush1.bf16.msra.mxu1 %v8150_v16 }
 0x443   :  { %4352 = vmatprep.subr.bf16.mxu0 %v8155_v17  ;;  %4438 = vmatprep.subr.bf16.mxu1 %v8158_v18  ;;  %v8189_v17 = vld [vmem:[#allocation11 + $0x200] ss:$16 sps:$4 sm:$0xff]   ;;  %v8192_v18 = vld [vmem:[#allocation11 + $0x208] ss:$16 sps:$4 sm:$0xff]  }
 0x446   :  { %4353 = vmatpush1.bf16.msra.mxu0 %v8153_v19  ;;  %4439 = vmatpush1.bf16.msra.mxu1 %v8156_v20  ;;  %v8197_v19 = vld [vmem:[#allocation11 + $0x224] ss:$16 sps:$4 sm:$0xff]   ;;  %v8200_v20 = vld [vmem:[#allocation11 + $0x22c] ss:$16 sps:$4 sm:$0xff]  }
 0x447   :  { %4354 = vmatprep.subr.bf16.mxu0 %v8161_v3  ;;  %4440 = vmatprep.subr.bf16.mxu1 %v8164_v5  ;;  %v8195_v3 = vld [vmem:[#allocation11 + $0x220] ss:$16 sps:$4 sm:$0xff]   ;;  %v8198_v5 = vld [vmem:[#allocation11 + $0x228] ss:$16 sps:$4 sm:$0xff]  }
 0x44a   :  { %4355 = vmatpush1.bf16.msra.mxu0 %v8159_v7  ;;  %4441 = vmatpush1.bf16.msra.mxu1 %v8162_v8  ;;  %v8203_v7 = vld [vmem:[#allocation11 + $0x244] ss:$16 sps:$4 sm:$0xff]   ;;  %v8206_v8 = vld [vmem:[#allocation11 + $0x24c] ss:$16 sps:$4 sm:$0xff]  }
 0x44b   :  { %4356 = vmatprep.subr.bf16.mxu0 %v8167_v21  ;;  %4442 = vmatprep.subr.bf16.mxu1 %v8170_v22  ;;  %v8201_v21 = vld [vmem:[#allocation11 + $0x240] ss:$16 sps:$4 sm:$0xff]   ;;  %v8204_v22 = vld [vmem:[#allocation11 + $0x248] ss:$16 sps:$4 sm:$0xff]  }
 0x44e   :  { %4357 = vmatpush1.bf16.msra.mxu0 %v8165_v23  ;;  %4443 = vmatpush1.bf16.msra.mxu1 %v8168_v24  ;;  %v8209_v23 = vld [vmem:[#allocation11 + $0x264] ss:$16 sps:$4 sm:$0xff]   ;;  %v8212_v24 = vld [vmem:[#allocation11 + $0x26c] ss:$16 sps:$4 sm:$0xff]  }
 0x44f   :  { %4358 = vmatprep.subr.bf16.mxu0 %v8173_v53  ;;  %4444 = vmatprep.subr.bf16.mxu1 %v8176_v25  ;;  %v8207_v53 = vld [vmem:[#allocation11 + $0x260] ss:$16 sps:$4 sm:$0xff]   ;;  %v8210_v25 = vld [vmem:[#allocation11 + $0x268] ss:$16 sps:$4 sm:$0xff]  }
 0x452   :  { %4359 = vmatpush1.bf16.msra.mxu0 %v8171_v26  ;;  %4445 = vmatpush1.bf16.msra.mxu1 %v8174_v27  ;;  %v8215_v26 = vld [vmem:[#allocation11 + $0x284] ss:$16 sps:$4 sm:$0xff]   ;;  %v8218_v27 = vld [vmem:[#allocation11 + $0x28c] ss:$16 sps:$4 sm:$0xff]  }
 0x453   :  { %4360 = vmatprep.subr.bf16.mxu0 %v8179_v28  ;;  %4446 = vmatprep.subr.bf16.mxu1 %v8182_v29  ;;  %v8213_v28 = vld [vmem:[#allocation11 + $0x280] ss:$16 sps:$4 sm:$0xff]   ;;  %v8216_v29 = vld [vmem:[#allocation11 + $0x288] ss:$16 sps:$4 sm:$0xff]  }
 0x456   :  { %4361 = vmatpush1.bf16.msra.mxu0 %v8177_v30  ;;  %4447 = vmatpush1.bf16.msra.mxu1 %v8180_v31  ;;  %v8221_v30 = vld [vmem:[#allocation11 + $0x2a4] ss:$16 sps:$4 sm:$0xff]   ;;  %v8224_v31 = vld [vmem:[#allocation11 + $0x2ac] ss:$16 sps:$4 sm:$0xff]  }
 0x457   :  { %4362 = vmatprep.subr.bf16.mxu0 %v8185_v32  ;;  %4448 = vmatprep.subr.bf16.mxu1 %v8188_v33  ;;  %v8219_v32 = vld [vmem:[#allocation11 + $0x2a0] ss:$16 sps:$4 sm:$0xff]   ;;  %v8222_v33 = vld [vmem:[#allocation11 + $0x2a8] ss:$16 sps:$4 sm:$0xff]  }
 0x45a   :  { %4363 = vmatpush1.bf16.msra.mxu0 %v8183_v34  ;;  %4449 = vmatpush1.bf16.msra.mxu1 %v8186_v35  ;;  %v8227_v34 = vld [vmem:[#allocation11 + $0x2c4] ss:$16 sps:$4 sm:$0xff]   ;;  %v8230_v35 = vld [vmem:[#allocation11 + $0x2cc] ss:$16 sps:$4 sm:$0xff]  }
 0x45b   :  { %4375 = vmatprep.subr.bf16.mxu0 %v8191_v36  ;;  %4461 = vmatprep.subr.bf16.mxu1 %v8194_v37  ;;  %v8225_v36 = vld [vmem:[#allocation11 + $0x2c0] ss:$16 sps:$4 sm:$0xff]   ;;  %v8228_v37 = vld [vmem:[#allocation11 + $0x2c8] ss:$16 sps:$4 sm:$0xff]  }
 0x4f0   :  { %v3478_v43 = vpop.f32.mrb[12].mxu0  ;;  %v3521_v44 = vpop.f32.mrb[16].mxu1 }
 0x4f1   :  { %v3479_v45 = vadd.f32 %v3478_v43, %v3267_v39  ;;  %v3522_v46 = vadd.f32 %v3521_v44, %v3275_v40  ;;  %v3480_v47 = vpop.f32.mrb[13].mxu0  ;;  %v3523_v48 = vpop.f32.mrb[17].mxu1  ;;  %v8242_v43 = vld [vmem:[#allocation11 + $0x30c] ss:$16 sps:$4 sm:$0xff]   ;;  %v8237_v44 = vld [vmem:[#allocation11 + $0x300] ss:$16 sps:$4 sm:$0xff]  }
 0x4f2   :  { %v3481_v49 = vadd.f32 %v3480_v47, %v3271_v41  ;;  %v3524_v50 = vadd.f32 %v3523_v48, %v3279_v42  ;;  %v3482_v51 = vpop.f32.mrb[14].mxu0  ;;  %v3525_v56 = vpop.f32.mrb[18].mxu1  ;;  %v8248_v47 = vld [vmem:[#allocation11 + $0x32c] ss:$16 sps:$4 sm:$0xff]   ;;  %v8243_v48 = vld [vmem:[#allocation11 + $0x320] ss:$16 sps:$4 sm:$0xff]  }
 0x4f3   :  { %v3483_v57 = vadd.f32 %v3482_v51, %v3267_v39  ;;  %v3526_v58 = vadd.f32 %v3525_v56, %v3275_v40  ;;  %v3484_v59 = vpop.f32.mrb[15].mxu0  ;;  %v3527_v60 = vpop.f32.mrb[19].mxu1  ;;  %v3530_v0 = vmax.f32 %v3479_v45, 0.0  ;;  %v3532_v63 = vmax.f32 %v3522_v46, 0.0  ;;  %v8236_v39 = vld [vmem:[#allocation11 + $0x2ec] ss:$16 sps:$4 sm:$0xff]  }
 0x4f4   :  { %v3485_v61 = vadd.f32 %v3484_v59, %v3271_v41  ;;  %v3528_v62 = vadd.f32 %v3527_v60, %v3279_v42  ;;  %v3531_v6 = vmax.f32 %v3481_v49, 0.0  ;;  %v3533_v10 = vmax.f32 %v3524_v50, 0.0  ;;  %v8231_v40 = vld [vmem:[#allocation11 + $0x2e0] ss:$16 sps:$4 sm:$0xff]   ;;  %v8234_v41 = vld [vmem:[#allocation11 + $0x2e8] ss:$16 sps:$4 sm:$0xff]  }
 0x4f5   :  { %v3534_v1 = vmax.f32 %v3483_v57, 0.0  ;;  %v3536_v4 = vmax.f32 %v3526_v58, 0.0  ;;  %v8239_v42 = vld [vmem:[#allocation11 + $0x304] ss:$16 sps:$4 sm:$0xff]   ;;  %v8240_v45 = vld [vmem:[#allocation11 + $0x308] ss:$16 sps:$4 sm:$0xff]  }
 0x4f6   :  { %v3535_v11 = vmax.f32 %v3485_v61, 0.0  ;;  %v3537_v12 = vmax.f32 %v3528_v62, 0.0  ;;  %v8245_v46 = vld [vmem:[#allocation11 + $0x324] ss:$16 sps:$4 sm:$0xff]   ;;  %v8246_v49 = vld [vmem:[#allocation11 + $0x328] ss:$16 sps:$4 sm:$0xff]  }
 0x4f7   :  { %v3538_v13 = vpack.c.bf16 %v3534_v1, %v3530_v0  ;;  %v9157_v14 = vpack.c.bf16 %v3536_v4, %v3532_v63  ;;  %v8251_v50 = vld [vmem:[#allocation11 + $0x344] ss:$16 sps:$4 sm:$0xff]   ;;  %v8254_v51 = vld [vmem:[#allocation11 + $0x34c] ss:$16 sps:$4 sm:$0xff]   ;;  %v8249_v56 = vld [vmem:[#allocation11 + $0x340] ss:$16 sps:$4 sm:$0xff]  }
 0x4f8   :  { %v3539_v15 = vpack.c.bf16 %v3535_v11, %v3531_v6  ;;  %v3541_v16 = vpack.c.bf16 %v3537_v12, %v3533_v10  ;;  %v8252_v57 = vld [vmem:[#allocation11 + $0x348] ss:$16 sps:$4 sm:$0xff]   ;;  %v8257_v58 = vld [vmem:[#allocation11 + $0x364] ss:$16 sps:$4 sm:$0xff]   ;;  %v8260_v59 = vld [vmem:[#allocation11 + $0x36c] ss:$16 sps:$4 sm:$0xff]  }
 0x4f9   :  { %v8255_v60 = vld [vmem:[#allocation11 + $0x360] ss:$16 sps:$4 sm:$0xff]   ;;  %v8258_v61 = vld [vmem:[#allocation11 + $0x368] ss:$16 sps:$4 sm:$0xff]   ;;  %v8263_v62 = vld [vmem:[#allocation11 + $0x384] ss:$16 sps:$4 sm:$0xff]  }
 0x4fa   :  { %4364 = vmatprep.mubr.bf16.mxu0 %v3539_v15  ;;  %4450 = vmatprep.mubr.bf16.mxu1 %v3539_v15  ;;  %v8266_v0 = vld [vmem:[#allocation11 + $0x38c] ss:$16 sps:$4 sm:$0xff]   ;;  %v8261_v63 = vld [vmem:[#allocation11 + $0x380] ss:$16 sps:$4 sm:$0xff]   ;;  %v8264_v1 = vld [vmem:[#allocation11 + $0x388] ss:$16 sps:$4 sm:$0xff]  }
 0x4fb   :  { %4365 = vmatmul.mubr.bf16.vlgmr.msra.gmra.mrb[16].mxu0 %v3538_v13  ;;  %4451 = vmatmul.mubr.bf16.vlgmr.msra.gmra.mrb[20].mxu1 %v3538_v13  ;;  %v8269_v4 = vld [vmem:[#allocation11 + $0x3a4] ss:$16 sps:$4 sm:$0xff]   ;;  %v8272_v6 = vld [vmem:[#allocation11 + $0x3ac] ss:$16 sps:$4 sm:$0xff]   ;;  %v8267_v10 = vld [vmem:[#allocation11 + $0x3a0] ss:$16 sps:$4 sm:$0xff]  }
 0x4fc   :  { %4376 = vmatpush1.bf16.msra.mxu0 %v8189_v17  ;;  %4462 = vmatpush1.bf16.msra.mxu1 %v8192_v18  ;;  %v8270_v11 = vld [vmem:[#allocation11 + $0x3a8] ss:$16 sps:$4 sm:$0xff]   ;;  %v8275_v12 = vld [vmem:[#allocation11 + $0x3c4] ss:$16 sps:$4 sm:$0xff]   ;;  %v8278_v13 = vld [vmem:[#allocation11 + $0x3cc] ss:$16 sps:$4 sm:$0xff]  }
 0x4fd   :  { %4407 = vmatprep.mubr.bf16.mxu0 %v3541_v16  ;;  %4493 = vmatprep.mubr.bf16.mxu1 %v3541_v16  ;;  %v8273_v15 = vld [vmem:[#allocation11 + $0x3c0] ss:$16 sps:$4 sm:$0xff]   ;;  %v8276_v16 = vld [vmem:[#allocation11 + $0x3c8] ss:$16 sps:$4 sm:$0xff]   ;;  %v8281_v17 = vld [vmem:[#allocation11 + $0x3e4] ss:$16 sps:$4 sm:$0xff]  }
 0x4fe   :  { %4377 = vmatprep.subr.bf16.mxu0 %v8197_v19  ;;  %4463 = vmatprep.subr.bf16.mxu1 %v8200_v20  ;;  %v8284_v18 = vld [vmem:[#allocation11 + $0x3ec] ss:$16 sps:$4 sm:$0xff]   ;;  %v8279_v19 = vld [vmem:[#allocation11 + $0x3e0] ss:$16 sps:$4 sm:$0xff]   ;;  %v8282_v20 = vld [vmem:[#allocation11 + $0x3e8] ss:$16 sps:$4 sm:$0xff]  }
 0x500   :  { %4378 = vmatpush1.bf16.msra.mxu0 %v8195_v3  ;;  %4464 = vmatpush1.bf16.msra.mxu1 %v8198_v5  ;;  %v8287_v3 = vld [vmem:[#allocation13 + $0x4] ss:$28 sps:$4 sm:$0xff]   ;;  %v8290_v5 = vld [vmem:[#allocation13 + $0xc] ss:$28 sps:$4 sm:$0xff]  }
 0x501   :  { %4379 = vmatprep.subr.bf16.mxu0 %v8203_v7  ;;  %4465 = vmatprep.subr.bf16.mxu1 %v8206_v8  ;;  %v8285_v7 = vld [vmem:[#allocation13] ss:$28 sps:$4 sm:$0xff]   ;;  %v8288_v8 = vld [vmem:[#allocation13 + $0x8] ss:$28 sps:$4 sm:$0xff]  }
 0x504   :  { %4380 = vmatpush1.bf16.msra.mxu0 %v8201_v21  ;;  %4466 = vmatpush1.bf16.msra.mxu1 %v8204_v22  ;;  %v8293_v21 = vld [vmem:[#allocation13 + $0x3c] ss:$28 sps:$4 sm:$0xff]   ;;  %v8296_v22 = vld [vmem:[#allocation13 + $0x44] ss:$28 sps:$4 sm:$0xff]  }
 0x505   :  { %4381 = vmatprep.subr.bf16.mxu0 %v8209_v23  ;;  %4467 = vmatprep.subr.bf16.mxu1 %v8212_v24  ;;  %v8291_v23 = vld [vmem:[#allocation13 + $0x38] ss:$28 sps:$4 sm:$0xff]   ;;  %v8294_v24 = vld [vmem:[#allocation13 + $0x40] ss:$28 sps:$4 sm:$0xff]  }
 0x508   :  { %4382 = vmatpush1.bf16.msra.mxu0 %v8207_v53  ;;  %4468 = vmatpush1.bf16.msra.mxu1 %v8210_v25  ;;  %v8299_v53 = vld [vmem:[#allocation13 + $0x74] ss:$28 sps:$4 sm:$0xff]   ;;  %v8302_v25 = vld [vmem:[#allocation13 + $0x7c] ss:$28 sps:$4 sm:$0xff]  }
 0x509   :  { %4383 = vmatprep.subr.bf16.mxu0 %v8215_v26  ;;  %4469 = vmatprep.subr.bf16.mxu1 %v8218_v27  ;;  %v8297_v26 = vld [vmem:[#allocation13 + $0x70] ss:$28 sps:$4 sm:$0xff]   ;;  %v8300_v27 = vld [vmem:[#allocation13 + $0x78] ss:$28 sps:$4 sm:$0xff]  }
 0x50c   :  { %4384 = vmatpush1.bf16.msra.mxu0 %v8213_v28  ;;  %4470 = vmatpush1.bf16.msra.mxu1 %v8216_v29  ;;  %v8305_v28 = vld [vmem:[#allocation13 + $0xac] ss:$28 sps:$4 sm:$0xff]   ;;  %v8308_v29 = vld [vmem:[#allocation13 + $0xb4] ss:$28 sps:$4 sm:$0xff]  }
 0x50d   :  { %4385 = vmatprep.subr.bf16.mxu0 %v8221_v30  ;;  %4471 = vmatprep.subr.bf16.mxu1 %v8224_v31  ;;  %v8303_v30 = vld [vmem:[#allocation13 + $0xa8] ss:$28 sps:$4 sm:$0xff]  }
 0x50e   :  { %v8311_v31 = vld [vmem:[#allocation13 + $0xe4] ss:$28 sps:$4 sm:$0xff]  }
 0x510   :  { %4386 = vmatpush1.bf16.msra.mxu0 %v8219_v32  ;;  %4472 = vmatpush1.bf16.msra.mxu1 %v8222_v33  ;;  %v8314_v32 = vld [vmem:[#allocation13 + $0xec] ss:$28 sps:$4 sm:$0xff]   ;;  %v8309_v33 = vld [vmem:[#allocation13 + $0xe0] ss:$28 sps:$4 sm:$0xff]  }
 0x511   :  { %4387 = vmatprep.subr.bf16.mxu0 %v8227_v34  ;;  %4473 = vmatprep.subr.bf16.mxu1 %v8230_v35  ;;  %v8312_v34 = vld [vmem:[#allocation13 + $0xe8] ss:$28 sps:$4 sm:$0xff]   ;;  %v8317_v35 = vld [vmem:[#allocation13 + $0x11c] ss:$28 sps:$4 sm:$0xff]  }
 0x514   :  { %4388 = vmatpush1.bf16.msra.mxu0 %v8225_v36  ;;  %4474 = vmatpush1.bf16.msra.mxu1 %v8228_v37  ;;  %v8320_v36 = vld [vmem:[#allocation13 + $0x124] ss:$28 sps:$4 sm:$0xff]   ;;  %v8315_v37 = vld [vmem:[#allocation13 + $0x118] ss:$28 sps:$4 sm:$0xff]  }
 0x515   :  { %4389 = vmatprep.subr.bf16.mxu0 %v8233_v38  ;;  %4475 = vmatprep.subr.bf16.mxu1 %v8236_v39  ;;  %v8318_v38 = vld [vmem:[#allocation13 + $0x120] ss:$28 sps:$4 sm:$0xff]   ;;  %v8323_v39 = vld [vmem:[#allocation13 + $0x154] ss:$28 sps:$4 sm:$0xff]  }
 0x518   :  { %4390 = vmatpush1.bf16.msra.mxu0 %v8231_v40  ;;  %4476 = vmatpush1.bf16.msra.mxu1 %v8234_v41  ;;  %v8326_v40 = vld [vmem:[#allocation13 + $0x15c] ss:$28 sps:$4 sm:$0xff]   ;;  %v8321_v41 = vld [vmem:[#allocation13 + $0x150] ss:$28 sps:$4 sm:$0xff]  }
 0x519   :  { %4391 = vmatprep.subr.bf16.mxu0 %v8239_v42  ;;  %4477 = vmatprep.subr.bf16.mxu1 %v8242_v43  ;;  %v8324_v42 = vld [vmem:[#allocation13 + $0x158] ss:$28 sps:$4 sm:$0xff]   ;;  %v8329_v43 = vld [vmem:[#allocation13 + $0x18c] ss:$28 sps:$4 sm:$0xff]  }
 0x51c   :  { %4392 = vmatpush1.bf16.msra.mxu0 %v8237_v44  ;;  %4478 = vmatpush1.bf16.msra.mxu1 %v8240_v45  ;;  %v8332_v44 = vld [vmem:[#allocation13 + $0x194] ss:$28 sps:$4 sm:$0xff]   ;;  %v8327_v45 = vld [vmem:[#allocation13 + $0x188] ss:$28 sps:$4 sm:$0xff]  }
 0x51d   :  { %4393 = vmatprep.subr.bf16.mxu0 %v8245_v46  ;;  %4479 = vmatprep.subr.bf16.mxu1 %v8248_v47  ;;  %v8330_v46 = vld [vmem:[#allocation13 + $0x190] ss:$28 sps:$4 sm:$0xff]   ;;  %v8335_v47 = vld [vmem:[#allocation13 + $0x1c4] ss:$28 sps:$4 sm:$0xff]  }
 0x520   :  { %4394 = vmatpush1.bf16.msra.mxu0 %v8243_v48  ;;  %4480 = vmatpush1.bf16.msra.mxu1 %v8246_v49  ;;  %v8338_v48 = vld [vmem:[#allocation13 + $0x1cc] ss:$28 sps:$4 sm:$0xff]   ;;  %v8333_v49 = vld [vmem:[#allocation13 + $0x1c0] ss:$28 sps:$4 sm:$0xff]  }
 0x521   :  { %4395 = vmatprep.subr.bf16.mxu0 %v8251_v50  ;;  %4481 = vmatprep.subr.bf16.mxu1 %v8254_v51  ;;  %v8336_v50 = vld [vmem:[#allocation13 + $0x1c8] ss:$28 sps:$4 sm:$0xff]   ;;  %v8341_v51 = vld [vmem:[#allocation13 + $0x1fc] ss:$28 sps:$4 sm:$0xff]  }
 0x524   :  { %4396 = vmatpush1.bf16.msra.mxu0 %v8249_v56  ;;  %4482 = vmatpush1.bf16.msra.mxu1 %v8252_v57  ;;  %v8344_v56 = vld [vmem:[#allocation13 + $0x204] ss:$28 sps:$4 sm:$0xff]   ;;  %v8339_v57 = vld [vmem:[#allocation13 + $0x1f8] ss:$28 sps:$4 sm:$0xff]  }
 0x525   :  { %4397 = vmatprep.subr.bf16.mxu0 %v8257_v58  ;;  %4483 = vmatprep.subr.bf16.mxu1 %v8260_v59  ;;  %v8342_v58 = vld [vmem:[#allocation13 + $0x200] ss:$28 sps:$4 sm:$0xff]   ;;  %v8347_v59 = vld [vmem:[#allocation13 + $0x234] ss:$28 sps:$4 sm:$0xff]  }
 0x528   :  { %4398 = vmatpush1.bf16.msra.mxu0 %v8255_v60  ;;  %4484 = vmatpush1.bf16.msra.mxu1 %v8258_v61  ;;  %v8350_v60 = vld [vmem:[#allocation13 + $0x23c] ss:$28 sps:$4 sm:$0xff]   ;;  %v8345_v61 = vld [vmem:[#allocation13 + $0x230] ss:$28 sps:$4 sm:$0xff]  }
 0x529   :  { %4399 = vmatprep.subr.bf16.mxu0 %v8263_v62  ;;  %4485 = vmatprep.subr.bf16.mxu1 %v8266_v0  ;;  %v8348_v62 = vld [vmem:[#allocation13 + $0x238] ss:$28 sps:$4 sm:$0xff]   ;;  %v8353_v0 = vld [vmem:[#allocation13 + $0x26c] ss:$28 sps:$4 sm:$0xff]  }
 0x52c   :  { %4400 = vmatpush1.bf16.msra.mxu0 %v8261_v63  ;;  %4486 = vmatpush1.bf16.msra.mxu1 %v8264_v1  ;;  %v8356_v63 = vld [vmem:[#allocation13 + $0x274] ss:$28 sps:$4 sm:$0xff]   ;;  %v8351_v1 = vld [vmem:[#allocation13 + $0x268] ss:$28 sps:$4 sm:$0xff]  }
 0x52d   :  { %4401 = vmatprep.subr.bf16.mxu0 %v8269_v4  ;;  %4487 = vmatprep.subr.bf16.mxu1 %v8272_v6  ;;  %v8354_v4 = vld [vmem:[#allocation13 + $0x270] ss:$28 sps:$4 sm:$0xff]   ;;  %v8359_v6 = vld [vmem:[#allocation13 + $0x2a4] ss:$28 sps:$4 sm:$0xff]  }
 0x530   :  { %4402 = vmatpush1.bf16.msra.mxu0 %v8267_v10  ;;  %4488 = vmatpush1.bf16.msra.mxu1 %v8270_v11  ;;  %v8362_v10 = vld [vmem:[#allocation13 + $0x2ac] ss:$28 sps:$4 sm:$0xff]   ;;  %v8357_v11 = vld [vmem:[#allocation13 + $0x2a0] ss:$28 sps:$4 sm:$0xff]  }
 0x531   :  { %4403 = vmatprep.subr.bf16.mxu0 %v8275_v12  ;;  %4489 = vmatprep.subr.bf16.mxu1 %v8278_v13  ;;  %v8360_v12 = vld [vmem:[#allocation13 + $0x2a8] ss:$28 sps:$4 sm:$0xff]   ;;  %v8365_v13 = vld [vmem:[#allocation13 + $0x2dc] ss:$28 sps:$4 sm:$0xff]  }
 0x534   :  { %4404 = vmatpush1.bf16.msra.mxu0 %v8273_v15  ;;  %4490 = vmatpush1.bf16.msra.mxu1 %v8276_v16  ;;  %v8368_v15 = vld [vmem:[#allocation13 + $0x2e4] ss:$28 sps:$4 sm:$0xff]   ;;  %v8363_v16 = vld [vmem:[#allocation13 + $0x2d8] ss:$28 sps:$4 sm:$0xff]  }
 0x535   :  { %4405 = vmatprep.subr.bf16.mxu0 %v8281_v17  ;;  %4491 = vmatprep.subr.bf16.mxu1 %v8284_v18  ;;  %v8366_v17 = vld [vmem:[#allocation13 + $0x2e0] ss:$28 sps:$4 sm:$0xff]   ;;  %v8371_v18 = vld [vmem:[#allocation13 + $0x314] ss:$28 sps:$4 sm:$0xff]  }
 0x538   :  { %4406 = vmatpush1.bf16.msra.mxu0 %v8279_v19  ;;  %4492 = vmatpush1.bf16.msra.mxu1 %v8282_v20  ;;  %v8374_v19 = vld [vmem:[#allocation13 + $0x31c] ss:$28 sps:$4 sm:$0xff]   ;;  %v8369_v20 = vld [vmem:[#allocation13 + $0x310] ss:$28 sps:$4 sm:$0xff]  }
 0x539   :  { %5961 = vmatprep.subr.bf16.mxu0 %v8287_v3  ;;  %6047 = vmatprep.subr.bf16.mxu1 %v8290_v5  ;;  %v8372_v3 = vld [vmem:[#allocation13 + $0x318] ss:$28 sps:$4 sm:$0xff]   ;;  %v8377_v5 = vld [vmem:[#allocation13 + $0x34c] ss:$28 sps:$4 sm:$0xff]  }
 0x53b   :  { %4408 = vmatmul.mubr.bf16.vlgmr.msra.gmra.mrb[16].mxu0 %v9157_v14  ;;  %4494 = vmatmul.mubr.bf16.vlgmr.msra.gmra.mrb[20].mxu1 %v9157_v14  ;;  %v8306_v14 = vld [vmem:[#allocation13 + $0xb0] ss:$28 sps:$4 sm:$0xff]  }
 0x53c   :  { %5962 = vmatpush1.bf16.msra.mxu0 %v8285_v7  ;;  %6048 = vmatpush1.bf16.msra.mxu1 %v8288_v8  ;;  %v8380_v7 = vld [vmem:[#allocation13 + $0x354] ss:$28 sps:$4 sm:$0xff]   ;;  %v8375_v8 = vld [vmem:[#allocation13 + $0x348] ss:$28 sps:$4 sm:$0xff]  }
 0x53d   :  { %5963 = vmatprep.subr.bf16.mxu0 %v8293_v21  ;;  %6049 = vmatprep.subr.bf16.mxu1 %v8296_v22  ;;  %v8378_v21 = vld [vmem:[#allocation13 + $0x350] ss:$28 sps:$4 sm:$0xff]   ;;  %v8383_v22 = vld [vmem:[#allocation13 + $0x384] ss:$28 sps:$4 sm:$0xff]  }
 0x540   :  { %5964 = vmatpush1.bf16.msra.mxu0 %v8291_v23  ;;  %6050 = vmatpush1.bf16.msra.mxu1 %v8294_v24  ;;  %v8386_v23 = vld [vmem:[#allocation13 + $0x38c] ss:$28 sps:$4 sm:$0xff]  }
 0x541   :  { %5965 = vmatprep.subr.bf16.mxu0 %v8299_v53  ;;  %6051 = vmatprep.subr.bf16.mxu1 %v8302_v25  ;;  %v3670_v24 = vld [vmem:[%s9248_s10] sm:$0xf] }
 0x542   :  { %v3675_v53 = vrot.slane %v3670_v24, %v9115_v54  ;;  %v3683_v25 = vrot.slane %v3670_v24, %v9129_v2 }
 0x544   :  { %5966 = vmatpush1.bf16.msra.mxu0 %v8297_v26  ;;  %6052 = vmatpush1.bf16.msra.mxu1 %v8300_v27  ;;  %v3679_v26 = vrot.slane %v3670_v24, %v9118_v55  ;;  %v3687_v27 = vrot.slane %v3670_v24, %v9132_v9  ;;  %v8425_v24 = vld [vmem:[#allocation13 + $0x50c] ss:$28 sps:$4 sm:$0xff]  }
 0x545   :  { %5967 = vmatprep.subr.bf16.mxu0 %v8305_v28  ;;  %6053 = vmatprep.subr.bf16.mxu1 %v8308_v29 }
 0x548   :  { %5968 = vmatpush1.bf16.msra.mxu0 %v8303_v30  ;;  %6054 = vmatpush1.bf16.msra.mxu1 %v8306_v14 }
 0x549   :  { %5969 = vmatprep.subr.bf16.mxu0 %v8311_v31  ;;  %6055 = vmatprep.subr.bf16.mxu1 %v8314_v32 }
 0x54c   :  { %5970 = vmatpush1.bf16.msra.mxu0 %v8309_v33  ;;  %6056 = vmatpush1.bf16.msra.mxu1 %v8312_v34 }
 0x54d   :  { %5971 = vmatprep.subr.bf16.mxu0 %v8317_v35  ;;  %6057 = vmatprep.subr.bf16.mxu1 %v8320_v36 }
 0x550   :  { %5972 = vmatpush1.bf16.msra.mxu0 %v8315_v37  ;;  %6058 = vmatpush1.bf16.msra.mxu1 %v8318_v38 }
 0x551   :  { %5973 = vmatprep.subr.bf16.mxu0 %v8323_v39  ;;  %6059 = vmatprep.subr.bf16.mxu1 %v8326_v40 }
 0x554   :  { %5974 = vmatpush1.bf16.msra.mxu0 %v8321_v41  ;;  %6060 = vmatpush1.bf16.msra.mxu1 %v8324_v42 }
 0x555   :  { %5975 = vmatprep.subr.bf16.mxu0 %v8329_v43  ;;  %6061 = vmatprep.subr.bf16.mxu1 %v8332_v44 }
 0x558   :  { %5976 = vmatpush1.bf16.msra.mxu0 %v8327_v45  ;;  %6062 = vmatpush1.bf16.msra.mxu1 %v8330_v46 }
 0x559   :  { %5977 = vmatprep.subr.bf16.mxu0 %v8335_v47  ;;  %6063 = vmatprep.subr.bf16.mxu1 %v8338_v48 }
 0x55c   :  { %5978 = vmatpush1.bf16.msra.mxu0 %v8333_v49  ;;  %6064 = vmatpush1.bf16.msra.mxu1 %v8336_v50 }
 0x55d   :  { %5979 = vmatprep.subr.bf16.mxu0 %v8341_v51  ;;  %6065 = vmatprep.subr.bf16.mxu1 %v8344_v56 }
 0x560   :  { %5980 = vmatpush1.bf16.msra.mxu0 %v8339_v57  ;;  %6066 = vmatpush1.bf16.msra.mxu1 %v8342_v58 }
 0x561   :  { %5981 = vmatprep.subr.bf16.mxu0 %v8347_v59  ;;  %6067 = vmatprep.subr.bf16.mxu1 %v8350_v60  ;;  %v8381_v59 = vld [vmem:[#allocation13 + $0x380] ss:$28 sps:$4 sm:$0xff]   ;;  %v8384_v60 = vld [vmem:[#allocation13 + $0x388] ss:$28 sps:$4 sm:$0xff]  }
 0x564   :  { %5982 = vmatpush1.bf16.msra.mxu0 %v8345_v61  ;;  %6068 = vmatpush1.bf16.msra.mxu1 %v8348_v62  ;;  %v8389_v61 = vld [vmem:[#allocation13 + $0x3bc] ss:$28 sps:$4 sm:$0xff]   ;;  %v8392_v62 = vld [vmem:[#allocation13 + $0x3c4] ss:$28 sps:$4 sm:$0xff]  }
 0x565   :  { %5983 = vmatprep.subr.bf16.mxu0 %v8353_v0  ;;  %6069 = vmatprep.subr.bf16.mxu1 %v8356_v63  ;;  %v8387_v0 = vld [vmem:[#allocation13 + $0x3b8] ss:$28 sps:$4 sm:$0xff]   ;;  %v8390_v63 = vld [vmem:[#allocation13 + $0x3c0] ss:$28 sps:$4 sm:$0xff]  }
 0x568   :  { %5984 = vmatpush1.bf16.msra.mxu0 %v8351_v1  ;;  %6070 = vmatpush1.bf16.msra.mxu1 %v8354_v4  ;;  %v8395_v1 = vld [vmem:[#allocation13 + $0x3f4] ss:$28 sps:$4 sm:$0xff]   ;;  %v8398_v4 = vld [vmem:[#allocation13 + $0x3fc] ss:$28 sps:$4 sm:$0xff]  }
 0x569   :  { %5985 = vmatprep.subr.bf16.mxu0 %v8359_v6  ;;  %6071 = vmatprep.subr.bf16.mxu1 %v8362_v10  ;;  %v8393_v6 = vld [vmem:[#allocation13 + $0x3f0] ss:$28 sps:$4 sm:$0xff]   ;;  %v8396_v10 = vld [vmem:[#allocation13 + $0x3f8] ss:$28 sps:$4 sm:$0xff]  }
 0x56c   :  { %5986 = vmatpush1.bf16.msra.mxu0 %v8357_v11  ;;  %6072 = vmatpush1.bf16.msra.mxu1 %v8360_v12  ;;  %v8401_v11 = vld [vmem:[#allocation13 + $0x42c] ss:$28 sps:$4 sm:$0xff]   ;;  %v8404_v12 = vld [vmem:[#allocation13 + $0x434] ss:$28 sps:$4 sm:$0xff]  }
 0x56d   :  { %5987 = vmatprep.subr.bf16.mxu0 %v8365_v13  ;;  %6073 = vmatprep.subr.bf16.mxu1 %v8368_v15  ;;  %v8399_v13 = vld [vmem:[#allocation13 + $0x428] ss:$28 sps:$4 sm:$0xff]   ;;  %v8402_v15 = vld [vmem:[#allocation13 + $0x430] ss:$28 sps:$4 sm:$0xff]  }
 0x570   :  { %5988 = vmatpush1.bf16.msra.mxu0 %v8363_v16  ;;  %6074 = vmatpush1.bf16.msra.mxu1 %v8366_v17  ;;  %v8407_v16 = vld [vmem:[#allocation13 + $0x464] ss:$28 sps:$4 sm:$0xff]   ;;  %v8410_v17 = vld [vmem:[#allocation13 + $0x46c] ss:$28 sps:$4 sm:$0xff]  }
 0x571   :  { %5989 = vmatprep.subr.bf16.mxu0 %v8371_v18  ;;  %6075 = vmatprep.subr.bf16.mxu1 %v8374_v19  ;;  %v8405_v18 = vld [vmem:[#allocation13 + $0x460] ss:$28 sps:$4 sm:$0xff]   ;;  %v8408_v19 = vld [vmem:[#allocation13 + $0x468] ss:$28 sps:$4 sm:$0xff]  }
 0x574   :  { %5990 = vmatpush1.bf16.msra.mxu0 %v8369_v20  ;;  %6076 = vmatpush1.bf16.msra.mxu1 %v8372_v3  ;;  %v8413_v20 = vld [vmem:[#allocation13 + $0x49c] ss:$28 sps:$4 sm:$0xff]   ;;  %v8416_v3 = vld [vmem:[#allocation13 + $0x4a4] ss:$28 sps:$4 sm:$0xff]  }
 0x575   :  { %5991 = vmatprep.subr.bf16.mxu0 %v8377_v5  ;;  %6077 = vmatprep.subr.bf16.mxu1 %v8380_v7  ;;  %v8411_v5 = vld [vmem:[#allocation13 + $0x498] ss:$28 sps:$4 sm:$0xff]   ;;  %v8414_v7 = vld [vmem:[#allocation13 + $0x4a0] ss:$28 sps:$4 sm:$0xff]  }
 0x578   :  { %5992 = vmatpush1.bf16.msra.mxu0 %v8375_v8  ;;  %6078 = vmatpush1.bf16.msra.mxu1 %v8378_v21  ;;  %v8419_v8 = vld [vmem:[#allocation13 + $0x4d4] ss:$28 sps:$4 sm:$0xff]   ;;  %v8422_v21 = vld [vmem:[#allocation13 + $0x4dc] ss:$28 sps:$4 sm:$0xff]  }
 0x579   :  { %6004 = vmatprep.subr.bf16.mxu0 %v8383_v22  ;;  %6090 = vmatprep.subr.bf16.mxu1 %v8386_v23  ;;  %v8417_v22 = vld [vmem:[#allocation13 + $0x4d0] ss:$28 sps:$4 sm:$0xff]   ;;  %v8420_v23 = vld [vmem:[#allocation13 + $0x4d8] ss:$28 sps:$4 sm:$0xff]  }
 0x60e   :  { %v4409_v28 = vpop.f32.mrb[16].mxu0  ;;  %v4495_v29 = vpop.f32.mrb[20].mxu1 }
 0x60f   :  { %v7389_v30 = vadd.f32 %v4409_v28, %v3675_v53  ;;  %v7393_v14 = vadd.f32 %v4495_v29, %v3683_v25  ;;  %v4411_v31 = vpop.f32.mrb[17].mxu0  ;;  %v4497_v32 = vpop.f32.mrb[21].mxu1  ;;  %v8434_v28 = vld [vmem:[#allocation13 + $0x54c] ss:$28 sps:$4 sm:$0xff]   ;;  %v8429_v29 = vld [vmem:[#allocation13 + $0x540] ss:$28 sps:$4 sm:$0xff]  }
 0x610   :  { %v7390_v33 = vadd.f32 %v4411_v31, %v3679_v26  ;;  %v7394_v34 = vadd.f32 %v4497_v32, %v3687_v27  ;;  %v4413_v35 = vpop.f32.mrb[18].mxu0  ;;  %v4499_v36 = vpop.f32.mrb[22].mxu1  ;;  %v8440_v31 = vld [vmem:[#allocation13 + $0x584] ss:$28 sps:$4 sm:$0xff]   ;;  %v8435_v32 = vld [vmem:[#allocation13 + $0x578] ss:$28 sps:$4 sm:$0xff]  }
 0x611   :  { %v7391_v37 = vadd.f32 %v4413_v35, %v3675_v53  ;;  %v7395_v38 = vadd.f32 %v4499_v36, %v3683_v25  ;;  %v4415_v39 = vpop.f32.mrb[19].mxu0  ;;  %v4501_v40 = vpop.f32.mrb[23].mxu1  ;;  %v4504_v43 = vmax.f32 %v7389_v30, 0.0  ;;  %v4506_v44 = vmax.f32 %v7393_v14, 0.0  ;;  %v8428_v53 = vld [vmem:[#allocation13 + $0x514] ss:$28 sps:$4 sm:$0xff]  }
 0x612   :  { %v7392_v41 = vadd.f32 %v4415_v39, %v3679_v26  ;;  %v7396_v42 = vadd.f32 %v4501_v40, %v3687_v27  ;;  %v4505_v47 = vmax.f32 %v7390_v33, 0.0  ;;  %v4507_v48 = vmax.f32 %v7394_v34, 0.0  ;;  %v8423_v25 = vld [vmem:[#allocation13 + $0x508] ss:$28 sps:$4 sm:$0xff]   ;;  %v8426_v26 = vld [vmem:[#allocation13 + $0x510] ss:$28 sps:$4 sm:$0xff]  }
 0x613   :  { %v4508_v45 = vmax.f32 %v7391_v37, 0.0  ;;  %v4510_v46 = vmax.f32 %v7395_v38, 0.0  ;;  %v8431_v27 = vld [vmem:[#allocation13 + $0x544] ss:$28 sps:$4 sm:$0xff]   ;;  %v8437_v14 = vld [vmem:[#allocation13 + $0x57c] ss:$28 sps:$4 sm:$0xff]  }
 0x614   :  { %v4509_v49 = vmax.f32 %v7392_v41, 0.0  ;;  %v4511_v50 = vmax.f32 %v7396_v42, 0.0  ;;  %v8432_v30 = vld [vmem:[#allocation13 + $0x548] ss:$28 sps:$4 sm:$0xff]   ;;  %v8438_v33 = vld [vmem:[#allocation13 + $0x580] ss:$28 sps:$4 sm:$0xff]  }
 0x615   :  { %v9168_v51 = vpack.c.bf16 %v4508_v45, %v4504_v43  ;;  %v9170_v56 = vpack.c.bf16 %v4510_v46, %v4506_v44  ;;  %v8443_v34 = vld [vmem:[#allocation13 + $0x5b4] ss:$28 sps:$4 sm:$0xff]   ;;  %v8446_v35 = vld [vmem:[#allocation13 + $0x5bc] ss:$28 sps:$4 sm:$0xff]   ;;  %v8449_v38 = vld [vmem:[#allocation13 + $0x5ec] ss:$28 sps:$4 sm:$0xff]  }
 0x616   :  { %v9172_v57 = vpack.c.bf16 %v4509_v49, %v4505_v47  ;;  %v9174_v58 = vpack.c.bf16 %v4511_v50, %v4507_v48  ;;  %v8441_v36 = vld [vmem:[#allocation13 + $0x5b0] ss:$28 sps:$4 sm:$0xff]   ;;  %v8444_v37 = vld [vmem:[#allocation13 + $0x5b8] ss:$28 sps:$4 sm:$0xff]   ;;  %v8447_v40 = vld [vmem:[#allocation13 + $0x5e8] ss:$28 sps:$4 sm:$0xff]  }
 0x617   :  { %v8452_v39 = vld [vmem:[#allocation13 + $0x5f4] ss:$28 sps:$4 sm:$0xff]   ;;  %v8455_v42 = vld [vmem:[#allocation13 + $0x624] ss:$28 sps:$4 sm:$0xff]   ;;  %v8458_v43 = vld [vmem:[#allocation13 + $0x62c] ss:$28 sps:$4 sm:$0xff]  }
 0x618   :  { %5993 = vmatprep.mubr.bf16.mxu0 %v9172_v57  ;;  %6079 = vmatprep.mubr.bf16.mxu1 %v9172_v57  ;;  %v8450_v41 = vld [vmem:[#allocation13 + $0x5f0] ss:$28 sps:$4 sm:$0xff]   ;;  %v8453_v44 = vld [vmem:[#allocation13 + $0x620] ss:$28 sps:$4 sm:$0xff]   ;;  %v8456_v45 = vld [vmem:[#allocation13 + $0x628] ss:$28 sps:$4 sm:$0xff]  }
 0x619   :  { %5994 = vmatmul.mubr.bf16.vlgmr.msra.gmra.mrb[20].mxu0 %v9168_v51  ;;  %6080 = vmatmul.mubr.bf16.vlgmr.msra.gmra.mrb[24].mxu1 %v9168_v51  ;;  %v8461_v46 = vld [vmem:[#allocation13 + $0x65c] ss:$28 sps:$4 sm:$0xff]   ;;  %v8464_v47 = vld [vmem:[#allocation13 + $0x664] ss:$28 sps:$4 sm:$0xff]   ;;  %v8467_v50 = vld [vmem:[#allocation13 + $0x694] ss:$28 sps:$4 sm:$0xff]  }
 0x61a   :  { %6005 = vmatpush1.bf16.msra.mxu0 %v8381_v59  ;;  %6091 = vmatpush1.bf16.msra.mxu1 %v8384_v60  ;;  %v8459_v48 = vld [vmem:[#allocation13 + $0x658] ss:$28 sps:$4 sm:$0xff]   ;;  %v8462_v49 = vld [vmem:[#allocation13 + $0x660] ss:$28 sps:$4 sm:$0xff]   ;;  %v8465_v60 = vld [vmem:[#allocation13 + $0x690] ss:$28 sps:$4 sm:$0xff]  }
 0x61b   :  { %6036 = vmatprep.mubr.bf16.mxu0 %v9174_v58  ;;  %6122 = vmatprep.mubr.bf16.mxu1 %v9174_v58  ;;  %v8470_v59 = vld [vmem:[#allocation13 + $0x69c] ss:$28 sps:$4 sm:$0xff]  }
 0x61c   :  { %6006 = vmatprep.subr.bf16.mxu0 %v8389_v61  ;;  %6092 = vmatprep.subr.bf16.mxu1 %v8392_v62  ;;  %v8468_v61 = vld [vmem:[#allocation13 + $0x698] ss:$28 sps:$4 sm:$0xff]   ;;  %v8473_v62 = vld [vmem:[#allocation13 + $0x6cc] ss:$28 sps:$4 sm:$0xff]  }
 0x61e   :  { %6007 = vmatpush1.bf16.msra.mxu0 %v8387_v0  ;;  %6093 = vmatpush1.bf16.msra.mxu1 %v8390_v63  ;;  %v8476_v0 = vld [vmem:[#allocation13 + $0x6d4] ss:$28 sps:$4 sm:$0xff]   ;;  %v8471_v63 = vld [vmem:[#allocation13 + $0x6c8] ss:$28 sps:$4 sm:$0xff]  }
 0x61f   :  { %6008 = vmatprep.subr.bf16.mxu0 %v8395_v1  ;;  %6094 = vmatprep.subr.bf16.mxu1 %v8398_v4  ;;  %v8474_v1 = vld [vmem:[#allocation13 + $0x6d0] ss:$28 sps:$4 sm:$0xff]  }
 0x620   :  { %v8479_v4 = vld [vmem:[#allocation13 + $0x14] ss:$28 sps:$4 sm:$0xff]  }
 0x622   :  { %6009 = vmatpush1.bf16.msra.mxu0 %v8393_v6  ;;  %6095 = vmatpush1.bf16.msra.mxu1 %v8396_v10  ;;  %v8480_v6 = vld [vmem:[#allocation13 + $0x1d8] ss:$28 sps:$4 sm:$0xff]   ;;  %v8477_v10 = vld [vmem:[#allocation13 + $0x10] ss:$28 sps:$4 sm:$0xff]  }
 0x623   :  { %6010 = vmatprep.subr.bf16.mxu0 %v8401_v11  ;;  %6096 = vmatprep.subr.bf16.mxu1 %v8404_v12  ;;  %v8481_v11 = vld [vmem:[#allocation13 + $0x18] ss:$28 sps:$4 sm:$0xff]   ;;  %v8484_v12 = vld [vmem:[#allocation13 + $0x4c] ss:$28 sps:$4 sm:$0xff]  }
 0x626   :  { %6011 = vmatpush1.bf16.msra.mxu0 %v8399_v13  ;;  %6097 = vmatpush1.bf16.msra.mxu1 %v8402_v15  ;;  %v8485_v13 = vld [vmem:[#allocation13 + $0x210] ss:$28 sps:$4 sm:$0xff]   ;;  %v8482_v15 = vld [vmem:[#allocation13 + $0x48] ss:$28 sps:$4 sm:$0xff]  }
 0x627   :  { %6012 = vmatprep.subr.bf16.mxu0 %v8407_v16  ;;  %6098 = vmatprep.subr.bf16.mxu1 %v8410_v17  ;;  %v8486_v16 = vld [vmem:[#allocation13 + $0x50] ss:$28 sps:$4 sm:$0xff]   ;;  %v8489_v17 = vld [vmem:[#allocation13 + $0x84] ss:$28 sps:$4 sm:$0xff]  }
 0x62a   :  { %6013 = vmatpush1.bf16.msra.mxu0 %v8405_v18  ;;  %6099 = vmatpush1.bf16.msra.mxu1 %v8408_v19  ;;  %v8490_v18 = vld [vmem:[#allocation13 + $0x248] ss:$28 sps:$4 sm:$0xff]   ;;  %v8487_v19 = vld [vmem:[#allocation13 + $0x80] ss:$28 sps:$4 sm:$0xff]  }
 0x62b   :  { %6014 = vmatprep.subr.bf16.mxu0 %v8413_v20  ;;  %6100 = vmatprep.subr.bf16.mxu1 %v8416_v3  ;;  %v8491_v20 = vld [vmem:[#allocation13 + $0x88] ss:$28 sps:$4 sm:$0xff]   ;;  %v8494_v3 = vld [vmem:[#allocation13 + $0xbc] ss:$28 sps:$4 sm:$0xff]  }
 0x62e   :  { %6015 = vmatpush1.bf16.msra.mxu0 %v8411_v5  ;;  %6101 = vmatpush1.bf16.msra.mxu1 %v8414_v7  ;;  %v8495_v5 = vld [vmem:[#allocation13 + $0x280] ss:$28 sps:$4 sm:$0xff]   ;;  %v8492_v7 = vld [vmem:[#allocation13 + $0xb8] ss:$28 sps:$4 sm:$0xff]  }
 0x62f   :  { %6016 = vmatprep.subr.bf16.mxu0 %v8419_v8  ;;  %6102 = vmatprep.subr.bf16.mxu1 %v8422_v21  ;;  %v8496_v8 = vld [vmem:[#allocation13 + $0xc0] ss:$28 sps:$4 sm:$0xff]   ;;  %v8499_v21 = vld [vmem:[#allocation13 + $0xf4] ss:$28 sps:$4 sm:$0xff]  }
 0x632   :  { %6017 = vmatpush1.bf16.msra.mxu0 %v8417_v22  ;;  %6103 = vmatpush1.bf16.msra.mxu1 %v8420_v23  ;;  %v8497_v22 = vld [vmem:[#allocation13 + $0xf0] ss:$28 sps:$4 sm:$0xff]   ;;  %v8501_v23 = vld [vmem:[#allocation13 + $0xf8] ss:$28 sps:$4 sm:$0xff]  }
 0x633   :  { %6018 = vmatprep.subr.bf16.mxu0 %v8425_v24  ;;  %6104 = vmatprep.subr.bf16.mxu1 %v8428_v53  ;;  %v8504_v24 = vld [vmem:[#allocation13 + $0x12c] ss:$28 sps:$4 sm:$0xff]  }
 0x634   :  { %v8505_v53 = vld [vmem:[#allocation13 + $0x2f0] ss:$28 sps:$4 sm:$0xff]  }
 0x636   :  { %6019 = vmatpush1.bf16.msra.mxu0 %v8423_v25  ;;  %6105 = vmatpush1.bf16.msra.mxu1 %v8426_v26  ;;  %v8502_v25 = vld [vmem:[#allocation13 + $0x128] ss:$28 sps:$4 sm:$0xff]   ;;  %v8506_v26 = vld [vmem:[#allocation13 + $0x130] ss:$28 sps:$4 sm:$0xff]  }
 0x637   :  { %6020 = vmatprep.subr.bf16.mxu0 %v8431_v27  ;;  %6106 = vmatprep.subr.bf16.mxu1 %v8434_v28  ;;  %v8509_v27 = vld [vmem:[#allocation13 + $0x164] ss:$28 sps:$4 sm:$0xff]  }
 0x638   :  { %v8510_v28 = vld [vmem:[#allocation13 + $0x328] ss:$28 sps:$4 sm:$0xff]  }
 0x63a   :  { %6021 = vmatpush1.bf16.msra.mxu0 %v8429_v29  ;;  %6107 = vmatpush1.bf16.msra.mxu1 %v8432_v30  ;;  %v8507_v29 = vld [vmem:[#allocation13 + $0x160] ss:$28 sps:$4 sm:$0xff]   ;;  %v8511_v30 = vld [vmem:[#allocation13 + $0x168] ss:$28 sps:$4 sm:$0xff]  }
 0x63b   :  { %6022 = vmatprep.subr.bf16.mxu0 %v8437_v14  ;;  %6108 = vmatprep.subr.bf16.mxu1 %v8440_v31  ;;  %v8514_v14 = vld [vmem:[#allocation13 + $0x19c] ss:$28 sps:$4 sm:$0xff]  }
 0x63c   :  { %v8515_v31 = vld [vmem:[#allocation13 + $0x360] ss:$28 sps:$4 sm:$0xff]  }
 0x63e   :  { %6023 = vmatpush1.bf16.msra.mxu0 %v8435_v32  ;;  %6109 = vmatpush1.bf16.msra.mxu1 %v8438_v33  ;;  %v8512_v32 = vld [vmem:[#allocation13 + $0x198] ss:$28 sps:$4 sm:$0xff]   ;;  %v8516_v33 = vld [vmem:[#allocation13 + $0x1a0] ss:$28 sps:$4 sm:$0xff]  }
 0x63f   :  { %6024 = vmatprep.subr.bf16.mxu0 %v8443_v34  ;;  %6110 = vmatprep.subr.bf16.mxu1 %v8446_v35  ;;  %v8519_v34 = vld [vmem:[#allocation13 + $0x1d4] ss:$28 sps:$4 sm:$0xff]  }
 0x640   :  { %v8520_v35 = vld [vmem:[#allocation13 + $0x558] ss:$28 sps:$4 sm:$0xff]  }
 0x642   :  { %6025 = vmatpush1.bf16.msra.mxu0 %v8441_v36  ;;  %6111 = vmatpush1.bf16.msra.mxu1 %v8444_v37  ;;  %v8517_v36 = vld [vmem:[#allocation13 + $0x1d0] ss:$28 sps:$4 sm:$0xff]   ;;  %v8521_v37 = vld [vmem:[#allocation13 + $0x398] ss:$28 sps:$4 sm:$0xff]  }
 0x643   :  { %6026 = vmatprep.subr.bf16.mxu0 %v8449_v38  ;;  %6112 = vmatprep.subr.bf16.mxu1 %v8452_v39  ;;  %v8524_v38 = vld [vmem:[#allocation13 + $0x20c] ss:$28 sps:$4 sm:$0xff]  }
 0x644   :  { %v8525_v39 = vld [vmem:[#allocation13 + $0x590] ss:$28 sps:$4 sm:$0xff]  }
 0x646   :  { %6027 = vmatpush1.bf16.msra.mxu0 %v8447_v40  ;;  %6113 = vmatpush1.bf16.msra.mxu1 %v8450_v41  ;;  %v8522_v40 = vld [vmem:[#allocation13 + $0x208] ss:$28 sps:$4 sm:$0xff]   ;;  %v8526_v41 = vld [vmem:[#allocation13 + $0x3d0] ss:$28 sps:$4 sm:$0xff]  }
 0x647   :  { %6028 = vmatprep.subr.bf16.mxu0 %v8455_v42  ;;  %6114 = vmatprep.subr.bf16.mxu1 %v8458_v43  ;;  %v8529_v42 = vld [vmem:[#allocation13 + $0x244] ss:$28 sps:$4 sm:$0xff]  }
 0x648   :  { %v8530_v43 = vld [vmem:[#allocation13 + $0x5c8] ss:$28 sps:$4 sm:$0xff]  }
 0x64a   :  { %6029 = vmatpush1.bf16.msra.mxu0 %v8453_v44  ;;  %6115 = vmatpush1.bf16.msra.mxu1 %v8456_v45  ;;  %v8527_v44 = vld [vmem:[#allocation13 + $0x240] ss:$28 sps:$4 sm:$0xff]   ;;  %v8531_v45 = vld [vmem:[#allocation13 + $0x408] ss:$28 sps:$4 sm:$0xff]  }
 0x64b   :  { %6030 = vmatprep.subr.bf16.mxu0 %v8461_v46  ;;  %6116 = vmatprep.subr.bf16.mxu1 %v8464_v47  ;;  %v8534_v46 = vld [vmem:[#allocation13 + $0x27c] ss:$28 sps:$4 sm:$0xff]  }
 0x64c   :  { %v8535_v47 = vld [vmem:[#allocation13 + $0x600] ss:$28 sps:$4 sm:$0xff]  }
 0x64e   :  { %6031 = vmatpush1.bf16.msra.mxu0 %v8459_v48  ;;  %6117 = vmatpush1.bf16.msra.mxu1 %v8462_v49  ;;  %v8532_v48 = vld [vmem:[#allocation13 + $0x278] ss:$28 sps:$4 sm:$0xff]   ;;  %v8536_v49 = vld [vmem:[#allocation13 + $0x440] ss:$28 sps:$4 sm:$0xff]  }
 0x64f   :  { %6032 = vmatprep.subr.bf16.mxu0 %v8467_v50  ;;  %6118 = vmatprep.subr.bf16.mxu1 %v8470_v59  ;;  %v8539_v50 = vld [vmem:[#allocation13 + $0x2b4] ss:$28 sps:$4 sm:$0xff]  }
 0x650   :  { %v8540_v59 = vld [vmem:[#allocation13 + $0x638] ss:$28 sps:$4 sm:$0xff]  }
 0x652   :  { %6033 = vmatpush1.bf16.msra.mxu0 %v8465_v60  ;;  %6119 = vmatpush1.bf16.msra.mxu1 %v8468_v61  ;;  %v8537_v60 = vld [vmem:[#allocation13 + $0x2b0] ss:$28 sps:$4 sm:$0xff]   ;;  %v8541_v61 = vld [vmem:[#allocation13 + $0x478] ss:$28 sps:$4 sm:$0xff]  }
 0x653   :  { %6034 = vmatprep.subr.bf16.mxu0 %v8473_v62  ;;  %6120 = vmatprep.subr.bf16.mxu1 %v8476_v0  ;;  %v8544_v62 = vld [vmem:[#allocation13 + $0x2ec] ss:$28 sps:$4 sm:$0xff]  }
 0x654   :  { %v8545_v0 = vld [vmem:[#allocation13 + $0x670] ss:$28 sps:$4 sm:$0xff]  }
 0x656   :  { %6035 = vmatpush1.bf16.msra.mxu0 %v8471_v63  ;;  %6121 = vmatpush1.bf16.msra.mxu1 %v8474_v1  ;;  %v8542_v63 = vld [vmem:[#allocation13 + $0x2e8] ss:$28 sps:$4 sm:$0xff]   ;;  %v8546_v1 = vld [vmem:[#allocation13 + $0x4b0] ss:$28 sps:$4 sm:$0xff]  }
 0x657   :  { %6133 = vmatprep.subr.bf16.mxu0 %v8479_v4  ;;  %7325 = vmatprep.subr.bf16.mxu1 %v8480_v6  ;;  %v8549_v4 = vld [vmem:[#allocation13 + $0x324] ss:$28 sps:$4 sm:$0xff]  }
 0x658   :  { %v8550_v6 = vld [vmem:[#allocation13 + $0x6a8] ss:$28 sps:$4 sm:$0xff]  }
 0x659   :  { %6037 = vmatmul.mubr.bf16.vlgmr.msra.gmra.mrb[20].mxu0 %v9170_v56  ;;  %6123 = vmatmul.mubr.bf16.vlgmr.msra.gmra.mrb[24].mxu1 %v9170_v56 }
 0x65a   :  { %6134 = vmatpush1.bf16.msra.mxu0 %v8477_v10  ;;  %6165 = vmatprep.mubr.bf16.mxu0 %v9172_v57  ;;  %v8547_v10 = vld [vmem:[#allocation13 + $0x320] ss:$28 sps:$4 sm:$0xff]  }
 0x65b   :  { %7326 = vmatpush3.bf16.msra.mxu1 %v8481_v11  ;;  %6251 = vmatprep.mubr.bf16.mxu1 %v9172_v57  ;;  %v8500_v57 = vld [vmem:[#allocation13 + $0x2b8] ss:$28 sps:$4 sm:$0xff]   ;;  %v8551_v11 = vld [vmem:[#allocation13 + $0x4e8] ss:$28 sps:$4 sm:$0xff]  }
 0x65c   :  { %6135 = vmatprep.subr.bf16.mxu0 %v8484_v12  ;;  %7327 = vmatprep.subr.bf16.mxu1 %v8485_v13  ;;  %v8554_v12 = vld [vmem:[#allocation13 + $0x35c] ss:$28 sps:$4 sm:$0xff]  }
 0x65d   :  { %v8555_v13 = vld [vmem:[#allocation13 + $0x6e0] ss:$28 sps:$4 sm:$0xff]  }
 0x65e   :  { %6136 = vmatpush1.bf16.msra.mxu0 %v8482_v15  ;;  %v8552_v15 = vld [vmem:[#allocation13 + $0x358] ss:$28 sps:$4 sm:$0xff]  }
 0x65f   :  { %7328 = vmatpush3.bf16.msra.mxu1 %v8486_v16  ;;  %6137 = vmatprep.subr.bf16.mxu0 %v8489_v17  ;;  %v8556_v16 = vld [vmem:[#allocation13 + $0x520] ss:$28 sps:$4 sm:$0xff]   ;;  %v8559_v17 = vld [vmem:[#allocation13 + $0x394] ss:$28 sps:$4 sm:$0xff]  }
 0x660   :  { %7329 = vmatprep.subr.bf16.mxu1 %v8490_v18  ;;  %v8557_v18 = vld [vmem:[#allocation13 + $0x390] ss:$28 sps:$4 sm:$0xff]  }
 0x662   :  { %6138 = vmatpush1.bf16.msra.mxu0 %v8487_v19  ;;  %v8562_v19 = vld [vmem:[#allocation13 + $0x3cc] ss:$28 sps:$4 sm:$0xff]  }
 0x663   :  { %7330 = vmatpush3.bf16.msra.mxu1 %v8491_v20  ;;  %6139 = vmatprep.subr.bf16.mxu0 %v8494_v3  ;;  %v8560_v20 = vld [vmem:[#allocation13 + $0x3c8] ss:$28 sps:$4 sm:$0xff]  }
 0x664   :  { %7331 = vmatprep.subr.bf16.mxu1 %v8495_v5  ;;  %v8565_v3 = vld [vmem:[#allocation13 + $0x404] ss:$28 sps:$4 sm:$0xff]  }
 0x665   :  { %v8563_v5 = vld [vmem:[#allocation13 + $0x400] ss:$28 sps:$4 sm:$0xff]  }
 0x666   :  { %6140 = vmatpush1.bf16.msra.mxu0 %v8492_v7  ;;  %v8568_v7 = vld [vmem:[#allocation13 + $0x43c] ss:$28 sps:$4 sm:$0xff]  }
 0x667   :  { %7332 = vmatpush3.bf16.msra.mxu1 %v8496_v8  ;;  %6141 = vmatprep.subr.bf16.mxu0 %v8499_v21  ;;  %v8566_v8 = vld [vmem:[#allocation13 + $0x438] ss:$28 sps:$4 sm:$0xff]  }
 0x668   :  { %7333 = vmatprep.subr.bf16.mxu1 %v8500_v57  ;;  %v8571_v21 = vld [vmem:[#allocation13 + $0x474] ss:$28 sps:$4 sm:$0xff]  }
 0x669   :  { %v8569_v57 = vld [vmem:[#allocation13 + $0x470] ss:$28 sps:$4 sm:$0xff]  }
 0x66a   :  { %6142 = vmatpush1.bf16.msra.mxu0 %v8497_v22  ;;  %v8572_v22 = vld [vmem:[#allocation13 + $0x4a8] ss:$28 sps:$4 sm:$0xff]  }
 0x66b   :  { %7334 = vmatpush3.bf16.msra.mxu1 %v8501_v23  ;;  %6143 = vmatprep.subr.bf16.mxu0 %v8504_v24  ;;  %v8577_v23 = vld [vmem:[#allocation13 + $0x4e4] ss:$28 sps:$4 sm:$0xff]   ;;  %v8580_v24 = vld [vmem:[#allocation13 + $0x51c] ss:$28 sps:$4 sm:$0xff]  }
 0x66c   :  { %7335 = vmatprep.subr.bf16.mxu1 %v8505_v53  ;;  %v8578_v53 = vld [vmem:[#allocation13 + $0x518] ss:$28 sps:$4 sm:$0xff]  }
 0x66e   :  { %6144 = vmatpush1.bf16.msra.mxu0 %v8502_v25  ;;  %v8583_v25 = vld [vmem:[#allocation13 + $0x554] ss:$28 sps:$4 sm:$0xff]  }
 0x66f   :  { %7336 = vmatpush3.bf16.msra.mxu1 %v8506_v26  ;;  %6145 = vmatprep.subr.bf16.mxu0 %v8509_v27  ;;  %v8581_v26 = vld [vmem:[#allocation13 + $0x550] ss:$28 sps:$4 sm:$0xff]  }
 0x670   :  { %7337 = vmatprep.subr.bf16.mxu1 %v8510_v28  ;;  %v8586_v27 = vld [vmem:[#allocation13 + $0x58c] ss:$28 sps:$4 sm:$0xff]  }
 0x671   :  { %v8584_v28 = vld [vmem:[#allocation13 + $0x588] ss:$28 sps:$4 sm:$0xff]  }
 0x672   :  { %6146 = vmatpush1.bf16.msra.mxu0 %v8507_v29  ;;  %v8589_v29 = vld [vmem:[#allocation13 + $0x5c4] ss:$28 sps:$4 sm:$0xff]  }
 0x673   :  { %7338 = vmatpush3.bf16.msra.mxu1 %v8511_v30  ;;  %6147 = vmatprep.subr.bf16.mxu0 %v8514_v14  ;;  %v8587_v30 = vld [vmem:[#allocation13 + $0x5c0] ss:$28 sps:$4 sm:$0xff]  }
 0x674   :  { %7339 = vmatprep.subr.bf16.mxu1 %v8515_v31  ;;  %v8592_v14 = vld [vmem:[#allocation13 + $0x5fc] ss:$28 sps:$4 sm:$0xff]  }
 0x675   :  { %v8590_v31 = vld [vmem:[#allocation13 + $0x5f8] ss:$28 sps:$4 sm:$0xff]  }
 0x676   :  { %6148 = vmatpush1.bf16.msra.mxu0 %v8512_v32  ;;  %v8595_v32 = vld [vmem:[#allocation13 + $0x634] ss:$28 sps:$4 sm:$0xff]  }
 0x677   :  { %7340 = vmatpush3.bf16.msra.mxu1 %v8516_v33  ;;  %6149 = vmatprep.subr.bf16.mxu0 %v8519_v34  ;;  %v8593_v33 = vld [vmem:[#allocation13 + $0x630] ss:$28 sps:$4 sm:$0xff]  }
 0x678   :  { %7347 = vmatprep.subr.bf16.mxu1 %v8520_v35  ;;  %v8598_v34 = vld [vmem:[#allocation13 + $0x66c] ss:$28 sps:$4 sm:$0xff]  }
 0x679   :  { %v8596_v35 = vld [vmem:[#allocation13 + $0x668] ss:$28 sps:$4 sm:$0xff]  }
 0x67a   :  { %6252 = vmatmul.mubr.bf16.vlgmr.msra.gmra.mrb[28].mxu1 %v9168_v51  ;;  %6150 = vmatpush1.bf16.msra.mxu0 %v8517_v36  ;;  %v8601_v36 = vld [vmem:[#allocation13 + $0x6a4] ss:$28 sps:$4 sm:$0xff]  }
 0x67b   :  { %7348 = vmatpush3.bf16.msra.mxu1 %v8521_v37  ;;  %6292 = vmatprep.mubr.bf16.mxu1 %v9174_v58  ;;  %v8599_v37 = vld [vmem:[#allocation13 + $0x6a0] ss:$28 sps:$4 sm:$0xff]  }
 0x67c   :  { %6151 = vmatprep.subr.bf16.mxu0 %v8524_v38  ;;  %7349 = vmatprep.subr.bf16.mxu1 %v8525_v39  ;;  %v8604_v38 = vld [vmem:[#allocation13 + $0x6dc] ss:$28 sps:$4 sm:$0xff]  }
 0x67d   :  { %v8602_v39 = vld [vmem:[#allocation13 + $0x6d8] ss:$28 sps:$4 sm:$0xff]  }
 0x67e   :  { %6152 = vmatpush1.bf16.msra.mxu0 %v8522_v40  ;;  %v9195_v40 = vld [vmem:[%s9250_s12] sm:$0xff]  ;;  %s8886_s12 = smov [#allocation15]  }
 0x67f   :  { %7350 = vmatpush3.bf16.msra.mxu1 %v8526_v41  ;;  %6153 = vmatprep.subr.bf16.mxu0 %v8529_v42  ;;  %v4777_v41 = vrot.slane %v9195_v40, %v9115_v54  ;;  %v4785_v42 = vrot.slane %v9195_v40, %v9129_v2  ;;  %s6456_s3 = sshll.u32 %s8886_s12, 4  ;;  %s6457_s3 = int_to_ptr.vmem [resolvable:$true] %s6456_s3 }
 0x680   :  { %7351 = vmatprep.subr.bf16.mxu1 %v8530_v43  ;;  %v4781_v43 = vrot.slane %v9195_v40, %v9118_v55  ;;  %s8816_s5 = scalar_lea.vmem %s6457_s3, 256  ;;  %p8821_p1 = scmp.lt.s32.totalorder %s6457_s3, %s6457_s3 }
 0x681   :  { %p8817_p0 = scmp.ne.s32.totalorder %s6457_s3, %s8816_s5  ;;  %p8822_p2 = scmp.lt.s32.totalorder %s8816_s5, %s8816_s5 }
 0x682   :  { %6154 = vmatpush1.bf16.msra.mxu0 %v8527_v44  ;;  %v4789_v44 = vrot.slane %v9195_v40, %v9132_v9 }
 0x683   :  { %7352 = vmatpush3.bf16.msra.mxu1 %v8531_v45  ;;  %6155 = vmatprep.subr.bf16.mxu0 %v8534_v46  ;;  %p8823_p3 = por %p8822_p2, %p8821_p1 }
 0x684   :  { %7353 = vmatprep.subr.bf16.mxu1 %v8535_v47 }
 0x685   :  { %p8824_p4 = pnand %p8823_p3, %p8817_p0 }
 0x686   :  { %6156 = vmatpush1.bf16.msra.mxu0 %v8532_v48 }
 0x687   :  { %7354 = vmatpush3.bf16.msra.mxu1 %v8536_v49  ;;  %6157 = vmatprep.subr.bf16.mxu0 %v8539_v50 }
 0x688   :  { %7355 = vmatprep.subr.bf16.mxu1 %v8540_v59 }
 0x68a   :  { %6158 = vmatpush1.bf16.msra.mxu0 %v8537_v60 }
 0x68b   :  { %7356 = vmatpush3.bf16.msra.mxu1 %v8541_v61  ;;  %6159 = vmatprep.subr.bf16.mxu0 %v8544_v62 }
 0x68c   :  { %7357 = vmatprep.subr.bf16.mxu1 %v8545_v0 }
 0x68e   :  { %6160 = vmatpush1.bf16.msra.mxu0 %v8542_v63 }
 0x68f   :  { %7358 = vmatpush3.bf16.msra.mxu1 %v8546_v1  ;;  %6161 = vmatprep.subr.bf16.mxu0 %v8549_v4 }
 0x690   :  { %7359 = vmatprep.subr.bf16.mxu1 %v8550_v6 }
 0x692   :  { %6162 = vmatpush1.bf16.msra.mxu0 %v8547_v10 }
 0x693   :  { %7360 = vmatpush3.bf16.msra.mxu1 %v8551_v11  ;;  %6163 = vmatprep.subr.bf16.mxu0 %v8554_v12 }
 0x694   :  { %7361 = vmatprep.subr.bf16.mxu1 %v8555_v13 }
 0x696   :  { %6164 = vmatpush1.bf16.msra.mxu0 %v8552_v15 }
 0x697   :  { %7362 = vmatpush3.bf16.msra.mxu1 %v8556_v16  ;;  %6176 = vmatprep.subr.bf16.mxu0 %v8559_v17 }
 0x699   :  { %6166 = vmatmul.mubr.bf16.vlgmr.msra.gmra.mrb[24].mxu0 %v9168_v51  ;;  %v8574_v51 = vld [vmem:[#allocation13 + $0x4ac] ss:$28 sps:$4 sm:$0xff]  }
 0x69a   :  { %6293 = vmatmul.mubr.bf16.vlgmr.msra.gmra.mrb[32].mxu1 %v9170_v56  ;;  %6177 = vmatpush1.bf16.msra.mxu0 %v8557_v18 }
 0x69b   :  { %6208 = vmatprep.mubr.bf16.mxu0 %v9174_v58  ;;  %6178 = vmatprep.subr.bf16.mxu0 %v8562_v19  ;;  %v8575_v58 = vld [vmem:[#allocation13 + $0x4e0] ss:$28 sps:$4 sm:$0xff]  }
 0x69e   :  { %6179 = vmatpush1.bf16.msra.mxu0 %v8560_v20 }
 0x69f   :  { %6180 = vmatprep.subr.bf16.mxu0 %v8565_v3 }
 0x6a2   :  { %6181 = vmatpush1.bf16.msra.mxu0 %v8563_v5 }
 0x6a3   :  { %6182 = vmatprep.subr.bf16.mxu0 %v8568_v7 }
 0x6a6   :  { %6183 = vmatpush1.bf16.msra.mxu0 %v8566_v8 }
 0x6a7   :  { %6184 = vmatprep.subr.bf16.mxu0 %v8571_v21 }
 0x6aa   :  { %6185 = vmatpush1.bf16.msra.mxu0 %v8569_v57 }
 0x6ab   :  { %6186 = vmatprep.subr.bf16.mxu0 %v8574_v51 }
 0x6ae   :  { %6187 = vmatpush1.bf16.msra.mxu0 %v8572_v22 }
 0x6af   :  { %6188 = vmatprep.subr.bf16.mxu0 %v8577_v23 }
 0x6b2   :  { %6189 = vmatpush1.bf16.msra.mxu0 %v8575_v58 }
 0x6b3   :  { %6190 = vmatprep.subr.bf16.mxu0 %v8580_v24 }
 0x6b6   :  { %6191 = vmatpush1.bf16.msra.mxu0 %v8578_v53 }
 0x6b7   :  { %6192 = vmatprep.subr.bf16.mxu0 %v8583_v25 }
 0x6ba   :  { %6193 = vmatpush1.bf16.msra.mxu0 %v8581_v26 }
 0x6bb   :  { %6194 = vmatprep.subr.bf16.mxu0 %v8586_v27 }
 0x6be   :  { %6195 = vmatpush1.bf16.msra.mxu0 %v8584_v28 }
 0x6bf   :  { %6196 = vmatprep.subr.bf16.mxu0 %v8589_v29 }
 0x6c2   :  { %6197 = vmatpush1.bf16.msra.mxu0 %v8587_v30 }
 0x6c3   :  { %6198 = vmatprep.subr.bf16.mxu0 %v8592_v14 }
 0x6c6   :  { %6199 = vmatpush1.bf16.msra.mxu0 %v8590_v31 }
 0x6c7   :  { %6200 = vmatprep.subr.bf16.mxu0 %v8595_v32 }
 0x6ca   :  { %6201 = vmatpush1.bf16.msra.mxu0 %v8593_v33 }
 0x6cb   :  { %6202 = vmatprep.subr.bf16.mxu0 %v8598_v34 }
 0x6ce   :  { %6203 = vmatpush1.bf16.msra.mxu0 %v8596_v35 }
 0x6cf   :  { %6204 = vmatprep.subr.bf16.mxu0 %v8601_v36 }
 0x6d2   :  { %6205 = vmatpush1.bf16.msra.mxu0 %v8599_v37 }
 0x6d3   :  { %6206 = vmatprep.subr.bf16.mxu0 %v8604_v38 }
 0x6d6   :  { %6207 = vmatpush1.bf16.msra.mxu0 %v8602_v39 }
 0x6d9   :  { %6209 = vmatmul.mubr.bf16.vlgmr.msra.gmra.mrb[24].mxu0 %v9170_v56 }
 0x72c   :  { %v6038_v45 = vpop.f32.mrb[20].mxu0  ;;  %v6124_v46 = vpop.f32.mrb[24].mxu1 }
 0x72d   :  { %v7397_v56 = vadd.f32 %v6038_v45, %v4777_v41  ;;  %v7401_v47 = vadd.f32 %v6124_v46, %v4785_v42  ;;  %v6040_v48 = vpop.f32.mrb[21].mxu0  ;;  %v6126_v49 = vpop.f32.mrb[25].mxu1 }
 0x72e   :  { %v7398_v50 = vadd.f32 %v6040_v48, %v4781_v43  ;;  %v7402_v59 = vadd.f32 %v6126_v49, %v4789_v44  ;;  %v6042_v60 = vpop.f32.mrb[22].mxu0  ;;  %v6128_v61 = vpop.f32.mrb[26].mxu1 }
 0x72f   :  { %v7251_v54 = vmul.f32 -1.442695, %v7397_v56  ;;  %v7253_v62 = vmul.f32 -1.442695, %v7401_v47  ;;  %v7399_v0 = vadd.f32 %v6042_v60, %v4777_v41  ;;  %v7403_v2 = vadd.f32 %v6128_v61, %v4785_v42  ;;  %v6044_v63 = vpop.f32.mrb[23].mxu0  ;;  %v6130_v1 = vpop.f32.mrb[27].mxu1 }
 0x730   :  { %v7252_v55 = vmul.f32 -1.442695, %v7398_v50  ;;  %v7254_v4 = vmul.f32 -1.442695, %v7402_v59  ;;  %v7400_v6 = vadd.f32 %v6044_v63, %v4781_v43  ;;  %v7404_v9 = vadd.f32 %v6130_v1, %v4789_v44 }
 0x731   :  { %8605 = vpow2.f32 %v7251_v54  ;;  %v7258_v10 = vmul.f32 -1.442695, %v7399_v0  ;;  %v7260_v11 = vmul.f32 -1.442695, %v7403_v2 }
 0x732   :  { %8607 = vpow2.f32 %v7253_v62  ;;  %v7259_v12 = vmul.f32 -1.442695, %v7400_v6  ;;  %v7261_v13 = vmul.f32 -1.442695, %v7404_v9 }
 0x733   :  { %8609 = vpow2.f32 %v7252_v55 }
 0x734   :  { %8611 = vpow2.f32 %v7254_v4 }
 0x735   :  { %8613 = vpow2.f32 %v7258_v10 }
 0x736   :  { %8615 = vpow2.f32 %v7260_v11 }
 0x737   :  { %8617 = vpow2.f32 %v7259_v12 }
 0x738   :  { %8619 = vpow2.f32 %v7261_v13 }
 0x73b   :  { %v8606_v15 = vpop.eup %8605 }
 0x73c   :  { %v8608_v16 = vpop.eup %8607  ;;  %v6343_v17 = vadd.f32 1.0, %v8606_v15 }
 0x73d   :  { %v8610_v18 = vpop.eup %8609  ;;  %v6345_v19 = vadd.f32 1.0, %v8608_v16 }
 0x73e   :  { %v8612_v20 = vpop.eup %8611  ;;  %8621 = vrcp.f32 %v6343_v17  ;;  %v6344_v3 = vadd.f32 1.0, %v8610_v18 }
 0x73f   :  { %v8614_v5 = vpop.eup %8613  ;;  %8623 = vrcp.f32 %v6345_v19  ;;  %v6346_v7 = vadd.f32 1.0, %v8612_v20 }
 0x740   :  { %v8616_v8 = vpop.eup %8615  ;;  %8625 = vrcp.f32 %v6344_v3  ;;  %v6350_v21 = vadd.f32 1.0, %v8614_v5 }
 0x741   :  { %v8618_v57 = vpop.eup %8617  ;;  %8627 = vrcp.f32 %v6346_v7  ;;  %v6352_v51 = vadd.f32 1.0, %v8616_v8 }
 0x742   :  { %v8620_v22 = vpop.eup %8619  ;;  %8629 = vrcp.f32 %v6350_v21  ;;  %v6351_v23 = vadd.f32 1.0, %v8618_v57 }
 0x743   :  { %8631 = vrcp.f32 %v6352_v51  ;;  %v6353_v58 = vadd.f32 1.0, %v8620_v22 }
 0x744   :  { %8633 = vrcp.f32 %v6351_v23 }
 0x745   :  { %8635 = vrcp.f32 %v6353_v58 }
 0x748   :  { %v8622_v24 = vpop.eup %8621 }
 0x749   :  { %v8624_v53 = vpop.eup %8623 }
 0x74a   :  { %v8626_v25 = vpop.eup %8625 }
 0x74b   :  { %v8628_v26 = vpop.eup %8627  ;;  %v7273_v27 = vpack.c.bf16 %v8626_v25, %v8622_v24 }
 0x74c   :  { %v8630_v28 = vpop.eup %8629  ;;  %v7274_v29 = vpack.c.bf16 %v8628_v26, %v8624_v53 }
 0x74d   :  { %v8632_v30 = vpop.eup %8631  ;;  %6429 = vst [vmem:[#allocation14] sm:$0xff] %v7273_v27  ;;  %v7341_v14 = vpop.f32.mrb[28].mxu1 }
 0x74e   :  { %v8634_v31 = vpop.eup %8633  ;;  %6430 = vst [vmem:[#allocation14 + $0x8] sm:$0xff] %v7274_v29  ;;  %v7342_v32 = vpop.f32.mrb[29].mxu1 }
 0x74f   :  { %v8636_v33 = vpop.eup %8635  ;;  %v7277_v34 = vpack.c.bf16 %v8634_v31, %v8630_v28  ;;  %v7343_v35 = vadd.f32 %v7342_v32, %v7341_v14  ;;  %v7344_v36 = vpop.f32.mrb[30].mxu1 }
 0x750   :  { %v7278_v37 = vpack.c.bf16 %v8636_v33, %v8632_v30  ;;  %v7345_v38 = vpop.f32.mrb[31].mxu1 }
 0x751   :  { %6433 = vst [vmem:[#allocation14 + $0x1c] sm:$0xff] %v7277_v34  ;;  %v7346_v39 = vadd.f32 %v7345_v38, %v7344_v36 }
 0x752   :  { %6434 = vst [vmem:[#allocation14 + $0x24] sm:$0xff] %v7278_v37 }
 0x753   :  { %8827 = shalt.err (!%p8824_p4)
}
 0x754   :  { %s8828_s17 = scalar_lea.hbm %s9252_s14, 256 }
 0x755   :  { %p8829_p5 = scmp.ne.s32.totalorder %s9252_s14, %s8828_s17  ;;  %p8832_p6 = scmp.lt.u32.totalorder %s8828_s17, %s9252_s14 }
 0x757   :  { %p8834_p7 = pnand %p8832_p6, %p8829_p5 }
 0x759   :  { %8837 = shalt.err (!%p8834_p7)
}
 0x75a   :  { %s8887_s20 = smov 128   ;;  %s8888_s21 = smov 8   ;;  %v4800_v41 = vsub.s32 6, %v9107_v52  ;;  %v4792_v6 = vsub.s32 4, %v9107_v52  ;;  %v4796_v9 = vsub.s32 5, %v9107_v52 }
 0x75b   :  { %6462 = dma.vmem_to_hbm [thread:$0]  %s6457_s3, 256, %s9252_s14, [#allocation16], %s8887_s20, %s8887_s20, %s8888_s21  }
 0x75c   :  { %v4801_v42 = vrot.slane %v9195_v40, %v4800_v41  ;;  %v4793_v10 = vrot.slane %v9195_v40, %v4792_v6  ;;  %v4797_v11 = vrot.slane %v9195_v40, %v4796_v9  ;;  %s8889_s14 = smov [#allocation14]  }
 0x75d   :  { %s6444_s24 = sshll.u32 %s8889_s14, 4  ;;  %s6445_s24 = int_to_ptr.vmem [resolvable:$true] %s6444_s24 }
 0x75e   :  { %v6254_v45 = vadd.f32 %v7343_v35, %v4801_v42  ;;  %v6257_v48 = vadd.f32 %v7346_v39, %v4801_v42  ;;  %s8838_s11 = scalar_lea.vmem %s6445_s24, 896  ;;  %p8843_p9 = scmp.lt.s32.totalorder %s6445_s24, %s6445_s24 }
 0x75f   :  { %p8839_p8 = scmp.ne.s32.totalorder %s6445_s24, %s8838_s11  ;;  %p8844_p10 = scmp.lt.s32.totalorder %s8838_s11, %s8838_s11 }
 0x761   :  { %p8845_p11 = por %p8844_p10, %p8843_p9 }
 0x763   :  { %p8846_p12 = pnand %p8845_p11, %p8839_p8 }
 0x76d   :  { %v7363_v43 = vpop.f32.mrb[32].mxu1 }
 0x76e   :  { %v7364_v44 = vpop.f32.mrb[33].mxu1 }
 0x76f   :  { %v7365_v46 = vadd.f32 %v7364_v44, %v7363_v43  ;;  %v7366_v56 = vpop.f32.mrb[34].mxu1 }
 0x770   :  { %v7367_v47 = vpop.f32.mrb[35].mxu1 }
 0x771   :  { %v6295_v49 = vadd.f32 %v7365_v46, %v6254_v45  ;;  %v7368_v50 = vadd.f32 %v7367_v47, %v7366_v56 }
 0x773   :  { %v7257_v59 = vmul.f32 -1.442695, %v6295_v49  ;;  %v6298_v60 = vadd.f32 %v7368_v50, %v6257_v48 }
 0x775   :  { %8637 = vpow2.f32 %v7257_v59  ;;  %v7264_v61 = vmul.f32 -1.442695, %v6298_v60 }
 0x777   :  { %8639 = vpow2.f32 %v7264_v61 }
 0x77f   :  { %v8638_v54 = vpop.eup %8637 }
 0x780   :  { %v6349_v62 = vadd.f32 1.0, %v8638_v54 }
 0x781   :  { %v8640_v0 = vpop.eup %8639 }
 0x782   :  { %8641 = vrcp.f32 %v6349_v62  ;;  %v6356_v2 = vadd.f32 1.0, %v8640_v0 }
 0x784   :  { %8643 = vrcp.f32 %v6356_v2 }
 0x78c   :  { %v8642_v63 = vpop.eup %8641 }
 0x78d   :  { %v7276_v1 = vpack.c.bf16 %v8642_v63, %v8642_v63 }
 0x78e   :  { %v8644_v55 = vpop.eup %8643 }
 0x78f   :  { %6432 = vst [vmem:[#allocation14 + $0x18] sm:$0xf] %v7276_v1  ;;  %v7280_v4 = vpack.c.bf16 %v8644_v55, %v8644_v55 }
 0x791   :  { %6436 = vst [vmem:[#allocation14 + $0x34] sm:$0xf] %v7280_v4 }
 0x7ac   :  { %v6210_v12 = vpop.f32.mrb[24].mxu0 }
 0x7ad   :  { %v7405_v13 = vadd.f32 %v6210_v12, %v4793_v10  ;;  %v6212_v15 = vpop.f32.mrb[25].mxu0 }
 0x7ae   :  { %v7406_v16 = vadd.f32 %v6212_v15, %v4797_v11  ;;  %v6214_v17 = vpop.f32.mrb[26].mxu0 }
 0x7af   :  { %v7255_v18 = vmul.f32 -1.442695, %v7405_v13  ;;  %v7407_v19 = vadd.f32 %v6214_v17, %v4793_v10  ;;  %v6216_v20 = vpop.f32.mrb[27].mxu0 }
 0x7b0   :  { %v7256_v3 = vmul.f32 -1.442695, %v7406_v16  ;;  %v7408_v5 = vadd.f32 %v6216_v20, %v4797_v11 }
 0x7b1   :  { %8645 = vpow2.f32 %v7255_v18  ;;  %v7262_v7 = vmul.f32 -1.442695, %v7407_v19 }
 0x7b2   :  { %8647 = vpow2.f32 %v7256_v3  ;;  %v7263_v8 = vmul.f32 -1.442695, %v7408_v5 }
 0x7b3   :  { %8649 = vpow2.f32 %v7262_v7 }
 0x7b4   :  { %8651 = vpow2.f32 %v7263_v8 }
 0x7bb   :  { %v8646_v52 = vpop.eup %8645 }
 0x7bc   :  { %v8648_v21 = vpop.eup %8647  ;;  %v6347_v57 = vadd.f32 1.0, %v8646_v52 }
 0x7bd   :  { %v8650_v40 = vpop.eup %8649  ;;  %v6348_v51 = vadd.f32 1.0, %v8648_v21 }
 0x7be   :  { %v8652_v22 = vpop.eup %8651  ;;  %8653 = vrcp.f32 %v6347_v57  ;;  %v6354_v23 = vadd.f32 1.0, %v8650_v40 }
 0x7bf   :  { %8655 = vrcp.f32 %v6348_v51  ;;  %v6355_v58 = vadd.f32 1.0, %v8652_v22 }
 0x7c0   :  { %8657 = vrcp.f32 %v6354_v23 }
 0x7c1   :  { %8659 = vrcp.f32 %v6355_v58 }
 0x7c8   :  { %v8654_v24 = vpop.eup %8653 }
 0x7c9   :  { %v8656_v53 = vpop.eup %8655 }
 0x7ca   :  { %v8658_v25 = vpop.eup %8657  ;;  %v7275_v26 = vpack.c.bf16 %v8656_v53, %v8654_v24 }
 0x7cb   :  { %v8660_v27 = vpop.eup %8659 }
 0x7cc   :  { %6431 = vst [vmem:[#allocation14 + $0x10] sm:$0xff] %v7275_v26  ;;  %v7279_v28 = vpack.c.bf16 %v8660_v27, %v8658_v25 }
 0x7ce   :  { %6435 = vst [vmem:[#allocation14 + $0x2c] sm:$0xff] %v7279_v28 }
 0x7cf   :  { %8849 = shalt.err (!%p8846_p12)
}
 0x7d0   :  { %s8850_s30 = scalar_lea.hbm %s9251_s13, 896 }
 0x7d1   :  { %p8851_p13 = scmp.ne.s32.totalorder %s9251_s13, %s8850_s30  ;;  %p8854_p0 = scmp.lt.u32.totalorder %s8850_s30, %s9251_s13 }
 0x7d3   :  { %p8856_p1 = pnand %p8854_p0, %p8851_p13 }
 0x7d5   :  { %8859 = shalt.err (!%p8856_p1)
}
 0x7d6   :  { %6450 = dma.vmem_to_hbm [thread:$0]  %s6445_s24, 896, %s9251_s13, [#allocation4], %s8880_s9, %s8880_s9, %s8881_s27  }
 0x7d7   :  { %8868 = dma.done.wait [#allocation4], 896  }
 0x7d8   :  { %8869 = vsyncadd [#allocation4], 4294966400 }
 0x7d9   :  { %8870 = dma.done.wait [#allocation16], 256  }
 0x7da   :  { %8871 = vsyncadd [#allocation16], 4294967040 }
 0x7db   :  { %6469 = vsyncpa [#allocation3], 1 }
 0x7dc   :  { %6470 = vsyncpa [#allocation6], 1 }
 0x7dd   :  { %6471 = vsyncpa [#allocation9], 1 }
 0x7de   :  { %6472 = vsyncpa [#allocation12], 1 }
 0x7df   :  { %6473 = vsyncpa [#allocation4], 1 }
 0x7e0   :  { %6474 = vsyncpa [#allocation16], 1 }

</bundles_post_ra>
